<compile_context>
chip_gen: v5e
topology: v5e:2x2
jax: 0.10.0
libtpu: 0.0.40
codegen_flags: <defaults>
</compile_context>

<pallas_src>
import functools

import jax
import jax.numpy as jnp
from jax import lax
from jax.experimental import pallas as pl
from jax.experimental.pallas import tpu as pltpu


# 3x3 tap offsets (dy, dx), cross-correlation order (matches PyTorch Conv2d).
_TAPS = [(dy, dx) for dy in range(3) for dx in range(3)]


# ----------------------------------------------------------------------------
# In-kernel helpers (traced inside the kernel bodies)
# ----------------------------------------------------------------------------

def _group_norm_scale_shift(x2d, gmean_mat, gamma, beta, eps):
    """Vectorized GroupNorm -> per-channel (1, C) scale/shift.

    x2d: (HW, C) f32 activation; gmean_mat: (C, C) constant with 1/(HW*Cg) on
    same-group entries (so csum @ gmean_mat == per-channel group mean).
    """
    csum = jnp.sum(x2d, axis=0, keepdims=True)                 # (1, C)
    cssq = jnp.sum(x2d * x2d, axis=0, keepdims=True)           # (1, C)
    mean_c = jnp.dot(csum, gmean_mat, preferred_element_type=jnp.float32)
    msq_c = jnp.dot(cssq, gmean_mat, preferred_element_type=jnp.float32)
    var_c = jnp.maximum(msq_c - mean_c * mean_c, 0.0)          # guard cancellation
    scale_c = gamma * lax.rsqrt(var_c + eps)
    shift_c = beta - mean_c * scale_c
    return scale_c, shift_c


def _im2col_into_scratch(yb, patches_ref, H, W, C):
    """Scatter the 9 shifted (SAME, pad=1) views of yb (H, W, C) bf16 into
    patches_ref[..., :9*C].

    Zero padding is realized by pre-zeroing only the four one-pixel border
    strips of the tap channel range (NOT the whole scratch); the in-bounds
    rectangle of every tap then overwrites all valid positions.  Vertical tap
    partiality is along the outer H axis (free); horizontal partiality touches
    at most one sublane column per tap.
    """
    K9 = 9 * C
    zrow = jnp.zeros((1, W, K9), patches_ref.dtype)
    zcol = jnp.zeros((H, 1, K9), patches_ref.dtype)
    patches_ref[0:1, :, 0:K9] = zrow
    patches_ref[H - 1:H, :, 0:K9] = zrow
    patches_ref[:, 0:1, 0:K9] = zcol
    patches_ref[:, W - 1:W, 0:K9] = zcol
    for k, (dy, dx) in enumerate(_TAPS):
        oy, ox = dy - 1, dx - 1
        h0, h1 = max(0, -oy), min(H, H - oy)
        w0, w1 = max(0, -ox), min(W, W - ox)
        patches_ref[h0:h1, w0:w1, k * C:(k + 1) * C] = (
            yb[h0 + oy:h1 + oy, w0 + ox:w1 + ox, :])


# ----------------------------------------------------------------------------
# Kernel bodies
# ----------------------------------------------------------------------------

def make_gn1_conv1_kernel(H, W, Cin, Cout, eps):
    HW = H * W

    def kernel(x_ref, g_ref, b_ref, gm_ref, w_ref, tbias_ref, o_ref, patches_ref):
        # GroupNorm1 + SiLU: one lane-dense f32 pass over the tile.
        x2d = x_ref[0].reshape(HW, Cin).astype(jnp.float32)
        scale_c, shift_c = _group_norm_scale_shift(
            x2d, gm_ref[...], g_ref[...], b_ref[...], eps)
        y = x2d * scale_c + shift_c
        y = y * jax.nn.sigmoid(y)                               # SiLU (f32)

        # conv1: im2col (bf16 scratch) -> single (HW, 9*Cin) @ (9*Cin, Cout) MXU
        # matmul with f32 accumulation.
        yb = y.reshape(H, W, Cin).astype(jnp.bfloat16)
        _im2col_into_scratch(yb, patches_ref, H, W, Cin)
        patches = patches_ref[...].reshape(HW, 9 * Cin)
        acc = jnp.dot(patches, w_ref[...], preferred_element_type=jnp.float32)

        # Precomputed per-sample bias = SiLU(temb) @ Wt + temb_b + conv1_b.
        o_ref[0] = (acc + tbias_ref[0]).reshape(H, W, Cout).astype(o_ref.dtype)

    return kernel


def make_gn2_conv2_shortcut_kernel(H, W, Cin, Cout, eps, output_scale_factor):
    HW = H * W
    inv_scale = 1.0 / float(output_scale_factor)

    def kernel(h_ref, x_ref, g_ref, b_ref, gm_ref, w_ref, bias_ref,
               o_ref, patches_ref):
        # GroupNorm2 + SiLU (f32 math; h1 arrives bf16, stats accumulate in f32).
        h2d = h_ref[0].reshape(HW, Cout).astype(jnp.float32)
        scale_c, shift_c = _group_norm_scale_shift(
            h2d, gm_ref[...], g_ref[...], b_ref[...], eps)
        y = h2d * scale_c + shift_c
        y = y * jax.nn.sigmoid(y)
        # dropout(p=0.0) is identity.

        # conv2 + 1x1 shortcut fused into ONE MXU matmul:
        #   [patches | x] (HW, 9*Cout + Cin) @ [w2; scw] (9*Cout + Cin, Cout)
        yb = y.reshape(H, W, Cout).astype(jnp.bfloat16)
        _im2col_into_scratch(yb, patches_ref, H, W, Cout)
        patches_ref[:, :, 9 * Cout:] = x_ref[0]                 # bf16 shortcut operand
        patches = patches_ref[...].reshape(HW, 9 * Cout + Cin)
        acc = jnp.dot(patches, w_ref[...],
                      preferred_element_type=jnp.float32) + bias_ref[...]

        # Residual already folded into the matmul; apply 1/output_scale_factor.
        # NOTE: output kept f32 to match the PyTorch module; emit bf16 here if
        # the downstream consumer tolerates it (halves writeback bytes).
        o_ref[0] = (acc * inv_scale).reshape(H, W, Cout).astype(o_ref.dtype)

    return kernel


# ----------------------------------------------------------------------------
# pallas_call wrappers
# ----------------------------------------------------------------------------

def _vmem_limit_bytes(working_set_bytes):
    # Per-step working set (with 2x block double-buffering already counted by the
    # caller) + headroom, clamped to [32 MiB, 100 MiB].
    return int(min(max(working_set_bytes + (8 << 20), 32 << 20), 100 << 20))


def gn1_conv1_temb(x, gamma, beta, gmean_mat, w1, tbias, *, eps):
    N, H, W, Cin = x.shape
    Cout = w1.shape[-1]
    kernel = make_gn1_conv1_kernel(H, W, Cin, Cout, eps)

    blocks = H * W * Cin * 4 + H * W * Cout * 2 + Cout * 4      # x, h1 out, tbias
    consts = 2 * Cin * 4 + Cin * Cin * 4 + 9 * Cin * Cout * 2
    scratch = H * W * 9 * Cin * 2
    vmem = _vmem_limit_bytes(2 * blocks + consts + scratch)

    return pl.pallas_call(
        kernel,
        out_shape=jax.ShapeDtypeStruct((N, H, W, Cout), jnp.bfloat16),
        grid=(N,),
        in_specs=[
            pl.BlockSpec((1, H, W, Cin), lambda i: (i, 0, 0, 0)),
            pl.BlockSpec((1, Cin), lambda i: (0, 0)),
            pl.BlockSpec((1, Cin), lambda i: (0, 0)),
            pl.BlockSpec((Cin, Cin), lambda i: (0, 0)),
            pl.BlockSpec((9 * Cin, Cout), lambda i: (0, 0)),
            pl.BlockSpec((1, 1, Cout), lambda i: (i, 0, 0)),
        ],
        out_specs=pl.BlockSpec((1, H, W, Cout), lambda i: (i, 0, 0, 0)),
        scratch_shapes=[pltpu.VMEM((H, W, 9 * Cin), jnp.bfloat16)],
        compiler_params=pltpu.CompilerParams(
            dimension_semantics=("parallel",),
            vmem_limit_bytes=vmem),
    )(x, gamma, beta, gmean_mat, w1, tbias)


def gn2_conv2_shortcut(h1, x_bf16, gamma, beta, gmean_mat, w2sc, bias2sc, *,
                       eps, output_scale_factor):
    N, H, W, Cin = x_bf16.shape
    Cout = h1.shape[-1]
    kernel = make_gn2_conv2_shortcut_kernel(H, W, Cin, Cout, eps,
                                            output_scale_factor)

    blocks = H * W * Cout * 2 + H * W * Cin * 2 + H * W * Cout * 4   # h1, x, out
    consts = 2 * Cout * 4 + Cout * Cout * 4 + (9 * Cout + Cin) * Cout * 2 + Cout * 4
    scratch = H * W * (9 * Cout + Cin) * 2
    vmem = _vmem_limit_bytes(2 * blocks + consts + scratch)

    return pl.pallas_call(
        kernel,
        out_shape=jax.ShapeDtypeStruct((N, H, W, Cout), jnp.float32),
        grid=(N,),
        in_specs=[
            pl.BlockSpec((1, H, W, Cout), lambda i: (i, 0, 0, 0)),
            pl.BlockSpec((1, H, W, Cin), lambda i: (i, 0, 0, 0)),
            pl.BlockSpec((1, Cout), lambda i: (0, 0)),
            pl.BlockSpec((1, Cout), lambda i: (0, 0)),
            pl.BlockSpec((Cout, Cout), lambda i: (0, 0)),
            pl.BlockSpec((9 * Cout + Cin, Cout), lambda i: (0, 0)),
            pl.BlockSpec((1, Cout), lambda i: (0, 0)),
        ],
        out_specs=pl.BlockSpec((1, H, W, Cout), lambda i: (i, 0, 0, 0)),
        scratch_shapes=[pltpu.VMEM((H, W, 9 * Cout + Cin), jnp.bfloat16)],
        compiler_params=pltpu.CompilerParams(
            dimension_semantics=("parallel",),
            vmem_limit_bytes=vmem),
    )(h1, x_bf16, gamma, beta, gmean_mat, w2sc, bias2sc)


# ----------------------------------------------------------------------------
# Full ResnetBlock2D forward (Pallas)
# ----------------------------------------------------------------------------

def _group_mean_matrix(C, G, HW):
    """Constant (C, C) matrix: csum @ M == per-channel group mean."""
    Cg = C // G
    gid = jnp.arange(C) // Cg
    same = (gid[:, None] == gid[None, :]).astype(jnp.float32)
    return same / float(HW * Cg)


@functools.partial(jax.jit, static_argnames=("groups", "eps", "output_scale_factor"))
def resnet_block_2d(x_nchw, temb, params, *, groups, eps, output_scale_factor):
    # NCHW -> NHWC (kernel layout).  In a real model keep NHWC end-to-end.
    x = jnp.transpose(x_nchw, (0, 2, 3, 1)).astype(jnp.float32)
    N, H, W, Cin = x.shape
    Cout = params["conv1_w"].shape[-1]

    # Constant group-averaging matrices (constant-folded by XLA; ~KB of DMA).
    gm1 = _group_mean_matrix(Cin, groups, H * W)
    gm2 = _group_mean_matrix(Cout, groups, H * W)

    # bf16 MXU operands (accumulation stays f32 inside the kernels).
    w1 = params["conv1_w"].reshape(9 * Cin, Cout).astype(jnp.bfloat16)
    if "sc_w" in params:
        scw = params["sc_w"]
        scb = params["sc_b"]
    else:                                   # no 1x1 shortcut -> identity residual
        scw = jnp.eye(Cin, Cout, dtype=jnp.float32)
        scb = jnp.zeros((Cout,), jnp.float32)
    # conv2 and the 1x1 shortcut share one fused weight / bias.
    w2sc = jnp.concatenate(
        [params["conv2_w"].reshape(9 * Cout, Cout), scw], axis=0).astype(jnp.bfloat16)
    bias2sc = (params["conv2_b"] + scb).reshape(1, Cout)

    # Precompute the time-embedding bias in XLA: SiLU(temb) @ Wt + temb_b + conv1_b.
    if temb is not None:
        t = temb.astype(jnp.float32)
        t = t * jax.nn.sigmoid(t)
        tbias = t @ params["temb_w"] + params["temb_b"] + params["conv1_b"]
    else:
        tbias = jnp.broadcast_to(params["conv1_b"], (N, Cout))
    tbias = tbias.reshape(N, 1, Cout).astype(jnp.float32)

    # Stage A: GN1 + SiLU + conv1 (3x3) + time-emb bias -> h1 (bf16 intermediate).
    h1 = gn1_conv1_temb(
        x,
        params["gn1_gamma"].reshape(1, Cin), params["gn1_beta"].reshape(1, Cin),
        gm1, w1, tbias, eps=eps)

    # Stage B: GN2 + SiLU + [conv2 | 1x1 shortcut] fused matmul + residual + scale.
    # x only feeds the bf16 MXU shortcut operand here -> ship it as bf16.
    out = gn2_conv2_shortcut(
        h1, x.astype(jnp.bfloat16),
        params["gn2_gamma"].reshape(1, Cout), params["gn2_beta"].reshape(1, Cout),
        gm2, w2sc, bias2sc, eps=eps, output_scale_factor=output_scale_factor)

    # NHWC -> NCHW to match PyTorch
    return jnp.transpose(out, (0, 3, 1, 2))


# ----------------------------------------------------------------------------
# Pure-JAX reference (mirrors the PyTorch module) for the correctness check
# ----------------------------------------------------------------------------

def reference_forward(x_nchw, temb, params, *, groups, eps, output_scale_factor):
    def silu(v):
        return v * jax.nn.sigmoid(v)

    def gn(v, gamma, beta):
        n, c, hh, ww = v.shape
        vg = v.reshape(n, groups, c // groups, hh, ww)
        m = vg.mean(axis=(2, 3, 4), keepdims=True)
        var = ((vg - m) ** 2).mean(axis=(2, 3, 4), keepdims=True)
        vn = (vg - m) / jnp.sqrt(var + eps)
        vn = vn.reshape(n, c, hh, ww)
        return vn * gamma[None, :, None, None] + beta[None, :, None, None]

    def conv(v, w9, b):
        cin, cout = w9.shape[1], w9.shape[2]
        w = jnp.transpose(w9.reshape(3, 3, cin, cout), (3, 2, 0, 1))  # OIHW
        y = lax.conv_general_dilated(v, w, (1, 1), ((1, 1), (1, 1)),
                                     dimension_numbers=("NCHW", "OIHW", "NCHW"))
        return y + b[None, :, None, None]

    h = silu(gn(x_nchw, params["gn1_gamma"], params["gn1_beta"]))
    h = conv(h, params["conv1_w"], params["conv1_b"])
    t = silu(temb) @ params["temb_w"] + params["temb_b"]
    h = h + t[:, :, None, None]
    h = silu(gn(h, params["gn2_gamma"], params["gn2_beta"]))
    h = conv(h, params["conv2_w"], params["conv2_b"])
    sc = jnp.einsum("nchw,cd->ndhw", x_nchw, params["sc_w"]) + params["sc_b"][None, :, None, None]
    return (sc + h) / output_scale_factor


# ----------------------------------------------------------------------------
# Main
# ----------------------------------------------------------------------------

if __name__ == "__main__":
    # Module config (small, consistent with the PyTorch __init__)
    N, Cin, Cout, H, W = 2, 32, 64, 16, 16
    groups = 8
    temb_channels = 64
    eps = 1e-6
    output_scale_factor = 1.0

    key = jax.random.PRNGKey(0)
    ks = jax.random.split(key, 12)

    params = {
        "gn1_gamma": 1.0 + 0.1 * jax.random.normal(ks[0], (Cin,), jnp.float32),
        "gn1_beta": 0.1 * jax.random.normal(ks[1], (Cin,), jnp.float32),
        "conv1_w": 0.05 * jax.random.normal(ks[2], (9, Cin, Cout), jnp.float32),
        "conv1_b": 0.05 * jax.random.normal(ks[3], (Cout,), jnp.float32),
        "temb_w": 0.05 * jax.random.normal(ks[4], (temb_channels, Cout), jnp.float32),
        "temb_b": 0.05 * jax.random.normal(ks[5], (Cout,), jnp.float32),
        "gn2_gamma": 1.0 + 0.1 * jax.random.normal(ks[6], (Cout,), jnp.float32),
        "gn2_beta": 0.1 * jax.random.normal(ks[7], (Cout,), jnp.float32),
        "conv2_w": 0.05 * jax.random.normal(ks[8], (9, Cout, Cout), jnp.float32),
        "conv2_b": 0.05 * jax.random.normal(ks[9], (Cout,), jnp.float32),
        "sc_w": 0.05 * jax.random.normal(ks[10], (Cin, Cout), jnp.float32),
        "sc_b": 0.05 * jax.random.normal(ks[11], (Cout,), jnp.float32),
    }

    kx, kt = jax.random.split(jax.random.PRNGKey(42))
    x = jax.random.normal(kx, (N, Cin, H, W), jnp.float32)      # NCHW, like PyTorch
    temb = jax.random.normal(kt, (N, temb_channels), jnp.float32)

    out = resnet_block_2d(x, temb, params, groups=groups, eps=eps,
                          output_scale_factor=output_scale_factor)
    out = jax.block_until_ready(out)

    ref = reference_forward(x, temb, params, groups=groups, eps=eps,
                            output_scale_factor=output_scale_factor)
    assert out.shape == (N, Cout, H, W)
    # Tolerance accounts for bf16 MXU operands, the bf16 inter-stage activation and
    # the bf16 shortcut operand (f32 accumulation / GroupNorm statistics throughout).
    err = float(jnp.max(jnp.abs(out - ref)))
    assert jnp.allclose(out, ref, atol=3e-2, rtol=3e-2), err

    print("KERNEL_OK")
</pallas_src>

<mosaic_0001>
module attributes {stable_mosaic.version = 11 : i64} {
  func.func @kernel(%arg0: i32, %arg1: memref<1x16x16x32xf32, #tpu.memory_space<vmem>>, %arg2: memref<1x32xf32, #tpu.memory_space<vmem>>, %arg3: memref<1x32xf32, #tpu.memory_space<vmem>>, %arg4: memref<32x32xf32, #tpu.memory_space<vmem>>, %arg5: memref<288x64xbf16, #tpu.memory_space<vmem>>, %arg6: memref<1x1x64xf32, #tpu.memory_space<vmem>>, %arg7: memref<1x16x16x64xbf16, #tpu.memory_space<vmem>>, %arg8: memref<16x16x288xbf16, #tpu.memory_space<vmem>>) attributes {dimension_semantics = [#tpu.dimension_semantics<parallel>], iteration_bounds = array<i64: 2>, scalar_prefetch = 0 : i64, scratch_operands = 1 : i64, tpu.core_type = #tpu.core_type<tc>, window_params = [{transform_indices = @transform_0, window_bounds = array<i64: 1, 16, 16, 32>}, {pipeline_mode = #tpu.pipeline_mode<synchronous>, transform_indices = @transform_1, window_bounds = array<i64: 1, 32>}, {pipeline_mode = #tpu.pipeline_mode<synchronous>, transform_indices = @transform_2, window_bounds = array<i64: 1, 32>}, {pipeline_mode = #tpu.pipeline_mode<synchronous>, transform_indices = @transform_3, window_bounds = array<i64: 32, 32>}, {pipeline_mode = #tpu.pipeline_mode<synchronous>, transform_indices = @transform_4, window_bounds = array<i64: 288, 64>}, {transform_indices = @transform_5, window_bounds = array<i64: 1, 1, 64>}, {transform_indices = @transform_6, window_bounds = array<i64: 1, 16, 16, 64>}]} {
    %c0 = arith.constant 0 : index
    %c0_0 = arith.constant 0 : index
    %c0_1 = arith.constant 0 : index
    %c0_2 = arith.constant 0 : index
    %0 = vector.load %arg1[%c0, %c0_0, %c0_1, %c0_2] : memref<1x16x16x32xf32, #tpu.memory_space<vmem>>, vector<1x16x16x32xf32>
    %1 = vector.shape_cast %0 : vector<1x16x16x32xf32> to vector<16x16x32xf32>
    %2 = vector.shape_cast %1 : vector<16x16x32xf32> to vector<256x32xf32>
    %c0_3 = arith.constant 0 : index
    %c0_4 = arith.constant 0 : index
    %3 = vector.load %arg4[%c0_3, %c0_4] : memref<32x32xf32, #tpu.memory_space<vmem>>, vector<32x32xf32>
    %c0_5 = arith.constant 0 : index
    %c0_6 = arith.constant 0 : index
    %4 = vector.load %arg2[%c0_5, %c0_6] : memref<1x32xf32, #tpu.memory_space<vmem>>, vector<1x32xf32>
    %c0_7 = arith.constant 0 : index
    %c0_8 = arith.constant 0 : index
    %5 = vector.load %arg3[%c0_7, %c0_8] : memref<1x32xf32, #tpu.memory_space<vmem>>, vector<1x32xf32>
    %cst = arith.constant dense<0.000000e+00> : vector<32xf32>
    %6 = vector.multi_reduction <add>, %2, %cst [0] : vector<256x32xf32> to vector<32xf32>
    %7 = vector.shape_cast %6 : vector<32xf32> to vector<1x32xf32>
    %8 = arith.mulf %2, %2 : vector<256x32xf32>
    %cst_9 = arith.constant dense<0.000000e+00> : vector<32xf32>
    %9 = vector.multi_reduction <add>, %8, %cst_9 [0] : vector<256x32xf32> to vector<32xf32>
    %10 = vector.shape_cast %9 : vector<32xf32> to vector<1x32xf32>
    %cst_10 = arith.constant dense<0.000000e+00> : vector<1x32xf32>
    %11 = tpu.matmul %7, %3, %cst_10 {dimension_numbers = #tpu.dot_dimension_numbers<[1], [0], [0], [1], [0, 0, 1, 1], [], []>} : vector<1x32xf32>, vector<32x32xf32>, vector<1x32xf32> -> vector<1x32xf32>
    %cst_11 = arith.constant dense<0.000000e+00> : vector<1x32xf32>
    %12 = tpu.matmul %10, %3, %cst_11 {dimension_numbers = #tpu.dot_dimension_numbers<[1], [0], [0], [1], [0, 0, 1, 1], [], []>} : vector<1x32xf32>, vector<32x32xf32>, vector<1x32xf32> -> vector<1x32xf32>
    %13 = arith.mulf %11, %11 : vector<1x32xf32>
    %14 = arith.subf %12, %13 : vector<1x32xf32>
    %cst_12 = arith.constant 0.000000e+00 : f32
    %15 = vector.broadcast %cst_12 : f32 to vector<1x32xf32>
    %16 = arith.maximumf %14, %15 : vector<1x32xf32>
    %cst_13 = arith.constant 9.99999997E-7 : f32
    %17 = vector.broadcast %cst_13 : f32 to vector<1x32xf32>
    %18 = arith.addf %16, %17 : vector<1x32xf32>
    %19 = math.rsqrt %18 : vector<1x32xf32>
    %20 = arith.mulf %4, %19 : vector<1x32xf32>
    %21 = arith.mulf %11, %20 : vector<1x32xf32>
    %22 = arith.subf %5, %21 : vector<1x32xf32>
    %23 = vector.broadcast %20 : vector<1x32xf32> to vector<256x32xf32>
    %24 = arith.mulf %2, %23 : vector<256x32xf32>
    %25 = vector.broadcast %22 : vector<1x32xf32> to vector<256x32xf32>
    %26 = arith.addf %24, %25 : vector<256x32xf32>
    %27 = arith.negf %26 : vector<256x32xf32>
    %28 = math.exp %27 : vector<256x32xf32>
    %cst_14 = arith.constant 1.000000e+00 : f32
    %29 = vector.broadcast %cst_14 : f32 to vector<256x32xf32>
    %30 = arith.addf %29, %28 : vector<256x32xf32>
    %31 = arith.divf %29, %30 : vector<256x32xf32>
    %32 = arith.mulf %26, %31 : vector<256x32xf32>
    %33 = vector.shape_cast %32 : vector<256x32xf32> to vector<16x16x32xf32>
    %34 = arith.truncf %33 : vector<16x16x32xf32> to vector<16x16x32xbf16>
    %cst_15 = arith.constant 0.000000e+00 : bf16
    %35 = vector.broadcast %cst_15 : bf16 to vector<1x16x288xbf16>
    %cst_16 = arith.constant 0.000000e+00 : bf16
    %36 = vector.broadcast %cst_16 : bf16 to vector<16x1x288xbf16>
    %c0_17 = arith.constant 0 : index
    %c0_18 = arith.constant 0 : index
    %c0_19 = arith.constant 0 : index
    %37 = vector.load %arg8[%c0_17, %c0_18, %c0_19] : memref<16x16x288xbf16, #tpu.memory_space<vmem>>, vector<1x16x288xbf16>
    tpu.vector_store %arg8[%c0_17, %c0_18, %c0_19], %35 {strides = array<i32>} : memref<16x16x288xbf16, #tpu.memory_space<vmem>>, vector<1x16x288xbf16>,
    %c15 = arith.constant 15 : index
    %c0_20 = arith.constant 0 : index
    %c0_21 = arith.constant 0 : index
    %38 = vector.load %arg8[%c15, %c0_20, %c0_21] : memref<16x16x288xbf16, #tpu.memory_space<vmem>>, vector<1x16x288xbf16>
    tpu.vector_store %arg8[%c15, %c0_20, %c0_21], %35 {strides = array<i32>} : memref<16x16x288xbf16, #tpu.memory_space<vmem>>, vector<1x16x288xbf16>,
    %c0_22 = arith.constant 0 : index
    %c0_23 = arith.constant 0 : index
    %c0_24 = arith.constant 0 : index
    %39 = vector.load %arg8[%c0_22, %c0_23, %c0_24] : memref<16x16x288xbf16, #tpu.memory_space<vmem>>, vector<16x1x288xbf16>
    tpu.vector_store %arg8[%c0_22, %c0_23, %c0_24], %36 {strides = array<i32>} : memref<16x16x288xbf16, #tpu.memory_space<vmem>>, vector<16x1x288xbf16>,
    %c0_25 = arith.constant 0 : index
    %c15_26 = arith.constant 15 : index
    %c0_27 = arith.constant 0 : index
    %40 = vector.load %arg8[%c0_25, %c15_26, %c0_27] : memref<16x16x288xbf16, #tpu.memory_space<vmem>>, vector<16x1x288xbf16>
    tpu.vector_store %arg8[%c0_25, %c15_26, %c0_27], %36 {strides = array<i32>} : memref<16x16x288xbf16, #tpu.memory_space<vmem>>, vector<16x1x288xbf16>,
    %41 = vector.extract_strided_slice %34 {offsets = [0, 0, 0], sizes = [15, 15, 32], strides = [1, 1, 1]} : vector<16x16x32xbf16> to vector<15x15x32xbf16>
    %c1 = arith.constant 1 : index
    %c1_28 = arith.constant 1 : index
    %c0_29 = arith.constant 0 : index
    %42 = vector.load %arg8[%c1, %c1_28, %c0_29] : memref<16x16x288xbf16, #tpu.memory_space<vmem>>, vector<15x15x32xbf16>
    tpu.vector_store %arg8[%c1, %c1_28, %c0_29], %41 {strides = array<i32>} : memref<16x16x288xbf16, #tpu.memory_space<vmem>>, vector<15x15x32xbf16>,
    %43 = vector.extract_strided_slice %34 {offsets = [0, 0, 0], sizes = [15, 16, 32], strides = [1, 1, 1]} : vector<16x16x32xbf16> to vector<15x16x32xbf16>
    %c1_30 = arith.constant 1 : index
    %c0_31 = arith.constant 0 : index
    %c32 = arith.constant 32 : index
    %44 = vector.load %arg8[%c1_30, %c0_31, %c32] : memref<16x16x288xbf16, #tpu.memory_space<vmem>>, vector<15x16x32xbf16>
    tpu.vector_store %arg8[%c1_30, %c0_31, %c32], %43 {strides = array<i32>} : memref<16x16x288xbf16, #tpu.memory_space<vmem>>, vector<15x16x32xbf16>,
    %45 = vector.extract_strided_slice %34 {offsets = [0, 1, 0], sizes = [15, 15, 32], strides = [1, 1, 1]} : vector<16x16x32xbf16> to vector<15x15x32xbf16>
    %c1_32 = arith.constant 1 : index
    %c0_33 = arith.constant 0 : index
    %c64 = arith.constant 64 : index
    %46 = vector.load %arg8[%c1_32, %c0_33, %c64] : memref<16x16x288xbf16, #tpu.memory_space<vmem>>, vector<15x15x32xbf16>
    tpu.vector_store %arg8[%c1_32, %c0_33, %c64], %45 {strides = array<i32>} : memref<16x16x288xbf16, #tpu.memory_space<vmem>>, vector<15x15x32xbf16>,
    %47 = vector.extract_strided_slice %34 {offsets = [0, 0, 0], sizes = [16, 15, 32], strides = [1, 1, 1]} : vector<16x16x32xbf16> to vector<16x15x32xbf16>
    %c0_34 = arith.constant 0 : index
    %c1_35 = arith.constant 1 : index
    %c96 = arith.constant 96 : index
    %48 = vector.load %arg8[%c0_34, %c1_35, %c96] : memref<16x16x288xbf16, #tpu.memory_space<vmem>>, vector<16x15x32xbf16>
    tpu.vector_store %arg8[%c0_34, %c1_35, %c96], %47 {strides = array<i32>} : memref<16x16x288xbf16, #tpu.memory_space<vmem>>, vector<16x15x32xbf16>,
    %c0_36 = arith.constant 0 : index
    %c0_37 = arith.constant 0 : index
    %c128 = arith.constant 128 : index
    %49 = vector.load %arg8[%c0_36, %c0_37, %c128] : memref<16x16x288xbf16, #tpu.memory_space<vmem>>, vector<16x16x32xbf16>
    tpu.vector_store %arg8[%c0_36, %c0_37, %c128], %34 {strides = array<i32>} : memref<16x16x288xbf16, #tpu.memory_space<vmem>>, vector<16x16x32xbf16>,
    %50 = vector.extract_strided_slice %34 {offsets = [0, 1, 0], sizes = [16, 15, 32], strides = [1, 1, 1]} : vector<16x16x32xbf16> to vector<16x15x32xbf16>
    %c0_38 = arith.constant 0 : index
    %c0_39 = arith.constant 0 : index
    %c160 = arith.constant 160 : index
    %51 = vector.load %arg8[%c0_38, %c0_39, %c160] : memref<16x16x288xbf16, #tpu.memory_space<vmem>>, vector<16x15x32xbf16>
    tpu.vector_store %arg8[%c0_38, %c0_39, %c160], %50 {strides = array<i32>} : memref<16x16x288xbf16, #tpu.memory_space<vmem>>, vector<16x15x32xbf16>,
    %52 = vector.extract_strided_slice %34 {offsets = [1, 0, 0], sizes = [15, 15, 32], strides = [1, 1, 1]} : vector<16x16x32xbf16> to vector<15x15x32xbf16>
    %c0_40 = arith.constant 0 : index
    %c1_41 = arith.constant 1 : index
    %c192 = arith.constant 192 : index
    %53 = vector.load %arg8[%c0_40, %c1_41, %c192] : memref<16x16x288xbf16, #tpu.memory_space<vmem>>, vector<15x15x32xbf16>
    tpu.vector_store %arg8[%c0_40, %c1_41, %c192], %52 {strides = array<i32>} : memref<16x16x288xbf16, #tpu.memory_space<vmem>>, vector<15x15x32xbf16>,
    %54 = vector.extract_strided_slice %34 {offsets = [1, 0, 0], sizes = [15, 16, 32], strides = [1, 1, 1]} : vector<16x16x32xbf16> to vector<15x16x32xbf16>
    %c0_42 = arith.constant 0 : index
    %c0_43 = arith.constant 0 : index
    %c224 = arith.constant 224 : index
    %55 = vector.load %arg8[%c0_42, %c0_43, %c224] : memref<16x16x288xbf16, #tpu.memory_space<vmem>>, vector<15x16x32xbf16>
    tpu.vector_store %arg8[%c0_42, %c0_43, %c224], %54 {strides = array<i32>} : memref<16x16x288xbf16, #tpu.memory_space<vmem>>, vector<15x16x32xbf16>,
    %56 = vector.extract_strided_slice %34 {offsets = [1, 1, 0], sizes = [15, 15, 32], strides = [1, 1, 1]} : vector<16x16x32xbf16> to vector<15x15x32xbf16>
    %c0_44 = arith.constant 0 : index
    %c0_45 = arith.constant 0 : index
    %c256 = arith.constant 256 : index
    %57 = vector.load %arg8[%c0_44, %c0_45, %c256] : memref<16x16x288xbf16, #tpu.memory_space<vmem>>, vector<15x15x32xbf16>
    tpu.vector_store %arg8[%c0_44, %c0_45, %c256], %56 {strides = array<i32>} : memref<16x16x288xbf16, #tpu.memory_space<vmem>>, vector<15x15x32xbf16>,
    %c0_46 = arith.constant 0 : index
    %c0_47 = arith.constant 0 : index
    %c0_48 = arith.constant 0 : index
    %58 = vector.load %arg8[%c0_46, %c0_47, %c0_48] : memref<16x16x288xbf16, #tpu.memory_space<vmem>>, vector<16x16x288xbf16>
    %59 = vector.shape_cast %58 : vector<16x16x288xbf16> to vector<256x288xbf16>
    %c0_49 = arith.constant 0 : index
    %c0_50 = arith.constant 0 : index
    %60 = vector.load %arg5[%c0_49, %c0_50] : memref<288x64xbf16, #tpu.memory_space<vmem>>, vector<288x64xbf16>
    %cst_51 = arith.constant dense<0.000000e+00> : vector<256x64xf32>
    %61 = tpu.matmul %59, %60, %cst_51 {dimension_numbers = #tpu.dot_dimension_numbers<[1], [0], [0], [1], [0, 0, 1, 1], [], []>} : vector<256x288xbf16>, vector<288x64xbf16>, vector<256x64xf32> -> vector<256x64xf32>
    %c0_52 = arith.constant 0 : index
    %c0_53 = arith.constant 0 : index
    %c0_54 = arith.constant 0 : index
    %62 = vector.load %arg6[%c0_52, %c0_53, %c0_54] : memref<1x1x64xf32, #tpu.memory_space<vmem>>, vector<1x1x64xf32>
    %63 = vector.shape_cast %62 : vector<1x1x64xf32> to vector<1x64xf32>
    %64 = vector.broadcast %63 : vector<1x64xf32> to vector<256x64xf32>
    %65 = arith.addf %61, %64 : vector<256x64xf32>
    %66 = vector.shape_cast %65 : vector<256x64xf32> to vector<16x16x64xf32>
    %67 = arith.truncf %66 : vector<16x16x64xf32> to vector<16x16x64xbf16>
    %c0_55 = arith.constant 0 : index
    %c0_56 = arith.constant 0 : index
    %c0_57 = arith.constant 0 : index
    %c0_58 = arith.constant 0 : index
    %68 = vector.load %arg7[%c0_55, %c0_56, %c0_57, %c0_58] : memref<1x16x16x64xbf16, #tpu.memory_space<vmem>>, vector<1x16x16x64xbf16>
    %69 = vector.shape_cast %68 : vector<1x16x16x64xbf16> to vector<16x16x64xbf16>
    %70 = vector.shape_cast %67 : vector<16x16x64xbf16> to vector<1x16x16x64xbf16>
    tpu.vector_store %arg7[%c0_55, %c0_56, %c0_57, %c0_58], %70 {strides = array<i32>} : memref<1x16x16x64xbf16, #tpu.memory_space<vmem>>, vector<1x16x16x64xbf16>,
    return
  }
  func.func @transform_0(%arg0: i32) -> (i32, i32, i32, i32) {
    %c0_i32 = arith.constant 0 : i32
    %c0_i32_0 = arith.constant 0 : i32
    %c0_i32_1 = arith.constant 0 : i32
    %c0_i32_2 = arith.constant 0 : i32
    return %arg0, %c0_i32, %c0_i32_0, %c0_i32_1 : i32, i32, i32, i32
  }
  func.func @transform_1(%arg0: i32) -> (i32, i32) {
    %c0_i32 = arith.constant 0 : i32
    %c0_i32_0 = arith.constant 0 : i32
    %c0_i32_1 = arith.constant 0 : i32
    return %c0_i32, %c0_i32_0 : i32, i32
  }
  func.func @transform_2(%arg0: i32) -> (i32, i32) {
    %c0_i32 = arith.constant 0 : i32
    %c0_i32_0 = arith.constant 0 : i32
    %c0_i32_1 = arith.constant 0 : i32
    return %c0_i32, %c0_i32_0 : i32, i32
  }
  func.func @transform_3(%arg0: i32) -> (i32, i32) {
    %c0_i32 = arith.constant 0 : i32
    %c0_i32_0 = arith.constant 0 : i32
    %c0_i32_1 = arith.constant 0 : i32
    return %c0_i32, %c0_i32_0 : i32, i32
  }
  func.func @transform_4(%arg0: i32) -> (i32, i32) {
    %c0_i32 = arith.constant 0 : i32
    %c0_i32_0 = arith.constant 0 : i32
    %c0_i32_1 = arith.constant 0 : i32
    return %c0_i32, %c0_i32_0 : i32, i32
  }
  func.func @transform_5(%arg0: i32) -> (i32, i32, i32) {
    %c0_i32 = arith.constant 0 : i32
    %c0_i32_0 = arith.constant 0 : i32
    %c0_i32_1 = arith.constant 0 : i32
    return %arg0, %c0_i32, %c0_i32_0 : i32, i32, i32
  }
  func.func @transform_6(%arg0: i32) -> (i32, i32, i32, i32) {
    %c0_i32 = arith.constant 0 : i32
    %c0_i32_0 = arith.constant 0 : i32
    %c0_i32_1 = arith.constant 0 : i32
    %c0_i32_2 = arith.constant 0 : i32
    return %arg0, %c0_i32, %c0_i32_0, %c0_i32_1 : i32, i32, i32, i32
  }
}

module attributes {stable_mosaic.version = 11 : i64} {
  func.func @kernel(%arg0: i32, %arg1: memref<1x16x16x64xbf16, #tpu.memory_space<vmem>>, %arg2: memref<1x16x16x32xbf16, #tpu.memory_space<vmem>>, %arg3: memref<1x64xf32, #tpu.memory_space<vmem>>, %arg4: memref<1x64xf32, #tpu.memory_space<vmem>>, %arg5: memref<64x64xf32, #tpu.memory_space<vmem>>, %arg6: memref<608x64xbf16, #tpu.memory_space<vmem>>, %arg7: memref<1x64xf32, #tpu.memory_space<vmem>>, %arg8: memref<1x16x16x64xf32, #tpu.memory_space<vmem>>, %arg9: memref<16x16x608xbf16, #tpu.memory_space<vmem>>) attributes {dimension_semantics = [#tpu.dimension_semantics<parallel>], iteration_bounds = array<i64: 2>, scalar_prefetch = 0 : i64, scratch_operands = 1 : i64, tpu.core_type = #tpu.core_type<tc>, window_params = [{transform_indices = @transform_0, window_bounds = array<i64: 1, 16, 16, 64>}, {transform_indices = @transform_1, window_bounds = array<i64: 1, 16, 16, 32>}, {pipeline_mode = #tpu.pipeline_mode<synchronous>, transform_indices = @transform_2, window_bounds = array<i64: 1, 64>}, {pipeline_mode = #tpu.pipeline_mode<synchronous>, transform_indices = @transform_3, window_bounds = array<i64: 1, 64>}, {pipeline_mode = #tpu.pipeline_mode<synchronous>, transform_indices = @transform_4, window_bounds = array<i64: 64, 64>}, {pipeline_mode = #tpu.pipeline_mode<synchronous>, transform_indices = @transform_5, window_bounds = array<i64: 608, 64>}, {pipeline_mode = #tpu.pipeline_mode<synchronous>, transform_indices = @transform_6, window_bounds = array<i64: 1, 64>}, {transform_indices = @transform_7, window_bounds = array<i64: 1, 16, 16, 64>}]} {
    %c0 = arith.constant 0 : index
    %c0_0 = arith.constant 0 : index
    %c0_1 = arith.constant 0 : index
    %c0_2 = arith.constant 0 : index
    %0 = vector.load %arg1[%c0, %c0_0, %c0_1, %c0_2] : memref<1x16x16x64xbf16, #tpu.memory_space<vmem>>, vector<1x16x16x64xbf16>
    %1 = vector.shape_cast %0 : vector<1x16x16x64xbf16> to vector<16x16x64xbf16>
    %2 = vector.shape_cast %1 : vector<16x16x64xbf16> to vector<256x64xbf16>
    %3 = arith.extf %2 : vector<256x64xbf16> to vector<256x64xf32>
    %c0_3 = arith.constant 0 : index
    %c0_4 = arith.constant 0 : index
    %4 = vector.load %arg5[%c0_3, %c0_4] : memref<64x64xf32, #tpu.memory_space<vmem>>, vector<64x64xf32>
    %c0_5 = arith.constant 0 : index
    %c0_6 = arith.constant 0 : index
    %5 = vector.load %arg3[%c0_5, %c0_6] : memref<1x64xf32, #tpu.memory_space<vmem>>, vector<1x64xf32>
    %c0_7 = arith.constant 0 : index
    %c0_8 = arith.constant 0 : index
    %6 = vector.load %arg4[%c0_7, %c0_8] : memref<1x64xf32, #tpu.memory_space<vmem>>, vector<1x64xf32>
    %cst = arith.constant dense<0.000000e+00> : vector<64xf32>
    %7 = vector.multi_reduction <add>, %3, %cst [0] : vector<256x64xf32> to vector<64xf32>
    %8 = vector.shape_cast %7 : vector<64xf32> to vector<1x64xf32>
    %9 = arith.mulf %3, %3 : vector<256x64xf32>
    %cst_9 = arith.constant dense<0.000000e+00> : vector<64xf32>
    %10 = vector.multi_reduction <add>, %9, %cst_9 [0] : vector<256x64xf32> to vector<64xf32>
    %11 = vector.shape_cast %10 : vector<64xf32> to vector<1x64xf32>
    %cst_10 = arith.constant dense<0.000000e+00> : vector<1x64xf32>
    %12 = tpu.matmul %8, %4, %cst_10 {dimension_numbers = #tpu.dot_dimension_numbers<[1], [0], [0], [1], [0, 0, 1, 1], [], []>} : vector<1x64xf32>, vector<64x64xf32>, vector<1x64xf32> -> vector<1x64xf32>
    %cst_11 = arith.constant dense<0.000000e+00> : vector<1x64xf32>
    %13 = tpu.matmul %11, %4, %cst_11 {dimension_numbers = #tpu.dot_dimension_numbers<[1], [0], [0], [1], [0, 0, 1, 1], [], []>} : vector<1x64xf32>, vector<64x64xf32>, vector<1x64xf32> -> vector<1x64xf32>
    %14 = arith.mulf %12, %12 : vector<1x64xf32>
    %15 = arith.subf %13, %14 : vector<1x64xf32>
    %cst_12 = arith.constant 0.000000e+00 : f32
    %16 = vector.broadcast %cst_12 : f32 to vector<1x64xf32>
    %17 = arith.maximumf %15, %16 : vector<1x64xf32>
    %cst_13 = arith.constant 9.99999997E-7 : f32
    %18 = vector.broadcast %cst_13 : f32 to vector<1x64xf32>
    %19 = arith.addf %17, %18 : vector<1x64xf32>
    %20 = math.rsqrt %19 : vector<1x64xf32>
    %21 = arith.mulf %5, %20 : vector<1x64xf32>
    %22 = arith.mulf %12, %21 : vector<1x64xf32>
    %23 = arith.subf %6, %22 : vector<1x64xf32>
    %24 = vector.broadcast %21 : vector<1x64xf32> to vector<256x64xf32>
    %25 = arith.mulf %3, %24 : vector<256x64xf32>
    %26 = vector.broadcast %23 : vector<1x64xf32> to vector<256x64xf32>
    %27 = arith.addf %25, %26 : vector<256x64xf32>
    %28 = arith.negf %27 : vector<256x64xf32>
    %29 = math.exp %28 : vector<256x64xf32>
    %cst_14 = arith.constant 1.000000e+00 : f32
    %30 = vector.broadcast %cst_14 : f32 to vector<256x64xf32>
    %31 = arith.addf %30, %29 : vector<256x64xf32>
    %32 = arith.divf %30, %31 : vector<256x64xf32>
    %33 = arith.mulf %27, %32 : vector<256x64xf32>
    %34 = vector.shape_cast %33 : vector<256x64xf32> to vector<16x16x64xf32>
    %35 = arith.truncf %34 : vector<16x16x64xf32> to vector<16x16x64xbf16>
    %cst_15 = arith.constant 0.000000e+00 : bf16
    %36 = vector.broadcast %cst_15 : bf16 to vector<1x16x576xbf16>
    %cst_16 = arith.constant 0.000000e+00 : bf16
    %37 = vector.broadcast %cst_16 : bf16 to vector<16x1x576xbf16>
    %c0_17 = arith.constant 0 : index
    %c0_18 = arith.constant 0 : index
    %c0_19 = arith.constant 0 : index
    %38 = vector.load %arg9[%c0_17, %c0_18, %c0_19] : memref<16x16x608xbf16, #tpu.memory_space<vmem>>, vector<1x16x576xbf16>
    tpu.vector_store %arg9[%c0_17, %c0_18, %c0_19], %36 {strides = array<i32>} : memref<16x16x608xbf16, #tpu.memory_space<vmem>>, vector<1x16x576xbf16>,
    %c15 = arith.constant 15 : index
    %c0_20 = arith.constant 0 : index
    %c0_21 = arith.constant 0 : index
    %39 = vector.load %arg9[%c15, %c0_20, %c0_21] : memref<16x16x608xbf16, #tpu.memory_space<vmem>>, vector<1x16x576xbf16>
    tpu.vector_store %arg9[%c15, %c0_20, %c0_21], %36 {strides = array<i32>} : memref<16x16x608xbf16, #tpu.memory_space<vmem>>, vector<1x16x576xbf16>,
    %c0_22 = arith.constant 0 : index
    %c0_23 = arith.constant 0 : index
    %c0_24 = arith.constant 0 : index
    %40 = vector.load %arg9[%c0_22, %c0_23, %c0_24] : memref<16x16x608xbf16, #tpu.memory_space<vmem>>, vector<16x1x576xbf16>
    tpu.vector_store %arg9[%c0_22, %c0_23, %c0_24], %37 {strides = array<i32>} : memref<16x16x608xbf16, #tpu.memory_space<vmem>>, vector<16x1x576xbf16>,
    %c0_25 = arith.constant 0 : index
    %c15_26 = arith.constant 15 : index
    %c0_27 = arith.constant 0 : index
    %41 = vector.load %arg9[%c0_25, %c15_26, %c0_27] : memref<16x16x608xbf16, #tpu.memory_space<vmem>>, vector<16x1x576xbf16>
    tpu.vector_store %arg9[%c0_25, %c15_26, %c0_27], %37 {strides = array<i32>} : memref<16x16x608xbf16, #tpu.memory_space<vmem>>, vector<16x1x576xbf16>,
    %42 = vector.extract_strided_slice %35 {offsets = [0, 0, 0], sizes = [15, 15, 64], strides = [1, 1, 1]} : vector<16x16x64xbf16> to vector<15x15x64xbf16>
    %c1 = arith.constant 1 : index
    %c1_28 = arith.constant 1 : index
    %c0_29 = arith.constant 0 : index
    %43 = vector.load %arg9[%c1, %c1_28, %c0_29] : memref<16x16x608xbf16, #tpu.memory_space<vmem>>, vector<15x15x64xbf16>
    tpu.vector_store %arg9[%c1, %c1_28, %c0_29], %42 {strides = array<i32>} : memref<16x16x608xbf16, #tpu.memory_space<vmem>>, vector<15x15x64xbf16>,
    %44 = vector.extract_strided_slice %35 {offsets = [0, 0, 0], sizes = [15, 16, 64], strides = [1, 1, 1]} : vector<16x16x64xbf16> to vector<15x16x64xbf16>
    %c1_30 = arith.constant 1 : index
    %c0_31 = arith.constant 0 : index
    %c64 = arith.constant 64 : index
    %45 = vector.load %arg9[%c1_30, %c0_31, %c64] : memref<16x16x608xbf16, #tpu.memory_space<vmem>>, vector<15x16x64xbf16>
    tpu.vector_store %arg9[%c1_30, %c0_31, %c64], %44 {strides = array<i32>} : memref<16x16x608xbf16, #tpu.memory_space<vmem>>, vector<15x16x64xbf16>,
    %46 = vector.extract_strided_slice %35 {offsets = [0, 1, 0], sizes = [15, 15, 64], strides = [1, 1, 1]} : vector<16x16x64xbf16> to vector<15x15x64xbf16>
    %c1_32 = arith.constant 1 : index
    %c0_33 = arith.constant 0 : index
    %c128 = arith.constant 128 : index
    %47 = vector.load %arg9[%c1_32, %c0_33, %c128] : memref<16x16x608xbf16, #tpu.memory_space<vmem>>, vector<15x15x64xbf16>
    tpu.vector_store %arg9[%c1_32, %c0_33, %c128], %46 {strides = array<i32>} : memref<16x16x608xbf16, #tpu.memory_space<vmem>>, vector<15x15x64xbf16>,
    %48 = vector.extract_strided_slice %35 {offsets = [0, 0, 0], sizes = [16, 15, 64], strides = [1, 1, 1]} : vector<16x16x64xbf16> to vector<16x15x64xbf16>
    %c0_34 = arith.constant 0 : index
    %c1_35 = arith.constant 1 : index
    %c192 = arith.constant 192 : index
    %49 = vector.load %arg9[%c0_34, %c1_35, %c192] : memref<16x16x608xbf16, #tpu.memory_space<vmem>>, vector<16x15x64xbf16>
    tpu.vector_store %arg9[%c0_34, %c1_35, %c192], %48 {strides = array<i32>} : memref<16x16x608xbf16, #tpu.memory_space<vmem>>, vector<16x15x64xbf16>,
    %c0_36 = arith.constant 0 : index
    %c0_37 = arith.constant 0 : index
    %c256 = arith.constant 256 : index
    %50 = vector.load %arg9[%c0_36, %c0_37, %c256] : memref<16x16x608xbf16, #tpu.memory_space<vmem>>, vector<16x16x64xbf16>
    tpu.vector_store %arg9[%c0_36, %c0_37, %c256], %35 {strides = array<i32>} : memref<16x16x608xbf16, #tpu.memory_space<vmem>>, vector<16x16x64xbf16>,
    %51 = vector.extract_strided_slice %35 {offsets = [0, 1, 0], sizes = [16, 15, 64], strides = [1, 1, 1]} : vector<16x16x64xbf16> to vector<16x15x64xbf16>
    %c0_38 = arith.constant 0 : index
    %c0_39 = arith.constant 0 : index
    %c320 = arith.constant 320 : index
    %52 = vector.load %arg9[%c0_38, %c0_39, %c320] : memref<16x16x608xbf16, #tpu.memory_space<vmem>>, vector<16x15x64xbf16>
    tpu.vector_store %arg9[%c0_38, %c0_39, %c320], %51 {strides = array<i32>} : memref<16x16x608xbf16, #tpu.memory_space<vmem>>, vector<16x15x64xbf16>,
    %53 = vector.extract_strided_slice %35 {offsets = [1, 0, 0], sizes = [15, 15, 64], strides = [1, 1, 1]} : vector<16x16x64xbf16> to vector<15x15x64xbf16>
    %c0_40 = arith.constant 0 : index
    %c1_41 = arith.constant 1 : index
    %c384 = arith.constant 384 : index
    %54 = vector.load %arg9[%c0_40, %c1_41, %c384] : memref<16x16x608xbf16, #tpu.memory_space<vmem>>, vector<15x15x64xbf16>
    tpu.vector_store %arg9[%c0_40, %c1_41, %c384], %53 {strides = array<i32>} : memref<16x16x608xbf16, #tpu.memory_space<vmem>>, vector<15x15x64xbf16>,
    %55 = vector.extract_strided_slice %35 {offsets = [1, 0, 0], sizes = [15, 16, 64], strides = [1, 1, 1]} : vector<16x16x64xbf16> to vector<15x16x64xbf16>
    %c0_42 = arith.constant 0 : index
    %c0_43 = arith.constant 0 : index
    %c448 = arith.constant 448 : index
    %56 = vector.load %arg9[%c0_42, %c0_43, %c448] : memref<16x16x608xbf16, #tpu.memory_space<vmem>>, vector<15x16x64xbf16>
    tpu.vector_store %arg9[%c0_42, %c0_43, %c448], %55 {strides = array<i32>} : memref<16x16x608xbf16, #tpu.memory_space<vmem>>, vector<15x16x64xbf16>,
    %57 = vector.extract_strided_slice %35 {offsets = [1, 1, 0], sizes = [15, 15, 64], strides = [1, 1, 1]} : vector<16x16x64xbf16> to vector<15x15x64xbf16>
    %c0_44 = arith.constant 0 : index
    %c0_45 = arith.constant 0 : index
    %c512 = arith.constant 512 : index
    %58 = vector.load %arg9[%c0_44, %c0_45, %c512] : memref<16x16x608xbf16, #tpu.memory_space<vmem>>, vector<15x15x64xbf16>
    tpu.vector_store %arg9[%c0_44, %c0_45, %c512], %57 {strides = array<i32>} : memref<16x16x608xbf16, #tpu.memory_space<vmem>>, vector<15x15x64xbf16>,
    %c0_46 = arith.constant 0 : index
    %c0_47 = arith.constant 0 : index
    %c0_48 = arith.constant 0 : index
    %c0_49 = arith.constant 0 : index
    %59 = vector.load %arg2[%c0_46, %c0_47, %c0_48, %c0_49] : memref<1x16x16x32xbf16, #tpu.memory_space<vmem>>, vector<1x16x16x32xbf16>
    %60 = vector.shape_cast %59 : vector<1x16x16x32xbf16> to vector<16x16x32xbf16>
    %c0_50 = arith.constant 0 : index
    %c0_51 = arith.constant 0 : index
    %c576 = arith.constant 576 : index
    %61 = vector.load %arg9[%c0_50, %c0_51, %c576] : memref<16x16x608xbf16, #tpu.memory_space<vmem>>, vector<16x16x32xbf16>
    tpu.vector_store %arg9[%c0_50, %c0_51, %c576], %60 {strides = array<i32>} : memref<16x16x608xbf16, #tpu.memory_space<vmem>>, vector<16x16x32xbf16>,
    %c0_52 = arith.constant 0 : index
    %c0_53 = arith.constant 0 : index
    %c0_54 = arith.constant 0 : index
    %62 = vector.load %arg9[%c0_52, %c0_53, %c0_54] : memref<16x16x608xbf16, #tpu.memory_space<vmem>>, vector<16x16x608xbf16>
    %63 = vector.shape_cast %62 : vector<16x16x608xbf16> to vector<256x608xbf16>
    %c0_55 = arith.constant 0 : index
    %c0_56 = arith.constant 0 : index
    %64 = vector.load %arg6[%c0_55, %c0_56] : memref<608x64xbf16, #tpu.memory_space<vmem>>, vector<608x64xbf16>
    %cst_57 = arith.constant dense<0.000000e+00> : vector<256x64xf32>
    %65 = tpu.matmul %63, %64, %cst_57 {dimension_numbers = #tpu.dot_dimension_numbers<[1], [0], [0], [1], [0, 0, 1, 1], [], []>} : vector<256x608xbf16>, vector<608x64xbf16>, vector<256x64xf32> -> vector<256x64xf32>
    %c0_58 = arith.constant 0 : index
    %c0_59 = arith.constant 0 : index
    %66 = vector.load %arg7[%c0_58, %c0_59] : memref<1x64xf32, #tpu.memory_space<vmem>>, vector<1x64xf32>
    %67 = vector.broadcast %66 : vector<1x64xf32> to vector<256x64xf32>
    %68 = arith.addf %65, %67 : vector<256x64xf32>
    %cst_60 = arith.constant 1.000000e+00 : f32
    %69 = vector.broadcast %cst_60 : f32 to vector<256x64xf32>
    %70 = arith.mulf %68, %69 : vector<256x64xf32>
    %71 = vector.shape_cast %70 : vector<256x64xf32> to vector<16x16x64xf32>
    %c0_61 = arith.constant 0 : index
    %c0_62 = arith.constant 0 : index
    %c0_63 = arith.constant 0 : index
    %c0_64 = arith.constant 0 : index
    %72 = vector.load %arg8[%c0_61, %c0_62, %c0_63, %c0_64] : memref<1x16x16x64xf32, #tpu.memory_space<vmem>>, vector<1x16x16x64xf32>
    %73 = vector.shape_cast %72 : vector<1x16x16x64xf32> to vector<16x16x64xf32>
    %74 = vector.shape_cast %71 : vector<16x16x64xf32> to vector<1x16x16x64xf32>
    tpu.vector_store %arg8[%c0_61, %c0_62, %c0_63, %c0_64], %74 {strides = array<i32>} : memref<1x16x16x64xf32, #tpu.memory_space<vmem>>, vector<1x16x16x64xf32>,
    return
  }
  func.func @transform_0(%arg0: i32) -> (i32, i32, i32, i32) {
    %c0_i32 = arith.constant 0 : i32
    %c0_i32_0 = arith.constant 0 : i32
    %c0_i32_1 = arith.constant 0 : i32
    %c0_i32_2 = arith.constant 0 : i32
    return %arg0, %c0_i32, %c0_i32_0, %c0_i32_1 : i32, i32, i32, i32
  }
  func.func @transform_1(%arg0: i32) -> (i32, i32, i32, i32) {
    %c0_i32 = arith.constant 0 : i32
    %c0_i32_0 = arith.constant 0 : i32
    %c0_i32_1 = arith.constant 0 : i32
    %c0_i32_2 = arith.constant 0 : i32
    return %arg0, %c0_i32, %c0_i32_0, %c0_i32_1 : i32, i32, i32, i32
  }
  func.func @transform_2(%arg0: i32) -> (i32, i32) {
    %c0_i32 = arith.constant 0 : i32
    %c0_i32_0 = arith.constant 0 : i32
    %c0_i32_1 = arith.constant 0 : i32
    return %c0_i32, %c0_i32_0 : i32, i32
  }
  func.func @transform_3(%arg0: i32) -> (i32, i32) {
    %c0_i32 = arith.constant 0 : i32
    %c0_i32_0 = arith.constant 0 : i32
    %c0_i32_1 = arith.constant 0 : i32
    return %c0_i32, %c0_i32_0 : i32, i32
  }
  func.func @transform_4(%arg0: i32) -> (i32, i32) {
    %c0_i32 = arith.constant 0 : i32
    %c0_i32_0 = arith.constant 0 : i32
    %c0_i32_1 = arith.constant 0 : i32
    return %c0_i32, %c0_i32_0 : i32, i32
  }
  func.func @transform_5(%arg0: i32) -> (i32, i32) {
    %c0_i32 = arith.constant 0 : i32
    %c0_i32_0 = arith.constant 0 : i32
    %c0_i32_1 = arith.constant 0 : i32
    return %c0_i32, %c0_i32_0 : i32, i32
  }
  func.func @transform_6(%arg0: i32) -> (i32, i32) {
    %c0_i32 = arith.constant 0 : i32
    %c0_i32_0 = arith.constant 0 : i32
    %c0_i32_1 = arith.constant 0 : i32
    return %c0_i32, %c0_i32_0 : i32, i32
  }
  func.func @transform_7(%arg0: i32) -> (i32, i32, i32, i32) {
    %c0_i32 = arith.constant 0 : i32
    %c0_i32_0 = arith.constant 0 : i32
    %c0_i32_1 = arith.constant 0 : i32
    %c0_i32_2 = arith.constant 0 : i32
    return %arg0, %c0_i32, %c0_i32_0, %c0_i32_1 : i32, i32, i32, i32
  }
}

</mosaic_0001>

<bundles_post_ra>
// kernel: resnet_block_2d.2
= control target key start
LH: loop header
LB: loop body
LE: loop exit
PB: predicated region body
PF: predicated region fallthrough
CT: control target
= control target key end

     0   :  { %s4539_s21 = smov 0   ;;  %s7680_s0 = inlined_call_operand.vmem [shape: f32[2,16,16,32], index: 0, kind: input, shape index: {}]   ;;  %s7681_s1 = inlined_call_operand.vmem [shape: f32[1,32], index: 1, kind: input, shape index: {}]   ;;  %s7682_s2 = inlined_call_operand.vmem [shape: f32[1,32], index: 2, kind: input, shape index: {}]   ;;  %s7683_s3 = inlined_call_operand.vmem [shape: f32[32,32], index: 3, kind: input, shape index: {}]   ;;  %s7684_s4 = inlined_call_operand.vmem [shape: bf16[288,64], index: 4, kind: input, shape index: {}]   ;;  %s7685_s5 = inlined_call_operand.vmem [shape: f32[2,1,64], index: 5, kind: input, shape index: {}]   ;;  %s7686_s6 = inlined_call_operand.vmem [shape: bf16[2,16,16,64], index: 6, kind: output, shape index: {}]  }
   0x1 LB: > { %s3921_s22 = sadd.s32 4294967295, %s4498_s21   ;;  %p3925_p0 = scmp.ge.s32.totalorder %s4498_s21, 1  ;;  %s4498_s21 = sphi %s4539_s21, %s16_s21  }
   0x2   : > { %p220_p1 = scmp.lt.s32.totalorder %s4498_s21, 3 }
   0x4   : > { %p221_p2 = pnand %p3925_p0, %p220_p1 }
   0x6   : > { %224 = sbr.rel (%p221_p2) target bundleno = 1174 (0x496), region = 44 }
   0xb   : > { %v302_v0 = vld [vmem:[%s7683_s3 + $0x18] sm:$0xff]  ;;  %v301_v1 = vld [vmem:[%s7683_s3 + $0x10] sm:$0xff]  ;;  %p253_p3 = scmp.lt.s32.totalorder %s3921_s22, 1  ;;  %v300_v2 = vld [vmem:[%s7683_s3 + $0x8] sm:$0xff]  ;;  %vm7689_vm0 = vcmask 261120   ;;  %vm1406_vm5 = vcmask 257027  }
   0xc   : > { %491 = vmatpush.msra.mxu0 %v302_v0  ;;  %514 = vmatpush.msra.mxu1 %v302_v0  ;;  %v299_v3 = vld [vmem:[%s7683_s3] sm:$0xff]  ;;  %vm7687_vm4 = vsmask.f32 7950  ;;  %vm7690_vm6 = vcmask 257024   ;;  %vm7688_vm8 = vsmask.f32 256 }
   0xd   : > { %s8213_s22 = smov (!%p253_p3, %s3921_s22), 1  ;;  %vm4795_vm7 = vmand %vm1406_vm5, %vm7687_vm4  ;;  %vm1301_vm9 = vcmask 253952   ;;  %s4501_s19 = smov 32  }
   0xe   : > { %492 = vmatpush.msra.mxu0 %v301_v1  ;;  %515 = vmatpush.msra.mxu1 %v301_v1  ;;  %s4246_s7 = sshll.u32 %s8213_s22, 8  ;;  %vm4813_vm10 = vmand %vm1301_vm9, %vm7688_vm8  ;;  %s4502_s20 = smov 96  }
   0xf   : > { %s4565_s10 = scalar_lea.vmem %s7680_s0, %s4246_s7  ;;  %s4503_s23 = smov 64  }
  0x10   : > { %493 = vmatpush.msra.mxu0 %v300_v2  ;;  %516 = vmatpush.msra.mxu1 %v300_v2  ;;  %v4568_v4 = vld [vmem:[%s4565_s10] sm:$0xff]  ;;  %v4571_v5 = vld [vmem:[%s4565_s10 + $0x8] sm:$0xff]  ;;  %v4574_v6 = vld [vmem:[%s4565_s10 + $0x10] sm:$0xff]  ;;  %s260_s18 = scalar_lea.vmem %s7685_s5, %s8213_s22 }
  0x11   : > { %v4577_v7 = vld [vmem:[%s4565_s10 + $0x18] sm:$0xff]  ;;  %v306_v8 = vsel %vm7689_vm0, %v4568_v4, 0.0  ;;  %v307_v9 = vsel %vm7689_vm0, %v4571_v5, 0.0  ;;  %v309_v10 = vsel %vm7689_vm0, %v4574_v6, 0.0  ;;  %v4586_v11 = vld [vmem:[%s4565_s10 + $0x20] sm:$0xff]  ;;  %v4591_v14 = vld [vmem:[%s4565_s10 + $0x28] sm:$0xff]  ;;  %v375_v25 = vmul.f32 %v4568_v4, %v4568_v4 }
  0x12   : > { %494 = vmatpush.msra.mxu0 %v299_v3  ;;  %517 = vmatpush.msra.mxu1 %v299_v3  ;;  %v308_v12 = vadd.f32 %v307_v9, %v306_v8  ;;  %v311_v13 = vsel %vm7689_vm0, %v4577_v7, 0.0  ;;  %v313_v16 = vsel %vm7689_vm0, %v4586_v11, 0.0  ;;  %v4596_v17 = vld [vmem:[%s4565_s10 + $0x30] sm:$0xff]  ;;  %v315_v19 = vsel %vm7689_vm0, %v4591_v14, 0.0  ;;  %v4601_v20 = vld [vmem:[%s4565_s10 + $0x38] sm:$0xff]  ;;  %v4606_v23 = vld [vmem:[%s4565_s10 + $0x40] sm:$0xff] }
  0x13   : > { %v317_v22 = vsel %vm7689_vm0, %v4596_v17, 0.0  ;;  %v319_v26 = vsel %vm7689_vm0, %v4601_v20, 0.0  ;;  %v376_v27 = vmul.f32 %v4571_v5, %v4571_v5  ;;  %v377_v28 = vmul.f32 %v4574_v6, %v4574_v6  ;;  %v4617_v29 = vld [vmem:[%s4565_s10 + $0x48] sm:$0xff]  ;;  %v4624_v33 = vld [vmem:[%s4565_s10 + $0x50] sm:$0xff]  ;;  %v4634_v40 = vld [vmem:[%s4565_s10 + $0x58] sm:$0xff] }
  0x14   : > { %v310_v15 = vadd.f32 %v309_v10, %v308_v12  ;;  %v321_v31 = vsel %vm7689_vm0, %v4606_v23, 0.0  ;;  %v378_v32 = vmul.f32 %v4577_v7, %v4577_v7  ;;  %v407_v35 = vsel %vm7689_vm0, %v375_v25, 0.0  ;;  %v4642_v46 = vld [vmem:[%s4565_s10 + $0x60] sm:$0xff]  ;;  %v4650_v52 = vld [vmem:[%s4565_s10 + $0x68] sm:$0xff]  ;;  %v4658_v58 = vld [vmem:[%s4565_s10 + $0x70] sm:$0xff] }
  0x15   : > { %v323_v36 = vsel %vm7689_vm0, %v4617_v29, 0.0  ;;  %v379_v37 = vmul.f32 %v4586_v11, %v4586_v11  ;;  %v408_v38 = vsel %vm7689_vm0, %v376_v27, 0.0  ;;  %v410_v39 = vsel %vm7689_vm0, %v377_v28, 0.0  ;;  %v282_v0 = vld [vmem:[%s4565_s10 + $0x78] sm:$0xff]  ;;  %v4672_v10 = vld [vmem:[%s4565_s10 + $0x80] sm:$0xff]  ;;  %v285_v27 = vld [vmem:[%s4565_s10 + $0x90] sm:$0xff] }
  0x16   : > { %v312_v18 = vadd.f32 %v311_v13, %v310_v15  ;;  %v409_v42 = vadd.f32 %v408_v38, %v407_v35  ;;  %v325_v43 = vsel %vm7689_vm0, %v4624_v33, 0.0  ;;  %v380_v44 = vmul.f32 %v4591_v14, %v4591_v14  ;;  %v286_v35 = vld [vmem:[%s4565_s10 + $0x98] sm:$0xff] }
  0x17   : > { %v412_v45 = vsel %vm7689_vm0, %v378_v32, 0.0  ;;  %v327_v49 = vsel %vm7689_vm0, %v4634_v40, 0.0  ;;  %v381_v50 = vmul.f32 %v4596_v17, %v4596_v17  ;;  %v414_v51 = vsel %vm7689_vm0, %v379_v37, 0.0 }
  0x18   : > { %v314_v21 = vadd.f32 %v313_v16, %v312_v18  ;;  %v411_v48 = vadd.f32 %v410_v39, %v409_v42  ;;  %v329_v55 = vsel %vm7689_vm0, %v4642_v46, 0.0  ;;  %v382_v56 = vmul.f32 %v4601_v20, %v4601_v20  ;;  %v287_v42 = vld [vmem:[%s4565_s10 + $0xa0] sm:$0xff] }
  0x19   : > { %v416_v57 = vsel %vm7689_vm0, %v380_v44, 0.0  ;;  %v331_v61 = vsel %vm7689_vm0, %v4650_v52, 0.0  ;;  %v383_v62 = vmul.f32 %v4606_v23, %v4606_v23  ;;  %v418_v63 = vsel %vm7689_vm0, %v381_v50, 0.0 }
  0x1a   : > { %v316_v24 = vadd.f32 %v315_v19, %v314_v21  ;;  %v413_v54 = vadd.f32 %v412_v45, %v411_v48  ;;  %v333_v3 = vsel %vm7689_vm0, %v4658_v58, 0.0  ;;  %v384_v8 = vmul.f32 %v4617_v29, %v4617_v29  ;;  %v4679_v19 = vld [vmem:[%s4565_s10 + $0x88] sm:$0xff] }
  0x1b   : > { %v420_v9 = vsel %vm7689_vm0, %v382_v56, 0.0  ;;  %v335_v15 = vsel %vm7689_vm0, %v282_v0, 0.0  ;;  %v385_v16 = vmul.f32 %v4624_v33, %v4624_v33  ;;  %v422_v18 = vsel %vm7689_vm0, %v383_v62, 0.0  ;;  %v289_v56 = vld [vmem:[%s4565_s10 + $0xb0] sm:$0xff] }
  0x1c   : > { %v318_v30 = vadd.f32 %v317_v22, %v316_v24  ;;  %v415_v60 = vadd.f32 %v414_v51, %v413_v54  ;;  %v337_v24 = vsel %vm7689_vm0, %v4672_v10, 0.0  ;;  %v386_v25 = vmul.f32 %v4634_v40, %v4634_v40 }
  0x1d   : > { %v387_v32 = vmul.f32 %v4642_v46, %v4642_v46  ;;  %v341_v38 = vsel %vm7689_vm0, %v285_v27, 0.0  ;;  %v388_v39 = vmul.f32 %v4650_v52, %v4650_v52  ;;  %v343_v45 = vsel %vm7689_vm0, %v286_v35, 0.0 }
  0x1e   : > { %v320_v34 = vadd.f32 %v319_v26, %v318_v30  ;;  %v417_v2 = vadd.f32 %v416_v57, %v415_v60  ;;  %v424_v26 = vsel %vm7689_vm0, %v384_v8, 0.0  ;;  %v390_v54 = vmul.f32 %v282_v0, %v282_v0 }
  0x1f   : > { %v430_v48 = vsel %vm7689_vm0, %v387_v32, 0.0  ;;  %v392_v0 = vmul.f32 %v4679_v19, %v4679_v19 }
  0x20   : > { %v322_v41 = vadd.f32 %v321_v31, %v320_v34  ;;  %v419_v13 = vadd.f32 %v418_v63, %v417_v2  ;;  %v339_v31 = vsel %vm7689_vm0, %v4679_v19, 0.0  ;;  %v426_v34 = vsel %vm7689_vm0, %v385_v16, 0.0  ;;  %v290_v63 = vld [vmem:[%s4565_s10 + $0xb8] sm:$0xff] }
  0x21   : > { %v436_v8 = vsel %vm7689_vm0, %v390_v54, 0.0  ;;  %v393_v16 = vmul.f32 %v285_v27, %v285_v27 }
  0x22   : > { %v324_v47 = vadd.f32 %v323_v36, %v322_v41  ;;  %v421_v22 = vadd.f32 %v420_v9, %v419_v13  ;;  %v428_v41 = vsel %vm7689_vm0, %v386_v25, 0.0  ;;  %v291_v9 = vld [vmem:[%s4565_s10 + $0xc0] sm:$0xff] }
  0x23   : > { %v353_v25 = vsel %vm7689_vm0, %v291_v9, 0.0  ;;  %v442_v27 = vsel %vm7689_vm0, %v393_v16, 0.0 }
  0x24   : > { %v326_v53 = vadd.f32 %v325_v43, %v324_v47  ;;  %v423_v30 = vadd.f32 %v422_v18, %v421_v22  ;;  %v389_v47 = vmul.f32 %v4658_v58, %v4658_v58 }
  0x26   : > { %v328_v59 = vadd.f32 %v327_v49, %v326_v53  ;;  %v425_v37 = vadd.f32 %v424_v26, %v423_v30  ;;  %v288_v49 = vld [vmem:[%s4565_s10 + $0xa8] sm:$0xff]  ;;  %v345_v53 = vsel %vm7689_vm0, %v287_v42, 0.0  ;;  %v434_v62 = vsel %vm7689_vm0, %v389_v47, 0.0  ;;  %v293_v30 = vld [vmem:[%s4565_s10 + $0xd0] sm:$0xff] }
  0x27   : > { %v347_v60 = vsel %vm7689_vm0, %v288_v49, 0.0  ;;  %v394_v26 = vmul.f32 %v286_v35, %v286_v35 }
  0x28   : > { %v330_v1 = vadd.f32 %v329_v55, %v328_v59  ;;  %v427_v44 = vadd.f32 %v426_v34, %v425_v37  ;;  %v432_v55 = vsel %vm7689_vm0, %v388_v39, 0.0  ;;  %v294_v37 = vld [vmem:[%s4565_s10 + $0xd8] sm:$0xff] }
  0x29   : > { %v444_v35 = vsel %vm7689_vm0, %v394_v26, 0.0 }
  0x2a   : > { %v332_v12 = vadd.f32 %v331_v61, %v330_v1  ;;  %v429_v51 = vadd.f32 %v428_v41, %v427_v44  ;;  %v391_v61 = vmul.f32 %v4672_v10, %v4672_v10  ;;  %v357_v41 = vsel %vm7689_vm0, %v293_v30, 0.0  ;;  %v295_v44 = vld [vmem:[%s4565_s10 + $0xe0] sm:$0xff] }
  0x2c   : > { %v334_v21 = vadd.f32 %v333_v3, %v332_v12  ;;  %v431_v59 = vadd.f32 %v430_v48, %v429_v51  ;;  %v349_v3 = vsel %vm7689_vm0, %v289_v56, 0.0  ;;  %v438_v18 = vsel %vm7689_vm0, %v391_v61, 0.0  ;;  %v296_v51 = vld [vmem:[%s4565_s10 + $0xe8] sm:$0xff] }
  0x2d   : > { %v359_v48 = vsel %vm7689_vm0, %v294_v37, 0.0 }
  0x2e   : > { %v336_v28 = vadd.f32 %v335_v15, %v334_v21  ;;  %v433_v2 = vadd.f32 %v432_v55, %v431_v59  ;;  %v351_v15 = vsel %vm7689_vm0, %v290_v63, 0.0  ;;  %v292_v21 = vld [vmem:[%s4565_s10 + $0xc8] sm:$0xff]  ;;  %v361_v55 = vsel %vm7689_vm0, %v295_v44, 0.0 }
  0x2f   : > { %v355_v34 = vsel %vm7689_vm0, %v292_v21, 0.0 }
  0x30   : > { %v338_v36 = vadd.f32 %v337_v24, %v336_v28  ;;  %v435_v13 = vadd.f32 %v434_v62, %v433_v2  ;;  %v440_v28 = vsel %vm7689_vm0, %v392_v0, 0.0  ;;  %v363_v62 = vsel %vm7689_vm0, %v296_v51, 0.0 }
  0x32   : > { %v340_v43 = vadd.f32 %v339_v31, %v338_v36  ;;  %v437_v24 = vadd.f32 %v436_v8, %v435_v13  ;;  %v395_v36 = vmul.f32 %v287_v42, %v287_v42 }
  0x34   : > { %v342_v50 = vadd.f32 %v341_v38, %v340_v43  ;;  %v439_v32 = vadd.f32 %v438_v18, %v437_v24  ;;  %v396_v43 = vmul.f32 %v288_v49, %v288_v49  ;;  %v446_v42 = vsel %vm7689_vm0, %v395_v36, 0.0  ;;  %v297_v49 = vld [vmem:[%s4565_s10 + $0xf0] sm:$0xff] }
  0x35   : > { %v365_v8 = vsel %vm7689_vm0, %v297_v49, 0.0  ;;  %v401_v18 = vmul.f32 %v293_v30, %v293_v30  ;;  %v405_v30 = vmul.f32 %v297_v49, %v297_v49 }
  0x36   : > { %v344_v57 = vadd.f32 %v343_v45, %v342_v50  ;;  %v441_v39 = vadd.f32 %v440_v28, %v439_v32  ;;  %v397_v50 = vmul.f32 %v289_v56, %v289_v56  ;;  %v448_v59 = vsel %vm7689_vm0, %v396_v43, 0.0 }
  0x37   : > { %v403_v32 = vmul.f32 %v295_v44, %v295_v44  ;;  %v466_v44 = vsel %vm7689_vm0, %v405_v30, 0.0 }
  0x38   : > { %v346_v1 = vadd.f32 %v345_v53, %v344_v57  ;;  %v443_v47 = vadd.f32 %v442_v27, %v441_v39  ;;  %v398_v57 = vmul.f32 %v290_v63, %v290_v63  ;;  %v450_v2 = vsel %vm7689_vm0, %v397_v50, 0.0 }
  0x39   : > { %v404_v27 = vmul.f32 %v296_v51, %v296_v51  ;;  %v462_v43 = vsel %vm7689_vm0, %v403_v32, 0.0 }
  0x3a   : > { %v348_v12 = vadd.f32 %v347_v60, %v346_v1  ;;  %v445_v54 = vadd.f32 %v444_v35, %v443_v47  ;;  %v399_v1 = vmul.f32 %v291_v9, %v291_v9  ;;  %v452_v13 = vsel %vm7689_vm0, %v398_v57, 0.0 }
  0x3b   : > { %v402_v9 = vmul.f32 %v294_v37, %v294_v37  ;;  %v464_v47 = vsel %vm7689_vm0, %v404_v27, 0.0 }
  0x3c   : > { %v350_v22 = vadd.f32 %v349_v3, %v348_v12  ;;  %v447_v61 = vadd.f32 %v446_v42, %v445_v54  ;;  %v298_v3 = vld [vmem:[%s4565_s10 + $0xf8] sm:$0xff]  ;;  %v400_v12 = vmul.f32 %v292_v21, %v292_v21 }
  0x3d   : > { %v367_v16 = vsel %vm7689_vm0, %v298_v3, 0.0  ;;  %v406_v37 = vmul.f32 %v298_v3, %v298_v3 }
  0x3e   : > { %v352_v31 = vadd.f32 %v351_v15, %v350_v22  ;;  %v449_v0 = vadd.f32 %v448_v59, %v447_v61  ;;  %v454_v22 = vsel %vm7689_vm0, %v399_v1, 0.0  ;;  %v456_v26 = vsel %vm7689_vm0, %v400_v12, 0.0 }
  0x3f   : > { %v468_v51 = vsel %vm7689_vm0, %v406_v37, 0.0 }
  0x40   : > { %v354_v38 = vadd.f32 %v353_v25, %v352_v31  ;;  %v451_v63 = vadd.f32 %v450_v2, %v449_v0 }
  0x42   : > { %v356_v45 = vadd.f32 %v355_v34, %v354_v38  ;;  %v453_v25 = vadd.f32 %v452_v13, %v451_v63  ;;  %v458_v34 = vsel %vm7689_vm0, %v401_v18, 0.0  ;;  %v460_v38 = vsel %vm7689_vm0, %v402_v9, 0.0 }
  0x44   : > { %v358_v53 = vadd.f32 %v357_v41, %v356_v45  ;;  %v455_v31 = vadd.f32 %v454_v22, %v453_v25  ;;  %v303_v22 = vld [vmem:[%s7681_s1] sm:$0x1] }
  0x46   : > { %v360_v60 = vadd.f32 %v359_v48, %v358_v53  ;;  %v457_v36 = vadd.f32 %v456_v26, %v455_v31  ;;  %v304_v26 = vld [vmem:[%s7682_s2] sm:$0x1] }
  0x48   : > { %v362_v56 = vadd.f32 %v361_v55, %v360_v60  ;;  %v459_v41 = vadd.f32 %v458_v34, %v457_v36 }
  0x4a   : > { %v364_v15 = vadd.f32 %v363_v62, %v362_v56  ;;  %v461_v45 = vadd.f32 %v460_v38, %v459_v41 }
  0x4c   : > { %v366_v24 = vadd.f32 %v365_v8, %v364_v15  ;;  %v463_v50 = vadd.f32 %v462_v43, %v461_v45 }
  0x4e   : > { %v368_v28 = vadd.f32 %v367_v16, %v366_v24  ;;  %v465_v53 = vadd.f32 %v464_v47, %v463_v50  ;;  %v7839_v47 = vmov 0 }
  0x4f   : > { %v7840_v47 = vsel %vm4795_vm7, 4294967295, %v7839_v47 }
  0x50   : > { %v369_v21 = vrot.slane %v368_v28, 4  ;;  %v467_v55 = vadd.f32 %v466_v44, %v465_v53  ;;  %7841 = vst [vmem:[#allocation3_spill] sm:$0xff] %v7840_v47  ;;  %v4500_v44 = vmov 0  }
  0x51   : > { %1283 = vst.msk [vmem:[#allocation2 + $0x8] sm:$0xf] %vm7690_vm6, %v4500_v44 }
  0x52   : > { %v370_v39 = vadd.f32 %v369_v21, %v368_v28  ;;  %v469_v57 = vadd.f32 %v468_v51, %v467_v55  ;;  %1285 = vst.msk [vmem:[#allocation2 + $0x14] sm:$0xf] %vm7690_vm6, %v4500_v44 }
  0x53   : > { %1281 = vst [vmem:[#allocation2] sm:$0xff] %v4500_v44 }
  0x54   : > { %v371_v35 = vrot.slane %v370_v39, 2  ;;  %v470_v59 = vrot.slane %v469_v57, 4  ;;  %1284 = vst [vmem:[#allocation2 + $0xc] sm:$0xff] %v4500_v44 }
  0x55   : > { %1287 = vst [vmem:[#allocation2 + $0x168] sm:$0xff] %v4500_v44 }
  0x56   : > { %v372_v48 = vadd.f32 %v371_v35, %v370_v39  ;;  %v471_v49 = vadd.f32 %v470_v59, %v469_v57  ;;  %1288 = vst.msk [vmem:[#allocation2 + $0x170] sm:$0xf] %vm7690_vm6, %v4500_v44 }
  0x57   : > { %1289 = vst [vmem:[#allocation2 + $0x174] sm:$0xff] %v4500_v44 }
  0x58   : > { %v373_v42 = vrot.slane %v372_v48, 1  ;;  %v472_v60 = vrot.slane %v471_v49, 2  ;;  %1290 = vst.msk [vmem:[#allocation2 + $0x17c] sm:$0xf] %vm7690_vm6, %v4500_v44 }
  0x5a   : > { %v374_v54 = vadd.f32 %v373_v42, %v372_v48  ;;  %v473_v61 = vadd.f32 %v472_v60, %v471_v49  ;;  %v1414_v48 = vld [vmem:[#allocation2 + $0x2c] sm:$0x8] }
  0x5c   : > { %3930 = vmatmul.msk.f32.vlgmr.msra.gmra.mxu0 %vm7689_vm0, %v374_v54  ;;  %v474_v62 = vrot.slane %v473_v61, 1  ;;  %v1309_v54 = vld [vmem:[#allocation2 + $0x20] sm:$0x1] }
  0x5d   : > { %v1310_v60 = vsel %vm4813_vm10, 0, %v1309_v54 }
  0x5e   : > { %v475_v1 = vadd.f32 %v474_v62, %v473_v61  ;;  %1311 = vst [vmem:[#allocation2 + $0x20] sm:$0x1] %v1310_v60 }
  0x60   : > { %3931 = vmatmul.msk.f32.vlgmr.msra.gmra.mxu1 %vm7689_vm0, %v475_v1 }
  0xd9   : > { %v496_v2 = vpop.f32.mrf.mxu0 }
  0xda   : > { %v522_v3 = vmul.f32 %v496_v2, %v496_v2 }
  0xdd   : > { %v519_v56 = vpop.f32.mrf.mxu1 }
  0xde   : > { %v523_v0 = vsub.f32 %v519_v56, %v522_v3 }
  0xe0   : > { %v524_v8 = vmax.f32 %v523_v0, 0.0 }
  0xe2   : > { %v525_v12 = vadd.f32 1e-06, %v524_v8 }
  0xe4   : > { %4345 = vrsqrt.f32 %v525_v12  ;;  %vm532_vm2 = vweird.f32 %v525_v12 }
  0xea   : > { %v4346_v13 = vpop.eup %4345 }
  0xeb   : > { %v527_v15 = vmul.f32 %v4346_v13, %v525_v12  ;;  %vm533_vm1 = vweird.f32 %v4346_v13 }
  0xec   : > { %vm534_vm3 = vmor %vm532_vm2, %vm533_vm1 }
  0xed   : > { %v528_v63 = vmul.f32 %v4346_v13, %v527_v15 }
  0xef   : > { %v529_v16 = vmul.f32 0.5, %v528_v63  ;;  %v1303_v63 = vld [vmem:[#allocation2 + $0x8] sm:$0x1] }
  0xf1   : > { %v530_v18 = vsub.f32 1.5, %v529_v16 }
  0xf3   : > { %v531_v24 = vmul.f32 %v4346_v13, %v530_v18 }
  0xf5   : > { %v535_v25 = vsel %vm534_vm3, %v4346_v13, %v531_v24 }
  0xf6   : > { %v536_v9 = vmul.f32 %v535_v25, %v303_v22 }
  0xf8   : > { %v537_v28 = vmul.f32 %v536_v9, %v496_v2  ;;  %v4756_v31 = vperm.slane %v536_v9, 0 }
  0xfa   : > { %v538_v32 = vsub.f32 %v304_v26, %v537_v28  ;;  %v546_v21 = vmul.f32 %v4756_v31, %v4586_v11  ;;  %v544_v36 = vmul.f32 %v4756_v31, %v4574_v6  ;;  %v542_v27 = vmul.f32 %v4756_v31, %v4568_v4 }
  0xfb   : > { %v547_v38 = vmul.f32 %v4756_v31, %v4591_v14  ;;  %v545_v30 = vmul.f32 %v4756_v31, %v4577_v7  ;;  %v543_v35 = vmul.f32 %v4756_v31, %v4571_v5  ;;  %v1415_v5 = vsel %vm4795_vm7, 0, %v1414_v48 }
  0xfc   : > { %v4758_v34 = vperm.slane %v538_v32, 0  ;;  %v550_v42 = vmul.f32 %v4756_v31, %v4606_v23  ;;  %1416 = vst [vmem:[#allocation2 + $0x2c] sm:$0x8] %v1415_v5  ;;  %v549_v55 = vmul.f32 %v4756_v31, %v4601_v20  ;;  %v7842_v23 = vmov 0 }
  0xfd   : > { %v7843_v23 = vsel %vm4813_vm10, 4294967295, %v7842_v23  ;;  %v548_v20 = vmul.f32 %v4756_v31, %v4596_v17  ;;  %v553_v16 = vmul.f32 %v4756_v31, %v4634_v40 }
  0xfe   : > { %v4769_v39 = vadd.f32 %v4758_v34, %v546_v21  ;;  %v4772_v41 = vadd.f32 %v4758_v34, %v544_v36  ;;  %v4777_v11 = vadd.f32 %v4758_v34, %v542_v27  ;;  %v4780_v6 = vadd.f32 %v4758_v34, %v547_v38  ;;  %7844 = vst [vmem:[#allocation4_spill] sm:$0xff] %v7843_v23  ;;  %v1408_v36 = vld [vmem:[#allocation2 + $0x14] sm:$0x8] }
  0xff   : > { %v4785_v14 = vadd.f32 %v4758_v34, %v545_v30  ;;  %v4791_v7 = vadd.f32 %v4758_v34, %v543_v35  ;;  %v4808_v51 = vadd.f32 %v4758_v34, %v550_v42  ;;  %v4822_v61 = vadd.f32 %v4758_v34, %v549_v55  ;;  %v4313_v35 = vld [vmem:[%s7684_s4 + $0x88] sm:$0xff] }
 0x100   : > { %v3936_v4 = vmul.f32 -1.442695, %v4769_v39  ;;  %v3934_v43 = vmul.f32 -1.442695, %v4772_v41  ;;  %v3932_v45 = vmul.f32 -1.442695, %v4777_v11  ;;  %v4832_v3 = vadd.f32 %v4758_v34, %v548_v20  ;;  %3709 = vmatpush.bf16.msrb.mxu0 %v4313_v35 }
 0x101   : > { %v3937_v37 = vmul.f32 -1.442695, %v4780_v6  ;;  %v3935_v50 = vmul.f32 -1.442695, %v4785_v14  ;;  %v3933_v53 = vmul.f32 -1.442695, %v4791_v7  ;;  %v4856_v9 = vadd.f32 %v4758_v34, %v553_v16 }
 0x102   : > { %4347 = vpow2.f32 %v3936_v4  ;;  %v3940_v2 = vmul.f32 -1.442695, %v4808_v51  ;;  %v4839_v8 = vmul.f32 -1.442695, %v4822_v61  ;;  %v4850_v22 = vmul.f32 -1.442695, %v4832_v3 }
 0x103   : > { %4349 = vpow2.f32 %v3934_v43  ;;  %v1304_v21 = vsel %vm4813_vm10, 0, %v1303_v63  ;;  %v1409_v42 = vsel %vm4795_vm7, 0, %v1408_v36 }
 0x104   : > { %4351 = vpow2.f32 %v3932_v45  ;;  %1305 = vst [vmem:[#allocation2 + $0x8] sm:$0x1] %v1304_v21 }
 0x105   : > { %4353 = vpow2.f32 %v3937_v37  ;;  %1410 = vst [vmem:[#allocation2 + $0x14] sm:$0x8] %v1409_v42 }
 0x106   : > { %4355 = vpow2.f32 %v3935_v50 }
 0x107   : > { %4357 = vpow2.f32 %v3933_v53  ;;  %v4312_v53 = vld [vmem:[%s7684_s4 + $0x80] sm:$0xff] }
 0x108   : > { %v4348_v57 = vpop.eup %4347  ;;  %3710 = vmatpush.bf16.msrb.mxu0 %v4312_v53 }
 0x109   : > { %v4350_v59 = vpop.eup %4349  ;;  %v4817_v49 = vadd.f32 1.0, %v4348_v57 }
 0x10a   : > { %v4352_v62 = vpop.eup %4351  ;;  %v4826_v1 = vadd.f32 1.0, %v4350_v59 }
 0x10b   : > { %4359 = vrcp.f32 %v4817_v49  ;;  %v4354_v56 = vpop.eup %4353  ;;  %v808_v17 = vand.u32 2147483648, %v4817_v49  ;;  %v4836_v0 = vadd.f32 1.0, %v4352_v62  ;;  %v806_v13 = vand.u32 2147483647, %v4817_v49 }
 0x10c   : > { %4361 = vrcp.f32 %v4826_v1  ;;  %v4356_v12 = vpop.eup %4355  ;;  %v4842_v15 = vadd.f32 1.0, %v4354_v56  ;;  %v776_v18 = vand.u32 2147483647, %v4826_v1  ;;  %vm802_vm11 = vweird.f32 %v4817_v49 }
 0x10d   : > { %4363 = vpow2.f32 %v3940_v2  ;;  %v4358_v24 = vpop.eup %4357  ;;  %v778_v25 = vand.u32 2147483648, %v4826_v1  ;;  %v809_v26 = vor.u32 1.1754944e-38, %v808_v17  ;;  %v748_v28 = vand.u32 2147483648, %v4836_v0 }
 0x10e   : > { %4365 = vrcp.f32 %v4836_v0  ;;  %v4859_v32 = vadd.f32 1.0, %v4356_v12  ;;  %vm4866_vm12 = vcmp.eq.f32.partialorder %v806_v13, 8.507059e+37  ;;  %vm772_vm13 = vweird.f32 %v4826_v1 }
 0x10f   : > { %4367 = vrcp.f32 %v4842_v15  ;;  %v746_v4 = vand.u32 2147483647, %v4836_v0  ;;  %v823_v43 = vand.u32 2147483648, %v4842_v15  ;;  %vm4878_vm14 = vcmp.eq.f32.partialorder %v776_v18, 8.507059e+37 }
 0x110   : > { %v821_v48 = vand.u32 2147483647, %v4842_v15  ;;  %4369 = vrcp.f32 %v4859_v32  ;;  %v779_v44 = vor.u32 1.1754944e-38, %v778_v25  ;;  %vm742_vm15 = vweird.f32 %v4836_v0 }
 0x111   : > { %v4360_v40 = vpop.eup %4359  ;;  %v749_v57 = vor.u32 1.1754944e-38, %v748_v28  ;;  %v4891_v59 = vadd.f32 1.0, %v4358_v24  ;;  %vm4894_vm3 = vcmp.eq.f32.partialorder %v746_v4, 8.507059e+37  ;;  %v824_v56 = vor.u32 1.1754944e-38, %v823_v43 }
 0x112   : > { %v4863_v27 = vpop.eup %4361  ;;  %v798_v38 = vmul.f32 %v4360_v40, %v4817_v49  ;;  %vm803_vm1 = vweird.f32 %v4360_v40  ;;  %v793_v17 = vand.u32 2147483648, %v4859_v32  ;;  %vm4902_vm9 = vcmp.eq.f32.partialorder %v821_v48, 8.507059e+37 }
 0x113   : > { %v768_v45 = vmul.f32 %v4863_v27, %v4826_v1  ;;  %v4364_v5 = vpop.eup %4363  ;;  %vm773_vm5 = vweird.f32 %v4863_v27  ;;  %v791_v16 = vand.u32 2147483647, %v4859_v32  ;;  %vm804_vm8 = vmor %vm802_vm11, %vm803_vm1  ;;  %4371 = vrcp.f32 %v4891_v59 }
 0x114   : > { %v799_v50 = vsub.f32 1.0, %v798_v38  ;;  %v4366_v54 = vpop.eup %4365  ;;  %v4907_v25 = vadd.f32 1.0, %v4364_v5  ;;  %vm774_vm2 = vmor %vm772_vm13, %vm773_vm5  ;;  %v794_v49 = vor.u32 1.1754944e-38, %v793_v17  ;;  %vm7692_vm11 = vsmask.f32 3328 }
 0x115   : > { %v769_v55 = vsub.f32 1.0, %v768_v45  ;;  %v4368_v60 = vpop.eup %4367  ;;  %v738_v62 = vmul.f32 %v4366_v54, %v4836_v0  ;;  %vm743_vm4 = vweird.f32 %v4366_v54  ;;  %vm1989_vm1 = vsmask.f32 7440 }
 0x116   : > { %v800_v20 = vmul.f32 %v4360_v40, %v799_v50  ;;  %v813_v13 = vmul.f32 %v4368_v60, %v4842_v15  ;;  %v4909_v28 = vpop.eup %4369  ;;  %vm818_vm0 = vweird.f32 %v4368_v60  ;;  %vm4926_vm6 = vcmp.eq.f32.partialorder %v791_v16, 8.507059e+37 }
 0x117   : > { %v770_v12 = vmul.f32 %v4863_v27, %v769_v55  ;;  %v739_v24 = vsub.f32 1.0, %v738_v62  ;;  %v783_v43 = vmul.f32 %v4909_v28, %v4859_v32  ;;  %v761_v1 = vand.u32 2147483647, %v4891_v59 }
 0x118   : > { %v801_v18 = vadd.f32 %v4360_v40, %v800_v20  ;;  %v814_v36 = vsub.f32 1.0, %v813_v13  ;;  %v763_v30 = vand.u32 2147483648, %v4891_v59  ;;  %4373 = vrcp.f32 %v4907_v25 }
 0x119   : > { %v771_v21 = vadd.f32 %v4863_v27, %v770_v12  ;;  %v740_v4 = vmul.f32 %v4366_v54, %v739_v24  ;;  %v784_v53 = vsub.f32 1.0, %v783_v43  ;;  %vm862_vm5 = vweird.f32 %v4907_v25 }
 0x11a   : > { %v805_v38 = vsel %vm804_vm8, %v4360_v40, %v801_v18  ;;  %v815_v48 = vmul.f32 %v4368_v60, %v814_v36  ;;  %vm744_vm8 = vmor %vm742_vm15, %vm743_vm4  ;;  %v4953_v62 = vor.u32 1.1754944e-38, %v763_v30  ;;  %vm7859_vm4 = vweird.f32 %v4859_v32 }
 0x11b   : > { %v810_v35 = vsel %vm4866_vm12, %v809_v26, %v805_v38  ;;  %v775_v45 = vsel %vm774_vm2, %v4863_v27, %v771_v21  ;;  %v741_v42 = vadd.f32 %v4366_v54, %v740_v4  ;;  %vm7856_vm12 = vweird.f32 %v4842_v15 }
 0x11c   : > { %v1221_v5 = vmul.f32 %v810_v35, %v4769_v39  ;;  %v780_v50 = vsel %vm4878_vm14, %v779_v44, %v775_v45  ;;  %v816_v27 = vadd.f32 %v4368_v60, %v815_v48  ;;  %vm819_vm13 = vmor %vm7856_vm12, %vm818_vm0  ;;  %v785_v39 = vmul.f32 %v4909_v28, %v784_v53 }
 0x11d   : > { %v1219_v26 = vmul.f32 %v780_v50, %v4772_v41  ;;  %v745_v20 = vsel %vm744_vm8, %v4366_v54, %v741_v42  ;;  %vm788_vm14 = vweird.f32 %v4909_v28  ;;  %v4947_v41 = vpop.eup %4371  ;;  %vm757_vm0 = vweird.f32 %v4891_v59 }
 0x11e   : > { %v4940_v55 = vpack.c.bf16 %v1221_v5, %v1221_v5  ;;  %v750_v37 = vsel %vm4894_vm3, %v749_v57, %v745_v20  ;;  %v820_v44 = vsel %vm819_vm13, %v4368_v60, %v816_v27  ;;  %v786_v13 = vadd.f32 %v4909_v28, %v785_v39  ;;  %vm789_vm15 = vmor %vm7859_vm4, %vm788_vm14  ;;  %v4985_v18 = vpop.eup %4373 }
 0x11f   : > { %v4949_v0 = vpack.c.bf16 %v1219_v26, %v1219_v26  ;;  %v1217_v17 = vmul.f32 %v750_v37, %v4777_v11  ;;  %v825_v12 = vsel %vm4902_vm9, %v824_v56, %v820_v44  ;;  %v753_v63 = vmul.f32 %v4947_v41, %v4891_v59  ;;  %vm5005_vm9 = vmor %vm7692_vm11, %vm1989_vm1 }
 0x120   : > { %7855 = vst [vmem:[#allocation5_spill] sm:$0xff] %v4940_v55  ;;  %1875 = vrot.lane.b32.xlu2 %v4940_v55, %s4501_s19  ;;  %v7699_v15 = vshrl.u32 %v4940_v55, 16  ;;  %v7696_v54 = vshll.u32 %v4940_v55, 16  ;;  %v1222_v2 = vmul.f32 %v825_v12, %v4780_v6  ;;  %vm4981_vm2 = vcmp.eq.f32.partialorder %v761_v1, 8.507059e+37  ;;  %v1420_v12 = vld [vmem:[#allocation2 + $0x44] sm:$0x8] }
 0x121   : > { %7857 = vst [vmem:[#allocation6_spill] sm:$0xff] %v4949_v0  ;;  %1871 = vrot.lane.b32.xlu1 %v4949_v0, %s4501_s19  ;;  %v7707_v57 = vshrl.u32 %v4949_v0, 16  ;;  %v7704_v60 = vshll.u32 %v4949_v0, 16  ;;  %v4973_v56 = vpack.c.bf16 %v1217_v17, %v1217_v17  ;;  %v790_v32 = vsel %vm789_vm15, %v4909_v28, %v786_v13  ;;  %v2970_v13 = vld [vmem:[#allocation2 + $0x2c] sm:$0xf] }
 0x122   : > { %v2009_v16 = vrot.slane %v7699_v15, 4  ;;  %v2010_v11 = vrot.slane %v7696_v54, 5  ;;  %v4991_v36 = vpack.c.bf16 %v1222_v2, %v1222_v2  ;;  %v795_v4 = vsel %vm4926_vm6, %v794_v49, %v790_v32  ;;  %v1432_v6 = vld [vmem:[#allocation2 + $0x74] sm:$0x8] }
 0x123   : > { %7858 = vst [vmem:[#allocation7_spill] sm:$0xff] %v4973_v56  ;;  %v2000_v24 = vrot.slane %v7707_v57, 4  ;;  %v2001_v21 = vrot.slane %v7704_v60, 5  ;;  %1867 = vrot.lane.b32.xlu0 %v4973_v56, %s4501_s19  ;;  %v754_v43 = vsub.f32 1.0, %v753_v63  ;;  %vm758_vm3 = vweird.f32 %v4947_v41 }
 0x124   : > { %7862 = vst [vmem:[#allocation8_spill] sm:$0xff] %v4991_v36  ;;  %v2011_v38 = vor.u32 %v2010_v11, %v2009_v16  ;;  %v7693_v45 = vshrl.u32 %v4991_v36, 16  ;;  %v7691_v48 = vshll.u32 %v4991_v36, 16  ;;  %v1220_v1 = vmul.f32 %v795_v4, %v4785_v14  ;;  %vm759_vm1 = vmor %vm757_vm0, %vm758_vm3 }
 0x125   : > { %v2002_v35 = vor.u32 %v2001_v21, %v2000_v24  ;;  %v755_v49 = vmul.f32 %v4947_v41, %v754_v43  ;;  %v858_v40 = vmul.f32 %v4985_v18, %v4907_v25  ;;  %vm863_vm6 = vweird.f32 %v4985_v18 }
 0x126   : > { %v2012_v28 = vrot.slane %v2011_v38, 4  ;;  %v2013_v42 = vrot.slane %v7691_v48, 5  ;;  %v2015_v14 = vrot.slane %v7693_v45, 4  ;;  %v5017_v53 = vpack.c.bf16 %v1220_v1, %v1220_v1  ;;  %vm864_vm0 = vmor %vm862_vm5, %vm863_vm6 }
 0x127   : > { %v2003_v50 = vrot.slane %v2002_v35, 4  ;;  %v756_v26 = vadd.f32 %v4947_v41, %v755_v49  ;;  %v859_v27 = vsub.f32 1.0, %v858_v40  ;;  %v866_v30 = vand.u32 2147483647, %v4907_v25 }
 0x128   : > { %1877 = vrot.lane.b32.xlu2 %v4991_v36, %s4501_s19  ;;  %v868_v20 = vand.u32 2147483648, %v4907_v25  ;;  %v2016_v39 = vor.u32 %v2015_v14, %v2013_v42  ;;  %v5026_v37 = vsel %vm5005_vm9, %v2012_v28, %v2013_v42  ;;  %v7695_v44 = vshrl.u32 %v5017_v53, 16  ;;  %v2966_v28 = vld [vmem:[#allocation2 + $0x14] sm:$0xf] }
 0x129   : > { %7865 = vst [vmem:[#allocation9_spill] sm:$0xff] %v5026_v37  ;;  %v7694_v17 = vshll.u32 %v5017_v53, 16  ;;  %1873 = vrot.lane.b32.xlu1 %v5017_v53, %s4501_s19  ;;  %vm7866_vm8 = vcmask 257024   ;;  %v760_v16 = vsel %vm759_vm1, %v4947_v41, %v756_v26  ;;  %v860_v11 = vmul.f32 %v4985_v18, %v859_v27 }
 0x12a   : > { %vm5038_vm12 = vmand %vm7866_vm8, %vm7692_vm11  ;;  %vm5046_vm14 = vcmp.eq.f32.partialorder %v866_v30, 8.507059e+37  ;;  %v869_v59 = vor.u32 1.1754944e-38, %v868_v20  ;;  %v5050_v24 = vrot.slane %v2016_v39, 4  ;;  %v2006_v32 = vrot.slane %v7695_v44, 4 }
 0x12b   : > { %vm7869_vm13 = vmmov %vm7866_vm8  ;;  %v2004_v21 = vrot.slane %v7694_v17, 5  ;;  %v765_v38 = vsel %vm4981_vm2, %v4953_v62, %v760_v16  ;;  %v861_v4 = vadd.f32 %v4985_v18, %v860_v11  ;;  %4375 = vpow2.f32 %v4839_v8 }
 0x12c   : > { %2969 = vst.msk [vmem:[#allocation2 + $0x20] sm:$0xf] %vm7869_vm13, %v5026_v37  ;;  %v1218_v41 = vmul.f32 %v765_v38, %v4791_v7  ;;  %v1421_v43 = vsel %vm4795_vm7, 0, %v1420_v12  ;;  %v2971_v35 = vsel %vm5038_vm12, %v5050_v24, %v2970_v13  ;;  %4377 = vpow2.f32 %v4850_v22  ;;  %vm7875_vm4 = vmmov %vm7866_vm8 }
 0x12d   : > { %7872 = vst [vmem:[#allocation10_spill] sm:$0xff] %v5050_v24  ;;  %v2007_v1 = vor.u32 %v2006_v32, %v2004_v21  ;;  %v5069_v49 = vsel %vm5005_vm9, %v2003_v50, %v2004_v21  ;;  %v865_v8 = vsel %vm864_vm0, %v4985_v18, %v861_v4  ;;  %v3943_v62 = vmul.f32 -1.442695, %v4856_v9 }
 0x12e   : > { %7873 = vst [vmem:[#allocation11_spill] sm:$0xff] %v5069_v49  ;;  %v5076_v7 = vpack.c.bf16 %v1218_v41, %v1218_v41  ;;  %v552_v40 = vmul.f32 %v4756_v31, %v4624_v33  ;;  %v870_v25 = vsel %vm5046_vm14, %v869_v59, %v865_v8  ;;  %v1433_v22 = vsel %vm4795_vm7, 0, %v1432_v6 }
 0x12f   : > { %1422 = vst [vmem:[#allocation2 + $0x44] sm:$0x8] %v1421_v43  ;;  %v5082_v50 = vrot.slane %v2007_v1, 4  ;;  %v551_v18 = vmul.f32 %v4756_v31, %v4617_v29  ;;  %v1225_v42 = vmul.f32 %v870_v25, %v4808_v51  ;;  %4379 = vpow2.f32 %v3943_v62 }
 0x130   : > { %2972 = vst [vmem:[#allocation2 + $0x2c] sm:$0xf] %v2971_v35  ;;  %1869 = vrot.lane.b32.xlu0 %v5076_v7, %s4501_s19  ;;  %v5096_v33 = vadd.f32 %v4758_v34, %v552_v40  ;;  %v556_v13 = vmul.f32 %v4756_v31, %v4658_v58  ;;  %v555_v11 = vmul.f32 %v4756_v31, %v4650_v52  ;;  %v1426_v52 = vld [vmem:[#allocation2 + $0x5c] sm:$0x8]  ;;  %vm7879_vm5 = vcmask 261120  }
 0x131   : > { %7874 = vst [vmem:[#allocation12_spill] sm:$0xff] %v5082_v50  ;;  %v2967_v14 = vsel %vm5038_vm12, %v5082_v50, %v2966_v28  ;;  %v5102_v26 = vadd.f32 %v4758_v34, %v551_v18  ;;  %v4376_v27 = vpop.eup %4375  ;;  %v5104_v29 = vpack.c.bf16 %v1225_v42, %v1225_v42  ;;  %v554_v63 = vmul.f32 %v4756_v31, %v4642_v46  ;;  %v1321_v42 = vld [vmem:[#allocation2 + $0x50] sm:$0x1] }
 0x132   : > { %2964 = vst.msk [vmem:[#allocation2 + $0x8] sm:$0xf] %vm7875_vm4, %v5069_v49  ;;  %v3942_v30 = vmul.f32 -1.442695, %v5096_v33  ;;  %v4378_v20 = vpop.eup %4377  ;;  %v5107_v51 = vadd.f32 1.0, %v4376_v27  ;;  %v5125_v38 = vadd.f32 %v4758_v34, %v556_v13  ;;  %v559_v58 = vmul.f32 %v4756_v31, %v4679_v19 }
 0x133   : > { %1434 = vst [vmem:[#allocation2 + $0x74] sm:$0x8] %v1433_v22  ;;  %1883 = vrot.lane.b32.xlu2 %v5104_v29, %s4501_s19  ;;  %v5111_v39 = vadd.f32 1.0, %v4378_v20  ;;  %v3941_v12 = vmul.f32 -1.442695, %v5102_v26  ;;  %v7713_v59 = vshrl.u32 %v5104_v29, 16  ;;  %v5133_v43 = vadd.f32 %v4758_v34, %v555_v11 }
 0x134   : > { %2968 = vst [vmem:[#allocation2 + $0x14] sm:$0xf] %v2967_v14  ;;  %4381 = vpow2.f32 %v3942_v30  ;;  %v7712_v21 = vshll.u32 %v5104_v29, 16  ;;  %v851_v41 = vand.u32 2147483647, %v5107_v51  ;;  %v853_v46 = vand.u32 2147483648, %v5107_v51 }
 0x135   : > { %7876 = vst [vmem:[#allocation13_spill] sm:$0xff] %v5104_v29  ;;  %4383 = vrcp.f32 %v5107_v51  ;;  %v4380_v16 = vpop.eup %4379  ;;  %v836_v35 = vand.u32 2147483647, %v5111_v39  ;;  %v1427_v28 = vsel %vm4795_vm7, 0, %v1426_v52  ;;  %v5140_v8 = vadd.f32 %v4758_v34, %v554_v63 }
 0x136   : > { %4385 = vrcp.f32 %v5111_v39  ;;  %v5130_v4 = vadd.f32 1.0, %v4380_v16  ;;  %vm847_vm15 = vweird.f32 %v5107_v51  ;;  %v838_v62 = vand.u32 2147483648, %v5111_v39  ;;  %1428 = vst [vmem:[#allocation2 + $0x5c] sm:$0x8] %v1427_v28 }
 0x137   : > { %4387 = vpow2.f32 %v3941_v12  ;;  %v5147_v25 = vrot.slane %v7713_v59, 4  ;;  %v5151_v22 = vrot.slane %v7712_v21, 5  ;;  %vm832_vm2 = vweird.f32 %v5111_v39  ;;  %v1468_v59 = vld [vmem:[#allocation2 + $0x104] sm:$0x8] }
 0x138   : > { %4389 = vrcp.f32 %v5130_v4  ;;  %vm5157_vm3 = vcmp.eq.f32.partialorder %v851_v41, 8.507059e+37  ;;  %v1322_v20 = vsel %vm4813_vm10, 0, %v1321_v42  ;;  %v3946_v12 = vmul.f32 -1.442695, %v5125_v38 }
 0x139   : > { %v3974_v32 = vld [vmem:[#allocation2 + $0x8] sm:$0xf]  ;;  %v854_v13 = vor.u32 1.1754944e-38, %v853_v46  ;;  %vm5166_vm6 = vcmp.eq.f32.partialorder %v836_v35, 8.507059e+37  ;;  %1323 = vst [vmem:[#allocation2 + $0x50] sm:$0x1] %v1322_v20  ;;  %v5171_v63 = vadd.f32 %v4758_v34, %v559_v58  ;;  %vm907_vm8 = vweird.f32 %v5130_v4 }
 0x13a   : > { %v4382_v19 = vpop.eup %4381  ;;  %v839_v52 = vor.u32 1.1754944e-38, %v838_v62  ;;  %v913_v46 = vand.u32 2147483648, %v5130_v4  ;;  %v5181_v58 = vmul.f32 %v4756_v31, %v4672_v10 }
 0x13b   : > { %v4250_v1 = vld [vmem:[#allocation2 + $0x10] sm:$0xf0]  ;;  %v4384_v40 = vpop.eup %4383  ;;  %v5154_v18 = vadd.f32 1.0, %v4382_v19 }
 0x13c   : > { %v3975_v6 = vor.u32 %v4250_v1, %v3974_v32  ;;  %v4386_v14 = vpop.eup %4385  ;;  %v843_v27 = vmul.f32 %v4384_v40, %v5107_v51  ;;  %v911_v1 = vand.u32 2147483647, %v5130_v4  ;;  %vm848_vm1 = vweird.f32 %v4384_v40 }
 0x13d   : > { %v828_v16 = vmul.f32 %v4386_v14, %v5111_v39  ;;  %v4388_v32 = vpop.eup %4387  ;;  %4391 = vrcp.f32 %v5154_v18  ;;  %vm833_vm13 = vweird.f32 %v4386_v14  ;;  %vm849_vm0 = vmor %vm847_vm15, %vm848_vm1  ;;  %vm892_vm4 = vweird.f32 %v5154_v18 }
 0x13e   : > { %4228 = vmatmul.msk.bf16.vlgmr.msrb.gmra.mxu0 %vm7879_vm5, %v3975_v6  ;;  %v844_v41 = vsub.f32 1.0, %v843_v27  ;;  %v5176_v19 = vadd.f32 1.0, %v4388_v32  ;;  %4393 = vpow2.f32 %v3946_v12  ;;  %v4390_v35 = vpop.eup %4389  ;;  %v896_v27 = vand.u32 2147483647, %v5154_v18  ;;  %vm834_vm5 = vmor %vm832_vm2, %vm833_vm13 }
 0x13f   : > { %v829_v28 = vsub.f32 1.0, %v828_v16  ;;  %v903_v42 = vmul.f32 %v4390_v35, %v5130_v4  ;;  %vm5185_vm14 = vcmp.eq.f32.partialorder %v911_v1, 8.507059e+37  ;;  %v898_v12 = vand.u32 2147483648, %v5154_v18 }
 0x140   : > { %v845_v6 = vmul.f32 %v4384_v40, %v844_v41  ;;  %4395 = vrcp.f32 %v5176_v19  ;;  %v914_v41 = vor.u32 1.1754944e-38, %v913_v46  ;;  %vm908_vm11 = vweird.f32 %v4390_v35 }
 0x141   : > { %v830_v62 = vmul.f32 %v4386_v14, %v829_v28  ;;  %v904_v32 = vsub.f32 1.0, %v903_v42  ;;  %v3945_v1 = vmul.f32 -1.442695, %v5133_v43  ;;  %vm5201_vm15 = vcmp.eq.f32.partialorder %v896_v27, 8.507059e+37  ;;  %vm909_vm2 = vmor %vm907_vm8, %vm908_vm11 }
 0x142   : > { %v846_v20 = vadd.f32 %v4384_v40, %v845_v6  ;;  %v3944_v6 = vmul.f32 -1.442695, %v5140_v8  ;;  %v881_v44 = vand.u32 2147483647, %v5176_v19  ;;  %v2029_v42 = vor.u32 %v5151_v22, %v5147_v25 }
 0x143   : > { %v831_v10 = vadd.f32 %v4386_v14, %v830_v62  ;;  %v4392_v28 = vpop.eup %4391  ;;  %v905_v62 = vmul.f32 %v4390_v35, %v904_v32  ;;  %4397 = vpow2.f32 %v3945_v1  ;;  %vm877_vm1 = vweird.f32 %v5176_v19 }
 0x144   : > { %v850_v48 = vsel %vm849_vm0, %v4384_v40, %v846_v20  ;;  %v4394_v45 = vpop.eup %4393  ;;  %v888_v46 = vmul.f32 %v4392_v28, %v5154_v18  ;;  %v899_v20 = vor.u32 1.1754944e-38, %v898_v12  ;;  %4399 = vpow2.f32 %v3944_v6 }
 0x145   : > { %v855_v51 = vsel %vm5157_vm3, %v854_v13, %v850_v48  ;;  %v835_v17 = vsel %vm834_vm5, %v4386_v14, %v831_v10  ;;  %v906_v30 = vadd.f32 %v4390_v35, %v905_v62  ;;  %v883_v14 = vand.u32 2147483648, %v5176_v19 }
 0x146   : > { %v1224_v39 = vmul.f32 %v855_v51, %v4822_v61  ;;  %v840_v40 = vsel %vm5166_vm6, %v839_v52, %v835_v17  ;;  %v889_v48 = vsub.f32 1.0, %v888_v46  ;;  %v5211_v13 = vpop.eup %4395  ;;  %vm893_vm3 = vweird.f32 %v4392_v28 }
 0x147   : > { %v1223_v54 = vmul.f32 %v840_v40, %v4832_v3  ;;  %v5218_v61 = vadd.f32 1.0, %v4394_v45  ;;  %v910_v11 = vsel %vm909_vm2, %v4390_v35, %v906_v30  ;;  %v873_v52 = vmul.f32 %v5211_v13, %v5176_v19  ;;  %vm894_vm11 = vmor %vm892_vm4, %vm893_vm3  ;;  %v2974_v30 = vld [vmem:[#allocation2 + $0x44] sm:$0xf] }
 0x148   : > { %v5213_v27 = vpack.c.bf16 %v1224_v39, %v1224_v39  ;;  %v890_v3 = vmul.f32 %v4392_v28, %v889_v48  ;;  %v915_v4 = vsel %vm5185_vm14, %v914_v41, %v910_v11  ;;  %vm878_vm6 = vweird.f32 %v5211_v13 }
 0x149   : > { %v5220_v17 = vpack.c.bf16 %v1223_v54, %v1223_v54  ;;  %v1228_v35 = vmul.f32 %v915_v4, %v4856_v9  ;;  %v874_v16 = vsub.f32 1.0, %v873_v52  ;;  %4401 = vrcp.f32 %v5218_v61  ;;  %v4398_v62 = vpop.eup %4397  ;;  %vm879_vm8 = vmor %vm877_vm1, %vm878_vm6 }
 0x14a   : > { %7886 = vst [vmem:[#allocation14_spill] sm:$0xff] %v5213_v27  ;;  %v7698_v12 = vshrl.u32 %v5213_v27, 16  ;;  %v7697_v10 = vshll.u32 %v5213_v27, 16  ;;  %1881 = vrot.lane.b32.xlu1 %v5213_v27, %s4501_s19  ;;  %v891_v32 = vadd.f32 %v4392_v28, %v890_v3  ;;  %v3949_v9 = vmul.f32 -1.442695, %v5171_v63  ;;  %v4400_v52 = vpop.eup %4399 }
 0x14b   : > { %7887 = vst [vmem:[#allocation15_spill] sm:$0xff] %v5220_v17  ;;  %v7706_v45 = vshrl.u32 %v5220_v17, 16  ;;  %v7701_v54 = vshll.u32 %v5220_v17, 16  ;;  %1879 = vrot.lane.b32.xlu0 %v5220_v17, %s4501_s19  ;;  %v5245_v41 = vpack.c.bf16 %v1228_v35, %v1228_v35  ;;  %v875_v40 = vmul.f32 %v5211_v13, %v874_v16 }
 0x14c   : > { %v5237_v1 = vrot.slane %v7697_v10, 5  ;;  %v2024_v51 = vrot.slane %v7698_v12, 4  ;;  %v895_v6 = vsel %vm894_vm11, %v4392_v28, %v891_v32  ;;  %v884_v16 = vor.u32 1.1754944e-38, %v883_v14 }
 0x14d   : > { %v2018_v39 = vrot.slane %v7706_v45, 4  ;;  %v900_v18 = vsel %vm5201_vm15, %v899_v20, %v895_v6  ;;  %v2019_v48 = vrot.slane %v7701_v54, 5  ;;  %v7705_v28 = vshrl.u32 %v5245_v41, 16  ;;  %1889 = vrot.lane.b32.xlu2 %v5245_v41, %s4501_s19 }
 0x14e   : > { %v2025_v46 = vor.u32 %v2024_v51, %v5237_v1  ;;  %v7700_v11 = vshll.u32 %v5245_v41, 16  ;;  %v1227_v3 = vmul.f32 %v900_v18, %v5096_v33  ;;  %v876_v4 = vadd.f32 %v5211_v13, %v875_v40  ;;  %v2982_v18 = vld [vmem:[#allocation2 + $0x74] sm:$0xf] }
 0x14f   : > { %v2042_v32 = vrot.slane %v7705_v28, 4  ;;  %v5280_v33 = vadd.f32 %v4758_v34, %v5181_v58  ;;  %v4402_v25 = vpop.eup %4401  ;;  %v2020_v6 = vor.u32 %v2019_v48, %v2018_v39  ;;  %vm882_vm13 = vcmp.eq.f32.partialorder %v881_v44, 8.507059e+37  ;;  %v4477_v28 = vld [vmem:[%s4565_s10 + $0x98] sm:$0xff] }
 0x150   : > { %v5264_v20 = vrot.slane %v2025_v46, 4  ;;  %v5270_v35 = vrot.slane %v7700_v11, 5  ;;  %v5274_v51 = vpack.c.bf16 %v1227_v3, %v1227_v3  ;;  %v880_v19 = vsel %vm879_vm8, %v5211_v13, %v876_v4  ;;  %v1438_v13 = vld [vmem:[#allocation2 + $0x8c] sm:$0x8] }
 0x151   : > { %4403 = vpow2.f32 %v3949_v9  ;;  %v885_v58 = vsel %vm882_vm13, %v884_v16, %v880_v19  ;;  %v948_v40 = vmul.f32 %v4402_v25, %v5218_v61  ;;  %v5290_v3 = vadd.f32 1.0, %v4398_v62  ;;  %v3986_v16 = vld [vmem:[#allocation2 + $0x20] sm:$0xf] }
 0x152   : > { %7888 = vst [vmem:[#allocation16_spill] sm:$0xff] %v5264_v20  ;;  %v2975_v22 = vsel %vm5038_vm12, %v5264_v20, %v2974_v30  ;;  %v2043_v46 = vor.u32 %v2042_v32, %v5270_v35  ;;  %1887 = vrot.lane.b32.xlu1 %v5274_v51, %s4501_s19  ;;  %v2030_v10 = vrot.slane %v2029_v42, 4  ;;  %v1226_v14 = vmul.f32 %v885_v58, %v5102_v26 }
 0x153   : > { %2976 = vst [vmem:[#allocation2 + $0x44] sm:$0xf] %v2975_v22  ;;  %v3948_v39 = vmul.f32 -1.442695, %v5280_v33  ;;  %v949_v48 = vsub.f32 1.0, %v948_v40  ;;  %v958_v44 = vand.u32 2147483648, %v5218_v61  ;;  %4405 = vrcp.f32 %v5290_v3 }
 0x154   : > { %v5292_v30 = vrot.slane %v2043_v46, 4  ;;  %v956_v4 = vand.u32 2147483647, %v5218_v61  ;;  %v5299_v9 = vrot.slane %v2020_v6, 4  ;;  %v7708_v42 = vshrl.u32 %v5274_v51, 16  ;;  %v4475_v40 = vld [vmem:[%s4565_s10 + $0x78] sm:$0xff] }
 0x155   : > { %v5305_v26 = vpack.c.bf16 %v1226_v14, %v1226_v14  ;;  %v950_v32 = vmul.f32 %v4402_v25, %v949_v48  ;;  %vm953_vm14 = vweird.f32 %v4402_v25  ;;  %v1439_v22 = vsel %vm4795_vm7, 0, %v1438_v13 }
 0x156   : > { %7889 = vst [vmem:[#allocation17_spill] sm:$0xff] %v5292_v30  ;;  %v2983_v62 = vsel %vm5038_vm12, %v5292_v30, %v2982_v18  ;;  %v5309_v19 = vadd.f32 1.0, %v4400_v52  ;;  %vm952_vm0 = vweird.f32 %v5218_v61  ;;  %v4253_v18 = vld [vmem:[#allocation2 + $0x28] sm:$0xf0]  ;;  %v557_v14 = vmul.f32 %v4475_v40, %v4756_v31 }
 0x157   : > { %7890 = vst [vmem:[#allocation18_spill] sm:$0xff] %v5305_v26  ;;  %v4404_v6 = vpop.eup %4403  ;;  %v7703_v46 = vshrl.u32 %v5305_v26, 16  ;;  %v7702_v58 = vshll.u32 %v5305_v26, 16  ;;  %1885 = vrot.lane.b32.xlu0 %v5305_v26, %s4501_s19  ;;  %v951_v48 = vadd.f32 %v4402_v25, %v950_v32  ;;  %vm957_vm4 = vcmp.eq.f32.partialorder %v956_v4, 8.507059e+37  ;;  %vm954_vm5 = vmor %vm952_vm0, %vm953_vm14 }
 0x158   : > { %2984 = vst [vmem:[#allocation2 + $0x74] sm:$0xf] %v2983_v62  ;;  %v959_v52 = vor.u32 1.1754944e-38, %v958_v44  ;;  %4407 = vrcp.f32 %v5309_v19  ;;  %v7711_v13 = vshll.u32 %v5274_v51, 16  ;;  %v5322_v62 = vrot.slane %v7708_v42, 4 }
 0x159   : > { %1440 = vst [vmem:[#allocation2 + $0x8c] sm:$0x8] %v1439_v22  ;;  %v2031_v12 = vrot.slane %v7702_v58, 5  ;;  %v2033_v61 = vrot.slane %v7703_v46, 4  ;;  %v4406_v22 = vpop.eup %4405  ;;  %v955_v32 = vsel %vm954_vm5, %v4402_v25, %v951_v48  ;;  %v941_v4 = vand.u32 2147483647, %v5290_v3 }
 0x15a   : > { %v3987_v44 = vor.u32 %v4253_v18, %v3986_v16  ;;  %v5330_v40 = vadd.f32 1.0, %v4404_v6  ;;  %v960_v54 = vsel %vm957_vm4, %v959_v52, %v955_v32  ;;  %v933_v58 = vmul.f32 %v4406_v22, %v5290_v3  ;;  %v2978_v46 = vld [vmem:[#allocation2 + $0x5c] sm:$0xf] }
 0x15b   : > { %v5334_v15 = vsel %vm5005_vm9, %v2030_v10, %v2031_v12  ;;  %v2034_v11 = vor.u32 %v2033_v61, %v2031_v12  ;;  %vm7892_vm15 = vcmask 257024   ;;  %v1231_v60 = vmul.f32 %v960_v54, %v5125_v38 }
 0x15c   : > { %7891 = vst [vmem:[#allocation19_spill] sm:$0xff] %v5334_v15  ;;  %vm937_vm2 = vweird.f32 %v5290_v3  ;;  %v943_v25 = vand.u32 2147483648, %v5290_v3  ;;  %vm7893_vm3 = vcmask 261120   ;;  %4409 = vrcp.f32 %v5330_v40 }
 0x15d   : > { %2977 = vst.msk [vmem:[#allocation2 + $0x50] sm:$0xf] %vm7892_vm15, %v5334_v15  ;;  %4229 = vmatmul.msk.bf16.gmra.mxu0 %vm7893_vm3, %v3987_v44  ;;  %v5344_v10 = vrot.slane %v2034_v11, 4  ;;  %v934_v12 = vsub.f32 1.0, %v933_v58  ;;  %v926_v16 = vand.u32 2147483647, %v5309_v19  ;;  %v5348_v48 = vpack.c.bf16 %v1231_v60, %v1231_v60 }
 0x15e   : > { %v928_v6 = vand.u32 2147483648, %v5309_v19  ;;  %v4408_v18 = vpop.eup %4407  ;;  %vm5350_vm11 = vcmp.eq.f32.partialorder %v941_v4, 8.507059e+37  ;;  %4411 = vpow2.f32 %v3948_v39  ;;  %v5355_v54 = vadd.f32 %v4758_v34, %v557_v14  ;;  %v4476_v14 = vld [vmem:[%s4565_s10 + $0xa0] sm:$0xff] }
 0x15f   : > { %7894 = vst [vmem:[#allocation20_spill] sm:$0xff] %v5344_v10  ;;  %v2979_v11 = vsel %vm5038_vm12, %v5344_v10, %v2978_v46  ;;  %v935_v58 = vmul.f32 %v4406_v22, %v934_v12  ;;  %vm938_vm6 = vweird.f32 %v4406_v22  ;;  %v918_v52 = vmul.f32 %v4408_v18, %v5309_v19  ;;  %1895 = vrot.lane.b32.xlu2 %v5348_v48, %s4501_s19 }
 0x160   : > { %2980 = vst [vmem:[#allocation2 + $0x5c] sm:$0xf] %v2979_v11  ;;  %v944_v60 = vor.u32 1.1754944e-38, %v943_v25  ;;  %vm922_vm1 = vweird.f32 %v5309_v19  ;;  %v3947_v39 = vmul.f32 -1.442695, %v5355_v54  ;;  %v562_v61 = vmul.f32 %v4476_v14, %v4756_v31  ;;  %vm939_vm13 = vmor %vm937_vm2, %vm938_vm6 }
 0x161   : > { %v936_v32 = vadd.f32 %v4406_v22, %v935_v58  ;;  %v919_v4 = vsub.f32 1.0, %v918_v52  ;;  %vm5367_vm8 = vcmp.eq.f32.partialorder %v926_v16, 8.507059e+37  ;;  %v929_v44 = vor.u32 1.1754944e-38, %v928_v6 }
 0x162   : > { %v4410_v12 = vpop.eup %4409  ;;  %v1001_v25 = vand.u32 2147483647, %v5330_v40  ;;  %4413 = vpow2.f32 %v3947_v39  ;;  %v5375_v11 = vadd.f32 %v4758_v34, %v562_v61  ;;  %v561_v14 = vmul.f32 %v4477_v28, %v4756_v31 }
 0x163   : > { %v940_v58 = vsel %vm939_vm13, %v4406_v22, %v936_v32  ;;  %v920_v52 = vmul.f32 %v4408_v18, %v919_v4  ;;  %vm923_vm14 = vweird.f32 %v4408_v18  ;;  %v993_v16 = vmul.f32 %v4410_v12, %v5330_v40  ;;  %v8144_v5 = vld [vmem:[#allocation19_spill] sm:$0xff] }
 0x164   : > { %v4412_v6 = vpop.eup %4411  ;;  %v945_v3 = vsel %vm5350_vm11, %v944_v60, %v940_v58  ;;  %v1003_v45 = vand.u32 2147483648, %v5330_v40  ;;  %v3952_v39 = vmul.f32 -1.442695, %v5375_v11  ;;  %v5385_v61 = vadd.f32 %v4758_v34, %v561_v14  ;;  %vm924_vm0 = vmor %vm922_vm1, %vm923_vm14  ;;  %v4478_v60 = vld [vmem:[%s4565_s10 + $0x90] sm:$0xff] }
 0x165   : > { %v1230_v57 = vmul.f32 %v945_v3, %v5133_v43  ;;  %v921_v28 = vadd.f32 %v4408_v18, %v920_v52  ;;  %v994_v22 = vsub.f32 1.0, %v993_v16  ;;  %v5388_v32 = vadd.f32 1.0, %v4412_v6 }
 0x166   : > { %vm998_vm4 = vweird.f32 %v4410_v12  ;;  %4415 = vpow2.f32 %v3952_v39  ;;  %v3951_v38 = vmul.f32 -1.442695, %v5385_v61  ;;  %v560_v4 = vmul.f32 %v4478_v60, %v4756_v31 }
 0x167   : > { %v5395_v58 = vpack.c.bf16 %v1230_v57, %v1230_v57  ;;  %v925_v14 = vsel %vm924_vm0, %v4408_v18, %v921_v28  ;;  %v995_v42 = vmul.f32 %v4410_v12, %v994_v22  ;;  %4417 = vrcp.f32 %v5388_v32 }
 0x168   : > { %v4414_v43 = vpop.eup %4413  ;;  %v5400_v52 = vrot.slane %v7711_v13, 5  ;;  %v930_v19 = vsel %vm5367_vm8, %v929_v44, %v925_v14  ;;  %vm997_vm5 = vweird.f32 %v5330_v40  ;;  %v5406_v16 = vadd.f32 %v4758_v34, %v560_v4  ;;  %v2986_v14 = vld [vmem:[#allocation2 + $0x8c] sm:$0xf] }
 0x169   : > { %v7710_v57 = vshrl.u32 %v5395_v58, 16  ;;  %v7709_v18 = vshll.u32 %v5395_v58, 16  ;;  %1893 = vrot.lane.b32.xlu1 %v5395_v58, %s4501_s19  ;;  %v1229_v6 = vmul.f32 %v930_v19, %v5140_v8  ;;  %v996_v3 = vadd.f32 %v4410_v12, %v995_v42  ;;  %vm999_vm15 = vmor %vm997_vm5, %vm998_vm4 }
 0x16a   : > { %vm1002_vm2 = vcmp.eq.f32.partialorder %v1001_v25, 8.507059e+37  ;;  %v1004_v46 = vor.u32 1.1754944e-38, %v1003_v45  ;;  %v5414_v44 = vadd.f32 1.0, %v4414_v43  ;;  %4419 = vpow2.f32 %v3951_v38 }
 0x16b   : > { %v5418_v40 = vrot.slane %v7709_v18, 5  ;;  %v2051_v39 = vrot.slane %v7710_v57, 4  ;;  %v5422_v28 = vpack.c.bf16 %v1229_v6, %v1229_v6  ;;  %v1000_v22 = vsel %vm999_vm15, %v4410_v12, %v996_v3  ;;  %v4479_v6 = vld [vmem:[%s4565_s10 + $0xb8] sm:$0xff] }
 0x16c   : > { %v4416_v8 = vpop.eup %4415  ;;  %v1005_v42 = vsel %vm1002_vm2, %v1004_v46, %v1000_v22  ;;  %4421 = vrcp.f32 %v5414_v44  ;;  %v3950_v45 = vmul.f32 -1.442695, %v5406_v16  ;;  %v5430_v38 = vsel %vm5005_vm9, %v5299_v9, %v5237_v1  ;;  %v4480_v1 = vld [vmem:[%s4565_s10 + $0xb0] sm:$0xff] }
 0x16d   : > { %v4418_v25 = vpop.eup %4417  ;;  %7899 = vst [vmem:[#allocation21_spill] sm:$0xff] %v5430_v38  ;;  %v2052_v4 = vor.u32 %v2051_v39, %v5418_v40  ;;  %1891 = vrot.lane.b32.xlu0 %v5422_v28, %s4501_s19  ;;  %v1234_v12 = vmul.f32 %v1005_v42, %v5171_v63  ;;  %v986_v19 = vand.u32 2147483647, %v5388_v32  ;;  %v565_v3 = vmul.f32 %v4479_v6, %v4756_v31 }
 0x16e   : > { %v978_v43 = vmul.f32 %v4418_v25, %v5388_v32  ;;  %v5444_v9 = vmul.f32 %v4480_v1, %v4756_v31  ;;  %v988_v22 = vand.u32 2147483648, %v5388_v32  ;;  %v971_v63 = vand.u32 2147483647, %v5414_v44 }
 0x16f   : > { %v5446_v46 = vrot.slane %v2052_v4, 4  ;;  %v5448_v39 = vpack.c.bf16 %v1234_v12, %v1234_v12  ;;  %v7716_v18 = vshrl.u32 %v5422_v28, 16  ;;  %v5453_v13 = vadd.f32 1.0, %v4416_v8 }
 0x170   : > { %v4420_v42 = vpop.eup %4419  ;;  %v979_v57 = vsub.f32 1.0, %v978_v43  ;;  %4423 = vpow2.f32 %v3950_v45  ;;  %v7719_v4 = vshll.u32 %v5422_v28, 16  ;;  %v5464_v1 = vadd.f32 %v4758_v34, %v565_v3  ;;  %v1315_v3 = vld [vmem:[#allocation2 + $0x38] sm:$0x1] }
 0x171   : > { %7900 = vst [vmem:[#allocation22_spill] sm:$0xff] %v5446_v46  ;;  %v2987_v6 = vsel %vm5038_vm12, %v5446_v46, %v2986_v14  ;;  %1901 = vrot.lane.b32.xlu2 %v5448_v39, %s4501_s19  ;;  %v5461_v12 = vadd.f32 1.0, %v4420_v42  ;;  %vm982_vm3 = vweird.f32 %v5388_v32  ;;  %vm983_vm11 = vweird.f32 %v4418_v25 }
 0x172   : > { %v4422_v21 = vpop.eup %4421  ;;  %2988 = vst [vmem:[#allocation2 + $0x8c] sm:$0xf] %v2987_v6  ;;  %v980_v43 = vmul.f32 %v4418_v25, %v979_v57  ;;  %4425 = vrcp.f32 %v5453_v13  ;;  %vm5468_vm6 = vcmp.eq.f32.partialorder %v986_v19, 8.507059e+37  ;;  %v989_v45 = vor.u32 1.1754944e-38, %v988_v22  ;;  %vm984_vm8 = vmor %vm982_vm3, %vm983_vm11 }
 0x173   : > { %v963_v14 = vmul.f32 %v4422_v21, %v5414_v44  ;;  %vm5473_vm1 = vcmp.eq.f32.partialorder %v971_v63, 8.507059e+37  ;;  %v5479_v57 = vrot.slane %v7716_v18, 4  ;;  %v973_v6 = vand.u32 2147483648, %v5414_v44 }
 0x174   : > { %v981_v32 = vadd.f32 %v4418_v25, %v980_v43  ;;  %4427 = vrcp.f32 %v5461_v12  ;;  %v5485_v19 = vrot.slane %v7719_v4, 5  ;;  %vm967_vm13 = vweird.f32 %v5414_v44 }
 0x175   : > { %v964_v22 = vsub.f32 1.0, %v963_v14  ;;  %v1046_v63 = vand.u32 2147483647, %v5453_v13  ;;  %vm968_vm14 = vweird.f32 %v4422_v21  ;;  %v1316_v43 = vsel %vm4813_vm10, 0, %v1315_v3 }
 0x176   : > { %v4424_v60 = vpop.eup %4423  ;;  %v985_v37 = vsel %vm984_vm8, %v4418_v25, %v981_v32  ;;  %v3955_v18 = vmul.f32 -1.442695, %v5464_v1  ;;  %v1048_v49 = vand.u32 2147483648, %v5453_v13  ;;  %1317 = vst [vmem:[#allocation2 + $0x38] sm:$0x1] %v1316_v43  ;;  %vm7905_vm0 = vcmask 257024   ;;  %vm969_vm4 = vmor %vm967_vm13, %vm968_vm14 }
 0x177   : > { %v990_v15 = vsel %vm5468_vm6, %v989_v45, %v985_v37  ;;  %v965_v4 = vmul.f32 %v4422_v21, %v964_v22  ;;  %v5495_v14 = vadd.f32 1.0, %v4424_v60  ;;  %v1031_v25 = vand.u32 2147483647, %v5461_v12  ;;  %2973 = vst.msk [vmem:[#allocation2 + $0x38] sm:$0xf] %vm7905_vm0, %v5430_v38 }
 0x178   : > { %v4426_v30 = vpop.eup %4425  ;;  %v1233_v46 = vmul.f32 %v990_v15, %v5280_v33  ;;  %4429 = vpow2.f32 %v3955_v18  ;;  %v1469_v3 = vsel %vm4795_vm7, 0, %v1468_v59  ;;  %v974_v37 = vor.u32 1.1754944e-38, %v973_v6 }
 0x179   : > { %v966_v8 = vadd.f32 %v4422_v21, %v965_v4  ;;  %v1038_v45 = vmul.f32 %v4426_v30, %v5453_v13  ;;  %4431 = vrcp.f32 %v5495_v14  ;;  %1470 = vst [vmem:[#allocation2 + $0x104] sm:$0x8] %v1469_v3  ;;  %vm1042_vm5 = vweird.f32 %v5453_v13  ;;  %v4256_v3 = vld [vmem:[#allocation2 + $0x40] sm:$0xf0] }
 0x17a   : > { %v4428_v60 = vpop.eup %4427  ;;  %v5505_v32 = vpack.c.bf16 %v1233_v46, %v1233_v46  ;;  %vm5511_vm15 = vcmp.eq.f32.partialorder %v1046_v63, 8.507059e+37  ;;  %v1033_v59 = vand.u32 2147483648, %v5461_v12  ;;  %vm1027_vm2 = vweird.f32 %v5461_v12 }
 0x17b   : > { %v970_v33 = vsel %vm969_vm4, %v4422_v21, %v966_v8  ;;  %v1039_v18 = vsub.f32 1.0, %v1038_v45  ;;  %v1023_v4 = vmul.f32 %v4428_v60, %v5461_v12  ;;  %v1049_v46 = vor.u32 1.1754944e-38, %v1048_v49 }
 0x17c   : > { %1899 = vrot.lane.b32.xlu1 %v5505_v32, %s4501_s19  ;;  %v975_v44 = vsel %vm5473_vm1, %v974_v37, %v970_v33  ;;  %vm5522_vm3 = vcmp.eq.f32.partialorder %v1031_v25, 8.507059e+37  ;;  %v5528_v22 = vadd.f32 %v4758_v34, %v5444_v9  ;;  %vm1043_vm11 = vweird.f32 %v4426_v30 }
 0x17d   : > { %v1232_v21 = vmul.f32 %v975_v44, %v5355_v54  ;;  %v1040_v63 = vmul.f32 %v4426_v30, %v1039_v18  ;;  %v1024_v43 = vsub.f32 1.0, %v1023_v4  ;;  %vm1028_vm6 = vweird.f32 %v4428_v60  ;;  %vm1044_vm1 = vmor %vm1042_vm5, %vm1043_vm11 }
 0x17e   : > { %v4430_v8 = vpop.eup %4429  ;;  %v1034_v45 = vor.u32 1.1754944e-38, %v1033_v59  ;;  %v1016_v42 = vand.u32 2147483647, %v5495_v14  ;;  %v3954_v49 = vmul.f32 -1.442695, %v5528_v22  ;;  %v1018_v59 = vand.u32 2147483648, %v5495_v14  ;;  %vm1029_vm8 = vmor %vm1027_vm2, %vm1028_vm6 }
 0x17f   : > { %v4432_v25 = vpop.eup %4431  ;;  %v5533_v37 = vpack.c.bf16 %v1232_v21, %v1232_v21  ;;  %v1041_v33 = vadd.f32 %v4426_v30, %v1040_v63  ;;  %v1025_v9 = vmul.f32 %v4428_v60, %v1024_v43  ;;  %v3998_v38 = vld [vmem:[#allocation2 + $0x38] sm:$0xf]  ;;  %v5535_v10 = vadd.f32 1.0, %v4430_v8  ;;  %v4481_v21 = vld [vmem:[%s4565_s10 + $0xa8] sm:$0xff] }
 0x180   : > { %v1008_v54 = vmul.f32 %v4432_v25, %v5495_v14  ;;  %v3999_v18 = vor.u32 %v4256_v3, %v3998_v38  ;;  %4433 = vpow2.f32 %v3954_v49  ;;  %v563_v63 = vmul.f32 %v4481_v21, %v4756_v31  ;;  %v4482_v38 = vld [vmem:[%s4565_s10 + $0xd0] sm:$0xff]  ;;  %v3006_v24 = vld [vmem:[#allocation2 + $0x104] sm:$0xf] }
 0x181   : > { %1897 = vrot.lane.b32.xlu0 %v5533_v37, %s4501_s19  ;;  %v1045_v4 = vsel %vm1044_vm1, %v4426_v30, %v1041_v33  ;;  %v1026_v44 = vadd.f32 %v4428_v60, %v1025_v9  ;;  %4435 = vrcp.f32 %v5535_v10  ;;  %vm1012_vm13 = vweird.f32 %v5495_v14 }
 0x182   : > { %v1050_v13 = vsel %vm5511_vm15, %v1049_v46, %v1045_v4  ;;  %v1009_v43 = vsub.f32 1.0, %v1008_v54  ;;  %vm7910_vm14 = vcmask 261120   ;;  %v568_v30 = vmul.f32 %v4482_v38, %v4756_v31  ;;  %v1462_v54 = vld [vmem:[#allocation2 + $0xec] sm:$0x8] }
 0x183   : > { %4230 = vmatmul.msk.bf16.gmra.mxu0 %vm7910_vm14, %v3999_v18  ;;  %v1237_v3 = vmul.f32 %v1050_v13, %v5375_v11  ;;  %v1030_v8 = vsel %vm1029_vm8, %v4428_v60, %v1026_v44  ;;  %vm5556_vm0 = vcmp.eq.f32.partialorder %v1016_v42, 8.507059e+37  ;;  %v5561_v15 = vadd.f32 %v4758_v34, %v563_v63 }
 0x184   : > { %v1035_v12 = vsel %vm5522_vm3, %v1034_v45, %v1030_v8  ;;  %v1010_v46 = vmul.f32 %v4432_v25, %v1009_v43  ;;  %vm1013_vm4 = vweird.f32 %v4432_v25  ;;  %v5566_v33 = vadd.f32 %v4758_v34, %v568_v30  ;;  %v4483_v45 = vld [vmem:[%s4565_s10 + $0xc8] sm:$0xff] }
 0x185   : > { %v5568_v9 = vpack.c.bf16 %v1237_v3, %v1237_v3  ;;  %v1236_v11 = vmul.f32 %v1035_v12, %v5385_v61  ;;  %v1019_v60 = vor.u32 1.1754944e-38, %v1018_v59  ;;  %v3953_v42 = vmul.f32 -1.442695, %v5561_v15  ;;  %vm1014_vm5 = vmor %vm1012_vm13, %vm1013_vm4  ;;  %v1357_v3 = vld [vmem:[#allocation2 + $0xe0] sm:$0x1] }
 0x186   : > { %v4434_v18 = vpop.eup %4433  ;;  %v1011_v4 = vadd.f32 %v4432_v25, %v1010_v46  ;;  %v1463_v44 = vsel %vm4795_vm7, 0, %v1462_v54  ;;  %v3958_v6 = vmul.f32 -1.442695, %v5566_v33  ;;  %v567_v21 = vmul.f32 %v4483_v45, %v4756_v31 }
 0x187   : > { %v4436_v63 = vpop.eup %4435  ;;  %v7733_v13 = vshrl.u32 %v5568_v9, 16  ;;  %v7730_v61 = vshll.u32 %v5568_v9, 16  ;;  %1907 = vrot.lane.b32.xlu2 %v5568_v9, %s4501_s19  ;;  %v5581_v59 = vpack.c.bf16 %v1236_v11, %v1236_v11  ;;  %v5586_v43 = vadd.f32 1.0, %v4434_v18  ;;  %1464 = vst [vmem:[#allocation2 + $0xec] sm:$0x8] %v1463_v44 }
 0x188   : > { %v1015_v38 = vsel %vm1014_vm5, %v4432_v25, %v1011_v4  ;;  %v1083_v30 = vmul.f32 %v4436_v63, %v5535_v10  ;;  %4437 = vpow2.f32 %v3953_v42  ;;  %v5590_v8 = vadd.f32 %v4758_v34, %v567_v21  ;;  %v4484_v25 = vld [vmem:[%s4565_s10 + $0xc0] sm:$0xff] }
 0x189   : > { %v2047_v12 = vor.u32 %v5485_v19, %v5479_v57  ;;  %1905 = vrot.lane.b32.xlu1 %v5581_v59, %s4501_s19  ;;  %v1020_v14 = vsel %vm5556_vm0, %v1019_v60, %v1015_v38  ;;  %v1091_v46 = vand.u32 2147483647, %v5535_v10  ;;  %v566_v11 = vmul.f32 %v4484_v25, %v4756_v31 }
 0x18a   : > { %v1235_v42 = vmul.f32 %v1020_v14, %v5406_v16  ;;  %v1084_v54 = vsub.f32 1.0, %v1083_v30  ;;  %v1093_v18 = vand.u32 2147483648, %v5535_v10  ;;  %4439 = vrcp.f32 %v5586_v43 }
 0x18b   : > { %v2081_v57 = vrot.slane %v7733_v13, 4  ;;  %v2082_v19 = vrot.slane %v7730_v61, 5  ;;  %vm1088_vm15 = vweird.f32 %v4436_v63  ;;  %v1358_v49 = vsel %vm4813_vm10, 0, %v1357_v3 }
 0x18c   : > { %v5610_v60 = vpack.c.bf16 %v1235_v42, %v1235_v42  ;;  %v1085_v4 = vmul.f32 %v4436_v63, %v1084_v54  ;;  %1359 = vst [vmem:[#allocation2 + $0xe0] sm:$0x1] %v1358_v49  ;;  %4441 = vpow2.f32 %v3958_v6  ;;  %v3957_v16 = vmul.f32 -1.442695, %v5590_v8  ;;  %v1474_v6 = vld [vmem:[#allocation2 + $0x11c] sm:$0x8] }
 0x18d   : > { %v7913_v44 = vor.u32 %v5400_v52, %v5322_v62  ;;  %v5617_v21 = vadd.f32 %v4758_v34, %v566_v11  ;;  %v2048_v30 = vrot.slane %v2047_v12, 4  ;;  %vm1087_vm2 = vweird.f32 %v5535_v10  ;;  %v4485_v54 = vld [vmem:[%s4565_s10 + $0xe8] sm:$0xff] }
 0x18e   : > { %v4438_v38 = vpop.eup %4437  ;;  %1903 = vrot.lane.b32.xlu0 %v5610_v60, %s4501_s19  ;;  %v1086_v3 = vadd.f32 %v4436_v63, %v1085_v4  ;;  %4443 = vpow2.f32 %v3957_v16  ;;  %vm1089_vm3 = vmor %vm1087_vm2, %vm1088_vm15  ;;  %v1094_v14 = vor.u32 1.1754944e-38, %v1093_v18  ;;  %v1475_v62 = vsel %vm4795_vm7, 0, %v1474_v6 }
 0x18f   : > { %v2039_v45 = vrot.slane %v7913_v44, 4  ;;  %v5623_v25 = vadd.f32 1.0, %v4438_v38  ;;  %v3956_v52 = vmul.f32 -1.442695, %v5617_v21  ;;  %v2083_v11 = vor.u32 %v2082_v19, %v2081_v57  ;;  %1476 = vst [vmem:[#allocation2 + $0x11c] sm:$0x8] %v1475_v62 }
 0x190   : > { %v4440_v12 = vpop.eup %4439  ;;  %v1090_v42 = vsel %vm1089_vm3, %v4436_v63, %v1086_v3  ;;  %vm1092_vm11 = vcmp.eq.f32.partialorder %v1091_v46, 8.507059e+37  ;;  %v571_v10 = vmul.f32 %v4485_v54, %v4756_v31  ;;  %v1076_v63 = vand.u32 2147483647, %v5586_v43 }
 0x191   : > { %v1095_v49 = vsel %vm1092_vm11, %v1094_v14, %v1090_v42  ;;  %v1068_v4 = vmul.f32 %v4440_v12, %v5586_v43  ;;  %4445 = vrcp.f32 %v5623_v25  ;;  %v5635_v16 = vsel %vm5005_vm9, %v2039_v45, %v5270_v35  ;;  %v4486_v14 = vld [vmem:[%s4565_s10 + $0xe0] sm:$0xff] }
 0x192   : > { %v4442_v18 = vpop.eup %4441  ;;  %7914 = vst [vmem:[#allocation23_spill] sm:$0xff] %v5635_v16  ;;  %v1240_v57 = vmul.f32 %v1095_v49, %v5464_v1  ;;  %v5640_v46 = vadd.f32 %v4758_v34, %v571_v10  ;;  %v1078_v44 = vand.u32 2147483648, %v5586_v43  ;;  %4447 = vpow2.f32 %v3956_v52 }
 0x193   : > { %v1069_v19 = vsub.f32 1.0, %v1068_v4  ;;  %v5643_v38 = vadd.f32 1.0, %v4442_v18  ;;  %v5648_v35 = vsel %vm5005_vm9, %v2048_v30, %v5418_v40  ;;  %v5650_v45 = vrot.slane %v2083_v11, 4  ;;  %v4487_v4 = vld [vmem:[%s4565_s10 + $0xd8] sm:$0xff] }
 0x194   : > { %v4444_v3 = vpop.eup %4443  ;;  %7915 = vst [vmem:[#allocation24_spill] sm:$0xff] %v5648_v35  ;;  %v5652_v1 = vpack.c.bf16 %v1240_v57, %v1240_v57  ;;  %vm1072_vm6 = vweird.f32 %v5586_v43  ;;  %vm1073_vm1 = vweird.f32 %v4440_v12  ;;  %v570_v62 = vmul.f32 %v4486_v14, %v4756_v31 }
 0x195   : > { %v1070_v6 = vmul.f32 %v4440_v12, %v1069_v19  ;;  %4449 = vrcp.f32 %v5643_v38  ;;  %v5662_v40 = vadd.f32 1.0, %v4444_v3  ;;  %v3961_v30 = vmul.f32 -1.442695, %v5640_v46  ;;  %vm1074_vm13 = vmor %vm1072_vm6, %vm1073_vm1  ;;  %v1369_v3 = vld [vmem:[#allocation2 + $0x110] sm:$0x1] }
 0x196   : > { %7916 = vst [vmem:[#allocation25_spill] sm:$0xff] %v5652_v1  ;;  %v7732_v52 = vshrl.u32 %v5652_v1, 16  ;;  %v7731_v42 = vshll.u32 %v5652_v1, 16  ;;  %1913 = vrot.lane.b32.xlu2 %v5652_v1, %s4501_s19  ;;  %vm5665_vm8 = vcmp.eq.f32.partialorder %v1076_v63, 8.507059e+37  ;;  %v1079_v49 = vor.u32 1.1754944e-38, %v1078_v44 }
 0x197   : > { %v4446_v11 = vpop.eup %4445  ;;  %v1071_v54 = vadd.f32 %v4440_v12, %v1070_v6  ;;  %v569_v18 = vmul.f32 %v4487_v4, %v4756_v31  ;;  %v5682_v6 = vadd.f32 %v4758_v34, %v570_v62  ;;  %v1061_v4 = vand.u32 2147483647, %v5623_v25 }
 0x198   : > { %v5673_v57 = vrot.slane %v7731_v42, 5  ;;  %v2096_v19 = vrot.slane %v7732_v52, 4  ;;  %v1053_v63 = vmul.f32 %v4446_v11, %v5623_v25  ;;  %v4448_v44 = vpop.eup %4447  ;;  %v1063_v61 = vand.u32 2147483648, %v5623_v25 }
 0x199   : > { %v1075_v14 = vsel %vm1074_vm13, %v4440_v12, %v1071_v54  ;;  %4451 = vrcp.f32 %v5662_v40  ;;  %vm1057_vm14 = vweird.f32 %v5623_v25  ;;  %v5692_v12 = vadd.f32 1.0, %v4448_v44 }
 0x19a   : > { %7919 = vst [vmem:[#allocation26_spill] sm:$0xff] %v5673_v57  ;;  %v2097_v42 = vor.u32 %v2096_v19, %v5673_v57  ;;  %v1080_v43 = vsel %vm5665_vm8, %v1079_v49, %v1075_v14  ;;  %v1054_v52 = vsub.f32 1.0, %v1053_v63  ;;  %4453 = vpow2.f32 %v3961_v30  ;;  %v4010_v49 = vld [vmem:[#allocation2 + $0x50] sm:$0xf]  ;;  %v4259_v63 = vld [vmem:[#allocation2 + $0x58] sm:$0xf0] }
 0x19b   : > { %v4450_v13 = vpop.eup %4449  ;;  %v1239_v62 = vmul.f32 %v1080_v43, %v5528_v22  ;;  %v1370_v54 = vsel %vm4813_vm10, 0, %v1369_v3  ;;  %vm1058_vm0 = vweird.f32 %v4446_v11  ;;  %vm5701_vm4 = vcmp.eq.f32.partialorder %v1061_v4, 8.507059e+37 }
 0x19c   : > { %v5696_v20 = vrot.slane %v2097_v42, 4  ;;  %v1055_v50 = vmul.f32 %v4446_v11, %v1054_v52  ;;  %v1128_v10 = vmul.f32 %v4450_v13, %v5643_v38  ;;  %1371 = vst [vmem:[#allocation2 + $0x110] sm:$0x1] %v1370_v54  ;;  %v1136_v22 = vand.u32 2147483647, %v5643_v38  ;;  %vm1059_vm5 = vmor %vm1057_vm14, %vm1058_vm0 }
 0x19d   : > { %v5699_v30 = vpack.c.bf16 %v1239_v62, %v1239_v62  ;;  %4455 = vrcp.f32 %v5692_v12  ;;  %v1064_v3 = vor.u32 1.1754944e-38, %v1063_v61  ;;  %vm1132_vm15 = vweird.f32 %v5643_v38 }
 0x19e   : > { %7920 = vst [vmem:[#allocation27_spill] sm:$0xff] %v5696_v20  ;;  %v3007_v52 = vsel %vm5038_vm12, %v5696_v20, %v3006_v24  ;;  %v1056_v42 = vadd.f32 %v4446_v11, %v1055_v50  ;;  %v1129_v44 = vsub.f32 1.0, %v1128_v10  ;;  %v1138_v4 = vand.u32 2147483648, %v5643_v38 }
 0x19f   : > { %v4452_v14 = vpop.eup %4451  ;;  %3008 = vst [vmem:[#allocation2 + $0x104] sm:$0xf] %v3007_v52  ;;  %1911 = vrot.lane.b32.xlu1 %v5699_v30, %s4501_s19  ;;  %v4011_v43 = vor.u32 %v4259_v63, %v4010_v49  ;;  %v3960_v62 = vmul.f32 -1.442695, %v5682_v6  ;;  %vm1133_vm2 = vweird.f32 %v4450_v13  ;;  %vm5721_vm3 = vcmp.eq.f32.partialorder %v1136_v22, 8.507059e+37 }
 0x1a0   : > { %v4454_v24 = vpop.eup %4453  ;;  %v1060_v50 = vsel %vm1059_vm5, %v4446_v11, %v1056_v42  ;;  %v1130_v61 = vmul.f32 %v4450_v13, %v1129_v44  ;;  %v1113_v54 = vmul.f32 %v4452_v14, %v5662_v40  ;;  %v1121_v25 = vand.u32 2147483647, %v5662_v40  ;;  %vm1134_vm6 = vmor %vm1132_vm15, %vm1133_vm2 }
 0x1a1   : > { %v1065_v10 = vsel %vm5701_vm4, %v1064_v3, %v1060_v50  ;;  %v1123_v20 = vand.u32 2147483648, %v5662_v40  ;;  %vm7925_vm11 = vcmask 261120   ;;  %v5730_v42 = vadd.f32 %v4758_v34, %v569_v18 }
 0x1a2   : > { %4231 = vmatmul.msk.bf16.gmra.mxu0 %vm7925_vm11, %v4011_v43  ;;  %v1238_v49 = vmul.f32 %v1065_v10, %v5561_v15  ;;  %v1131_v11 = vadd.f32 %v4450_v13, %v1130_v61  ;;  %v1114_v63 = vsub.f32 1.0, %v1113_v54  ;;  %v1139_v19 = vor.u32 1.1754944e-38, %v1138_v4 }
 0x1a3   : > { %v4456_v44 = vpop.eup %4455  ;;  %vm1118_vm1 = vweird.f32 %v4452_v14  ;;  %v5734_v22 = vadd.f32 1.0, %v4454_v24  ;;  %4457 = vpow2.f32 %v3960_v62  ;;  %vm1117_vm8 = vweird.f32 %v5662_v40 }
 0x1a4   : > { %v5736_v3 = vpack.c.bf16 %v1238_v49, %v1238_v49  ;;  %v1135_v50 = vsel %vm1134_vm6, %v4450_v13, %v1131_v11  ;;  %v1115_v43 = vmul.f32 %v4452_v14, %v1114_v63  ;;  %v1098_v15 = vmul.f32 %v4456_v44, %v5692_v12  ;;  %vm1119_vm14 = vmor %vm1117_vm8, %vm1118_vm1 }
 0x1a5   : > { %v1140_v61 = vsel %vm5721_vm3, %v1139_v19, %v1135_v50  ;;  %vm5742_vm13 = vcmp.eq.f32.partialorder %v1121_v25, 8.507059e+37  ;;  %v1124_v38 = vor.u32 1.1754944e-38, %v1123_v20  ;;  %v1108_v40 = vand.u32 2147483648, %v5692_v12 }
 0x1a6   : > { %7926 = vst [vmem:[#allocation28_spill] sm:$0xff] %v5736_v3  ;;  %v7745_v4 = vshrl.u32 %v5736_v3, 16  ;;  %v7744_v62 = vshll.u32 %v5736_v3, 16  ;;  %1909 = vrot.lane.b32.xlu0 %v5736_v3, %s4501_s19  ;;  %v1243_v13 = vmul.f32 %v1140_v61, %v5566_v33  ;;  %v1116_v24 = vadd.f32 %v4452_v14, %v1115_v43  ;;  %v3002_v61 = vld [vmem:[#allocation2 + $0xec] sm:$0xf] }
 0x1a7   : > { %v1099_v54 = vsub.f32 1.0, %v1098_v15  ;;  %4459 = vrcp.f32 %v5734_v22  ;;  %v3959_v10 = vmul.f32 -1.442695, %v5730_v42  ;;  %vm1103_vm0 = vweird.f32 %v4456_v44 }
 0x1a8   : > { %v2085_v20 = vrot.slane %v7744_v62, 5  ;;  %v2087_v52 = vrot.slane %v7745_v4, 4  ;;  %v5759_v25 = vpack.c.bf16 %v1243_v13, %v1243_v13  ;;  %v1120_v49 = vsel %vm1119_vm14, %v4452_v14, %v1116_v24 }
 0x1a9   : > { %v4458_v33 = vpop.eup %4457  ;;  %v1125_v11 = vsel %vm5742_vm13, %v1124_v38, %v1120_v49  ;;  %v1100_v63 = vmul.f32 %v4456_v44, %v1099_v54  ;;  %v1106_v19 = vand.u32 2147483647, %v5692_v12  ;;  %vm7931_vm4 = vcmask 257024  }
 0x1aa   : > { %7929 = vst [vmem:[#allocation29_spill] sm:$0xff] %v5759_v25  ;;  %v5767_v50 = vsel %vm5005_vm9, %v5650_v45, %v2085_v20  ;;  %v2088_v43 = vor.u32 %v2087_v52, %v2085_v20  ;;  %1919 = vrot.lane.b32.xlu2 %v5759_v25, %s4501_s19  ;;  %v1242_v15 = vmul.f32 %v1125_v11, %v5590_v8  ;;  %v5772_v14 = vadd.f32 1.0, %v4458_v33 }
 0x1ab   : > { %7930 = vst [vmem:[#allocation30_spill] sm:$0xff] %v5767_v50  ;;  %v1101_v18 = vadd.f32 %v4456_v44, %v1100_v63  ;;  %vm1102_vm5 = vweird.f32 %v5692_v12  ;;  %v1109_v38 = vor.u32 1.1754944e-38, %v1108_v40  ;;  %4461 = vpow2.f32 %v3959_v10 }
 0x1ac   : > { %3001 = vst.msk [vmem:[#allocation2 + $0xe0] sm:$0xf] %vm7931_vm4, %v5767_v50  ;;  %v5777_v13 = vrot.slane %v2088_v43, 4  ;;  %v5779_v45 = vpack.c.bf16 %v1242_v15, %v1242_v15  ;;  %vm1104_vm15 = vmor %vm1102_vm5, %vm1103_vm0  ;;  %v1181_v24 = vand.u32 2147483647, %v5734_v22  ;;  %4463 = vrcp.f32 %v5772_v14 }
 0x1ad   : > { %v5784_v8 = vpop.eup %4459  ;;  %v1105_v20 = vsel %vm1104_vm15, %v4456_v44, %v1101_v18  ;;  %vm1107_vm2 = vcmp.eq.f32.partialorder %v1106_v19, 8.507059e+37  ;;  %vm1291_vm3 = vcmask 1040384   ;;  %vm1177_vm11 = vweird.f32 %v5734_v22  ;;  %v3010_v43 = vld [vmem:[#allocation2 + $0x11c] sm:$0xf]  ;;  %v1348_v19 = vld [vmem:[#allocation2 + $0xc0] sm:$0x11] }
 0x1ae   : > { %7932 = vst [vmem:[#allocation31_spill] sm:$0xff] %v5777_v13  ;;  %v3003_v12 = vsel %vm5038_vm12, %v5777_v13, %v3002_v61  ;;  %v7743_v40 = vshrl.u32 %v5779_v45, 16  ;;  %v7742_v10 = vshll.u32 %v5779_v45, 16  ;;  %1917 = vrot.lane.b32.xlu1 %v5779_v45, %s4501_s19  ;;  %v1110_v52 = vsel %vm1107_vm2, %v1109_v38, %v1105_v20  ;;  %v1327_v38 = vld [vmem:[#allocation2 + $0x68] sm:$0x1] }
 0x1af   : > { %7933 = vst [vmem:[#allocation32_spill] sm:$0xff] %v5779_v45  ;;  %v1241_v49 = vmul.f32 %v1110_v52, %v5617_v21  ;;  %v1173_v44 = vmul.f32 %v5784_v8, %v5734_v22  ;;  %v1183_v33 = vand.u32 2147483648, %v5734_v22  ;;  %vm5805_vm6 = vcmp.eq.f32.partialorder %v1181_v24, 8.507059e+37  ;;  %v4262_v45 = vld [vmem:[#allocation2 + $0x70] sm:$0xf0] }
 0x1b0   : > { %3004 = vst [vmem:[#allocation2 + $0xec] sm:$0xf] %v3003_v12  ;;  %v5801_v11 = vrot.slane %v7742_v10, 5  ;;  %v2105_v63 = vrot.slane %v7743_v40, 4  ;;  %vm1294_vm1 = vcmask 1044484   ;;  %vm1178_vm8 = vweird.f32 %v5784_v8 }
 0x1b1   : > { %v4462_v21 = vpop.eup %4461  ;;  %v5809_v15 = vpack.c.bf16 %v1241_v49, %v1241_v49  ;;  %v1174_v61 = vsub.f32 1.0, %v1173_v44  ;;  %v1166_v18 = vand.u32 2147483647, %v5772_v14  ;;  %vm7937_vm13 = vsmask.f32 256  ;;  %vm1179_vm2 = vmor %vm1177_vm11, %vm1178_vm8 }
 0x1b2   : > { %vm5815_vm14 = vmand %vm1291_vm3, %vm7937_vm13  ;;  %v5819_v24 = vpop.eup %4463  ;;  %v2106_v12 = vor.u32 %v2105_v63, %v5801_v11  ;;  %v5822_v52 = vadd.f32 1.0, %v4462_v21  ;;  %v1328_v49 = vsel %vm4813_vm10, 0, %v1327_v38  ;;  %vm1295_vm0 = vsmask.f32 4352  ;;  %v1330_v44 = vld [vmem:[#allocation2 + $0x78] sm:$0x11] }
 0x1b3   : > { %7936 = vst [vmem:[#allocation33_spill] sm:$0xff] %v5809_v15  ;;  %v7751_v10 = vshrl.u32 %v5809_v15, 16  ;;  %v7750_v40 = vshll.u32 %v5809_v15, 16  ;;  %1915 = vrot.lane.b32.xlu0 %v5809_v15, %s4501_s19  ;;  %v1175_v62 = vmul.f32 %v5784_v8, %v1174_v61  ;;  %v1158_v4 = vmul.f32 %v5819_v24, %v5772_v14  ;;  %v1333_v63 = vld [vmem:[#allocation2 + $0x80] sm:$0x1]  ;;  %vm1296_vm4 = vmand %vm1294_vm1, %vm1295_vm0 }
 0x1b4   : > { %1329 = vst [vmem:[#allocation2 + $0x68] sm:$0x1] %v1328_v49  ;;  %v5834_v21 = vrot.slane %v2106_v12, 4  ;;  %v1184_v38 = vor.u32 1.1754944e-38, %v1183_v33  ;;  %v1168_v54 = vand.u32 2147483648, %v5772_v14  ;;  %4465 = vrcp.f32 %v5822_v52  ;;  %vm5842_vm15 = vmor %vm1296_vm4, %vm5815_vm14 }
 0x1b5   : > { %vm7941_vm5 = vcmask 257024   ;;  %v2099_v49 = vrot.slane %v7751_v10, 4  ;;  %v2100_v12 = vrot.slane %v7750_v40, 5  ;;  %v1176_v33 = vadd.f32 %v5784_v8, %v1175_v62  ;;  %v1306_v62 = vld [vmem:[#allocation2 + $0x18] sm:$0x11] }
 0x1b6   : > { %7940 = vst [vmem:[#allocation34_spill] sm:$0xff] %v5834_v21  ;;  %v1159_v50 = vsub.f32 1.0, %v1158_v4  ;;  %v3011_v13 = vsel %vm5038_vm12, %v5834_v21, %v3010_v43  ;;  %vm1163_vm3 = vweird.f32 %v5819_v24  ;;  %vm5859_vm1 = vcmp.eq.f32.partialorder %v1166_v18, 8.507059e+37  ;;  %vm7952_vm14 = vmmov %vm7941_vm5 }
 0x1b7   : > { %2981 = vst.msk [vmem:[#allocation2 + $0x68] sm:$0xf] %vm7941_vm5, %v5635_v16  ;;  %v1334_v40 = vsel %vm4813_vm10, 0, %v1333_v63  ;;  %v2101_v4 = vor.u32 %v2100_v12, %v2099_v49  ;;  %v1180_v10 = vsel %vm1179_vm2, %v5784_v8, %v1176_v33  ;;  %v1331_v22 = vsel %vm5842_vm15, 0, %v1330_v44  ;;  %v1336_v16 = vld [vmem:[#allocation2 + $0x90] sm:$0x11]  ;;  %v5879_v12 = vpop.permute.xlu2 %1875  ;;  %vm7953_vm0 = vmmov %vm7941_vm5 }
 0x1b8   : > { %3012 = vst [vmem:[#allocation2 + $0x11c] sm:$0xf] %v3011_v13  ;;  %v1160_v43 = vmul.f32 %v5819_v24, %v1159_v50  ;;  %v1185_v18 = vsel %vm5805_vm6, %v1184_v38, %v1180_v10  ;;  %vm1162_vm11 = vweird.f32 %v5772_v14  ;;  %v1169_v21 = vor.u32 1.1754944e-38, %v1168_v54  ;;  %vm7947_vm6 = vmmov %vm7941_vm5 }
 0x1b9   : > { %1335 = vst [vmem:[#allocation2 + $0x80] sm:$0x1] %v1334_v40  ;;  %v7946_v63 = vshrl.u32 %v5104_v29, 16  ;;  %v2102_v49 = vrot.slane %v2101_v4, 4  ;;  %v1246_v8 = vmul.f32 %v1185_v18, %v5640_v46  ;;  %vm5887_vm8 = vmor %vm1162_vm11, %vm1163_vm3  ;;  %vm1147_vm13 = vweird.f32 %v5822_v52 }
 0x1ba   : > { %v1161_v50 = vadd.f32 %v5819_v24, %v1160_v43  ;;  %2985 = vst.msk [vmem:[#allocation2 + $0x80] sm:$0xf] %vm7947_vm6, %v5648_v35  ;;  %v5883_v14 = vpop.eup %4465  ;;  %v1153_v46 = vand.u32 2147483648, %v5822_v52  ;;  %v1307_v40 = vsel %vm5842_vm15, 0, %v1306_v62  ;;  %v7758_v10 = vshrl.u32 %v4973_v56, 16  ;;  %vm7957_vm3 = vmmov %vm7953_vm0 }
 0x1bb   : > { %v5874_v13 = vrot.slane %v7946_v63, 7  ;;  %1332 = vst [vmem:[#allocation2 + $0x78] sm:$0x11] %v1331_v22  ;;  %v5899_v38 = vsel %vm5005_vm9, %v2102_v49, %v5801_v11  ;;  %v5901_v33 = vpack.c.bf16 %v1246_v8, %v1246_v8  ;;  %v1143_v43 = vmul.f32 %v5883_v14, %v5822_v52  ;;  %v1339_v62 = vld [vmem:[#allocation2 + $0x98] sm:$0x1]  ;;  %vm7963_vm6 = vmmov %vm7953_vm0 }
 0x1bc   : > { %7950 = vst [vmem:[#allocation35_spill] sm:$0xff] %v5899_v38  ;;  %v1165_v4 = vsel %vm5887_vm8, %v5819_v24, %v1161_v50  ;;  %vm1775_vm4 = vsmask.f32 7938  ;;  %v1337_v63 = vsel %vm5842_vm15, 0, %v1336_v16  ;;  %v7954_v8 = vshll.u32 %v5104_v29, 16 }
 0x1bd   : > { %7951 = vst [vmem:[#allocation36_spill] sm:$0xff] %v5901_v33  ;;  %v1170_v11 = vsel %vm5859_vm1, %v1169_v21, %v1165_v4  ;;  %1925 = vrot.lane.b32.xlu2 %v5901_v33, %s4501_s19  ;;  %v1144_v49 = vsub.f32 1.0, %v1143_v43  ;;  %v5926_v21 = vrot.slane %v7758_v10, 7  ;;  %vm1148_vm5 = vweird.f32 %v5883_v14  ;;  %vm7960_vm1 = vmmov %vm7953_vm0 }
 0x1be   : > { %v4022_v22 = vld [vmem:[#allocation2 + $0x68] sm:$0xf]  ;;  %2468 = vst.msk [vmem:[#allocation2 + $0x7c] sm:$0xf] %vm7952_vm14, %v5274_v51  ;;  %v1245_v24 = vmul.f32 %v1170_v11, %v5682_v6  ;;  %v5922_v50 = vor.u32 %v7954_v8, %v5874_v13  ;;  %vm7956_vm2 = vcmask 261120   ;;  %v7761_v16 = vshll.u32 %v4973_v56, 16  ;;  %vm5944_vm11 = vmand %vm7960_vm1, %vm1775_vm4 }
 0x1bf   : > { %3009 = vst.msk [vmem:[#allocation2 + $0x110] sm:$0xf] %vm7953_vm0, %v5899_v38  ;;  %v4023_v18 = vor.u32 %v4262_v45, %v4022_v22  ;;  %v1444_v45 = vld [vmem:[#allocation2 + $0xa4] sm:$0x8]  ;;  %v7958_v6 = vshrl.u32 %v5274_v51, 16  ;;  %v1340_v54 = vsel %vm4813_vm10, 0, %v1339_v62  ;;  %v1145_v4 = vmul.f32 %v5883_v14, %v1144_v49  ;;  %vm1149_vm8 = vmor %vm1147_vm13, %vm1148_vm5 }
 0x1c0   : > { %7955 = vst [vmem:[#allocation37_spill] sm:$0xff] %v5922_v50  ;;  %v1349_v22 = vsel %vm5842_vm15, 0, %v1348_v19  ;;  %v1616_v11 = vshrl.u32 %v5348_v48, 16  ;;  %v1154_v8 = vor.u32 1.1754944e-38, %v1153_v46  ;;  %v1445_v62 = vsel %vm4795_vm7, 0, %v1444_v45  ;;  %v5960_v19 = vpop.permute.xlu2 %1877  ;;  %vm7967_vm13 = vmmov %vm7953_vm0 }
 0x1c1   : > { %1308 = vst [vmem:[#allocation2 + $0x18] sm:$0x11] %v1307_v40  ;;  %4232 = vmatmul.msk.bf16.gmra.mxu0 %vm7956_vm2, %v4023_v18  ;;  %v5935_v20 = vrot.slane %v7958_v6, 7  ;;  %v5939_v40 = vpack.c.bf16 %v1245_v24, %v1245_v24  ;;  %v1342_v18 = vld [vmem:[#allocation2 + $0xa8] sm:$0x11]  ;;  %v1619_v24 = vshll.u32 %v5348_v48, 16  ;;  %v5965_v46 = vor.u32 %v7761_v16, %v5926_v21  ;;  %vm7972_vm5 = vmmov %vm7960_vm1 }
 0x1c2   : > { %2460 = vst.msk [vmem:[#allocation2 + $0x1c] sm:$0xf] %vm7957_vm3, %v4949_v0  ;;  %v7771_v49 = vshll.u32 %v5533_v37, 16  ;;  %v1793_v6 = vld [vmem:[#allocation2 + $0x78] sm:$0xf]  ;;  %v5967_v10 = vrot.slane %v1616_v11, 7  ;;  %vm7974_vm2 = vmmov %vm7960_vm1 }
 0x1c3   : > { %7959 = vst [vmem:[#allocation38_spill] sm:$0xff] %v5939_v40  ;;  %1923 = vrot.lane.b32.xlu1 %v5939_v40, %s4501_s19  ;;  %v2054_v45 = vrot.slane %v1616_v11, 4  ;;  %v2055_v44 = vrot.slane %v1619_v24, 5  ;;  %v7964_v16 = vshrl.u32 %v5533_v37, 16  ;;  %v7965_v11 = vand.u32 2147483647, %v5822_v52 }
 0x1c4   : > { %1338 = vst [vmem:[#allocation2 + $0x90] sm:$0x11] %v1337_v63  ;;  %v1146_v63 = vadd.f32 %v5883_v14, %v1145_v4  ;;  %v1794_v4 = vsel %vm5944_vm11, %v5922_v50, %v1793_v6  ;;  %v2058_v38 = vrot.slane %v7771_v49, 5  ;;  %v7966_v15 = vshll.u32 %v5274_v51, 16 }
 0x1c5   : > { %2470 = vst.msk [vmem:[#allocation2 + $0x94] sm:$0xf] %vm7963_vm6, %v5422_v28  ;;  %vm1152_vm14 = vcmp.eq.f32.partialorder %v7965_v11, 8.507059e+37  ;;  %v2056_v56 = vor.u32 %v2055_v44, %v2054_v45  ;;  %v1343_v49 = vsel %vm5842_vm15, 0, %v1342_v18  ;;  %2830 = vrot.lane.b32.xlu2 %v5274_v51, %s4502_s20  ;;  %v6000_v44 = vor.u32 %v1619_v24, %v5967_v10  ;;  %v1354_v45 = vld [vmem:[#allocation2 + $0xd8] sm:$0x11]  ;;  %vm7978_vm6 = vmmov %vm7960_vm1 }
 0x1c6   : > { %1341 = vst [vmem:[#allocation2 + $0x98] sm:$0x1] %v1340_v54  ;;  %v2060_v54 = vrot.slane %v7964_v16, 4  ;;  %v1150_v35 = vsel %vm1149_vm8, %v5883_v14, %v1146_v63  ;;  %v5986_v1 = vor.u32 %v7966_v15, %v5935_v20  ;;  %v1635_v11 = vshll.u32 %v5505_v32, 16 }
 0x1c7   : > { %1350 = vst [vmem:[#allocation2 + $0xc0] sm:$0x11] %v1349_v22  ;;  %v1155_v6 = vsel %vm1152_vm14, %v1154_v8, %v1150_v35  ;;  %v2057_v14 = vrot.slane %v2056_v56, 4  ;;  %v4265_v8 = vld [vmem:[#allocation2 + $0x88] sm:$0xf0]  ;;  %vm1957_vm0 = vcmask 519424  }
 0x1c8   : > { %1795 = vst [vmem:[#allocation2 + $0x78] sm:$0xf] %v1794_v4  ;;  %v1777_v22 = vld [vmem:[#allocation2 + $0x18] sm:$0xf]  ;;  %v2061_v57 = vor.u32 %v2060_v54, %v2058_v38  ;;  %v1244_v16 = vmul.f32 %v1155_v6, %v5730_v42  ;;  %v1345_v42 = vld [vmem:[#allocation2 + $0xb0] sm:$0x1] }
 0x1c9   : > { %1446 = vst [vmem:[#allocation2 + $0xa4] sm:$0x8] %v1445_v62  ;;  %v1778_v52 = vsel %vm5944_vm11, %v5965_v46, %v1777_v22  ;;  %v7969_v62 = vshrl.u32 %v5422_v28, 16  ;;  %v1632_v4 = vshrl.u32 %v5505_v32, 16  ;;  %v4034_v54 = vld [vmem:[#allocation2 + $0x80] sm:$0xf]  ;;  %v6014_v56 = vsel %vm5005_vm9, %v2057_v14, %v2058_v38 }
 0x1ca   : > { %2474 = vst.msk [vmem:[#allocation2 + $0xc4] sm:$0xf] %vm7967_vm13, %v5505_v32  ;;  %v6002_v18 = vpack.c.bf16 %v1244_v16, %v1244_v16  ;;  %v6016_v24 = vrot.slane %v2061_v57, 4  ;;  %v7772_v22 = vshll.u32 %v5448_v39, 16  ;;  %v1450_v38 = vld [vmem:[#allocation2 + $0xbc] sm:$0x8]  ;;  %v4035_v35 = vor.u32 %v4265_v8, %v4034_v54 }
 0x1cb   : > { %1779 = vst [vmem:[#allocation2 + $0x18] sm:$0xf] %v1778_v52  ;;  %v1797_v15 = vld [vmem:[#allocation2 + $0x90] sm:$0xf]  ;;  %v6009_v63 = vrot.slane %v7969_v62, 7  ;;  %2834 = vrot.lane.b32.xlu1 %v5422_v28, %s4502_s20  ;;  %v2063_v16 = vrot.slane %v1632_v4, 4 }
 0x1cc   : > { %7968 = vst [vmem:[#allocation39_spill] sm:$0xff] %v6002_v18  ;;  %v1798_v51 = vsel %vm5944_vm11, %v5986_v1, %v1797_v15  ;;  %1921 = vrot.lane.b32.xlu0 %v6002_v18, %s4501_s19  ;;  %v2064_v52 = vrot.slane %v1635_v11, 5  ;;  %v7973_v14 = vshll.u32 %v5422_v28, 16  ;;  %v1346_v62 = vsel %vm4813_vm10, 0, %v1345_v42 }
 0x1cd   : > { %1344 = vst [vmem:[#allocation2 + $0xa8] sm:$0x11] %v1343_v49  ;;  %v1884_v49 = vpop.permute.xlu2 %1883  ;;  %2836 = vrot.lane.b32.xlu2 %v5395_v58, %s4502_s20  ;;  %v2067_v28 = vrot.slane %v7772_v22, 5  ;;  %v7975_v42 = vshrl.u32 %v5448_v39, 16  ;;  %vm7976_vm3 = vcmask 261120   ;;  %vm1396_vm8 = vcmask 1043459  }
 0x1ce   : > { %1799 = vst [vmem:[#allocation2 + $0x90] sm:$0xf] %v1798_v51  ;;  %v1805_v6 = vld [vmem:[#allocation2 + $0xc0] sm:$0xf]  ;;  %v6033_v51 = vor.u32 %v7973_v14, %v6009_v63  ;;  %vm1399_vm14 = vcmask 1047559  }
 0x1cf   : > { %7970 = vst [vmem:[#allocation40_spill] sm:$0xff] %v6014_v56  ;;  %v1806_v57 = vsel %vm5944_vm11, %v6000_v44, %v1805_v6  ;;  %v1355_v6 = vsel %vm5842_vm15, 0, %v1354_v45  ;;  %v2069_v8 = vrot.slane %v7975_v42, 4  ;;  %vm1400_vm13 = vsmask.f32 7966 }
 0x1d0   : > { %7971 = vst [vmem:[#allocation41_spill] sm:$0xff] %v6016_v24  ;;  %v2990_v15 = vld [vmem:[#allocation2 + $0xa4] sm:$0xf] }
 0x1d1   : > { %2989 = vst.msk [vmem:[#allocation2 + $0x98] sm:$0xf] %vm7972_vm5, %v6014_v56  ;;  %4233 = vmatmul.msk.bf16.gmra.mxu0 %vm7976_vm3, %v4035_v35  ;;  %vm7981_vm5 = vmmov %vm7960_vm1  ;;  %v1648_v56 = vshrl.u32 %v5610_v60, 16 }
 0x1d2   : > { %1966 = vst.msk [vmem:[#allocation2 + $0x78] sm:$0xf] %vm1957_vm0, %v1884_v49  ;;  %v2991_v49 = vsel %vm5038_vm12, %v6016_v24, %v2990_v15  ;;  %v1451_v15 = vsel %vm4795_vm7, 0, %v1450_v38  ;;  %v6068_v38 = vpop.permute.xlu1 %1871  ;;  %v7996_v24 = vshll.u32 %v5245_v41, 16 }
 0x1d3   : > { %1807 = vst [vmem:[#allocation2 + $0xc0] sm:$0xf] %v1806_v57  ;;  %v2065_v57 = vor.u32 %v2064_v52, %v2063_v16  ;;  %v6056_v16 = vrot.slane %v1632_v4, 7  ;;  %v1312_v52 = vld [vmem:[#allocation2 + $0x30] sm:$0x11]  ;;  %2844 = vrot.lane.b32.xlu1 %v5448_v39, %s4502_s20 }
 0x1d4   : > { %2472 = vst.msk [vmem:[#allocation2 + $0xac] sm:$0xf] %vm7974_vm2, %v5348_v48  ;;  %v1801_v54 = vld [vmem:[#allocation2 + $0xa8] sm:$0xf]  ;;  %2832 = vrot.lane.b32.xlu0 %v5245_v41, %s4502_s20  ;;  %v1324_v4 = vld [vmem:[#allocation2 + $0x60] sm:$0x11] }
 0x1d5   : > { %2992 = vst [vmem:[#allocation2 + $0xa4] sm:$0xf] %v2991_v49  ;;  %v2066_v14 = vrot.slane %v2065_v57, 4  ;;  %v1802_v45 = vsel %vm5944_vm11, %v6033_v51, %v1801_v54  ;;  %v6066_v35 = vpop.permute.xlu2 %1889  ;;  %v1313_v57 = vsel %vm5842_vm15, 0, %v1312_v52  ;;  %v6076_v42 = vor.u32 %v1635_v11, %v6056_v16  ;;  %v1318_v54 = vld [vmem:[#allocation2 + $0x48] sm:$0x11]  ;;  %2838 = vrot.lane.b32.xlu2 %v5348_v48, %s4502_s20 }
 0x1d6   : > { %1347 = vst [vmem:[#allocation2 + $0xb0] sm:$0x1] %v1346_v62  ;;  %v2070_v62 = vor.u32 %v2069_v8, %v2067_v28  ;;  %v1325_v8 = vsel %vm5842_vm15, 0, %v1324_v4  ;;  %v1319_v48 = vsel %vm5842_vm15, 0, %v1318_v54  ;;  %vm7984_vm2 = vsmask.f32 7950 }
 0x1d7   : > { %1356 = vst [vmem:[#allocation2 + $0xd8] sm:$0x11] %v1355_v6  ;;  %v6060_v49 = vsel %vm5005_vm9, %v2066_v14, %v2067_v28  ;;  %v1868_v6 = vpop.permute.xlu0 %1867  ;;  %vm6102_vm3 = vmand %vm1396_vm8, %vm7984_vm2  ;;  %v8115_v61 = vld [vmem:[#allocation41_spill] sm:$0xff] }
 0x1d8   : > { %1803 = vst [vmem:[#allocation2 + $0xa8] sm:$0xf] %v1802_v45  ;;  %v6088_v14 = vrot.slane %v2070_v62, 4  ;;  %v7982_v45 = vshrl.u32 %v5220_v17, 16  ;;  %vm7991_vm8 = vmmov %vm7981_vm5 }
 0x1d9   : > { %7977 = vst [vmem:[#allocation42_spill] sm:$0xff] %v6060_v49  ;;  %vm8001_vm2 = vmmov %vm7991_vm8 }
 0x1da   : > { %1452 = vst [vmem:[#allocation2 + $0xbc] sm:$0x8] %v1451_v15  ;;  %v7979_v15 = vshrl.u32 %v4949_v0, 16  ;;  %v6094_v52 = vrot.slane %v7982_v45, 7 }
 0x1db   : > { %2993 = vst.msk [vmem:[#allocation2 + $0xb0] sm:$0xf] %vm7960_vm1, %v6060_v49  ;;  %vm6108_vm1 = vmand %vm1399_vm14, %vm1400_vm13  ;;  %2846 = vrot.lane.b32.xlu1 %v5610_v60, %s4502_s20  ;;  %vm7998_vm13 = vsmask.f32 256 }
 0x1dc   : > { %1958 = vst.msk [vmem:[#allocation2 + $0x18] sm:$0xf] %vm1957_vm0, %v1868_v6  ;;  %v6082_v28 = vrot.slane %v7979_v15, 7  ;;  %v4046_v6 = vld [vmem:[#allocation2 + $0x98] sm:$0xf]  ;;  %2840 = vrot.lane.b32.xlu0 %v5533_v37, %s4502_s20  ;;  %vm6142_vm14 = vmor %vm6108_vm1, %vm6102_vm3  ;;  %vm8003_vm3 = vcmask 261120  }
 0x1dd   : > { %2476 = vst.msk [vmem:[#allocation2 + $0xdc] sm:$0xf] %vm7978_vm6, %v5610_v60  ;;  %vm1501_vm6 = vsmask.f32 4368  ;;  %v4268_v54 = vld [vmem:[#allocation2 + $0xa0] sm:$0xf0]  ;;  %2848 = vrot.lane.b32.xlu2 %v5581_v59, %s4502_s20  ;;  %vm8006_vm1 = vmmov %vm8001_vm2 }
 0x1de   : > { %7980 = vst [vmem:[#allocation43_spill] sm:$0xff] %v6088_v14  ;;  %v1809_v11 = vld [vmem:[#allocation2 + $0xd8] sm:$0xf] }
 0x1df   : > { %1314 = vst [vmem:[#allocation2 + $0x30] sm:$0x11] %v1313_v57  ;;  %v1810_v4 = vsel %vm5944_vm11, %v6076_v42, %v1809_v11  ;;  %v7987_v57 = vshrl.u32 %v5245_v41, 16  ;;  %v1896_v11 = vpop.permute.xlu2 %1895  ;;  %v6130_v3 = vpop.permute.xlu0 %1869 }
 0x1e0   : > { %2462 = vst.msk [vmem:[#allocation2 + $0x34] sm:$0xf] %vm7981_vm5, %v4940_v55  ;;  %vm6155_vm5 = vmor %vm7998_vm13, %vm1501_vm6 }
 0x1e1   : > { %7983 = vst [vmem:[#allocation44_spill] sm:$0xff] %v6094_v52  ;;  %v1594_v15 = vrot.slane %v7987_v57, 7  ;;  %v2994_v22 = vld [vmem:[#allocation2 + $0xbc] sm:$0xf]  ;;  %v6119_v57 = vpop.permute.xlu1 %1873  ;;  %vm8008_vm6 = vmmov %vm8006_vm1 }
 0x1e2   : > { %1326 = vst [vmem:[#allocation2 + $0x60] sm:$0x11] %v1325_v8  ;;  %v2995_v8 = vsel %vm5038_vm12, %v6088_v14, %v2994_v22  ;;  %v7992_v22 = vshll.u32 %v5220_v17, 16  ;;  %vm8013_vm13 = vmmov %vm8006_vm1 }
 0x1e3   : > { %1811 = vst [vmem:[#allocation2 + $0xd8] sm:$0xf] %v1810_v4  ;;  %v7990_v4 = vshll.u32 %v4949_v0, 16  ;;  %v1597_v0 = vor.u32 %v7996_v24, %v1594_v15  ;;  %v2072_v24 = vrot.slane %v1648_v56, 4  ;;  %2295 = vrot.lane.b32.xlu1 %v5965_v46, %s4502_s20 }
 0x1e4   : > { %2466 = vst.msk [vmem:[#allocation2 + $0x64] sm:$0xf] %vm7991_vm8, %v5104_v29  ;;  %v6136_v14 = vor.u32 %v7992_v22, %v6094_v52  ;;  %v1441_v29 = vld [vmem:[#allocation2 + $0x9c] sm:$0x88]  ;;  %v7997_v22 = vshrl.u32 %v4940_v55, 16  ;;  %2842 = vrot.lane.b32.xlu0 %v5505_v32, %s4502_s20  ;;  %v7788_v32 = vshll.u32 %v5581_v59, 16  ;;  %vm8011_vm8 = vmmov %vm8006_vm1 }
 0x1e5   : > { %v6124_v49 = vor.u32 %v7990_v4, %v6082_v28  ;;  %2996 = vst [vmem:[#allocation2 + $0xbc] sm:$0xf] %v2995_v8  ;;  %v1590_v8 = vrot.slane %v5935_v20, 4  ;;  %v1442_v45 = vsel %vm6142_vm14, 0, %v1441_v29  ;;  %2315 = vrot.lane.b32.xlu2 %v5986_v1, %s4502_s20 }
 0x1e6   : > { %1972 = vst.msk [vmem:[#allocation2 + $0xc0] sm:$0xf] %vm1957_vm0, %v1896_v11  ;;  %v4047_v11 = vor.u32 %v4268_v54, %v4046_v6  ;;  %v1781_v18 = vld [vmem:[#allocation2 + $0x30] sm:$0xf]  ;;  %v6151_v52 = vrot.slane %v7997_v22, 7  ;;  %v8002_v6 = vshll.u32 %v5610_v60, 16 }
 0x1e7   : > { %7993 = vst [vmem:[#allocation45_spill] sm:$0xff] %v6136_v14  ;;  %v1782_v20 = vsel %vm5944_vm11, %v6124_v49, %v1781_v18  ;;  %v6178_v54 = vsel %vm6155_vm5, %v1590_v8, %v1597_v0  ;;  %v1351_v0 = vld [vmem:[#allocation2 + $0xc8] sm:$0x1]  ;;  %v1360_v8 = vld [vmem:[#allocation2 + $0xf0] sm:$0x11] }
 0x1e8   : > { %1320 = vst [vmem:[#allocation2 + $0x48] sm:$0x11] %v1319_v48  ;;  %v2073_v48 = vrot.slane %v8002_v6, 5  ;;  %4234 = vmatmul.msk.bf16.gmra.mxu0 %vm8003_vm3, %v4047_v11  ;;  %v8004_v11 = vshll.u32 %v4940_v55, 16  ;;  %v7790_v6 = vshrl.u32 %v5581_v59, 16 }
 0x1e9   : > { %2464 = vst.msk [vmem:[#allocation2 + $0x4c] sm:$0xf] %vm8001_vm2, %v5220_v17  ;;  %v1789_v15 = vld [vmem:[#allocation2 + $0x60] sm:$0xf]  ;;  %v6189_v29 = vpop.permute.xlu1 %1881  ;;  %vm8014_vm2 = vmmov %vm8003_vm3 }
 0x1ea   : > { %1783 = vst [vmem:[#allocation2 + $0x30] sm:$0xf] %v1782_v20  ;;  %v1790_v18 = vsel %vm5944_vm11, %v6136_v14, %v1789_v15  ;;  %v6183_v22 = vor.u32 %v8004_v11, %v6151_v52  ;;  %v1880_v20 = vpop.permute.xlu0 %1879  ;;  %vm8016_vm3 = vmmov %vm8006_vm1 }
 0x1eb   : > { %1960 = vst.msk [vmem:[#allocation2 + $0x30] sm:$0xf] %vm1957_vm0, %v6068_v38  ;;  %v2074_v38 = vor.u32 %v2073_v48, %v2072_v24  ;;  %v1456_v24 = vld [vmem:[#allocation2 + $0xd4] sm:$0x8]  ;;  %v8007_v48 = vshrl.u32 %v5395_v58, 16  ;;  %2323 = vrot.lane.b32.xlu1 %v6000_v44, %s4502_s20 }
 0x1ec   : > { %1791 = vst [vmem:[#allocation2 + $0x60] sm:$0xf] %v1790_v18  ;;  %v1352_v18 = vsel %vm4813_vm10, 0, %v1351_v0  ;;  %v1447_v0 = vld [vmem:[#allocation2 + $0xb4] sm:$0x88]  ;;  %2311 = vrot.lane.b32.xlu0 %v5922_v50, %s4502_s20 }
 0x1ed   : > { %8005 = vst [vmem:[#allocation46_spill] sm:$0xff] %v6183_v22  ;;  %v2075_v11 = vrot.slane %v2074_v38, 4  ;;  %v6219_v38 = vrot.slane %v1648_v56, 7  ;;  %v4271_v17 = vld [vmem:[#allocation2 + $0xb8] sm:$0xf0]  ;;  %2681 = vrot.lane.b32.xlu2 %v6033_v51, %s4503_s23 }
 0x1ee   : > { %1443 = vst [vmem:[#allocation2 + $0x9c] sm:$0x88] %v1442_v45  ;;  %v1610_v45 = vrot.slane %v8007_v48, 7  ;;  %v1435_v50 = vld [vmem:[#allocation2 + $0x84] sm:$0x88] }
 0x1ef   : > { %1800 = vst.msk [vmem:[#allocation2 + $0x9c] sm:$0xf] %vm8006_vm1, %v6178_v54  ;;  %v1785_v15 = vld [vmem:[#allocation2 + $0x48] sm:$0xf] }
 0x1f0   : > { %1964 = vst.msk [vmem:[#allocation2 + $0x60] sm:$0xf] %vm1957_vm0, %v1880_v20  ;;  %v1786_v46 = vsel %vm5944_vm11, %v6183_v22, %v1785_v15  ;;  %v1361_v20 = vsel %vm5842_vm15, 0, %v1360_v8  ;;  %v2076_v15 = vrot.slane %v7788_v32, 5  ;;  %v8009_v8 = vshll.u32 %v5395_v58, 16 }
 0x1f1   : > { %1969 = vst.msk [vmem:[#allocation2 + $0x9c] sm:$0xf] %vm1957_vm0, %v6066_v35  ;;  %v1457_v35 = vsel %vm4795_vm7, 0, %v1456_v24  ;;  %v6228_v24 = vpop.permute.xlu2 %1901  ;;  %v4058_v32 = vld [vmem:[#allocation2 + $0xb0] sm:$0xf] }
 0x1f2   : > { %1787 = vst [vmem:[#allocation2 + $0x48] sm:$0xf] %v1786_v46  ;;  %v2078_v46 = vrot.slane %v7790_v6, 4  ;;  %v1613_v48 = vor.u32 %v8009_v8, %v1610_v45  ;;  %v1888_v6 = vpop.permute.xlu1 %1887  ;;  %v6232_v56 = vsel %vm5005_vm9, %v2075_v11, %v2076_v15  ;;  %v1448_v8 = vsel %vm6142_vm14, 0, %v1447_v0 }
 0x1f3   : > { %1962 = vst.msk [vmem:[#allocation2 + $0x48] sm:$0xf] %vm1957_vm0, %v5879_v12  ;;  %v1606_v12 = vrot.slane %v6009_v63, 4  ;;  %v8010_v63 = vshrl.u32 %v5305_v26, 16  ;;  %v4059_v55 = vor.u32 %v4271_v17, %v4058_v32  ;;  %v1436_v17 = vsel %vm6142_vm14, 0, %v1435_v50  ;;  %2689 = vrot.lane.b32.xlu1 %v6076_v42, %s4503_s23  ;;  %v4488_v50 = vld [vmem:[%s4565_s10 + $0xf0] sm:$0xff] }
 0x1f4   : > { %2471 = vst.msk [vmem:[#allocation2 + $0xa0] sm:$0xf] %vm8008_vm6, %v5395_v58  ;;  %v1886_v58 = vpop.permute.xlu0 %1885  ;;  %v1574_v32 = vrot.slane %v5874_v13, 4  ;;  %2677 = vrot.lane.b32.xlu0 %v5986_v1, %s4503_s23  ;;  %vm8021_vm6 = vmmov %vm8006_vm1 }
 0x1f5   : > { %1353 = vst [vmem:[#allocation2 + $0xc8] sm:$0x1] %v1352_v18  ;;  %v1578_v45 = vrot.slane %v8010_v63, 7  ;;  %v2079_v18 = vor.u32 %v2078_v46, %v2076_v15  ;;  %v6243_v11 = vsel %vm6155_vm5, %v1606_v12, %v1613_v48  ;;  %v572_v48 = vmul.f32 %v4488_v50, %v4756_v31  ;;  %2299 = vrot.lane.b32.xlu2 %v6124_v49, %s4502_s20 }
 0x1f6   : > { %1362 = vst [vmem:[#allocation2 + $0xf0] sm:$0x11] %v1361_v20 }
 0x1f7   : > { %1968 = vst.msk [vmem:[#allocation2 + $0x90] sm:$0xf] %vm1957_vm0, %v1888_v6  ;;  %v8012_v6 = vshll.u32 %v5610_v60, 16  ;;  %v6260_v46 = vrot.slane %v2079_v18, 4  ;;  %v8017_v60 = vshrl.u32 %v5017_v53, 16 }
 0x1f8   : > { %1458 = vst [vmem:[#allocation2 + $0xd4] sm:$0x8] %v1457_v35  ;;  %4235 = vmatmul.msk.bf16.gmra.mxu0 %vm8014_vm2, %v4059_v55  ;;  %v8015_v35 = vshll.u32 %v5305_v26, 16  ;;  %vm8025_vm2 = vmmov %vm8006_vm1 }
 0x1f9   : > { %2997 = vst.msk [vmem:[#allocation2 + $0xc8] sm:$0xf] %vm8011_vm8, %v6232_v56  ;;  %v6250_v20 = vor.u32 %v8012_v6, %v6219_v38  ;;  %v1530_v0 = vrot.slane %v8017_v60, 7  ;;  %v6281_v1 = vpop.permute.xlu2 %1907  ;;  %v1417_v6 = vld [vmem:[#allocation2 + $0x3c] sm:$0x88]  ;;  %vm8023_vm8 = vmmov %vm8006_vm1 }
 0x1fa   : > { %2478 = vst.msk [vmem:[#allocation2 + $0xf4] sm:$0xf] %vm8013_vm13, %v5568_v9  ;;  %v1581_v15 = vor.u32 %v8015_v35, %v1578_v45  ;;  %v1894_v13 = vpop.permute.xlu1 %1893  ;;  %v8019_v35 = vshll.u32 %v5017_v53, 16  ;;  %vm8024_vm13 = vmmov %vm8006_vm1 }
 0x1fb   : > { %1449 = vst [vmem:[#allocation2 + $0xb4] sm:$0x88] %v1448_v8  ;;  %2307 = vrot.lane.b32.xlu1 %v6136_v14, %s4502_s20 }
 0x1fc   : > { %1804 = vst.msk [vmem:[#allocation2 + $0xb4] sm:$0xf] %vm8016_vm3, %v6243_v11  ;;  %v1892_v45 = vpop.permute.xlu0 %1891  ;;  %v6279_v18 = vsel %vm6155_vm5, %v1574_v32, %v1581_v15  ;;  %v1533_v60 = vor.u32 %v8019_v35, %v1530_v0  ;;  %v6293_v32 = vadd.f32 %v4758_v34, %v572_v48  ;;  %v7795_v15 = vshrl.u32 %v5076_v7, 16  ;;  %v4489_v0 = vld [vmem:[%s4565_s10 + $0xf8] sm:$0xff]  ;;  %v1453_v48 = vld [vmem:[#allocation2 + $0xcc] sm:$0x88]  ;;  %2319 = vrot.lane.b32.xlu0 %v6033_v51, %s4502_s20 }
 0x1fd   : > { %v1813_v12 = vld [vmem:[#allocation2 + $0xf0] sm:$0xf]  ;;  %2473 = vst.msk [vmem:[#allocation2 + $0xb8] sm:$0xf] %vm8006_vm1, %v5533_v37  ;;  %2327 = vrot.lane.b32.xlu2 %v6076_v42, %s4502_s20  ;;  %vm8026_vm3 = vcmask 261120  }
 0x1fe   : > { %v1814_v55 = vsel %vm5944_vm11, %v6250_v20, %v1813_v12  ;;  %1437 = vst [vmem:[#allocation2 + $0x84] sm:$0x88] %v1436_v17  ;;  %v1526_v17 = vrot.slane %v6082_v28, 4  ;;  %v8020_v12 = vshrl.u32 %v5533_v37, 16  ;;  %v1418_v28 = vsel %vm6142_vm14, 0, %v1417_v6 }
 0x1ff   : > { %v2998_v63 = vld [vmem:[#allocation2 + $0xd4] sm:$0xf]  ;;  %1815 = vst [vmem:[#allocation2 + $0xf0] sm:$0xf] %v1814_v55 }
 0x200   : > { %8018 = vst [vmem:[#allocation47_spill] sm:$0xff] %v6279_v18  ;;  %v2999_v8 = vsel %vm5038_vm12, %v6260_v46, %v2998_v63  ;;  %v1626_v55 = vrot.slane %v8020_v12, 7  ;;  %v6308_v50 = vsel %vm6155_vm5, %v1526_v17, %v1533_v60  ;;  %v1622_v63 = vrot.slane %v5967_v10, 4 }
 0x201   : > { %1971 = vst.msk [vmem:[#allocation2 + $0xb4] sm:$0xf] %vm1957_vm0, %v1894_v13  ;;  %v573_v13 = vmul.f32 %v4489_v0, %v4756_v31  ;;  %v3962_v31 = vmul.f32 -1.442695, %v6293_v32  ;;  %v1712_v17 = vshrl.u32 %v5759_v25, 16  ;;  %v7796_v60 = vshll.u32 %v5076_v7, 16 }
 0x202   : > { %3000 = vst [vmem:[#allocation2 + $0xd4] sm:$0xf] %v2999_v8  ;;  %v1510_v0 = vrot.slane %v5926_v21, 4  ;;  %v7793_v21 = vshrl.u32 %v5901_v33, 16 }
 0x203   : > { %1970 = vst.msk [vmem:[#allocation2 + $0xa8] sm:$0xf] %vm1957_vm0, %v1892_v45  ;;  %v8022_v45 = vshll.u32 %v5533_v37, 16  ;;  %v6316_v6 = vadd.f32 %v4758_v34, %v573_v13  ;;  %v1454_v37 = vsel %vm6142_vm14, 0, %v1453_v48  ;;  %v1514_v34 = vrot.slane %v7795_v15, 7  ;;  %v1900_v48 = vpop.permute.xlu1 %1899  ;;  %2679 = vrot.lane.b32.xlu1 %v6178_v54, %s4503_s23 }
 0x204   : > { %1796 = vst.msk [vmem:[#allocation2 + $0x84] sm:$0xf] %vm8021_vm6, %v6279_v18  ;;  %4467 = vpow2.f32 %v3962_v31  ;;  %vm8027_vm6 = vmmov %vm8006_vm1  ;;  %v6356_v42 = vrot.slane %v1712_v17, 7  ;;  %v7794_v31 = vshrl.u32 %v5939_v40, 16  ;;  %2685 = vrot.lane.b32.xlu0 %v6000_v44, %s4503_s23 }
 0x205   : > { %1967 = vst.msk [vmem:[#allocation2 + $0x84] sm:$0xf] %vm1957_vm0, %v1886_v58  ;;  %v1629_v8 = vor.u32 %v8022_v45, %v1626_v55  ;;  %v4070_v58 = vld [vmem:[#allocation2 + $0xc8] sm:$0xf]  ;;  %v3963_v12 = vmul.f32 -1.442695, %v6316_v6  ;;  %v6342_v55 = vpop.permute.xlu2 %1913  ;;  %v1517_v13 = vor.u32 %v7796_v60, %v1514_v34  ;;  %2693 = vrot.lane.b32.xlu2 %v6250_v20, %s4503_s23 }
 0x206   : > { %2469 = vst.msk [vmem:[#allocation2 + $0x88] sm:$0xf] %vm8023_vm8, %v5245_v41  ;;  %v1384_v41 = vld [vmem:[#allocation2 + $0x150] sm:$0x11]  ;;  %v8028_v45 = vshrl.u32 %v4991_v36, 16  ;;  %vm8029_vm8 = vmmov %vm8006_vm1 }
 0x207   : > { %1419 = vst [vmem:[#allocation2 + $0x3c] sm:$0x88] %v1418_v28  ;;  %v6333_v51 = vsel %vm6155_vm5, %v1622_v63, %v1629_v8  ;;  %v1411_v28 = vld [vmem:[#allocation2 + $0x24] sm:$0x88]  ;;  %v1898_v63 = vpop.permute.xlu0 %1897  ;;  %4469 = vpow2.f32 %v3963_v12  ;;  %v1423_v34 = vld [vmem:[#allocation2 + $0x54] sm:$0x88] }
 0x208   : > { %1784 = vst.msk [vmem:[#allocation2 + $0x3c] sm:$0xf] %vm8024_vm13, %v6308_v50  ;;  %v1546_v8 = vrot.slane %v8028_v45, 7  ;;  %v8031_v12 = vshll.u32 %v4991_v36, 16  ;;  %vm8032_vm13 = vmmov %vm8006_vm1  ;;  %v7798_v45 = vshll.u32 %v5901_v33, 16 }
 0x209   : > { %v4274_v10 = vld [vmem:[#allocation2 + $0xd0] sm:$0xf0]  ;;  %1961 = vst.msk [vmem:[#allocation2 + $0x3c] sm:$0xf] %vm1957_vm0, %v6119_v57  ;;  %v1385_v57 = vsel %vm5842_vm15, 0, %v1384_v41  ;;  %v6374_v41 = vsel %vm6155_vm5, %v1510_v0, %v1517_v13  ;;  %v1738_v0 = vrot.slane %v7793_v21, 7 }
 0x20a   : > { %v4071_v35 = vor.u32 %v4274_v10, %v4070_v58  ;;  %2463 = vst.msk [vmem:[#allocation2 + $0x40] sm:$0xf] %vm8025_vm2, %v4991_v36  ;;  %v7797_v58 = vshll.u32 %v5759_v25, 16  ;;  %v4468_v10 = vpop.eup %4467  ;;  %v7799_v13 = vshrl.u32 %v5699_v30, 16  ;;  %vm8033_vm2 = vmmov %vm8006_vm1  ;;  %v1718_v36 = vrot.slane %v6356_v42, 4 }
 0x20b   : > { %1455 = vst [vmem:[#allocation2 + $0xcc] sm:$0x88] %v1454_v37  ;;  %v1412_v37 = vsel %vm6142_vm14, 0, %v1411_v28  ;;  %v6387_v28 = vrot.slane %v7794_v31, 7  ;;  %v8034_v31 = vshrl.u32 %v5581_v59, 16  ;;  %v1741_v60 = vor.u32 %v7798_v45, %v1738_v0  ;;  %2317 = vrot.lane.b32.xlu1 %v6178_v54, %s4502_s20 }
 0x20c   : > { %4236 = vmatmul.msk.bf16.gmra.mxu0 %vm8026_vm3, %v4071_v35  ;;  %1808 = vst.msk [vmem:[#allocation2 + $0xcc] sm:$0xf] %vm8006_vm1, %v6333_v51  ;;  %v6379_v44 = vor.u32 %v7797_v58, %v6356_v42  ;;  %v1542_v35 = vrot.slane %v6151_v52, 4  ;;  %v1424_v52 = vsel %vm6142_vm14, 0, %v1423_v34  ;;  %2303 = vrot.lane.b32.xlu0 %v6183_v22, %s4502_s20  ;;  %v4277_v58 = vld [vmem:[#allocation2 + $0xe8] sm:$0xf0]  ;;  %vm8035_vm3 = vmmov %vm8006_vm1 }
 0x20d   : > { %2475 = vst.msk [vmem:[#allocation2 + $0xd0] sm:$0xf] %vm8027_vm6, %v5448_v39  ;;  %v1920_v21 = vpop.permute.xlu2 %1919  ;;  %v1658_v15 = vrot.slane %v8034_v31, 7  ;;  %v4082_v31 = vld [vmem:[#allocation2 + $0xe0] sm:$0xf]  ;;  %v8037_v45 = vshrl.u32 %v5448_v39, 16  ;;  %2313 = vrot.lane.b32.xlu2 %v6279_v18, %s4502_s20 }
 0x20e   : > { %1386 = vst [vmem:[#allocation2 + $0x150] sm:$0x11] %v1385_v57  ;;  %v1549_v57 = vor.u32 %v8031_v12, %v1546_v8  ;;  %v4470_v8 = vpop.eup %4469  ;;  %v1465_v54 = vld [vmem:[#allocation2 + $0xfc] sm:$0x88]  ;;  %vm8039_vm6 = vcmask 261120  }
 0x20f   : > { %2486 = vst.msk [vmem:[#allocation2 + $0x154] sm:$0xf] %vm8029_vm8, %v5939_v40  ;;  %vm8040_vm8 = vmmov %vm8006_vm1 }
 0x210   : > { %1974 = vst.msk [vmem:[#allocation2 + $0xd8] sm:$0xf] %vm1957_vm0, %v1900_v48  ;;  %v7800_v48 = vshll.u32 %v5699_v30, 16 }
 0x211   : > { %8030 = vst [vmem:[#allocation48_spill] sm:$0xff] %v6379_v44 }
 0x212   : > { %1973 = vst.msk [vmem:[#allocation2 + $0xcc] sm:$0xf] %vm1957_vm0, %v1898_v63  ;;  %v1495_v63 = vld [vmem:[#allocation2 + $0x174] sm:$0x88] }
 0x213   : > { %1413 = vst [vmem:[#allocation2 + $0x24] sm:$0x88] %v1412_v37  ;;  %v6402_v37 = vadd.f32 1.0, %v4468_v10  ;;  %v1734_v10 = vrot.slane %v6387_v28, 4  ;;  %v1496_v0 = vsel %vm6142_vm14, 0, %v1495_v63  ;;  %v4083_v63 = vor.u32 %v4277_v58, %v4082_v31  ;;  %2687 = vrot.lane.b32.xlu1 %v6333_v51, %s4503_s23 }
 0x214   : > { %1780 = vst.msk [vmem:[#allocation2 + $0x24] sm:$0xf] %vm8032_vm13, %v6374_v41  ;;  %v1459_v58 = vld [vmem:[#allocation2 + $0xe4] sm:$0x88]  ;;  %2683 = vrot.lane.b32.xlu0 %v6243_v11, %s4503_s23  ;;  %vm8043_vm13 = vmmov %vm8006_vm1 }
 0x215   : > { %1959 = vst.msk [vmem:[#allocation2 + $0x24] sm:$0xf] %vm1957_vm0, %v6130_v3  ;;  %v1829_v12 = vld [vmem:[#allocation2 + $0x150] sm:$0xf]  ;;  %v6413_v3 = vsel %vm6155_vm5, %v1542_v35, %v1549_v57  ;;  %v2090_v35 = vrot.slane %v7799_v13, 4  ;;  %v2091_v57 = vrot.slane %v7800_v48, 5  ;;  %4471 = vrcp.f32 %v6402_v37  ;;  %2297 = vrot.lane.b32.xlu2 %v6374_v41, %s4502_s20 }
 0x216   : > { %2461 = vst.msk [vmem:[#allocation2 + $0x28] sm:$0xf] %vm8033_vm2, %v5017_v53  ;;  %v1830_v34 = vsel %vm5944_vm11, %v6379_v44, %v1829_v12  ;;  %v6422_v12 = vadd.f32 1.0, %v4470_v8  ;;  %v8036_v8 = vshll.u32 %v5581_v59, 16  ;;  %v1642_v13 = vrot.slane %v8037_v45, 7  ;;  %vm8047_vm2 = vmmov %vm8006_vm1 }
 0x217   : > { %1425 = vst [vmem:[#allocation2 + $0x54] sm:$0x88] %v1424_v52  ;;  %v1654_v52 = vrot.slane %v6219_v38, 4  ;;  %v1904_v38 = vpop.permute.xlu0 %1903  ;;  %v1638_v45 = vrot.slane %v6056_v16, 4  ;;  %v8044_v16 = vshrl.u32 %v5213_v27, 16  ;;  %v8052_v41 = vshll.u32 %v5213_v27, 16  ;;  %v1926_v44 = vpop.permute.xlu2 %1925 }
 0x218   : > { %1831 = vst [vmem:[#allocation2 + $0x150] sm:$0xf] %v1830_v34  ;;  %v1661_v34 = vor.u32 %v8036_v8, %v1658_v15  ;;  %4473 = vrcp.f32 %v6422_v12  ;;  %v2092_v15 = vor.u32 %v2091_v57, %v2090_v35  ;;  %v8042_v8 = vshll.u32 %v5759_v25, 16  ;;  %v1906_v35 = vpop.permute.xlu1 %1905 }
 0x219   : > { %1984 = vst.msk [vmem:[#allocation2 + $0x150] sm:$0xf] %vm1957_vm0, %v1920_v21  ;;  %v6442_v21 = vsel %vm6155_vm5, %v1734_v10, %v1741_v60  ;;  %v8041_v10 = vshll.u32 %v5448_v39, 16  ;;  %v1460_v39 = vsel %vm6142_vm14, 0, %v1459_v58  ;;  %v1363_v58 = vld [vmem:[#allocation2 + $0xf8] sm:$0x1] }
 0x21a   : > { %1788 = vst.msk [vmem:[#allocation2 + $0x54] sm:$0xf] %vm8035_vm3, %v6413_v3  ;;  %v6457_v60 = vsel %vm6155_vm5, %v1654_v52, %v1661_v34  ;;  %v2093_v57 = vrot.slane %v2092_v15, 4  ;;  %v8045_v34 = vld [vmem:[#allocation39_spill] sm:$0xff]  ;;  %v6491_v15 = vld [vmem:[#allocation2 + $0x168] sm:$0x11]  ;;  %vm8048_vm3 = vmmov %vm8006_vm1 }
 0x21b   : > { %1963 = vst.msk [vmem:[#allocation2 + $0x54] sm:$0xf] %vm1957_vm0, %v5960_v19  ;;  %v1466_v19 = vsel %vm6142_vm14, 0, %v1465_v54  ;;  %v1645_v31 = vor.u32 %v8041_v10, %v1642_v13  ;;  %v2109_v54 = vrot.slane %v8042_v8, 5  ;;  %v6477_v13 = vpop.eup %4471  ;;  %v8046_v10 = vld [vmem:[#allocation28_spill] sm:$0xff]  ;;  %2305 = vrot.lane.b32.xlu1 %v6413_v3, %s4502_s20  ;;  %v1213_v42 = vand.u32 2147483648, %v6422_v12 }
 0x21c   : > { %8038 = vst [vmem:[#allocation49_spill] sm:$0xff] %v6442_v21  ;;  %4237 = vmatmul.msk.bf16.gmra.mxu0 %vm8039_vm6, %v4083_v63  ;;  %v1720_v63 = vshrl.u32 %v8045_v34, 16  ;;  %v1429_v8 = vld [vmem:[#allocation2 + $0x6c] sm:$0x88]  ;;  %2301 = vrot.lane.b32.xlu0 %v6308_v50, %s4502_s20  ;;  %vm8055_vm6 = vmmov %vm8006_vm1 }
 0x21d   : > { %2465 = vst.msk [vmem:[#allocation2 + $0x58] sm:$0xf] %vm8006_vm1, %v5213_v27  ;;  %v6482_v52 = vsel %vm6155_vm5, %v1638_v45, %v1645_v31  ;;  %v8049_v45 = vshll.u32 %v5076_v7, 16  ;;  %v1480_v27 = vld [vmem:[#allocation2 + $0x134] sm:$0x8]  ;;  %2321 = vrot.lane.b32.xlu2 %v6243_v11, %s4502_s20 }
 0x21e   : > { %1497 = vst [vmem:[#allocation2 + $0x174] sm:$0x88] %v1496_v0  ;;  %v2108_v0 = vrot.slane %v1712_v17, 4  ;;  %v1562_v17 = vrot.slane %v8044_v16, 7  ;;  %v8051_v16 = vld [vmem:[#allocation44_spill] sm:$0xff]  ;;  %v1722_v14 = vrot.slane %v1720_v63, 7 }
 0x21f   : > { %1836 = vst.msk [vmem:[#allocation2 + $0x174] sm:$0xf] %vm8040_vm8, %v6442_v21  ;;  %v6498_v31 = vrot.slane %v8049_v45, 5  ;;  %v1558_v48 = vrot.slane %v8051_v16, 4  ;;  %v8053_v21 = vld [vmem:[#allocation26_spill] sm:$0xff]  ;;  %v1364_v45 = vsel %vm4813_vm10, 0, %v1363_v58  ;;  %vm1193_vm8 = vweird.f32 %v6477_v13 }
 0x220   : > { %1976 = vst.msk [vmem:[#allocation2 + $0xf0] sm:$0xf] %vm1957_vm0, %v1904_v38  ;;  %v6485_v38 = vpop.eup %4473  ;;  %v6510_v18 = vsel %vm5005_vm9, %v2093_v57, %v8053_v21  ;;  %v1391_v21 = vsel %vm5842_vm15, 0, %v6491_v15 }
 0x221   : > { %1467 = vst [vmem:[#allocation2 + $0xfc] sm:$0x88] %v1466_v19  ;;  %v2110_v19 = vor.u32 %v2109_v54, %v2108_v0  ;;  %v8050_v0 = vshrl.u32 %v5076_v7, 16 }
 0x222   : > { %1816 = vst.msk [vmem:[#allocation2 + $0xfc] sm:$0xf] %vm8043_vm13, %v6457_v60  ;;  %vm1208_vm13 = vweird.f32 %v6485_v38 }
 0x223   : > { %1977 = vst.msk [vmem:[#allocation2 + $0xfc] sm:$0xf] %vm1957_vm0, %v1906_v35  ;;  %v1723_v35 = vshll.u32 %v8045_v34, 16  ;;  %v6502_v54 = vrot.slane %v8050_v0, 4  ;;  %v1188_v0 = vmul.f32 %v6477_v13, %v6402_v37  ;;  %v6518_v16 = vrot.slane %v2110_v19, 4  ;;  %2329 = vrot.lane.b32.xlu1 %v6482_v52, %s4502_s20 }
 0x224   : > { %2479 = vst.msk [vmem:[#allocation2 + $0x100] sm:$0xf] %vm8047_vm2, %v8046_v10  ;;  %v6537_v19 = vrot.slane %v1720_v63, 4  ;;  %vm8056_vm2 = vmmov %vm8006_vm1  ;;  %2325 = vrot.lane.b32.xlu0 %v6333_v51, %s4502_s20 }
 0x225   : > { %1461 = vst [vmem:[#allocation2 + $0xe4] sm:$0x88] %v1460_v39  ;;  %v1565_v39 = vor.u32 %v8052_v41, %v1562_v17  ;;  %v1430_v17 = vsel %vm6142_vm14, 0, %v1429_v8  ;;  %v6535_v57 = vrot.slane %v1723_v35, 5  ;;  %v1189_v58 = vsub.f32 1.0, %v1188_v0  ;;  %2691 = vrot.lane.b32.xlu2 %v6482_v52, %s4503_s23 }
 0x226   : > { %1812 = vst.msk [vmem:[#allocation2 + $0xe4] sm:$0xf] %vm8048_vm3, %v6482_v52  ;;  %v1375_v41 = vld [vmem:[#allocation2 + $0x128] sm:$0x1]  ;;  %v1725_v63 = vor.u32 %v1723_v35, %v1722_v14  ;;  %v8057_v35 = vshrl.u32 %v5939_v40, 16  ;;  %vm1192_vm3 = vweird.f32 %v6402_v37 }
 0x227   : > { %1975 = vst.msk [vmem:[#allocation2 + $0xe4] sm:$0xf] %vm1957_vm0, %v6228_v24  ;;  %v1203_v24 = vmul.f32 %v6485_v38, %v6422_v12  ;;  %v6543_v15 = vsel %vm6155_vm5, %v1558_v48, %v1565_v39  ;;  %v1190_v0 = vmul.f32 %v6477_v13, %v1189_v58  ;;  %v1196_v48 = vand.u32 2147483647, %v6402_v37 }
 0x228   : > { %1987 = vst.msk [vmem:[#allocation2 + $0x174] sm:$0xf] %vm1957_vm0, %v1926_v44  ;;  %v1489_v44 = vld [vmem:[#allocation2 + $0x15c] sm:$0x88]  ;;  %v1376_v14 = vsel %vm4813_vm10, 0, %v1375_v41  ;;  %v8058_v58 = vshll.u32 %v5939_v40, 16 }
 0x229   : > { %2477 = vst.msk [vmem:[#allocation2 + $0xe8] sm:$0xf] %vm8006_vm1, %v5581_v59  ;;  %v1204_v59 = vsub.f32 1.0, %v1203_v24  ;;  %v1211_v24 = vand.u32 2147483647, %v6422_v12  ;;  %v1191_v11 = vadd.f32 %v6477_v13, %v1190_v0  ;;  %vm6572_vm1 = vmor %vm1192_vm3, %vm1193_vm8  ;;  %v1490_v0 = vsel %vm6142_vm14, 0, %v1489_v44 }
 0x22a   : > { %1365 = vst [vmem:[#allocation2 + $0xf8] sm:$0x1] %v1364_v45  ;;  %v1198_v45 = vand.u32 2147483648, %v6402_v37  ;;  %v6578_v37 = vpop.permute.xlu2 %2830  ;;  %vm1197_vm3 = vcmp.eq.f32.partialorder %v1196_v48, 8.507059e+37  ;;  %v1214_v44 = vor.u32 1.1754944e-38, %v1213_v42 }
 0x22b   : > { %8054 = vst [vmem:[#allocation28_spill] sm:$0xff] %v6543_v15  ;;  %v1205_v39 = vmul.f32 %v6485_v38, %v1204_v59  ;;  %v2118_v59 = vrot.slane %v8058_v58, 5  ;;  %v2115_v58 = vor.u32 %v6537_v19, %v6535_v57  ;;  %v1298_v19 = vld [vmem:[#allocation2] sm:$0x11] }
 0x22c   : > { %3005 = vst.msk [vmem:[#allocation2 + $0xf8] sm:$0xf] %vm8055_vm6, %v6510_v18  ;;  %vm1207_vm6 = vweird.f32 %v6422_v12  ;;  %v1199_v22 = vor.u32 1.1754944e-38, %v1198_v45  ;;  %2695 = vrot.lane.b32.xlu0 %v6457_v60, %s4503_s23 }
 0x22d   : > { %1431 = vst [vmem:[#allocation2 + $0x6c] sm:$0x88] %v1430_v17  ;;  %v2117_v17 = vrot.slane %v8057_v35, 4  ;;  %v1206_v41 = vadd.f32 %v6485_v38, %v1205_v39  ;;  %v6580_v35 = vpop.permute.xlu1 %1911  ;;  %vm6592_vm8 = vmor %vm1207_vm6, %vm1208_vm13  ;;  %v4280_v39 = vld [vmem:[#allocation2 + $0x100] sm:$0xf0]  ;;  %vm1212_vm13 = vcmp.eq.f32.partialorder %v1211_v24, 8.507059e+37  ;;  %2309 = vrot.lane.b32.xlu2 %v6543_v15, %s4502_s20 }
 0x22e   : > { %1792 = vst.msk [vmem:[#allocation2 + $0x6c] sm:$0xf] %vm8056_vm2, %v6543_v15  ;;  %vm8071_vm6 = vcmask 261120   ;;  %v6647_v52 = vrot.slane %v2115_v58, 4 }
 0x22f   : > { %1965 = vst.msk [vmem:[#allocation2 + $0x6c] sm:$0xf] %vm1957_vm0, %v6189_v29  ;;  %v1481_v29 = vsel %vm4795_vm7, 0, %v1480_v27  ;;  %v1210_v27 = vsel %vm6592_vm8, %v6485_v38, %v1206_v41  ;;  %v6614_v38 = vsel %vm5005_vm9, %v6518_v16, %v6535_v57  ;;  %v2119_v51 = vor.u32 %v2118_v59, %v2117_v17 }
 0x230   : > { %8061 = vst [vmem:[#allocation44_spill] sm:$0xff] %v6578_v37  ;;  %v1215_v45 = vsel %vm1212_vm13, %v1214_v44, %v1210_v27  ;;  %v1299_v16 = vsel %vm5842_vm15, 0, %v1298_v19  ;;  %v8074_v17 = vshrl.u32 %v8046_v10, 16  ;;  %v1471_v27 = vld [vmem:[#allocation2 + $0x114] sm:$0x88]  ;;  %v8078_v44 = vld [vmem:[#allocation7_spill] sm:$0xff] }
 0x231   : > { %2467 = vst.msk [vmem:[#allocation2 + $0x70] sm:$0xf] %vm8056_vm2, %v5305_v26  ;;  %v1195_v26 = vsel %vm6572_vm1, %v6477_v13, %v1191_v11  ;;  %vm8068_vm1 = vmmov %vm8056_vm2  ;;  %v2120_v11 = vrot.slane %v2119_v51, 4  ;;  %v8080_v19 = vshll.u32 %v5901_v33, 16 }
 0x232   : > { %1392 = vst [vmem:[#allocation2 + $0x168] sm:$0x11] %v1391_v21  ;;  %v6608_v21 = vsel %vm6155_vm5, %v1718_v36, %v1725_v63  ;;  %v1200_v8 = vsel %vm1197_vm3, %v1199_v22, %v1195_v26  ;;  %v1248_v36 = vmul.f32 %v1215_v45, %v6316_v6  ;;  %v8066_v26 = vshll.u32 %v5939_v40, 16  ;;  %vm8072_vm2 = vmmov %vm8068_vm1 }
 0x233   : > { %1377 = vst [vmem:[#allocation2 + $0x128] sm:$0x1] %v1376_v14  ;;  %v4094_v13 = vld [vmem:[#allocation2 + $0xf8] sm:$0xf]  ;;  %v1247_v48 = vmul.f32 %v1200_v8, %v6293_v32  ;;  %v1403_v14 = vld [vmem:[#allocation2 + $0xc] sm:$0x88]  ;;  %v8070_v32 = vor.u32 %v6502_v54, %v6498_v31  ;;  %vm8077_vm8 = vmmov %vm8068_vm1 }
 0x234   : > { %8064 = vst [vmem:[#allocation26_spill] sm:$0xff] %v6608_v21  ;;  %v4095_v42 = vor.u32 %v4280_v39, %v4094_v13  ;;  %v6621_v22 = vor.u32 %v8066_v26, %v6387_v28  ;;  %v8073_v28 = vshrl.u32 %v5568_v9, 16  ;;  %v1674_v24 = vrot.slane %v8074_v17, 7  ;;  %v1381_v39 = vld [vmem:[#allocation2 + $0x140] sm:$0x1]  ;;  %vm8079_vm3 = vmmov %vm8068_vm1 }
 0x235   : > { %1482 = vst [vmem:[#allocation2 + $0x134] sm:$0x8] %v1481_v29  ;;  %v6627_v57 = vpack.c.bf16 %v1247_v48, %v1247_v48  ;;  %v6634_v6 = vrot.slane %v8070_v32, 4  ;;  %v6645_v59 = vpack.c.bf16 %v1248_v36, %v1248_v36  ;;  %v1404_v54 = vsel %vm6142_vm14, 0, %v1403_v14  ;;  %v1910_v29 = vpop.permute.xlu0 %1909  ;;  %v6672_v45 = vpop.permute.xlu1 %1917  ;;  %v1366_v17 = vld [vmem:[#allocation2 + $0x108] sm:$0x11]  ;;  %vm8084_vm13 = vmmov %vm8068_vm1 }
 0x236   : > { %8065 = vst [vmem:[#allocation50_spill] sm:$0xff] %v6614_v38  ;;  %4238 = vmatmul.msk.bf16.gmra.mxu0 %vm8071_vm6, %v4095_v42  ;;  %v6641_v63 = vrot.slane %v8073_v28, 7  ;;  %v6663_v8 = vrot.slane %v8080_v19, 5  ;;  %v8081_v14 = vshll.u32 %v8046_v10, 16  ;;  %v1382_v32 = vsel %vm4813_vm10, 0, %v1381_v39  ;;  %vm8090_vm6 = vmmov %vm8068_vm1 }
 0x237   : > { %1491 = vst [vmem:[#allocation2 + $0x15c] sm:$0x88] %v1490_v0  ;;  %v7814_v41 = vshrl.u32 %v6627_v57, 16  ;;  %v6654_v0 = vpop.permute.xlu2 %2836  ;;  %v7811_v51 = vshrl.u32 %v6645_v59, 16  ;;  %2128 = vrot.lane.b32.xlu1 %v6634_v6, %s4503_s23  ;;  %v7812_v26 = vshll.u32 %v6627_v57, 16 }
 0x238   : > { %8067 = vst [vmem:[#allocation51_spill] sm:$0xff] %v6621_v22  ;;  %v1670_v42 = vrot.slane %v6641_v63, 4  ;;  %v1677_v36 = vor.u32 %v8081_v14, %v1674_v24  ;;  %v6686_v28 = vsel %vm5005_vm9, %v2120_v11, %v6663_v8  ;;  %v8085_v11 = vshrl.u32 %v5699_v30, 16 }
 0x239   : > { %1832 = vst.msk [vmem:[#allocation2 + $0x15c] sm:$0xf] %vm8068_vm1, %v6608_v21  ;;  %v1833_v12 = vld [vmem:[#allocation2 + $0x168] sm:$0xf]  ;;  %v2282_v13 = vrot.slane %v7814_v41, 7  ;;  %v2290_v24 = vrot.slane %v7811_v51, 7 }
 0x23a   : > { %8069 = vst [vmem:[#allocation52_spill] sm:$0xff] %v6627_v57  ;;  %v1834_v58 = vsel %vm5944_vm11, %v6621_v22, %v1833_v12  ;;  %v6701_v39 = vrot.slane %v8085_v11, 7  ;;  %v1477_v11 = vld [vmem:[#allocation2 + $0x12c] sm:$0x88]  ;;  %v8100_v21 = vld [vmem:[#allocation10_spill] sm:$0xff] }
 0x23b   : > { %3013 = vst.msk [vmem:[#allocation2 + $0x128] sm:$0xf] %vm8072_vm2, %v6614_v38  ;;  %v2286_v12 = vrot.slane %v2282_v13, 4  ;;  %v6693_v19 = vor.u32 %v7812_v26, %v2282_v13  ;;  %v6709_v13 = vsel %vm6155_vm5, %v1670_v42, %v1677_v36  ;;  %v4283_v26 = vld [vmem:[#allocation2 + $0x118] sm:$0xf0]  ;;  %vm8098_vm2 = vmmov %vm8068_vm1  ;;  %2136 = vrot.lane.b32.xlu2 %v8100_v21, %s4503_s23 }
 0x23c   : > { %8075 = vst [vmem:[#allocation53_spill] sm:$0xff] %v6645_v59  ;;  %v3014_v48 = vld [vmem:[#allocation2 + $0x134] sm:$0xf]  ;;  %v1686_v42 = vrot.slane %v6701_v39, 4 }
 0x23d   : > { %8076 = vst [vmem:[#allocation54_spill] sm:$0xff] %v6647_v52 }
 0x23e   : > { %2487 = vst.msk [vmem:[#allocation2 + $0x160] sm:$0xf] %vm8077_vm8, %v5901_v33  ;;  %vm8101_vm8 = vcmask 261120  }
 0x23f   : > { %1300 = vst [vmem:[#allocation2] sm:$0x11] %v1299_v16  ;;  %v3015_v16 = vsel %vm5038_vm12, %v6647_v52, %v3014_v48  ;;  %v8086_v48 = vld [vmem:[#allocation25_spill] sm:$0xff]  ;;  %v6717_v51 = vpop.permute.xlu2 %2838 }
 0x240   : > { %2458 = vst.msk [vmem:[#allocation2 + $0x4] sm:$0xf] %vm8079_vm3, %v8078_v44  ;;  %v8087_v14 = vshrl.u32 %v8086_v48, 16  ;;  %v8091_v36 = vshll.u32 %v8086_v48, 16  ;;  %vm8102_vm3 = vmmov %vm8068_vm1 }
 0x241   : > { %1835 = vst [vmem:[#allocation2 + $0x168] sm:$0xf] %v1834_v58  ;;  %v7813_v58 = vshll.u32 %v6645_v59, 16 }
 0x242   : > { %1405 = vst [vmem:[#allocation2 + $0xc] sm:$0x88] %v1404_v54  ;;  %v1472_v54 = vsel %vm6142_vm14, 0, %v1471_v27  ;;  %v1367_v27 = vsel %vm5842_vm15, 0, %v1366_v17 }
 0x243   : > { %8082 = vst [vmem:[#allocation7_spill] sm:$0xff] %v6686_v28 }
 0x244   : > { %3016 = vst [vmem:[#allocation2 + $0x134] sm:$0xf] %v3015_v16  ;;  %v1690_v16 = vrot.slane %v8087_v14, 7  ;;  %v4106_v14 = vld [vmem:[#allocation2 + $0x110] sm:$0xf] }
 0x245   : > { %8083 = vst [vmem:[#allocation55_spill] sm:$0xff] %v6693_v19  ;;  %v8094_v19 = vld [vmem:[#allocation32_spill] sm:$0xff] }
 0x246   : > { %2459 = vst.msk [vmem:[#allocation2 + $0x10] sm:$0xf] %vm8084_vm13, %v5076_v7  ;;  %v2293_v7 = vor.u32 %v7813_v58, %v2290_v24  ;;  %v1693_v24 = vor.u32 %v8091_v36, %v1690_v16  ;;  %v8092_v58 = vld [vmem:[#allocation33_spill] sm:$0xff]  ;;  %v8095_v40 = vshrl.u32 %v8094_v19, 16  ;;  %v1924_v16 = vpop.permute.xlu1 %1923  ;;  %v4107_v36 = vor.u32 %v4283_v26, %v4106_v14  ;;  %vm8104_vm13 = vmmov %vm8068_vm1 }
 0x247   : > { %1383 = vst [vmem:[#allocation2 + $0x140] sm:$0x1] %v1382_v32  ;;  %v8093_v17 = vshrl.u32 %v8092_v58, 16  ;;  %v6758_v26 = vpop.permute.xlu2 %2848 }
 0x248   : > { %3017 = vst.msk [vmem:[#allocation2 + $0x140] sm:$0xf] %vm8068_vm1, %v6686_v28  ;;  %v6721_v32 = vsel %vm6155_vm5, %v2286_v12, %v2293_v7  ;;  %v1706_v22 = vrot.slane %v8095_v40, 7  ;;  %v6736_v12 = vpop.permute.xlu0 %1915  ;;  %v8097_v7 = vld [vmem:[#allocation16_spill] sm:$0xff]  ;;  %v6748_v40 = vsel %vm6155_vm5, %v1686_v42, %v1693_v24  ;;  %4239 = vmatmul.msk.bf16.gmra.mxu0 %vm8101_vm8, %v4107_v36  ;;  %v8107_v24 = vld [vmem:[#allocation22_spill] sm:$0xff] }
 0x249   : > { %8088 = vst [vmem:[#allocation25_spill] sm:$0xff] %v6717_v51  ;;  %v6730_v41 = vrot.slane %v8093_v17, 7  ;;  %2140 = vrot.lane.b32.xlu1 %v8097_v7, %s4503_s23  ;;  %v1478_v17 = vsel %vm6142_vm14, 0, %v1477_v11  ;;  %v8106_v42 = vld [vmem:[#allocation20_spill] sm:$0xff] }
 0x24a   : > { %1473 = vst [vmem:[#allocation2 + $0x114] sm:$0x88] %v1472_v54  ;;  %v8096_v54 = vld [vmem:[#allocation12_spill] sm:$0xff] }
 0x24b   : > { %8089 = vst [vmem:[#allocation56_spill] sm:$0xff] %v6721_v32  ;;  %2132 = vrot.lane.b32.xlu0 %v8096_v54, %s4503_s23  ;;  %v1483_v32 = vld [vmem:[#allocation2 + $0x144] sm:$0x88]  ;;  %v1702_v7 = vrot.slane %v6730_v41, 4 }
 0x24c   : > { %1820 = vst.msk [vmem:[#allocation2 + $0x114] sm:$0xf] %vm8090_vm6, %v6709_v13  ;;  %vm8118_vm6 = vmmov %vm8068_vm1 }
 0x24d   : > { %1979 = vst.msk [vmem:[#allocation2 + $0x114] sm:$0xf] %vm1957_vm0, %v1910_v29  ;;  %v8099_v29 = vshll.u32 %v8094_v19, 16 }
 0x24e   : > { %2481 = vst.msk [vmem:[#allocation2 + $0x118] sm:$0xf] %vm8098_vm2, %v8086_v48  ;;  %vm8123_vm2 = vmmov %vm8101_vm8 }
 0x24f   : > { %1368 = vst [vmem:[#allocation2 + $0x108] sm:$0x11] %v1367_v27  ;;  %v1709_v51 = vor.u32 %v8099_v29, %v1706_v22  ;;  %v8103_v27 = vshll.u32 %v5568_v9, 16  ;;  %v1484_v22 = vsel %vm6142_vm14, 0, %v1483_v32  ;;  %vm8110_vm14 = vmmov %vm8068_vm1  ;;  %v6799_v29 = vpop.permute.xlu2 %2315 }
 0x250   : > { %1986 = vst.msk [vmem:[#allocation2 + $0x168] sm:$0xf] %vm1957_vm0, %v1924_v16  ;;  %v1922_v32 = vpop.permute.xlu0 %1921  ;;  %v6783_v16 = vpop.permute.xlu1 %2834  ;;  %vm8125_vm8 = vmmov %vm8068_vm1 }
 0x251   : > { %2480 = vst.msk [vmem:[#allocation2 + $0x10c] sm:$0xf] %vm8102_vm3, %v5699_v30  ;;  %v6763_v11 = vor.u32 %v8103_v27, %v6641_v63  ;;  %v6773_v14 = vsel %vm6155_vm5, %v1702_v7, %v1709_v51  ;;  %2152 = vrot.lane.b32.xlu1 %v8107_v24, %s4503_s23  ;;  %v6781_v63 = vpop.f32.mrf.mxu0  ;;  %v1378_v51 = vld [vmem:[#allocation2 + $0x138] sm:$0x11]  ;;  %v8111_v7 = vld [vmem:[#allocation17_spill] sm:$0xff]  ;;  %vm8112_vm5 = vmmov %vm8068_vm1 }
 0x252   : > { %1479 = vst [vmem:[#allocation2 + $0x12c] sm:$0x88] %v1478_v17  ;;  %2148 = vrot.lane.b32.xlu2 %v8111_v7, %s4503_s23  ;;  %v1379_v17 = vsel %vm5842_vm15, 0, %v1378_v51  ;;  %v4118_v27 = vld [vmem:[#allocation2 + $0x128] sm:$0xf]  ;;  %vm8128_vm3 = vmmov %vm8068_vm1 }
 0x253   : > { %1824 = vst.msk [vmem:[#allocation2 + $0x12c] sm:$0xf] %vm8104_vm13, %v6748_v40  ;;  %2144 = vrot.lane.b32.xlu0 %v8106_v42, %s4503_s23  ;;  %vm2391_vm13 = vcmask 1044224  }
 0x254   : > { %1981 = vst.msk [vmem:[#allocation2 + $0x12c] sm:$0xf] %vm1957_vm0, %v6342_v55  ;;  %v1372_v55 = vld [vmem:[#allocation2 + $0x120] sm:$0x11] }
 0x255   : > { %8105 = vst [vmem:[#allocation33_spill] sm:$0xff] %v6773_v14  ;;  %v1373_v36 = vsel %vm5842_vm15, 0, %v1372_v55  ;;  %vm8117_vm15 = vmmov %vm8068_vm1 }
 0x256   : > { %2483 = vst.msk [vmem:[#allocation2 + $0x130] sm:$0xf] %vm8068_vm1, %v8094_v19  ;;  %v1817_v4 = vld [vmem:[#allocation2 + $0x108] sm:$0xf] }
 0x257   : > { %8108 = vst [vmem:[#allocation32_spill] sm:$0xff] %v6781_v63  ;;  %v1818_v62 = vsel %vm5944_vm11, %v6763_v11, %v1817_v4  ;;  %v4286_v4 = vld [vmem:[#allocation2 + $0x130] sm:$0xf0] }
 0x258   : > { %1485 = vst [vmem:[#allocation2 + $0x144] sm:$0x88] %v1484_v22  ;;  %v1486_v22 = vld [vmem:[#allocation2 + $0x14c] sm:$0x8]  ;;  %v4119_v15 = vor.u32 %v4286_v4, %v4118_v27  ;;  %v8122_v27 = vld [vmem:[#allocation43_spill] sm:$0xff] }
 0x259   : > { %8109 = vst [vmem:[#allocation12_spill] sm:$0xff] %v6783_v16  ;;  %2164 = vrot.lane.b32.xlu1 %v6260_v46, %s4503_s23  ;;  %v1487_v63 = vsel %vm4795_vm7, 0, %v1486_v22  ;;  %v4303_v16 = vld [vmem:[%s7684_s4 + $0x38] sm:$0xff]  ;;  %v8120_v22 = vshrl.u32 %v6645_v59, 16 }
 0x25a   : > { %1828 = vst.msk [vmem:[#allocation2 + $0x144] sm:$0xf] %vm8110_vm14, %v6773_v14  ;;  %v6832_v14 = vpop.f32.mrf.mxu0  ;;  %2160 = vrot.lane.b32.xlu2 %v8122_v27, %s4503_s23  ;;  %4240 = vmatmul.msk.bf16.gmra.mxu0 %vm8123_vm2, %v4119_v15  ;;  %v6849_v15 = vpop.permute.xlu2 %2681 }
 0x25b   : > { %1985 = vst.msk [vmem:[#allocation2 + $0x15c] sm:$0xf] %vm1957_vm0, %v1922_v32  ;;  %v8113_v32 = vshrl.u32 %v6627_v57, 16  ;;  %2156 = vrot.lane.b32.xlu0 %v8115_v61, %s4503_s23  ;;  %v2496_v37 = vrot.slane %v8120_v22, 4  ;;  %3525 = vmatpush.bf16.msrb.mxu1 %v4303_v16 }
 0x25c   : > { %1819 = vst [vmem:[#allocation2 + $0x108] sm:$0xf] %v1818_v62  ;;  %v8114_v62 = vshll.u32 %v6627_v57, 16  ;;  %4314 = vmatpush.bf16.msra.mxu2 %v4303_v16 }
 0x25d   : > { %1978 = vst.msk [vmem:[#allocation2 + $0x108] sm:$0xf] %vm1957_vm0, %v6281_v1  ;;  %v2490_v1 = vrot.slane %v8113_v32, 4  ;;  %v1492_v32 = vld [vmem:[#allocation2 + $0x164] sm:$0x8] }
 0x25e   : > { %1983 = vst.msk [vmem:[#allocation2 + $0x144] sm:$0xf] %vm1957_vm0, %v6672_v45  ;;  %v2491_v55 = vrot.slane %v8114_v62, 5  ;;  %v8116_v45 = vshrl.u32 %v5901_v33, 16  ;;  %v6821_v62 = vpop.permute.xlu1 %2844 }
 0x25f   : > { %2485 = vst.msk [vmem:[#allocation2 + $0x148] sm:$0xf] %vm8112_vm5, %v8045_v34  ;;  %v6819_v34 = vpop.permute.xlu0 %2832 }
 0x260   : > { %1374 = vst [vmem:[#allocation2 + $0x120] sm:$0x11] %v1373_v36  ;;  %v2123_v51 = vrot.slane %v8116_v45, 4  ;;  %v1387_v36 = vld [vmem:[#allocation2 + $0x158] sm:$0x1]  ;;  %v8119_v45 = vshll.u32 %v6645_v59, 16  ;;  %v2492_v21 = vor.u32 %v2491_v55, %v2490_v1 }
 0x261   : > { %2482 = vst.msk [vmem:[#allocation2 + $0x124] sm:$0xf] %vm8117_vm15, %v8092_v58  ;;  %v1388_v1 = vsel %vm4813_vm10, 0, %v1387_v36  ;;  %v4302_v36 = vld [vmem:[%s7684_s4 + $0x30] sm:$0xff] }
 0x262   : > { %1380 = vst [vmem:[#allocation2 + $0x138] sm:$0x11] %v1379_v17  ;;  %v2494_v33 = vrot.slane %v8119_v45, 5  ;;  %v8124_v17 = vshll.u32 %v5699_v30, 16  ;;  %v1493_v45 = vsel %vm4795_vm7, 0, %v1492_v32  ;;  %v2493_v16 = vrot.slane %v2492_v21, 4  ;;  %3526 = vmatpush.bf16.msrb.mxu1 %v4302_v36  ;;  %4315 = vmatpush.bf16.msra.mxu2 %v4302_v36  ;;  %v6895_v43 = vpop.permute.xlu2 %2299 }
 0x263   : > { %2484 = vst.msk [vmem:[#allocation2 + $0x13c] sm:$0xf] %vm8118_vm6, %v5759_v25  ;;  %v2124_v25 = vor.u32 %v2123_v51, %v6663_v8  ;;  %v8129_v51 = vld [vmem:[#allocation31_spill] sm:$0xff]  ;;  %v8130_v32 = vld [vmem:[#allocation34_spill] sm:$0xff] }
 0x264   : > { %8121 = vst [vmem:[#allocation20_spill] sm:$0xff] %v6832_v14  ;;  %v6840_v4 = vor.u32 %v8124_v17, %v6701_v39  ;;  %v8127_v39 = vshll.u32 %v8092_v58, 16  ;;  %2168 = vrot.lane.b32.xlu0 %v8129_v51, %s4503_s23  ;;  %2176 = vrot.lane.b32.xlu1 %v8130_v32, %s4503_s23  ;;  %v4300_v36 = vld [vmem:[%s7684_s4 + $0x20] sm:$0xff] }
 0x265   : > { %1488 = vst [vmem:[#allocation2 + $0x14c] sm:$0x8] %v1487_v63  ;;  %v2497_v63 = vor.u32 %v2496_v37, %v2494_v33  ;;  %v6868_v22 = vrot.slane %v2124_v25, 4 }
 0x266   : > { %2488 = vst.msk [vmem:[#allocation2 + $0x16c] sm:$0xf] %vm8125_vm8, %v6627_v57  ;;  %v6854_v55 = vor.u32 %v8127_v39, %v6730_v41  ;;  %v6872_v17 = vpop.permute.xlu1 %2846  ;;  %vm8210_vm8 = vmmov %vm8123_vm2 }
 0x267   : > { %8126 = vst [vmem:[#allocation22_spill] sm:$0xff] %v6849_v15  ;;  %v1821_v8 = vld [vmem:[#allocation2 + $0x120] sm:$0xf]  ;;  %v6870_v21 = vpop.permute.xlu0 %2840  ;;  %v6882_v39 = vrot.slane %v2497_v63, 4 }
 0x268   : > { %2489 = vst.msk [vmem:[#allocation2 + $0x178] sm:$0xf] %vm8128_vm3, %v6645_v59  ;;  %v1822_v41 = vsel %vm5944_vm11, %v6840_v4, %v1821_v8  ;;  %v6886_v8 = vsel %vm5005_vm9, %v2493_v16, %v2494_v33  ;;  %v2393_v16 = vld [vmem:[#allocation2] sm:$0xf] }
 0x269   : > { %1494 = vst [vmem:[#allocation2 + $0x164] sm:$0x8] %v1493_v45  ;;  %v1825_v37 = vld [vmem:[#allocation2 + $0x138] sm:$0xf]  ;;  %v4301_v45 = vld [vmem:[%s7684_s4 + $0x28] sm:$0xff] }
 0x26a   : > { %8131 = vst [vmem:[#allocation17_spill] sm:$0xff] %v6868_v22  ;;  %v1826_v25 = vsel %vm5944_vm11, %v6854_v55, %v1825_v37  ;;  %3527 = vmatpush.bf16.msrb.mxu1 %v4301_v45  ;;  %4316 = vmatpush.bf16.msra.mxu2 %v4301_v45  ;;  %vm8135_vm11 = vmmov %vm8068_vm1  ;;  %v8139_v45 = vshll.u32 %v8078_v44, 16 }
 0x26b   : > { %1389 = vst [vmem:[#allocation2 + $0x158] sm:$0x1] %v1388_v1  ;;  %vm6908_vm1 = vmand %vm2391_vm13, %vm1775_vm4 }
 0x26c   : > { %1823 = vst [vmem:[#allocation2 + $0x120] sm:$0xf] %v1822_v41  ;;  %v3018_v1 = vld [vmem:[#allocation2 + $0x14c] sm:$0xf]  ;;  %v8134_v41 = vld [vmem:[#allocation27_spill] sm:$0xff]  ;;  %2521 = vrot.lane.b32.xlu0 %v8111_v7, %s4501_s19  ;;  %2180 = vrot.lane.b32.xlu1 %v6647_v52, %s4503_s23  ;;  %v4299_v7 = vld [vmem:[%s7684_s4 + $0x18] sm:$0xff] }
 0x26d   : > { %1980 = vst.msk [vmem:[#allocation2 + $0x120] sm:$0xf] %vm1957_vm0, %v6580_v35  ;;  %2172 = vrot.lane.b32.xlu2 %v8134_v41, %s4503_s23  ;;  %v3019_v35 = vsel %vm5038_vm12, %v6868_v22, %v3018_v1 }
 0x26e   : > { %1827 = vst [vmem:[#allocation2 + $0x138] sm:$0xf] %v1826_v25  ;;  %v2296_v37 = vpop.permute.xlu1 %2295  ;;  %3528 = vmatpush.bf16.msrb.mxu1 %v4300_v36  ;;  %4317 = vmatpush.bf16.msra.mxu2 %v4300_v36  ;;  %v1992_v25 = vrot.slane %v8139_v45, 5 }
 0x26f   : > { %8132 = vst [vmem:[#allocation41_spill] sm:$0xff] %v6882_v39  ;;  %v6915_v2 = vpop.permute.xlu0 %2842  ;;  %v2394_v1 = vsel %vm6908_vm1, %v2296_v37, %v2393_v16 }
 0x270   : > { %8133 = vst [vmem:[#allocation43_spill] sm:$0xff] %v6886_v8  ;;  %v3022_v63 = vld [vmem:[#allocation2 + $0x164] sm:$0xf] }
 0x271   : > { %1982 = vst.msk [vmem:[#allocation2 + $0x138] sm:$0xf] %vm1957_vm0, %v6736_v12  ;;  %v3023_v33 = vsel %vm5038_vm12, %v6882_v39, %v3022_v63  ;;  %vm8154_vm12 = vsmask.f32 3328 }
 0x272   : > { %3020 = vst [vmem:[#allocation2 + $0x14c] sm:$0xf] %v3019_v35  ;;  %v8140_v35 = vshrl.u32 %v8078_v44, 16  ;;  %3529 = vmatpush.bf16.msrb.mxu1 %v4299_v7  ;;  %4318 = vmatpush.bf16.msra.mxu2 %v4299_v7  ;;  %v4298_v44 = vld [vmem:[%s7684_s4 + $0x10] sm:$0xff]  ;;  %vm8157_vm5 = vmmov %vm8154_vm12 }
 0x273   : > { %3021 = vst.msk [vmem:[#allocation2 + $0x158] sm:$0xf] %vm8135_vm11, %v6886_v8  ;;  %v8151_v8 = vld [vmem:[#allocation30_spill] sm:$0xff]  ;;  %vm7081_vm15 = vmand %vm1957_vm0, %vm8157_vm5 }
 0x274   : > { %3024 = vst [vmem:[#allocation2 + $0x164] sm:$0xf] %v3023_v33  ;;  %v1991_v63 = vrot.slane %v8140_v35, 4  ;;  %v6928_v33 = vpop.permute.xlu2 %2327  ;;  %2533 = vrot.lane.b32.xlu0 %v8122_v27, %s4501_s19  ;;  %2517 = vrot.lane.b32.xlu1 %v8106_v42, %s4501_s19  ;;  %v8141_v27 = vld [vmem:[#allocation11_spill] sm:$0xff] }
 0x275   : > { %8138 = vst [vmem:[#allocation31_spill] sm:$0xff] %v6915_v2  ;;  %2529 = vrot.lane.b32.xlu2 %v8115_v61, %s4501_s19  ;;  %v4297_v61 = vld [vmem:[%s7684_s4 + $0x8] sm:$0xff] }
 0x276   : > { %2395 = vst [vmem:[#allocation2] sm:$0xf] %v2394_v1  ;;  %v1993_v47 = vor.u32 %v1992_v25, %v1991_v63  ;;  %v6939_v36 = vpop.permute.xlu1 %2323  ;;  %3530 = vmatpush.bf16.msrb.mxu1 %v4298_v44  ;;  %4319 = vmatpush.bf16.msra.mxu2 %v4298_v44  ;;  %v8145_v1 = vld [vmem:[#allocation21_spill] sm:$0xff]  ;;  %v8147_v44 = vld [vmem:[#allocation40_spill] sm:$0xff] }
 0x277   : > { %v6937_v16 = vpop.permute.xlu0 %2311 }
 0x278   : > { %v1994_v37 = vrot.slane %v1993_v47, 4  ;;  %v4296_v47 = vld [vmem:[%s7684_s4] sm:$0xff] }
 0x27a   : > { %3531 = vmatpush.bf16.msrb.mxu1 %v4297_v61  ;;  %4320 = vmatpush.bf16.msra.mxu2 %v4297_v61  ;;  %v6951_v42 = vsel %vm5005_vm9, %v1994_v37, %v6498_v31  ;;  %v8148_v37 = vld [vmem:[#allocation24_spill] sm:$0xff]  ;;  %vm2216_vm9 = vcmask 781824  }
 0x27b   : > { %vm7019_vm14 = vmand %vm2216_vm9, %vm8154_vm12 }
 0x27c   : > { %v6946_v7 = vpop.permute.xlu2 %2693  ;;  %2126 = vrot.lane.b32.xlu0 %v6951_v42, %s4503_s23  ;;  %2525 = vrot.lane.b32.xlu1 %v8107_v24, %s4501_s19  ;;  %v8146_v24 = vld [vmem:[#allocation9_spill] sm:$0xff]  ;;  %vm7227_vm6 = vmand %vm2216_vm9, %vm1775_vm4  ;;  %vm3824_vm4 = vcmask 519168  }
 0x27d   : > { %2130 = vrot.lane.b32.xlu2 %v8141_v27, %s4503_s23  ;;  %v3966_v39 = vld [vmem:[#allocation2] sm:$0xf] }
 0x27e   : > { %v6962_v25 = vpop.permute.xlu1 %2689  ;;  %3532 = vmatpush.bf16.msrb.mxu1 %v4296_v47  ;;  %4321 = vmatpush.bf16.msra.mxu2 %v4296_v47  ;;  %v8149_v47 = vld [vmem:[#allocation23_spill] sm:$0xff] }
 0x27f   : > { %v6960_v45 = vpop.permute.xlu0 %2677  ;;  %8143 = vst [vmem:[#allocation11_spill] sm:$0xff] %v6962_v25  ;;  %v8153_v25 = vld [vmem:[#allocation35_spill] sm:$0xff] }
 0x280   : > { %8142 = vst [vmem:[#allocation27_spill] sm:$0xff] %v6960_v45  ;;  %v2240_v45 = vld [vmem:[#allocation2 + $0x9c] sm:$0xf] }
 0x284   : > { %v6966_v31 = vpop.permute.xlu2 %2313  ;;  %2138 = vrot.lane.b32.xlu0 %v8145_v1, %s4503_s23  ;;  %2134 = vrot.lane.b32.xlu1 %v8146_v24, %s4503_s23 }
 0x285   : > { %2142 = vrot.lane.b32.xlu2 %v8144_v5, %s4503_s23 }
 0x286   : > { %v6974_v63 = vpop.permute.xlu1 %2307 }
 0x287   : > { %v6972_v35 = vpop.permute.xlu0 %2319 }
 0x28c   : > { %v2298_v61 = vpop.permute.xlu2 %2297  ;;  %2150 = vrot.lane.b32.xlu0 %v8148_v37, %s4503_s23  ;;  %2146 = vrot.lane.b32.xlu1 %v8149_v47, %s4503_s23 }
 0x28d   : > { %2154 = vrot.lane.b32.xlu2 %v8147_v44, %s4503_s23  ;;  %2397 = vst.msk [vmem:[#allocation2 + $0xc] sm:$0xf] %vm2391_vm13, %v2298_v61  ;;  %v8152_v61 = vld [vmem:[#allocation42_spill] sm:$0xff] }
 0x28e   : > { %v6985_v14 = vpop.permute.xlu1 %2679 }
 0x28f   : > { %v6983_v23 = vpop.permute.xlu0 %2685 }
 0x290   : > { %8150 = vst [vmem:[#allocation19_spill] sm:$0xff] %v6983_v23 }
 0x294   : > { %v2322_v57 = vpop.permute.xlu2 %2321  ;;  %v4249_v59 = vld [vmem:[#allocation2 + $0x8] sm:$0xf0]  ;;  %2162 = vrot.lane.b32.xlu0 %v6232_v56, %s4503_s23  ;;  %2158 = vrot.lane.b32.xlu1 %v8152_v61, %s4503_s23 }
 0x295   : > { %2166 = vrot.lane.b32.xlu2 %v8151_v8, %s4503_s23  ;;  %v3967_v22 = vor.u32 %v4249_v59, %v3966_v39 }
 0x296   : > { %v6995_v1 = vpop.permute.xlu1 %2317 }
 0x297   : > { %3533 = vmatmul.bf16.vlgmr.msrb.gmra.mxu1 %v3967_v22  ;;  %v6993_v52 = vpop.permute.xlu0 %2303 }
 0x29c   : > { %v6999_v2 = vpop.permute.xlu2 %2691  ;;  %2174 = vrot.lane.b32.xlu0 %v8153_v25, %s4503_s23  ;;  %2170 = vrot.lane.b32.xlu1 %v6510_v18, %s4503_s23 }
 0x29d   : > { %2178 = vrot.lane.b32.xlu2 %v6614_v38, %s4503_s23 }
 0x29e   : > { %v7007_v39 = vpop.permute.xlu1 %2687 }
 0x29f   : > { %v7005_v59 = vpop.permute.xlu0 %2683 }
 0x2a4   : > { %v2310_v22 = vpop.permute.xlu2 %2309  ;;  %2515 = vrot.lane.b32.xlu0 %v8144_v5, %s4501_s19  ;;  %2519 = vrot.lane.b32.xlu1 %v8149_v47, %s4501_s19  ;;  %v2228_v5 = vld [vmem:[#allocation2 + $0x54] sm:$0xf] }
 0x2a5   : > { %2182 = vrot.lane.b32.xlu2 %v6686_v28, %s4503_s23 }
 0x2a6   : > { %v2306_v23 = vpop.permute.xlu1 %2305 }
 0x2a7   : > { %v2302_v38 = vpop.permute.xlu0 %2301 }
 0x2ac   : > { %v2137_v28 = vpop.permute.xlu2 %2136  ;;  %2523 = vrot.lane.b32.xlu0 %v8148_v37, %s4501_s19  ;;  %2527 = vrot.lane.b32.xlu1 %v8147_v44, %s4501_s19  ;;  %v2220_v37 = vld [vmem:[#allocation2 + $0x24] sm:$0xf] }
 0x2ad   : > { %2531 = vrot.lane.b32.xlu2 %v8152_v61, %s4501_s19  ;;  %v2229_v47 = vsel %vm7019_vm14, %v2137_v28, %v2228_v5  ;;  %v2232_v5 = vld [vmem:[#allocation2 + $0x6c] sm:$0xf] }
 0x2ae   : > { %2230 = vst [vmem:[#allocation2 + $0x54] sm:$0xf] %v2229_v47  ;;  %v7034_v15 = vpop.permute.xlu1 %2329 }
 0x2af   : > { %2409 = vst.msk [vmem:[#allocation2 + $0x54] sm:$0xf] %vm2391_vm13, %v2310_v22  ;;  %v2326_v61 = vpop.permute.xlu0 %2325 }
 0x2b4   : > { %v2149_v25 = vpop.permute.xlu2 %2148  ;;  %2535 = vrot.lane.b32.xlu0 %v6232_v56, %s4501_s19  ;;  %2537 = vrot.lane.b32.xlu1 %v6260_v46, %s4501_s19  ;;  %v2252_v56 = vld [vmem:[#allocation2 + $0xe4] sm:$0xf] }
 0x2b5   : > { %2333 = vrot.lane.b32.xlu2 %v6457_v60, %s4502_s20  ;;  %v2241_v28 = vsel %vm7019_vm14, %v2149_v25, %v2240_v45 }
 0x2b6   : > { %2242 = vst [vmem:[#allocation2 + $0x9c] sm:$0xf] %v2241_v28  ;;  %v2129_v22 = vpop.permute.xlu1 %2128 }
 0x2b7   : > { %2421 = vst.msk [vmem:[#allocation2 + $0x9c] sm:$0xf] %vm2391_vm13, %v2322_v57  ;;  %v7045_v44 = vpop.permute.xlu0 %2695  ;;  %v2221_v60 = vsel %vm7019_vm14, %v2129_v22, %v2220_v37  ;;  %v2224_v57 = vld [vmem:[#allocation2 + $0x3c] sm:$0xf] }
 0x2b8   : > { %2222 = vst [vmem:[#allocation2 + $0x24] sm:$0xf] %v2221_v60  ;;  %v2236_v60 = vld [vmem:[#allocation2 + $0x84] sm:$0xf] }
 0x2b9   : > { %2401 = vst.msk [vmem:[#allocation2 + $0x24] sm:$0xf] %vm2391_vm13, %v2302_v38 }
 0x2bc   : > { %v2161_v45 = vpop.permute.xlu2 %2160  ;;  %2331 = vrot.lane.b32.xlu0 %v6250_v20, %s4502_s20  ;;  %2697 = vrot.lane.b32.xlu1 %v6763_v11, %s4503_s23  ;;  %v2264_v20 = vld [vmem:[#allocation2 + $0x12c] sm:$0xf] }
 0x2bd   : > { %2699 = vrot.lane.b32.xlu2 %v6709_v13, %s4503_s23  ;;  %v2253_v46 = vsel %vm7019_vm14, %v2161_v45, %v2252_v56  ;;  %v2244_v56 = vld [vmem:[#allocation2 + $0xb4] sm:$0xf] }
 0x2be   : > { %2254 = vst [vmem:[#allocation2 + $0xe4] sm:$0xf] %v2253_v46  ;;  %v2141_v47 = vpop.permute.xlu1 %2140 }
 0x2bf   : > { %v2133_v25 = vpop.permute.xlu0 %2132  ;;  %v2233_v38 = vsel %vm7019_vm14, %v2141_v47, %v2232_v5  ;;  %v2268_v47 = vld [vmem:[#allocation2 + $0x144] sm:$0xf] }
 0x2c0   : > { %v2225_v28 = vsel %vm7019_vm14, %v2133_v25, %v2224_v57  ;;  %2234 = vst [vmem:[#allocation2 + $0x6c] sm:$0xf] %v2233_v38  ;;  %v2256_v25 = vld [vmem:[#allocation2 + $0xfc] sm:$0xf] }
 0x2c1   : > { %2226 = vst [vmem:[#allocation2 + $0x3c] sm:$0xf] %v2225_v28 }
 0x2c2   : > { %2405 = vst.msk [vmem:[#allocation2 + $0x3c] sm:$0xf] %vm2391_vm13, %v2306_v23 }
 0x2c3   : > { %2413 = vst.msk [vmem:[#allocation2 + $0x6c] sm:$0xf] %vm2391_vm13, %v6966_v31 }
 0x2c4   : > { %2499 = vrot.lane.b32.xlu0 %v6951_v42, %s4501_s19  ;;  %2852 = vrot.lane.b32.xlu1 %v8046_v10, %s4502_s20  ;;  %v2626_v10 = vld [vmem:[#allocation2 + $0xb8] sm:$0xf] }
 0x2c5   : > { %2501 = vrot.lane.b32.xlu2 %v6634_v6, %s4501_s19 }
 0x2c6   : > { %v2153_v23 = vpop.permute.xlu1 %2152 }
 0x2c7   : > { %v2173_v37 = vpop.permute.xlu2 %2172  ;;  %v2145_v6 = vpop.permute.xlu0 %2144  ;;  %v2245_v31 = vsel %vm7019_vm14, %v2153_v23, %v2244_v56 }
 0x2c8   : > { %v2265_v22 = vsel %vm7019_vm14, %v2173_v37, %v2264_v20  ;;  %v2237_v45 = vsel %vm7019_vm14, %v2145_v6, %v2236_v60  ;;  %2246 = vst [vmem:[#allocation2 + $0xb4] sm:$0xf] %v2245_v31  ;;  %v8160_v20 = vld [vmem:[#allocation6_spill] sm:$0xff]  ;;  %v2618_v37 = vld [vmem:[#allocation2 + $0x88] sm:$0xf] }
 0x2c9   : > { %2266 = vst [vmem:[#allocation2 + $0x12c] sm:$0xf] %v2265_v22  ;;  %v2272_v6 = vld [vmem:[#allocation2 + $0x15c] sm:$0xf]  ;;  %v2614_v31 = vld [vmem:[#allocation2 + $0x70] sm:$0xf] }
 0x2ca   : > { %2238 = vst [vmem:[#allocation2 + $0x84] sm:$0xf] %v2237_v45 }
 0x2cb   : > { %2417 = vst.msk [vmem:[#allocation2 + $0x84] sm:$0xf] %vm2391_vm13, %v6995_v1 }
 0x2cc   : > { %2425 = vst.msk [vmem:[#allocation2 + $0xb4] sm:$0xf] %vm2391_vm13, %v2326_v61  ;;  %2850 = vrot.lane.b32.xlu0 %v5568_v9, %s4502_s20  ;;  %2661 = vrot.lane.b32.xlu1 %v6124_v49, %s4503_s23 }
 0x2cd   : > { %2663 = vrot.lane.b32.xlu2 %v6308_v50, %s4503_s23  ;;  %v2248_v50 = vld [vmem:[#allocation2 + $0xcc] sm:$0xf] }
 0x2ce   : > { %v2165_v61 = vpop.permute.xlu1 %2164 }
 0x2cf   : > { %v2530_v46 = vpop.permute.xlu2 %2529  ;;  %v2157_v1 = vpop.permute.xlu0 %2156  ;;  %v2257_v9 = vsel %vm7019_vm14, %v2165_v61, %v2256_v25 }
 0x2d0   : > { %v2627_v57 = vsel %vm7081_vm15, %v2530_v46, %v2626_v10  ;;  %v2249_v5 = vsel %vm7019_vm14, %v2157_v1, %v2248_v50  ;;  %2258 = vst [vmem:[#allocation2 + $0xfc] sm:$0xf] %v2257_v9  ;;  %v4311_v10 = vld [vmem:[%s7684_s4 + $0x78] sm:$0xff]  ;;  %v4309_v50 = vld [vmem:[%s7684_s4 + $0x68] sm:$0xff] }
 0x2d1   : > { %2628 = vst [vmem:[#allocation2 + $0xb8] sm:$0xf] %v2627_v57  ;;  %4322 = vmatpush.bf16.msra.mxu3 %v4311_v10  ;;  %3614 = vmatpush.bf16.msra.mxu1 %v4311_v10 }
 0x2d2   : > { %2783 = vst.msk [vmem:[#allocation2 + $0xb8] sm:$0xf] %vm2216_vm9, %v6999_v2 }
 0x2d3   : > { %2919 = vst.msk [vmem:[#allocation2 + $0xb8] sm:$0xf] %vm2391_vm13, %v6821_v62  ;;  %v2260_v62 = vld [vmem:[#allocation2 + $0x114] sm:$0xf] }
 0x2d4   : > { %2250 = vst [vmem:[#allocation2 + $0xcc] sm:$0xf] %v2249_v5  ;;  %2539 = vrot.lane.b32.xlu0 %v8151_v8, %s4501_s19  ;;  %2816 = vrot.lane.b32.xlu1 %v5017_v53, %s4502_s20 }
 0x2d5   : > { %2335 = vrot.lane.b32.xlu2 %v6763_v11, %s4502_s20  ;;  %2429 = vst.msk [vmem:[#allocation2 + $0xcc] sm:$0xf] %vm2391_vm13, %v7034_v15 }
 0x2d6   : > { %v2177_v28 = vpop.permute.xlu1 %2176 }
 0x2d7   : > { %v2131_v49 = vpop.permute.xlu2 %2130  ;;  %v2169_v2 = vpop.permute.xlu0 %2168  ;;  %v2269_v15 = vsel %vm7019_vm14, %v2177_v28, %v2268_v47  ;;  %v4307_v28 = vld [vmem:[%s7684_s4 + $0x58] sm:$0xff] }
 0x2d8   : > { %2223 = vst.msk [vmem:[#allocation2 + $0x30] sm:$0xf] %vm2216_vm9, %v2131_v49  ;;  %v2261_v11 = vsel %vm7019_vm14, %v2169_v2, %v2260_v62  ;;  %v4252_v49 = vld [vmem:[#allocation2 + $0x20] sm:$0xf0] }
 0x2d9   : > { %2262 = vst [vmem:[#allocation2 + $0x114] sm:$0xf] %v2261_v11  ;;  %v8163_v11 = vld [vmem:[#allocation8_spill] sm:$0xff] }
 0x2da   : > { %2270 = vst [vmem:[#allocation2 + $0x144] sm:$0xf] %v2269_v15 }
 0x2dc   : > { %2814 = vrot.lane.b32.xlu0 %v8160_v20, %s4502_s20  ;;  %2337 = vrot.lane.b32.xlu1 %v6709_v13, %s4502_s20  ;;  %v4261_v20 = vld [vmem:[#allocation2 + $0x68] sm:$0xf0] }
 0x2dd   : > { %2503 = vrot.lane.b32.xlu2 %v8141_v27, %s4501_s19 }
 0x2de   : > { %v2181_v60 = vpop.permute.xlu1 %2180 }
 0x2df   : > { %v2402_v38 = vld [vmem:[#allocation2 + $0x30] sm:$0xf]  ;;  %v2143_v8 = vpop.permute.xlu2 %2142  ;;  %v2522_v22 = vpop.permute.xlu0 %2521 }
 0x2e0   : > { %v2403_v53 = vsel %vm6908_vm1, %v6993_v52, %v2402_v38  ;;  %2235 = vst.msk [vmem:[#allocation2 + $0x78] sm:$0xf] %vm2216_vm9, %v2143_v8  ;;  %v2619_v27 = vsel %vm7081_vm15, %v2522_v22, %v2618_v37  ;;  %v2273_v52 = vsel %vm7019_vm14, %v2181_v60, %v2272_v6  ;;  %v4306_v60 = vld [vmem:[%s7684_s4 + $0x50] sm:$0xff] }
 0x2e1   : > { %2404 = vst [vmem:[#allocation2 + $0x30] sm:$0xf] %v2403_v53 }
 0x2e2   : > { %2620 = vst [vmem:[#allocation2 + $0x88] sm:$0xf] %v2619_v27 }
 0x2e3   : > { %2775 = vst.msk [vmem:[#allocation2 + $0x88] sm:$0xf] %vm2216_vm9, %v7005_v59 }
 0x2e4   : > { %2915 = vst.msk [vmem:[#allocation2 + $0x88] sm:$0xf] %vm2391_vm13, %v6654_v0  ;;  %2541 = vrot.lane.b32.xlu0 %v8129_v51, %s4501_s19  ;;  %2703 = vrot.lane.b32.xlu1 %v6748_v40, %s4503_s23 }
 0x2e5   : > { %2854 = vrot.lane.b32.xlu2 %v5699_v30, %s4502_s20  ;;  %2274 = vst [vmem:[#allocation2 + $0x15c] sm:$0xf] %v2273_v52  ;;  %v2630_v30 = vld [vmem:[#allocation2 + $0xd0] sm:$0xf] }
 0x2e6   : > { %v2518_v45 = vpop.permute.xlu1 %2517 }
 0x2e7   : > { %v2414_v13 = vld [vmem:[#allocation2 + $0x78] sm:$0xf]  ;;  %v2155_v56 = vpop.permute.xlu2 %2154  ;;  %v2534_v59 = vpop.permute.xlu0 %2533 }
 0x2e8   : > { %v2415_v23 = vsel %vm6908_vm1, %v6799_v29, %v2414_v13  ;;  %2247 = vst.msk [vmem:[#allocation2 + $0xc0] sm:$0xf] %vm2216_vm9, %v2155_v56  ;;  %v2631_v0 = vsel %vm7081_vm15, %v2534_v59, %v2630_v30  ;;  %v2615_v29 = vsel %vm7081_vm15, %v2518_v45, %v2614_v31  ;;  %v4255_v56 = vld [vmem:[#allocation2 + $0x38] sm:$0xf0]  ;;  %v8167_v30 = vld [vmem:[#allocation33_spill] sm:$0xff]  ;;  %v8168_v59 = vld [vmem:[#allocation35_spill] sm:$0xff] }
 0x2e9   : > { %2416 = vst [vmem:[#allocation2 + $0x78] sm:$0xf] %v2415_v23  ;;  %v4304_v23 = vld [vmem:[%s7684_s4 + $0x40] sm:$0xff] }
 0x2ea   : > { %2632 = vst [vmem:[#allocation2 + $0xd0] sm:$0xf] %v2631_v0  ;;  %v4490_v0 = vld [vmem:[%s7684_s4 + $0x88] sm:$0xff] }
 0x2eb   : > { %2787 = vst.msk [vmem:[#allocation2 + $0xd0] sm:$0xf] %vm2216_vm9, %v7045_v44  ;;  %v2622_v44 = vld [vmem:[#allocation2 + $0xa0] sm:$0xf] }
 0x2ec   : > { %2921 = vst.msk [vmem:[#allocation2 + $0xd0] sm:$0xf] %vm2391_vm13, %v6758_v26  ;;  %2701 = vrot.lane.b32.xlu0 %v6840_v4, %s4503_s23  ;;  %2505 = vrot.lane.b32.xlu1 %v8096_v54, %s4501_s19  ;;  %v4310_v54 = vld [vmem:[%s7684_s4 + $0x70] sm:$0xff] }
 0x2ed   : > { %2543 = vrot.lane.b32.xlu2 %v6510_v18, %s4501_s19  ;;  %2616 = vst [vmem:[#allocation2 + $0x70] sm:$0xf] %v2615_v29  ;;  %4323 = vmatpush.bf16.msra.mxu3 %v4310_v54 }
 0x2ee   : > { %2771 = vst.msk [vmem:[#allocation2 + $0x70] sm:$0xf] %vm2216_vm9, %v6985_v14  ;;  %v2526_v57 = vpop.permute.xlu1 %2525  ;;  %3615 = vmatpush.bf16.msra.mxu1 %v4310_v54  ;;  %v8171_v54 = vld [vmem:[#allocation15_spill] sm:$0xff] }
 0x2ef   : > { %v2167_v51 = vpop.permute.xlu2 %2166  ;;  %v2426_v46 = vld [vmem:[#allocation2 + $0xc0] sm:$0xf]  ;;  %2913 = vst.msk [vmem:[#allocation2 + $0x70] sm:$0xf] %vm2391_vm13, %v6819_v34  ;;  %v2127_v26 = vpop.permute.xlu0 %2126  ;;  %v2623_v14 = vsel %vm7081_vm15, %v2526_v57, %v2622_v44 }
 0x2f0   : > { %v2427_v18 = vsel %vm6908_vm1, %v6928_v33, %v2426_v46  ;;  %2217 = vst.msk [vmem:[#allocation2 + $0x18] sm:$0xf] %vm2216_vm9, %v2127_v26  ;;  %v8161_v33 = vld [vmem:[#allocation5_spill] sm:$0xff]  ;;  %v4026_v45 = vld [vmem:[#allocation2 + $0x78] sm:$0xf] }
 0x2f1   : > { %2428 = vst [vmem:[#allocation2 + $0xc0] sm:$0xf] %v2427_v18  ;;  %4324 = vmatpush.bf16.msra.mxu3 %v4309_v50  ;;  %v8169_v46 = vld [vmem:[#allocation14_spill] sm:$0xff]  ;;  %v4491_v18 = vld [vmem:[%s7684_s4 + $0x80] sm:$0xff]  ;;  %v2598_v26 = vld [vmem:[#allocation2 + $0x10] sm:$0xf] }
 0x2f2   : > { %2259 = vst.msk [vmem:[#allocation2 + $0x108] sm:$0xf] %vm2216_vm9, %v2167_v51  ;;  %3616 = vmatpush.bf16.msra.mxu1 %v4309_v50  ;;  %v4264_v51 = vld [vmem:[#allocation2 + $0x80] sm:$0xf0] }
 0x2f3   : > { %2624 = vst [vmem:[#allocation2 + $0xa0] sm:$0xf] %v2623_v14  ;;  %v4027_v10 = vor.u32 %v4264_v51, %v4026_v45  ;;  %v8170_v14 = vld [vmem:[#allocation10_spill] sm:$0xff]  ;;  %v8185_v45 = vld [vmem:[#allocation21_spill] sm:$0xff] }
 0x2f4   : > { %2779 = vst.msk [vmem:[#allocation2 + $0xa0] sm:$0xf] %vm2216_vm9, %v7007_v39  ;;  %2856 = vrot.lane.b32.xlu0 %v8086_v48, %s4502_s20  ;;  %2667 = vrot.lane.b32.xlu1 %v6413_v3, %s4503_s23  ;;  %v8162_v48 = vld [vmem:[#allocation46_spill] sm:$0xff] }
 0x2f5   : > { %2818 = vrot.lane.b32.xlu2 %v8161_v33, %s4502_s20  ;;  %2917 = vst.msk [vmem:[#allocation2 + $0xa0] sm:$0xf] %vm2391_vm13, %v6870_v21 }
 0x2f6   : > { %v2135_v25 = vpop.permute.xlu1 %2134 }
 0x2f7   : > { %v2179_v34 = vpop.permute.xlu2 %2178  ;;  %v2398_v1 = vld [vmem:[#allocation2 + $0x18] sm:$0xf]  ;;  %v2139_v39 = vpop.permute.xlu0 %2138  ;;  %2227 = vst.msk [vmem:[#allocation2 + $0x48] sm:$0xf] %vm2216_vm9, %v2135_v25 }
 0x2f8   : > { %2271 = vst.msk [vmem:[#allocation2 + $0x150] sm:$0xf] %vm2216_vm9, %v2179_v34  ;;  %v2399_v61 = vsel %vm6908_vm1, %v6895_v43, %v2398_v1 }
 0x2f9   : > { %2231 = vst.msk [vmem:[#allocation2 + $0x60] sm:$0xf] %vm2216_vm9, %v2139_v39  ;;  %v8172_v39 = vld [vmem:[#allocation27_spill] sm:$0xff] }
 0x2fa   : > { %2400 = vst [vmem:[#allocation2 + $0x18] sm:$0xf] %v2399_v61 }
 0x2fc   : > { %2665 = vrot.lane.b32.xlu0 %v8162_v48, %s4503_s23  ;;  %2339 = vrot.lane.b32.xlu1 %v6840_v4, %s4502_s20  ;;  %v8173_v48 = vld [vmem:[#allocation22_spill] sm:$0xff] }
 0x2fd   : > { %2545 = vrot.lane.b32.xlu2 %v8134_v41, %s4501_s19 }
 0x2fe   : > { %v2147_v43 = vpop.permute.xlu1 %2146  ;;  %v2406_v62 = vld [vmem:[#allocation2 + $0x48] sm:$0xf] }
 0x2ff   : > { %v2183_v3 = vpop.permute.xlu2 %2182  ;;  %v2151_v5 = vpop.permute.xlu0 %2150  ;;  %v2407_v4 = vsel %vm6908_vm1, %v6974_v63, %v2406_v62  ;;  %2239 = vst.msk [vmem:[#allocation2 + $0x90] sm:$0xf] %vm2216_vm9, %v2147_v43  ;;  %v8174_v43 = vld [vmem:[#allocation44_spill] sm:$0xff]  ;;  %v8177_v62 = vld [vmem:[#allocation34_spill] sm:$0xff] }
 0x300   : > { %2275 = vst.msk [vmem:[#allocation2 + $0x168] sm:$0xf] %vm2216_vm9, %v2183_v3  ;;  %v2410_v21 = vld [vmem:[#allocation2 + $0x60] sm:$0xf]  ;;  %v4258_v3 = vld [vmem:[#allocation2 + $0x50] sm:$0xf0] }
 0x301   : > { %v2411_v9 = vsel %vm6908_vm1, %v6937_v16, %v2410_v21  ;;  %2243 = vst.msk [vmem:[#allocation2 + $0xa8] sm:$0xf] %vm2216_vm9, %v2151_v5  ;;  %v3978_v41 = vld [vmem:[#allocation2 + $0x18] sm:$0xf]  ;;  %v4308_v16 = vld [vmem:[%s7684_s4 + $0x60] sm:$0xff] }
 0x302   : > { %2412 = vst [vmem:[#allocation2 + $0x60] sm:$0xf] %v2411_v9  ;;  %v3979_v2 = vor.u32 %v4252_v49, %v3978_v41  ;;  %4325 = vmatpush.bf16.msra.mxu3 %v4308_v16  ;;  %3617 = vmatpush.bf16.msra.mxu1 %v4308_v16  ;;  %v8175_v41 = vld [vmem:[#allocation12_spill] sm:$0xff] }
 0x303   : > { %2408 = vst [vmem:[#allocation2 + $0x48] sm:$0xf] %v2407_v4  ;;  %v8176_v49 = vld [vmem:[#allocation28_spill] sm:$0xff] }
 0x304   : > { %3538 = vmatmul.bf16.gmra.mxu1 %v3979_v2  ;;  %2820 = vrot.lane.b32.xlu0 %v8163_v11, %s4502_s20  ;;  %v8178_v11 = vld [vmem:[#allocation19_spill] sm:$0xff] }
 0x305   : > { %2705 = vrot.lane.b32.xlu2 %v6854_v55, %s4503_s23  ;;  %2507 = vrot.lane.b32.xlu1 %v8146_v24, %s4501_s19 }
 0x306   : > { %v2159_v38 = vpop.permute.xlu1 %2158  ;;  %4326 = vmatpush.bf16.msra.mxu3 %v4307_v28  ;;  %3618 = vmatpush.bf16.msra.mxu1 %v4307_v28  ;;  %v2418_v37 = vld [vmem:[#allocation2 + $0x90] sm:$0xf] }
 0x307   : > { %v2532_v47 = vpop.permute.xlu2 %2531  ;;  %v2163_v15 = vpop.permute.xlu0 %2162  ;;  %2251 = vst.msk [vmem:[#allocation2 + $0xd8] sm:$0xf] %vm2216_vm9, %v2159_v38 }
 0x308   : > { %2629 = vst.msk [vmem:[#allocation2 + $0xc4] sm:$0xf] %vm1957_vm0, %v2532_v47  ;;  %v2422_v63 = vld [vmem:[#allocation2 + $0xa8] sm:$0xf] }
 0x309   : > { %v2423_v8 = vsel %vm6908_vm1, %v6939_v36, %v2422_v63  ;;  %2255 = vst.msk [vmem:[#allocation2 + $0xf0] sm:$0xf] %vm2216_vm9, %v2163_v15  ;;  %v4014_v53 = vld [vmem:[#allocation2 + $0x60] sm:$0xf]  ;;  %v2419_v36 = vsel %vm6908_vm1, %v6972_v35, %v2418_v37  ;;  %v3990_v35 = vld [vmem:[#allocation2 + $0x30] sm:$0xf] }
 0x30a   : > { %2424 = vst [vmem:[#allocation2 + $0xa8] sm:$0xf] %v2423_v8  ;;  %v4015_v22 = vor.u32 %v4261_v20, %v4014_v53  ;;  %4327 = vmatpush.bf16.msra.mxu3 %v4306_v60  ;;  %3619 = vmatpush.bf16.msra.mxu1 %v4306_v60  ;;  %v4002_v33 = vld [vmem:[#allocation2 + $0x48] sm:$0xf]  ;;  %v4267_v15 = vld [vmem:[#allocation2 + $0x98] sm:$0xf0] }
 0x30b   : > { %2420 = vst [vmem:[#allocation2 + $0x90] sm:$0xf] %v2419_v36  ;;  %v4003_v5 = vor.u32 %v4258_v3, %v4002_v33  ;;  %v2634_v47 = vld [vmem:[#allocation2 + $0xe8] sm:$0xf]  ;;  %v4016_v20 = vld [vmem:[#allocation2 + $0x6c] sm:$0xf0] }
 0x30c   : > { %3553 = vmatmul.bf16.vlgmr.msra.gmra.mxu2 %v4015_v22  ;;  %2341 = vrot.lane.b32.xlu0 %v6748_v40, %s4502_s20  ;;  %v3991_v40 = vor.u32 %v4255_v56, %v3990_v35  ;;  %v8179_v37 = vld [vmem:[#allocation26_spill] sm:$0xff]  ;;  %v8180_v22 = vld [vmem:[#allocation25_spill] sm:$0xff] }
 0x30d   : > { %2860 = vrot.lane.b32.xlu2 %v8094_v19, %s4502_s20  ;;  %v4305_v19 = vld [vmem:[%s7684_s4 + $0x48] sm:$0xff]  ;;  %2858 = vrot.lane.b32.xlu1 %v8092_v58, %s4502_s20  ;;  %v8166_v58 = vld [vmem:[#allocation45_spill] sm:$0xff]  ;;  %v8191_v3 = vld [vmem:[#allocation18_spill] sm:$0xff] }
 0x30e   : > { %v2171_v13 = vpop.permute.xlu1 %2170  ;;  %4328 = vmatpush.bf16.msra.mxu3 %v4305_v19  ;;  %3620 = vmatpush.bf16.msra.mxu1 %v4305_v19  ;;  %v8181_v19 = vld [vmem:[#allocation11_spill] sm:$0xff]  ;;  %v8189_v33 = vld [vmem:[#allocation37_spill] sm:$0xff] }
 0x30f   : > { %v2784_v27 = vld [vmem:[#allocation2 + $0xc4] sm:$0xf]  ;;  %v2334_v6 = vpop.permute.xlu2 %2333  ;;  %2263 = vst.msk [vmem:[#allocation2 + $0x120] sm:$0xf] %vm2216_vm9, %v2171_v13 }
 0x310   : > { %v2785_v52 = vsel %vm7227_vm6, %v6946_v7, %v2784_v27  ;;  %2433 = vst.msk [vmem:[#allocation2 + $0xe4] sm:$0xf] %vm2391_vm13, %v2334_v6  ;;  %v2175_v7 = vpop.permute.xlu0 %2174  ;;  %v2434_v60 = vld [vmem:[#allocation2 + $0xf0] sm:$0xf]  ;;  %v8183_v13 = vld [vmem:[#allocation31_spill] sm:$0xff] }
 0x311   : > { %2786 = vst [vmem:[#allocation2 + $0xc4] sm:$0xf] %v2785_v52 }
 0x312   : > { %2920 = vst.msk [vmem:[#allocation2 + $0xc4] sm:$0xf] %vm2391_vm13, %v6872_v17  ;;  %4329 = vmatpush.bf16.msra.mxu3 %v4304_v23  ;;  %3621 = vmatpush.bf16.msra.mxu1 %v4304_v23  ;;  %v4038_v2 = vld [vmem:[#allocation2 + $0x90] sm:$0xf]  ;;  %v2430_v23 = vld [vmem:[#allocation2 + $0xd8] sm:$0xf] }
 0x313   : > { %2267 = vst.msk [vmem:[#allocation2 + $0x138] sm:$0xf] %vm2216_vm9, %v2175_v7  ;;  %v4039_v8 = vor.u32 %v4267_v15, %v4038_v2  ;;  %v8182_v7 = vld [vmem:[#allocation48_spill] sm:$0xff] }
 0x314   : > { %3543 = vmatmul.bf16.gmra.mxu1 %v3991_v40  ;;  %2707 = vrot.lane.b32.xlu0 %v8167_v30, %s4503_s23 }
 0x315   : > { %2669 = vrot.lane.b32.xlu2 %v8166_v58, %s4503_s23  ;;  %2547 = vrot.lane.b32.xlu1 %v8168_v59, %s4501_s19 }
 0x316   : > { %4330 = vmatpush.bf16.msrb.mxu1 %v4490_v0  ;;  %v2520_v29 = vpop.permute.xlu1 %2519  ;;  %v8186_v0 = vld [vmem:[#allocation39_spill] sm:$0xff] }
 0x317   : > { %v7260_v17 = vpop.permute.xlu2 %2699  ;;  %2617 = vst.msk [vmem:[#allocation2 + $0x7c] sm:$0xf] %vm1957_vm0, %v2520_v29 }
 0x318   : > { %v2516_v31 = vpop.permute.xlu0 %2515 }
 0x319   : > { %2613 = vst.msk [vmem:[#allocation2 + $0x64] sm:$0xf] %vm1957_vm0, %v2516_v31  ;;  %v4050_v31 = vld [vmem:[#allocation2 + $0xa8] sm:$0xf] }
 0x31a   : > { %4331 = vmatpush.bf16.msrb.mxu1 %v4491_v18 }
 0x31c   : > { %3558 = vmatmul.bf16.gmra.mxu2 %v4027_v10  ;;  %2509 = vrot.lane.b32.xlu0 %v8170_v14, %s4501_s19 }
 0x31d   : > { %2824 = vrot.lane.b32.xlu2 %v8169_v46, %s4502_s20  ;;  %2822 = vrot.lane.b32.xlu1 %v8171_v54, %s4502_s20  ;;  %v4270_v46 = vld [vmem:[#allocation2 + $0xb0] sm:$0xf0] }
 0x31e   : > { %v2528_v1 = vpop.permute.xlu1 %2527  ;;  %v2772_v61 = vld [vmem:[#allocation2 + $0x7c] sm:$0xf]  ;;  %v4051_v18 = vor.u32 %v4270_v46, %v4050_v31  ;;  %v8188_v54 = vld [vmem:[#allocation29_spill] sm:$0xff]  ;;  %v2602_v31 = vld [vmem:[#allocation2 + $0x28] sm:$0xf] }
 0x31f   : > { %v2502_v44 = vpop.permute.xlu2 %2501  ;;  %v2773_v21 = vsel %vm7227_vm6, %v8173_v48, %v2772_v61  ;;  %2625 = vst.msk [vmem:[#allocation2 + $0xac] sm:$0xf] %vm1957_vm0, %v2528_v1  ;;  %v8190_v61 = vld [vmem:[#allocation50_spill] sm:$0xff]  ;;  %v4062_v48 = vld [vmem:[#allocation2 + $0xc0] sm:$0xf]  ;;  %v8199_v46 = vld [vmem:[#allocation56_spill] sm:$0xff] }
 0x320   : > { %v2599_v57 = vsel %vm7081_vm15, %v2502_v44, %v2598_v26  ;;  %v2768_v34 = vld [vmem:[#allocation2 + $0x64] sm:$0xf]  ;;  %v2524_v50 = vpop.permute.xlu0 %2523  ;;  %2774 = vst [vmem:[#allocation2 + $0x7c] sm:$0xf] %v2773_v21  ;;  %v4028_v26 = vld [vmem:[#allocation2 + $0x84] sm:$0xf0] }
 0x321   : > { %2600 = vst [vmem:[#allocation2 + $0x10] sm:$0xf] %v2599_v57  ;;  %v2769_v25 = vsel %vm7227_vm6, %v8172_v39, %v2768_v34  ;;  %v8187_v44 = vld [vmem:[#allocation47_spill] sm:$0xff] }
 0x322   : > { %2621 = vst.msk [vmem:[#allocation2 + $0x94] sm:$0xf] %vm1957_vm0, %v2524_v50 }
 0x323   : > { %2770 = vst [vmem:[#allocation2 + $0x64] sm:$0xf] %v2769_v25 }
 0x324   : > { %2912 = vst.msk [vmem:[#allocation2 + $0x64] sm:$0xf] %vm2391_vm13, %v8174_v43  ;;  %3548 = vmatmul.bf16.gmra.mxu1 %v4003_v5  ;;  %2671 = vrot.lane.b32.xlu0 %v8176_v49, %s4503_s23  ;;  %v4040_v49 = vld [vmem:[#allocation2 + $0x9c] sm:$0xf0] }
 0x325   : > { %2345 = vrot.lane.b32.xlu2 %v8167_v30, %s4502_s20  ;;  %2914 = vst.msk [vmem:[#allocation2 + $0x7c] sm:$0xf] %vm2391_vm13, %v8175_v41  ;;  %2549 = vrot.lane.b32.xlu1 %v8177_v62, %s4501_s19  ;;  %v8192_v62 = vld [vmem:[#allocation51_spill] sm:$0xff] }
 0x326   : > { %v2538_v28 = vpop.permute.xlu1 %2537  ;;  %v2780_v6 = vld [vmem:[#allocation2 + $0xac] sm:$0xf] }
 0x327   : > { %v2664_v9 = vpop.permute.xlu2 %2663  ;;  %v2635_v38 = vsel %vm7081_vm15, %v2538_v28, %v2634_v47  ;;  %v2781_v35 = vsel %vm7227_vm6, %v8181_v19, %v2780_v6 }
 0x328   : > { %2755 = vst.msk [vmem:[#allocation2 + $0x10] sm:$0xf] %vm2216_vm9, %v2664_v9  ;;  %v2536_v16 = vpop.permute.xlu0 %2535  ;;  %v4273_v9 = vld [vmem:[#allocation2 + $0xc8] sm:$0xf0] }
 0x329   : > { %v2776_v4 = vld [vmem:[#allocation2 + $0x94] sm:$0xf]  ;;  %2633 = vst.msk [vmem:[#allocation2 + $0xdc] sm:$0xf] %vm1957_vm0, %v2536_v16  ;;  %v4063_v41 = vor.u32 %v4273_v9, %v4062_v48 }
 0x32a   : > { %v2777_v63 = vsel %vm7227_vm6, %v8178_v11, %v2776_v4  ;;  %2636 = vst [vmem:[#allocation2 + $0xe8] sm:$0xf] %v2635_v38  ;;  %v8193_v16 = vld [vmem:[#allocation13_spill] sm:$0xff]  ;;  %v8194_v11 = vld [vmem:[#allocation36_spill] sm:$0xff]  ;;  %v7369_v38 = vpop.f32.mrf.mxu0 }
 0x32b   : > { %2778 = vst [vmem:[#allocation2 + $0x94] sm:$0xf] %v2777_v63  ;;  %v4260_v53 = vld [vmem:[#allocation2 + $0x64] sm:$0xf]  ;;  %v2642_v63 = vld [vmem:[#allocation2 + $0x118] sm:$0xf] }
 0x32c   : > { %2916 = vst.msk [vmem:[#allocation2 + $0x94] sm:$0xf] %vm2391_vm13, %v8180_v22  ;;  %v4019_v36 = vor.u32 %v4260_v53, %v4016_v20  ;;  %3563 = vmatmul.bf16.gmra.mxu2 %v4039_v8  ;;  %2343 = vrot.lane.b32.xlu0 %v6854_v55, %s4502_s20  ;;  %v8184_v55 = vld [vmem:[#allocation16_spill] sm:$0xff]  ;;  %v4263_v51 = vld [vmem:[#allocation2 + $0x7c] sm:$0xf] }
 0x32d   : > { %2711 = vrot.lane.b32.xlu2 %v8179_v37, %s4503_s23  ;;  %2791 = vst.msk [vmem:[#allocation2 + $0xe8] sm:$0xf] %vm2216_vm9, %v7260_v17  ;;  %2709 = vrot.lane.b32.xlu1 %v8182_v7, %s4503_s23  ;;  %v4031_v57 = vor.u32 %v4263_v51, %v4028_v26  ;;  %v8195_v53 = vld [vmem:[#allocation54_spill] sm:$0xff]  ;;  %v8200_v26 = vld [vmem:[#allocation7_spill] sm:$0xff] }
 0x32e   : > { %3642 = vmatmul.bf16.vlgmr.msra.gmra.mxu3 %v4019_v36  ;;  %2782 = vst [vmem:[#allocation2 + $0xac] sm:$0xf] %v2781_v35  ;;  %v2698_v58 = vpop.permute.xlu1 %2697  ;;  %v2638_v36 = vld [vmem:[#allocation2 + $0x100] sm:$0xf] }
 0x32f   : > { %v2336_v27 = vpop.permute.xlu2 %2335  ;;  %2918 = vst.msk [vmem:[#allocation2 + $0xac] sm:$0xf] %vm2391_vm13, %v8183_v13 }
 0x330   : > { %v2435_v52 = vsel %vm6908_vm1, %v2336_v27, %v2434_v60  ;;  %v2332_v56 = vpop.permute.xlu0 %2331  ;;  %v2788_v40 = vld [vmem:[#allocation2 + $0xdc] sm:$0xf] }
 0x331   : > { %2436 = vst [vmem:[#allocation2 + $0xf0] sm:$0xf] %v2435_v52  ;;  %v2431_v17 = vsel %vm6908_vm1, %v2332_v56, %v2430_v23  ;;  %v2789_v30 = vsel %vm7227_vm6, %v2698_v58, %v2788_v40  ;;  %v4052_v56 = vld [vmem:[#allocation2 + $0xb4] sm:$0xf0]  ;;  %v8197_v23 = vld [vmem:[#allocation17_spill] sm:$0xff] }
 0x332   : > { %2432 = vst [vmem:[#allocation2 + $0xd8] sm:$0xf] %v2431_v17 }
 0x333   : > { %2790 = vst [vmem:[#allocation2 + $0xdc] sm:$0xf] %v2789_v30  ;;  %v4266_v5 = vld [vmem:[#allocation2 + $0x94] sm:$0xf] }
 0x334   : > { %2511 = vrot.lane.b32.xlu0 %v8185_v45, %s4501_s19  ;;  %v4043_v2 = vor.u32 %v4266_v5, %v4040_v49  ;;  %v2438_v5 = vld [vmem:[#allocation2 + $0x108] sm:$0xf]  ;;  %v8203_v49 = vld [vmem:[#allocation41_spill] sm:$0xff] }
 0x335   : > { %2513 = vrot.lane.b32.xlu2 %v8184_v55, %s4501_s19  ;;  %2864 = vrot.lane.b32.xlu1 %v8186_v0, %s4502_s20  ;;  %v8198_v55 = vld [vmem:[#allocation49_spill] sm:$0xff] }
 0x336   : > { %v2853_v10 = vpop.permute.xlu1 %2852  ;;  %v4269_v6 = vld [vmem:[#allocation2 + $0xac] sm:$0xf] }
 0x337   : > { %v2504_v59 = vpop.permute.xlu2 %2503  ;;  %2923 = vst.msk [vmem:[#allocation2 + $0xe8] sm:$0xf] %vm2391_vm13, %v2853_v10  ;;  %v4055_v40 = vor.u32 %v4269_v6, %v4052_v56 }
 0x338   : > { %2601 = vst.msk [vmem:[#allocation2 + $0x1c] sm:$0xf] %vm1957_vm0, %v2504_v59  ;;  %v2500_v29 = vpop.permute.xlu0 %2499  ;;  %v7388_v59 = vpop.f32.mrf.mxu0 }
 0x339   : > { %2595 = vst.msk [vmem:[#allocation2 + $0x4] sm:$0xf] %vm1957_vm0, %v2500_v29  ;;  %v4074_v22 = vld [vmem:[#allocation2 + $0xd8] sm:$0xf] }
 0x33c   : > { %3568 = vmatmul.bf16.gmra.mxu2 %v4051_v18  ;;  %2862 = vrot.lane.b32.xlu0 %v8188_v54, %s4502_s20 }
 0x33d   : > { %2675 = vrot.lane.b32.xlu2 %v8187_v44, %s4503_s23  ;;  %2673 = vrot.lane.b32.xlu1 %v8189_v33, %s4503_s23  ;;  %v8201_v44 = vld [vmem:[#allocation55_spill] sm:$0xff] }
 0x33e   : > { %3647 = vmatmul.bf16.gmra.mxu3 %v4031_v57  ;;  %v2662_v1 = vpop.permute.xlu1 %2661  ;;  %v4272_v33 = vld [vmem:[#allocation2 + $0xc4] sm:$0xf] }
 0x33f   : > { %v7339_v14 = vpop.permute.xlu2 %2854 }
 0x340   : > { %v2851_v34 = vpop.permute.xlu0 %2850  ;;  %v2752_v50 = vld [vmem:[#allocation2 + $0x4] sm:$0xf] }
 0x341   : > { %2922 = vst.msk [vmem:[#allocation2 + $0xdc] sm:$0xf] %vm2391_vm13, %v2851_v34  ;;  %v2753_v39 = vsel %vm7227_vm6, %v2662_v1, %v2752_v50  ;;  %v7404_v50 = vpop.f32.mrf.mxu0  ;;  %v4086_v1 = vld [vmem:[#allocation2 + $0xf0] sm:$0xf] }
 0x342   : > { %2754 = vst [vmem:[#allocation2 + $0x4] sm:$0xf] %v2753_v39 }
 0x344   : > { %2551 = vrot.lane.b32.xlu0 %v8190_v61, %s4501_s19 }
 0x345   : > { %2347 = vrot.lane.b32.xlu2 %v8182_v7, %s4502_s20  ;;  %2828 = vrot.lane.b32.xlu1 %v8191_v3, %s4502_s20  ;;  %v4276_v7 = vld [vmem:[#allocation2 + $0xe0] sm:$0xf0]  ;;  %v8202_v3 = vld [vmem:[#allocation53_spill] sm:$0xff] }
 0x346   : > { %v2817_v43 = vpop.permute.xlu1 %2816  ;;  %v4075_v13 = vor.u32 %v4276_v7, %v4074_v22 }
 0x347   : > { %v2544_v25 = vpop.permute.xlu2 %2543  ;;  %2905 = vst.msk [vmem:[#allocation2 + $0x10] sm:$0xf] %vm2391_vm13, %v2817_v43 }
 0x348   : > { %2641 = vst.msk [vmem:[#allocation2 + $0x10c] sm:$0xf] %vm1957_vm0, %v2544_v25  ;;  %v2540_v21 = vpop.permute.xlu0 %2539 }
 0x349   : > { %2637 = vst.msk [vmem:[#allocation2 + $0xf4] sm:$0xf] %vm1957_vm0, %v2540_v21  ;;  %v2756_v21 = vld [vmem:[#allocation2 + $0x1c] sm:$0xf] }
 0x34c   : > { %3573 = vmatmul.bf16.gmra.mxu2 %v4063_v41  ;;  %2826 = vrot.lane.b32.xlu0 %v8193_v16, %s4502_s20  ;;  %v8204_v16 = vld [vmem:[#allocation52_spill] sm:$0xff] }
 0x34d   : > { %2713 = vrot.lane.b32.xlu2 %v8192_v62, %s4503_s23  ;;  %2349 = vrot.lane.b32.xlu1 %v8179_v37, %s4502_s20  ;;  %v8196_v37 = vld [vmem:[#allocation38_spill] sm:$0xff] }
 0x34e   : > { %3652 = vmatmul.bf16.gmra.mxu3 %v4043_v2  ;;  %v2338_v28 = vpop.permute.xlu1 %2337  ;;  %v3968_v20 = vld [vmem:[#allocation2 + $0xc] sm:$0xf0] }
 0x34f   : > { %v7359_v4 = vpop.permute.xlu2 %2818  ;;  %2437 = vst.msk [vmem:[#allocation2 + $0xfc] sm:$0xf] %vm2391_vm13, %v2338_v28  ;;  %v2796_v58 = vld [vmem:[#allocation2 + $0x10c] sm:$0xf]  ;;  %v4275_v28 = vld [vmem:[#allocation2 + $0xdc] sm:$0xf] }
 0x350   : > { %v2815_v47 = vpop.permute.xlu0 %2814  ;;  %v2792_v45 = vld [vmem:[#allocation2 + $0xf4] sm:$0xf] }
 0x351   : > { %2904 = vst.msk [vmem:[#allocation2 + $0x4] sm:$0xf] %vm2391_vm13, %v2815_v47 }
 0x354   : > { %2553 = vrot.lane.b32.xlu0 %v8195_v53, %s4501_s19 }
 0x355   : > { %2868 = vrot.lane.b32.xlu2 %v8194_v11, %s4502_s20  ;;  %2866 = vrot.lane.b32.xlu1 %v8196_v37, %s4502_s20  ;;  %v4076_v11 = vld [vmem:[#allocation2 + $0xe4] sm:$0xf0] }
 0x356   : > { %v2704_v52 = vpop.permute.xlu1 %2703  ;;  %v4279_v57 = vld [vmem:[#allocation2 + $0xf8] sm:$0xf0] }
 0x357   : > { %v2546_v15 = vpop.permute.xlu2 %2545  ;;  %v4087_v39 = vor.u32 %v4279_v57, %v4086_v1 }
 0x358   : > { %v2643_v8 = vsel %vm7081_vm15, %v2546_v15, %v2642_v63  ;;  %v2542_v60 = vpop.permute.xlu0 %2541  ;;  %v4248_v27 = vld [vmem:[#allocation2 + $0x4] sm:$0xf]  ;;  %v4079_v15 = vor.u32 %v4275_v28, %v4076_v11 }
 0x359   : > { %2644 = vst [vmem:[#allocation2 + $0x118] sm:$0xf] %v2643_v8  ;;  %v2639_v19 = vsel %vm7081_vm15, %v2542_v60, %v2638_v36  ;;  %v3971_v35 = vor.u32 %v4248_v27, %v3968_v20 }
 0x35a   : > { %2640 = vst [vmem:[#allocation2 + $0x100] sm:$0xf] %v2639_v19 }
 0x35b   : > { %3622 = vmatmul.bf16.vlgmr.msra.gmra.mxu1 %v3971_v35  ;;  %2795 = vst.msk [vmem:[#allocation2 + $0x100] sm:$0xf] %vm2216_vm9, %v2704_v52  ;;  %v8205_v52 = vld [vmem:[#allocation43_spill] sm:$0xff] }
 0x35c   : > { %3578 = vmatmul.bf16.gmra.mxu2 %v4075_v13  ;;  %2715 = vrot.lane.b32.xlu0 %v8198_v55, %s4503_s23 }
 0x35d   : > { %2557 = vrot.lane.b32.xlu2 %v8197_v23, %s4501_s19  ;;  %2351 = vrot.lane.b32.xlu1 %v8192_v62, %s4502_s20  ;;  %v7420_v62 = vpop.f32.mrf.mxu0 }
 0x35e   : > { %3657 = vmatmul.bf16.gmra.mxu3 %v4055_v40  ;;  %v2506_v29 = vpop.permute.xlu1 %2505 }
 0x35f   : > { %v2706_v17 = vpop.permute.xlu2 %2705  ;;  %v2603_v10 = vsel %vm7081_vm15, %v2506_v29, %v2602_v31  ;;  %v2606_v29 = vld [vmem:[#allocation2 + $0x40] sm:$0xf] }
 0x360   : > { %v2797_v30 = vsel %vm7227_vm6, %v2706_v17, %v2796_v58  ;;  %v2702_v0 = vpop.permute.xlu0 %2701  ;;  %2604 = vst [vmem:[#allocation2 + $0x28] sm:$0xf] %v2603_v10 }
 0x361   : > { %2798 = vst [vmem:[#allocation2 + $0x10c] sm:$0xf] %v2797_v30  ;;  %v2793_v51 = vsel %vm7227_vm6, %v2702_v0, %v2792_v45  ;;  %v2610_v30 = vld [vmem:[#allocation2 + $0x58] sm:$0xf]  ;;  %v7449_v45 = vpop.f32.mrf.mxu1 }
 0x362   : > { %2794 = vst [vmem:[#allocation2 + $0xf4] sm:$0xf] %v2793_v51 }
 0x363   : > { %2924 = vst.msk [vmem:[#allocation2 + $0xf4] sm:$0xf] %vm2391_vm13, %v7339_v14  ;;  %v4064_v14 = vld [vmem:[#allocation2 + $0xcc] sm:$0xf0] }
 0x364   : > { %2555 = vrot.lane.b32.xlu0 %v8200_v26, %s4501_s19  ;;  %v4067_v25 = vor.u32 %v4272_v33, %v4064_v14 }
 0x365   : > { %2719 = vrot.lane.b32.xlu2 %v8199_v46, %s4503_s23  ;;  %2717 = vrot.lane.b32.xlu1 %v8201_v44, %s4503_s23 }
 0x366   : > { %v2668_v34 = vpop.permute.xlu1 %2667 }
 0x367   : > { %v7398_v18 = vpop.permute.xlu2 %2860  ;;  %2759 = vst.msk [vmem:[#allocation2 + $0x28] sm:$0xf] %vm2216_vm9, %v2668_v34  ;;  %v2646_v34 = vld [vmem:[#allocation2 + $0x130] sm:$0xf] }
 0x368   : > { %v2857_v54 = vpop.permute.xlu0 %2856 }
 0x369   : > { %2925 = vst.msk [vmem:[#allocation2 + $0x100] sm:$0xf] %vm2391_vm13, %v2857_v54 }
 0x36a   : > { %v4278_v58 = vld [vmem:[#allocation2 + $0xf4] sm:$0xf] }
 0x36c   : > { %3583 = vmatmul.bf16.gmra.mxu2 %v4087_v39  ;;  %2353 = vrot.lane.b32.xlu0 %v8198_v55, %s4502_s20 }
 0x36d   : > { %2184 = vrot.lane.b32.xlu2 %v8197_v23, %s4503_s23  ;;  %2872 = vrot.lane.b32.xlu1 %v8202_v3, %s4502_s20  ;;  %v2446_v3 = vld [vmem:[#allocation2 + $0x138] sm:$0xf]  ;;  %s4247_s23 = sshll.u32 %s8213_s22, 7 }
 0x36e   : > { %3662 = vmatmul.bf16.gmra.mxu3 %v4067_v25  ;;  %v2340_v43 = vpop.permute.xlu1 %2339  ;;  %s7507_s27 = scalar_lea.vmem %s7686_s6, %s4247_s23 }
 0x36f   : > { %v2670_v61 = vpop.permute.xlu2 %2669  ;;  %v2439_v41 = vsel %vm6908_vm1, %v2340_v43, %v2438_v5 }
 0x370   : > { %v2666_v48 = vpop.permute.xlu0 %2665  ;;  %2440 = vst [vmem:[#allocation2 + $0x108] sm:$0xf] %v2439_v41  ;;  %v4088_v56 = vld [vmem:[#allocation2 + $0xfc] sm:$0xf0] }
 0x371   : > { %v2757_v9 = vsel %vm7227_vm6, %v2666_v48, %v2756_v21  ;;  %v4091_v17 = vor.u32 %v4278_v58, %v4088_v56  ;;  %v2442_v41 = vld [vmem:[#allocation2 + $0x120] sm:$0xf] }
 0x372   : > { %2758 = vst [vmem:[#allocation2 + $0x1c] sm:$0xf] %v2757_v9 }
 0x373   : > { %2906 = vst.msk [vmem:[#allocation2 + $0x1c] sm:$0xf] %vm2391_vm13, %v7359_v4  ;;  %v7432_v4 = vpop.f32.mrf.mxu0 }
 0x374   : > { %2870 = vrot.lane.b32.xlu0 %v8204_v16, %s4502_s20 }
 0x375   : > { %2561 = vrot.lane.b32.xlu2 %v8203_v49, %s4501_s19  ;;  %2357 = vrot.lane.b32.xlu1 %v8199_v46, %s4502_s20 }
 0x377   : > { %v7424_v2 = vpop.permute.xlu2 %2824  ;;  %v2508_v63 = vpop.permute.xlu1 %2507  ;;  %v4098_v7 = vld [vmem:[#allocation2 + $0x108] sm:$0xf] }
 0x378   : > { %v2821_v47 = vpop.permute.xlu0 %2820  ;;  %2605 = vst.msk [vmem:[#allocation2 + $0x34] sm:$0xf] %vm1957_vm0, %v2508_v63 }
 0x379   : > { %2907 = vst.msk [vmem:[#allocation2 + $0x28] sm:$0xf] %vm2391_vm13, %v2821_v47 }
 0x37a   : > { %v4251_v20 = vld [vmem:[#allocation2 + $0x1c] sm:$0xf] }
 0x37b   : > { %v7443_v19 = vpop.f32.mrf.mxu0 }
 0x37c   : > { %2355 = vrot.lane.b32.xlu0 %v8201_v44, %s4502_s20  ;;  %v7459_v44 = vpop.f32.mrf.mxu1 }
 0x37e   : > { %3667 = vmatmul.bf16.gmra.mxu3 %v4079_v15 }
 0x37f   : > { %v2346_v8 = vpop.permute.xlu2 %2345  ;;  %v2859_v22 = vpop.permute.xlu1 %2858  ;;  %v2760_v36 = vld [vmem:[#allocation2 + $0x34] sm:$0xf] }
 0x380   : > { %2445 = vst.msk [vmem:[#allocation2 + $0x12c] sm:$0xf] %vm2391_vm13, %v2346_v8  ;;  %v2342_v53 = vpop.permute.xlu0 %2341  ;;  %v3980_v37 = vld [vmem:[#allocation2 + $0x24] sm:$0xf0]  ;;  %v2761_v27 = vsel %vm7227_vm6, %v2670_v61, %v2760_v36 }
 0x381   : > { %2441 = vst.msk [vmem:[#allocation2 + $0x114] sm:$0xf] %vm2391_vm13, %v2342_v53  ;;  %v3983_v60 = vor.u32 %v4251_v20, %v3980_v37 }
 0x382   : > { %2926 = vst.msk [vmem:[#allocation2 + $0x10c] sm:$0xf] %vm2391_vm13, %v2859_v22 }
 0x383   : > { %2762 = vst [vmem:[#allocation2 + $0x34] sm:$0xf] %v2761_v27  ;;  %3627 = vmatmul.bf16.gmra.mxu1 %v3983_v60  ;;  %v7453_v46 = vpop.f32.mrf.mxu0 }
 0x384   : > { %2559 = vrot.lane.b32.xlu0 %v8205_v52, %s4501_s19  ;;  %v7471_v5 = vpop.f32.mrf.mxu1 }
 0x387   : > { %v2712_v6 = vpop.permute.xlu2 %2711  ;;  %v2548_v23 = vpop.permute.xlu1 %2547  ;;  %v4285_v36 = vld [vmem:[#allocation2 + $0x128] sm:$0xf0] }
 0x388   : > { %v2708_v35 = vpop.permute.xlu0 %2707  ;;  %v4282_v13 = vld [vmem:[#allocation2 + $0x110] sm:$0xf0]  ;;  %2645 = vst.msk [vmem:[#allocation2 + $0x124] sm:$0xf] %vm1957_vm0, %v2548_v23 }
 0x389   : > { %2799 = vst.msk [vmem:[#allocation2 + $0x118] sm:$0xf] %vm2216_vm9, %v2708_v35  ;;  %v4099_v40 = vor.u32 %v4282_v13, %v4098_v7  ;;  %v4281_v54 = vld [vmem:[#allocation2 + $0x10c] sm:$0xf] }
 0x38a   : > { %2927 = vst.msk [vmem:[#allocation2 + $0x118] sm:$0xf] %vm2391_vm13, %v7398_v18 }
 0x38b   : > { %3588 = vmatmul.bf16.gmra.mxu2 %v4099_v40  ;;  %v7466_v25 = vpop.f32.mrf.mxu0 }
 0x38c   : > { %v7481_v37 = vpop.f32.mrf.mxu1 }
 0x38e   : > { %3672 = vmatmul.bf16.gmra.mxu3 %v4091_v17 }
 0x38f   : > { %v2514_v55 = vpop.permute.xlu2 %2513  ;;  %v3554_v31 = vpop.f32.mrf.mxu2  ;;  %v2800_v49 = vld [vmem:[#allocation2 + $0x124] sm:$0xf] }
 0x390   : > { %v2611_v0 = vsel %vm7081_vm15, %v2514_v55, %v2610_v30  ;;  %v2510_v51 = vpop.permute.xlu0 %2509  ;;  %v2823_v10 = vpop.permute.xlu1 %2822 }
 0x391   : > { %2612 = vst [vmem:[#allocation2 + $0x58] sm:$0xf] %v2611_v0  ;;  %v2607_v18 = vsel %vm7081_vm15, %v2510_v51, %v2606_v29  ;;  %v4100_v33 = vld [vmem:[#allocation2 + $0x114] sm:$0xf0]  ;;  %v2654_v0 = vld [vmem:[#allocation2 + $0x160] sm:$0xf] }
 0x392   : > { %2908 = vst.msk [vmem:[#allocation2 + $0x34] sm:$0xf] %vm2391_vm13, %v2823_v10  ;;  %v4103_v61 = vor.u32 %v4281_v54, %v4100_v33 }
 0x393   : > { %2608 = vst [vmem:[#allocation2 + $0x40] sm:$0xf] %v2607_v18  ;;  %v7479_v8 = vpop.f32.mrf.mxu0 }
 0x394   : > { %v7501_v30 = vpop.f32.mrf.mxu1 }
 0x397   : > { %v2676_v26 = vpop.permute.xlu2 %2675  ;;  %v3556_v39 = vpop.f32.mrf.mxu2 }
 0x398   : > { %2767 = vst.msk [vmem:[#allocation2 + $0x58] sm:$0xf] %vm2216_vm9, %v2676_v26  ;;  %v2672_v57 = vpop.permute.xlu0 %2671  ;;  %v2550_v1 = vpop.permute.xlu1 %2549 }
 0x399   : > { %2763 = vst.msk [vmem:[#allocation2 + $0x40] sm:$0xf] %vm2216_vm9, %v2672_v57  ;;  %v2647_v14 = vsel %vm7081_vm15, %v2550_v1, %v2646_v34  ;;  %v4254_v43 = vld [vmem:[#allocation2 + $0x34] sm:$0xf] }
 0x39a   : > { %2909 = vst.msk [vmem:[#allocation2 + $0x40] sm:$0xf] %vm2391_vm13, %v7424_v2 }
 0x39b   : > { %2648 = vst [vmem:[#allocation2 + $0x130] sm:$0xf] %v2647_v14  ;;  %v7494_v35 = vpop.f32.mrf.mxu0 }
 0x39c   : > { %2803 = vst.msk [vmem:[#allocation2 + $0x130] sm:$0xf] %vm2216_vm9, %v2712_v6  ;;  %v7492_v6 = vld [vmem:[%s260_s18] ss:$0 sm:$0xff] }
 0x39d   : > { %v3555_v7 = vadd.f32 %v7492_v6, %v3554_v31  ;;  %v3557_v18 = vadd.f32 %v7492_v6, %v3556_v39 }
 0x39e   : > { %3677 = vmatmul.bf16.gmra.mxu3 %v4103_v61 }
 0x39f   : > { %v2348_v48 = vpop.permute.xlu2 %2347  ;;  %v3559_v63 = vpop.f32.mrf.mxu2 }
 0x3a0   : > { %v2447_v21 = vsel %vm6908_vm1, %v2348_v48, %v2446_v3  ;;  %v2344_v9 = vpop.permute.xlu0 %2343  ;;  %v2710_v2 = vpop.permute.xlu1 %2709 }
 0x3a1   : > { %2448 = vst [vmem:[#allocation2 + $0x138] sm:$0xf] %v2447_v21  ;;  %v2443_v16 = vsel %vm6908_vm1, %v2344_v9, %v2442_v41  ;;  %v3992_v47 = vld [vmem:[#allocation2 + $0x3c] sm:$0xf0]  ;;  %v2801_v28 = vsel %vm7227_vm6, %v2710_v2, %v2800_v49  ;;  %v7521_v3 = vpop.f32.mrf.mxu1  ;;  %v3560_v21 = vadd.f32 %v7492_v6, %v3559_v63 }
 0x3a2   : > { %2444 = vst [vmem:[#allocation2 + $0x120] sm:$0xf] %v2443_v16  ;;  %v3995_v11 = vor.u32 %v4254_v43, %v3992_v47 }
 0x3a3   : > { %2802 = vst [vmem:[#allocation2 + $0x124] sm:$0xf] %v2801_v28  ;;  %v7516_v33 = vpop.f32.mrf.mxu0 }
 0x3a4   : > { %3632 = vmatmul.bf16.gmra.mxu1 %v3995_v11  ;;  %v2276_v11 = vld [vmem:[#allocation2 + $0x174] sm:$0xf] }
 0x3a7   : > { %v7477_v15 = vpop.permute.xlu2 %2713  ;;  %v3561_v52 = vpop.f32.mrf.mxu2 }
 0x3a8   : > { %v2512_v53 = vpop.permute.xlu0 %2511  ;;  %v2865_v20 = vpop.permute.xlu1 %2864  ;;  %v4122_v32 = vld [vmem:[#allocation2 + $0x138] sm:$0xf] }
 0x3a9   : > { %2609 = vst.msk [vmem:[#allocation2 + $0x4c] sm:$0xf] %vm1957_vm0, %v2512_v53  ;;  %v4110_v22 = vld [vmem:[#allocation2 + $0x120] sm:$0xf] }
 0x3aa   : > { %v4111_v60 = vor.u32 %v4285_v36, %v4110_v22  ;;  %2929 = vst.msk [vmem:[#allocation2 + $0x130] sm:$0xf] %vm2391_vm13, %v2865_v20  ;;  %v3562_v36 = vadd.f32 %v7492_v6, %v3561_v52 }
 0x3ab   : > { %v7531_v47 = vpop.f32.mrf.mxu0 }
 0x3ac   : > { %3593 = vmatmul.bf16.gmra.mxu2 %v4111_v60  ;;  %v2650_v60 = vld [vmem:[#allocation2 + $0x148] sm:$0xf] }
 0x3af   : > { %v7485_v27 = vpop.permute.xlu2 %2868  ;;  %v7512_v26 = vpop.f32.mrf.mxu2 }
 0x3b0   : > { %v2863_v13 = vpop.permute.xlu0 %2862  ;;  %v2764_v40 = vld [vmem:[#allocation2 + $0x4c] sm:$0xf]  ;;  %v2674_v58 = vpop.permute.xlu1 %2673 }
 0x3b1   : > { %v3643_v56 = vpop.f32.mrf.mxu3  ;;  %2928 = vst.msk [vmem:[#allocation2 + $0x124] sm:$0xf] %vm2391_vm13, %v2863_v13  ;;  %v2765_v17 = vsel %vm7227_vm6, %v2674_v58, %v2764_v40  ;;  %v4112_v10 = vld [vmem:[#allocation2 + $0x12c] sm:$0xf0] }
 0x3b2   : > { %v3644_v23 = vadd.f32 %v3643_v56, %v3555_v7  ;;  %2766 = vst [vmem:[#allocation2 + $0x4c] sm:$0xf] %v2765_v17 }
 0x3b4   : > { %v3733_v55 = vadd.f32 %v7453_v46, %v3644_v23 }
 0x3b6   : > { %v3800_v29 = vpack.c.bf16 %v3733_v55, %v3733_v55 }
 0x3b7   : > { %v2558_v31 = vpop.permute.xlu2 %2557  ;;  %v3566_v49 = vpop.f32.mrf.mxu2 }
 0x3b8   : > { %v2655_v51 = vsel %vm7081_vm15, %v2558_v31, %v2654_v0  ;;  %3833 = vst.msk [vmem:[%s7507_s27 + $0x20] sm:$0xf] %vm3824_vm4, %v3800_v29  ;;  %v2552_v46 = vpop.permute.xlu0 %2551  ;;  %v4284_v54 = vld [vmem:[#allocation2 + $0x124] sm:$0xf]  ;;  %v2829_v14 = vpop.permute.xlu1 %2828  ;;  %v2658_v31 = vld [vmem:[#allocation2 + $0x178] sm:$0xf] }
 0x3b9   : > { %2656 = vst [vmem:[#allocation2 + $0x160] sm:$0xf] %v2655_v51  ;;  %v3645_v57 = vpop.f32.mrf.mxu3  ;;  %v4115_v1 = vor.u32 %v4284_v54, %v4112_v10  ;;  %v3747_v51 = vpop.f32.mrf.mxu0 }
 0x3ba   : > { %2649 = vst.msk [vmem:[#allocation2 + $0x13c] sm:$0xf] %vm1957_vm0, %v2552_v46  ;;  %v3646_v34 = vadd.f32 %v3645_v57, %v3557_v18  ;;  %v3565_v46 = vadd.f32 %v7492_v6, %v7512_v26 }
 0x3bb   : > { %2911 = vst.msk [vmem:[#allocation2 + $0x58] sm:$0xf] %vm2391_vm13, %v2829_v14  ;;  %3682 = vmatmul.bf16.gmra.mxu3 %v4115_v1  ;;  %v2450_v1 = vld [vmem:[#allocation2 + $0x150] sm:$0xf] }
 0x3bc   : > { %v3735_v61 = vadd.f32 %v7466_v25, %v3646_v34 }
 0x3be   : > { %v3801_v48 = vpack.c.bf16 %v3735_v61, %v3735_v61 }
 0x3bf   : > { %v2720_v39 = vpop.permute.xlu2 %2719  ;;  %v3569_v55 = vpop.f32.mrf.mxu2 }
 0x3c0   : > { %2811 = vst.msk [vmem:[#allocation2 + $0x160] sm:$0xf] %vm2216_vm9, %v2720_v39  ;;  %v2827_v9 = vpop.permute.xlu0 %2826  ;;  %v2350_v16 = vpop.permute.xlu1 %2349 }
 0x3c1   : > { %3834 = vst.msk [vmem:[%s7507_s27 + $0x24] sm:$0xf] %vm3824_vm4, %v3801_v48  ;;  %v2804_v43 = vld [vmem:[#allocation2 + $0x13c] sm:$0xf]  ;;  %v3648_v41 = vpop.f32.mrf.mxu3  ;;  %v4130_v48 = vld [vmem:[#allocation2 + $0x140] sm:$0xf] }
 0x3c2   : > { %v2805_v2 = vsel %vm7227_vm6, %v7477_v15, %v2804_v43  ;;  %2910 = vst.msk [vmem:[#allocation2 + $0x4c] sm:$0xf] %vm2391_vm13, %v2827_v9  ;;  %v3649_v25 = vadd.f32 %v3648_v41, %v3560_v21  ;;  %v4004_v22 = vld [vmem:[#allocation2 + $0x54] sm:$0xf0]  ;;  %v7537_v15 = vpop.f32.mrf.mxu1  ;;  %v4289_v21 = vld [vmem:[#allocation2 + $0x148] sm:$0xf0]  ;;  %v3749_v43 = vpop.f32.mrf.mxu0  ;;  %v3567_v9 = vadd.f32 %v7492_v6, %v3566_v49 }
 0x3c3   : > { %2806 = vst [vmem:[#allocation2 + $0x13c] sm:$0xf] %v2805_v2  ;;  %v3535_v2 = vadd.f32 %v7492_v6, %v7449_v45 }
 0x3c4   : > { %v3738_v28 = vadd.f32 %v7479_v8, %v3649_v25  ;;  %2449 = vst.msk [vmem:[#allocation2 + $0x144] sm:$0xf] %vm2391_vm13, %v2350_v16 }
 0x3c6   : > { %v3802_v53 = vpack.c.bf16 %v3738_v28, %v3738_v28  ;;  %v4131_v28 = vor.u32 %v4289_v21, %v4130_v48  ;;  %v1393_v48 = vld [vmem:[#allocation2 + $0x170] sm:$0x1]  ;;  %v1498_v21 = vld [vmem:[#allocation2 + $0x17c] sm:$0x8] }
 0x3c7   : > { %v2185_v63 = vpop.permute.xlu2 %2184  ;;  %v3571_v61 = vpop.f32.mrf.mxu2 }
 0x3c8   : > { %v2277_v20 = vsel %vm7019_vm14, %v2185_v63, %v2276_v11  ;;  %3835 = vst.msk [vmem:[%s7507_s27 + $0x28] sm:$0xf] %vm3824_vm4, %v3802_v53  ;;  %v2554_v7 = vpop.permute.xlu0 %2553  ;;  %v2867_v58 = vpop.permute.xlu1 %2866 }
 0x3c9   : > { %2278 = vst [vmem:[#allocation2 + $0x174] sm:$0xf] %v2277_v20  ;;  %v3650_v13 = vpop.f32.mrf.mxu3  ;;  %v4257_v8 = vld [vmem:[#allocation2 + $0x4c] sm:$0xf]  ;;  %v2651_v56 = vsel %vm7081_vm15, %v2554_v7, %v2650_v60  ;;  %v3570_v7 = vadd.f32 %v7492_v6, %v3569_v55 }
 0x3ca   : > { %v3651_v23 = vadd.f32 %v3650_v13, %v3562_v36  ;;  %v4007_v40 = vor.u32 %v4257_v8, %v4004_v22  ;;  %2652 = vst [vmem:[#allocation2 + $0x148] sm:$0xf] %v2651_v56  ;;  %v7552_v54 = vpop.f32.mrf.mxu1  ;;  %v8206_v22 = vld [vmem:[#allocation32_spill] sm:$0xff]  ;;  %v3537_v8 = vadd.f32 %v7492_v6, %v7459_v44 }
 0x3cb   : > { %v4288_v17 = vld [vmem:[#allocation2 + $0x140] sm:$0xf0]  ;;  %2930 = vst.msk [vmem:[#allocation2 + $0x13c] sm:$0xf] %vm2391_vm13, %v2867_v58  ;;  %v8207_v44 = vld [vmem:[#allocation20_spill] sm:$0xff] }
 0x3cc   : > { %v3740_v0 = vadd.f32 %v7494_v35, %v3651_v23  ;;  %3637 = vmatmul.bf16.gmra.mxu1 %v4007_v40  ;;  %v4123_v52 = vor.u32 %v4288_v17, %v4122_v32 }
 0x3ce   : > { %v3803_v10 = vpack.c.bf16 %v3740_v0, %v3740_v0  ;;  %3598 = vmatmul.bf16.gmra.mxu2 %v4123_v52  ;;  %v3752_v0 = vpop.f32.mrf.mxu0 }
 0x3cf   : > { %v2562_v29 = vpop.permute.xlu2 %2561  ;;  %v3574_v13 = vpop.f32.mrf.mxu2 }
 0x3d0   : > { %v2659_v18 = vsel %vm7081_vm15, %v2562_v29, %v2658_v31  ;;  %3836 = vst.msk [vmem:[%s7507_s27 + $0x2c] sm:$0xf] %vm3824_vm4, %v3803_v10  ;;  %v2716_v57 = vpop.permute.xlu0 %2715  ;;  %v2352_v14 = vpop.permute.xlu1 %2351 }
 0x3d1   : > { %2660 = vst [vmem:[#allocation2 + $0x178] sm:$0xf] %v2659_v18  ;;  %v3653_v35 = vpop.f32.mrf.mxu3  ;;  %v2451_v42 = vsel %vm6908_vm1, %v2352_v14, %v2450_v1  ;;  %v4142_v18 = vld [vmem:[#allocation2 + $0x158] sm:$0xf] }
 0x3d2   : > { %2807 = vst.msk [vmem:[#allocation2 + $0x148] sm:$0xf] %vm2216_vm9, %v2716_v57  ;;  %v3654_v34 = vadd.f32 %v3653_v35, %v3565_v46  ;;  %v4287_v41 = vld [vmem:[#allocation2 + $0x13c] sm:$0xf]  ;;  %v4292_v46 = vld [vmem:[#allocation2 + $0x160] sm:$0xf0]  ;;  %v3572_v57 = vadd.f32 %v7492_v6, %v3571_v61 }
 0x3d3   : > { %2931 = vst.msk [vmem:[#allocation2 + $0x148] sm:$0xf] %vm2391_vm13, %v7485_v27 }
 0x3d4   : > { %v3743_v26 = vadd.f32 %v7516_v33, %v3654_v34  ;;  %2452 = vst [vmem:[#allocation2 + $0x150] sm:$0xf] %v2451_v42 }
 0x3d6   : > { %v3804_v39 = vpack.c.bf16 %v3743_v26, %v3743_v26  ;;  %v4143_v26 = vor.u32 %v4292_v46, %v4142_v18 }
 0x3d7   : > { %v3576_v14 = vpop.f32.mrf.mxu2 }
 0x3d8   : > { %3837 = vst.msk [vmem:[%s7507_s27 + $0x30] sm:$0xf] %vm3824_vm4, %v3804_v39  ;;  %v2556_v27 = vpop.permute.xlu0 %2555  ;;  %v3623_v16 = vpop.f32.mrf.mxu1  ;;  %v4148_v46 = vld [vmem:[#allocation2 + $0x174] sm:$0xf0] }
 0x3d9   : > { %v3655_v25 = vpop.f32.mrf.mxu3  ;;  %2653 = vst.msk [vmem:[#allocation2 + $0x154] sm:$0xf] %vm1957_vm0, %v2556_v27  ;;  %v2718_v63 = vpop.permute.xlu1 %2717  ;;  %v3624_v53 = vadd.f32 %v3623_v16, %v3535_v2  ;;  %v1499_v2 = vsel %vm4795_vm7, 0, %v1498_v21  ;;  %vm8211_vm7 = vmmov %vm8123_vm2 }
 0x3da   : > { %v3656_v33 = vadd.f32 %v3655_v25, %v3567_v9  ;;  %v4124_v11 = vld [vmem:[#allocation2 + $0x144] sm:$0xf0]  ;;  %v1394_v9 = vsel %vm4813_vm10, 0, %v1393_v48  ;;  %1500 = vst [vmem:[#allocation2 + $0x17c] sm:$0x8] %v1499_v2  ;;  %v3754_v25 = vpop.f32.mrf.mxu0 }
 0x3db   : > { %v4127_v20 = vor.u32 %v4287_v41, %v4124_v11  ;;  %v3713_v36 = vadd.f32 %v8206_v22, %v3624_v53  ;;  %v4134_v34 = vld [vmem:[#allocation2 + $0x150] sm:$0xf]  ;;  %1395 = vst [vmem:[#allocation2 + $0x170] sm:$0x1] %v1394_v9 }
 0x3dc   : > { %v3745_v49 = vadd.f32 %v7531_v47, %v3656_v33  ;;  %4241 = vmatmul.msk.bf16.vlgmr.msrb.gmra.mxu1 %vm8123_vm2, %v4131_v28  ;;  %v3575_v28 = vadd.f32 %v7492_v6, %v3574_v13 }
 0x3dd   : > { %3687 = vmatmul.bf16.gmra.mxu3 %v4127_v20  ;;  %v3792_v60 = vpack.c.bf16 %v3713_v36, %v3713_v36 }
 0x3de   : > { %v3805_v45 = vpack.c.bf16 %v3745_v49, %v3745_v49 }
 0x3df   : > { %3825 = vst.msk [vmem:[%s7507_s27] sm:$0xf] %vm3824_vm4, %v3792_v60  ;;  %v3579_v36 = vpop.f32.mrf.mxu2 }
 0x3e0   : > { %3838 = vst.msk [vmem:[%s7507_s27 + $0x34] sm:$0xf] %vm3824_vm4, %v3805_v45  ;;  %v2354_v56 = vpop.permute.xlu0 %2353  ;;  %v2808_v47 = vld [vmem:[#allocation2 + $0x154] sm:$0xf]  ;;  %v3625_v32 = vpop.f32.mrf.mxu1 }
 0x3e1   : > { %v3658_v23 = vpop.f32.mrf.mxu3  ;;  %2453 = vst.msk [vmem:[#allocation2 + $0x15c] sm:$0xf] %vm2391_vm13, %v2354_v56  ;;  %v2809_v58 = vsel %vm7227_vm6, %v2718_v63, %v2808_v47  ;;  %v2873_v17 = vpop.permute.xlu1 %2872  ;;  %v3626_v55 = vadd.f32 %v3625_v32, %v3537_v8  ;;  %v2454_v63 = vld [vmem:[#allocation2 + $0x168] sm:$0xf]  ;;  %v3577_v56 = vadd.f32 %v7492_v6, %v3576_v14 }
 0x3e2   : > { %v3659_v40 = vadd.f32 %v3658_v23, %v3570_v7  ;;  %2810 = vst [vmem:[#allocation2 + $0x154] sm:$0xf] %v2809_v58  ;;  %v4154_v60 = vld [vmem:[#allocation2 + $0x170] sm:$0xf]  ;;  %v4295_v7 = vld [vmem:[#allocation2 + $0x178] sm:$0xf0]  ;;  %v3757_v13 = vpop.f32.mrf.mxu0 }
 0x3e3   : > { %2933 = vst.msk [vmem:[#allocation2 + $0x160] sm:$0xf] %vm2391_vm13, %v2873_v17  ;;  %v3715_v31 = vadd.f32 %v8207_v44, %v3626_v55  ;;  %v4155_v47 = vor.u32 %v4295_v7, %v4154_v60  ;;  %v3540_v44 = vadd.f32 %v7492_v6, %v7471_v5  ;;  %v3545_v7 = vadd.f32 %v7492_v6, %v7501_v30 }
 0x3e4   : > { %v3748_v52 = vadd.f32 %v3747_v51, %v3659_v40 }
 0x3e5   : > { %v3793_v10 = vpack.c.bf16 %v3715_v31, %v3715_v31  ;;  %v3580_v31 = vadd.f32 %v7492_v6, %v3579_v36 }
 0x3e6   : > { %v3806_v29 = vpack.c.bf16 %v3748_v52, %v3748_v52 }
 0x3e7   : > { %3826 = vst.msk [vmem:[%s7507_s27 + $0x4] sm:$0xf] %vm3824_vm4, %v3793_v10 }
 0x3e8   : > { %3839 = vst.msk [vmem:[%s7507_s27 + $0x38] sm:$0xf] %vm3824_vm4, %v3806_v29  ;;  %v2871_v24 = vpop.permute.xlu0 %2870  ;;  %v4291_v1 = vld [vmem:[#allocation2 + $0x158] sm:$0xf0] }
 0x3e9   : > { %v3660_v35 = vpop.f32.mrf.mxu3  ;;  %2932 = vst.msk [vmem:[#allocation2 + $0x154] sm:$0xf] %vm2391_vm13, %v2871_v24  ;;  %v4135_v42 = vor.u32 %v4291_v1, %v4134_v34  ;;  %v2358_v39 = vpop.permute.xlu1 %2357 }
 0x3ea   : > { %v3661_v51 = vadd.f32 %v3660_v35, %v3572_v57  ;;  %2457 = vst.msk [vmem:[#allocation2 + $0x174] sm:$0xf] %vm2391_vm13, %v2358_v39  ;;  %v4136_v16 = vld [vmem:[#allocation2 + $0x15c] sm:$0xf0]  ;;  %v3759_v34 = vpop.f32.mrf.mxu0 }
 0x3eb   : > { %3603 = vmatmul.bf16.gmra.mxu2 %v4135_v42  ;;  %v3542_v42 = vadd.f32 %v7492_v6, %v7481_v37 }
 0x3ec   : > { %v3750_v27 = vadd.f32 %v3749_v43, %v3661_v51  ;;  %4242 = vmatmul.msk.bf16.gmra.mxu1 %vm8210_vm8, %v4143_v26 }
 0x3ee   : > { %v3807_v33 = vpack.c.bf16 %v3750_v27, %v3750_v27 }
 0x3f0   : > { %3840 = vst.msk [vmem:[%s7507_s27 + $0x3c] sm:$0xf] %vm3824_vm4, %v3807_v33  ;;  %v2356_v11 = vpop.permute.xlu0 %2355  ;;  %v4290_v20 = vld [vmem:[#allocation2 + $0x154] sm:$0xf] }
 0x3f1   : > { %v3663_v53 = vpop.f32.mrf.mxu3  ;;  %v2455_v43 = vsel %vm6908_vm1, %v2356_v11, %v2454_v63  ;;  %v4139_v22 = vor.u32 %v4290_v20, %v4136_v16  ;;  %v4294_v23 = vld [vmem:[#allocation2 + $0x170] sm:$0xf0] }
 0x3f2   : > { %v3664_v49 = vadd.f32 %v3663_v53, %v3575_v28  ;;  %2456 = vst [vmem:[#allocation2 + $0x168] sm:$0xf] %v2455_v43  ;;  %v3762_v2 = vpop.f32.mrf.mxu0 }
 0x3f3   : > { %3692 = vmatmul.bf16.gmra.mxu3 %v4139_v22 }
 0x3f4   : > { %v3753_v45 = vadd.f32 %v3752_v0, %v3664_v49  ;;  %v3581_v0 = vpop.f32.mrf.mxu2 }
 0x3f5   : > { %v3582_v26 = vadd.f32 %v7492_v6, %v3581_v0 }
 0x3f6   : > { %v3808_v8 = vpack.c.bf16 %v3753_v45, %v3753_v45 }
 0x3f8   : > { %3841 = vst.msk [vmem:[%s7507_s27 + $0x40] sm:$0xf] %vm3824_vm4, %v3808_v8  ;;  %v2560_v40 = vpop.permute.xlu0 %2559 }
 0x3f9   : > { %v3665_v12 = vpop.f32.mrf.mxu3  ;;  %2657 = vst.msk [vmem:[#allocation2 + $0x16c] sm:$0xf] %vm1957_vm0, %v2560_v40  ;;  %v4146_v32 = vld [vmem:[#allocation2 + $0x168] sm:$0xf] }
 0x3fa   : > { %v3666_v58 = vadd.f32 %v3665_v12, %v3577_v56  ;;  %v4147_v17 = vor.u32 %v4294_v23, %v4146_v32  ;;  %v3764_v53 = vpop.f32.mrf.mxu0 }
 0x3fc   : > { %v3755_v55 = vadd.f32 %v3754_v25, %v3666_v58  ;;  %4243 = vmatmul.msk.bf16.gmra.mxu1 %vm8211_vm7, %v4155_v47  ;;  %3608 = vmatmul.bf16.gmra.mxu2 %v4147_v17  ;;  %v3584_v39 = vpop.f32.mrf.mxu2 }
 0x3fd   : > { %v3585_v37 = vadd.f32 %v7492_v6, %v3584_v39 }
 0x3fe   : > { %v3809_v52 = vpack.c.bf16 %v3755_v55, %v3755_v55  ;;  %v3547_v55 = vadd.f32 %v7492_v6, %v7521_v3 }
 0x400   : > { %3842 = vst.msk [vmem:[%s7507_s27 + $0x44] sm:$0xf] %vm3824_vm4, %v3809_v52  ;;  %v3628_v29 = vpop.f32.mrf.mxu1  ;;  %v4293_v18 = vld [vmem:[#allocation2 + $0x16c] sm:$0xf] }
 0x401   : > { %v3668_v10 = vpop.f32.mrf.mxu3  ;;  %v3629_v57 = vadd.f32 %v3628_v29, %v3540_v44  ;;  %v4151_v35 = vor.u32 %v4293_v18, %v4148_v46 }
 0x402   : > { %v3669_v24 = vadd.f32 %v3668_v10, %v3580_v31  ;;  %v3767_v60 = vpop.f32.mrf.mxu0 }
 0x403   : > { %v3718_v1 = vadd.f32 %v7369_v38, %v3629_v57  ;;  %3697 = vmatmul.bf16.gmra.mxu3 %v4151_v35 }
 0x404   : > { %v3758_v14 = vadd.f32 %v3757_v13, %v3669_v24  ;;  %v3586_v28 = vpop.f32.mrf.mxu2 }
 0x405   : > { %v3794_v51 = vpack.c.bf16 %v3718_v1, %v3718_v1  ;;  %v3587_v20 = vadd.f32 %v7492_v6, %v3586_v28 }
 0x406   : > { %v3810_v5 = vpack.c.bf16 %v3758_v14, %v3758_v14 }
 0x407   : > { %3827 = vst.msk [vmem:[%s7507_s27 + $0x8] sm:$0xf] %vm3824_vm4, %v3794_v51 }
 0x408   : > { %3843 = vst.msk [vmem:[%s7507_s27 + $0x48] sm:$0xf] %vm3824_vm4, %v3810_v5  ;;  %v3630_v48 = vpop.f32.mrf.mxu1  ;;  %v3550_v5 = vadd.f32 %v7492_v6, %v7537_v15 }
 0x409   : > { %v3670_v21 = vpop.f32.mrf.mxu3  ;;  %v3631_v61 = vadd.f32 %v3630_v48, %v3542_v42 }
 0x40a   : > { %v3671_v38 = vadd.f32 %v3670_v21, %v3582_v26  ;;  %v3769_v44 = vpop.f32.mrf.mxu0 }
 0x40b   : > { %v3720_v9 = vadd.f32 %v7388_v59, %v3631_v61 }
 0x40c   : > { %v3760_v41 = vadd.f32 %v3759_v34, %v3671_v38 }
 0x40d   : > { %v3795_v27 = vpack.c.bf16 %v3720_v9, %v3720_v9 }
 0x40e   : > { %v3811_v25 = vpack.c.bf16 %v3760_v41, %v3760_v41  ;;  %v3589_v49 = vpop.f32.mrf.mxu2  ;;  %v3552_v41 = vadd.f32 %v7492_v6, %v7552_v54 }
 0x40f   : > { %3828 = vst.msk [vmem:[%s7507_s27 + $0xc] sm:$0xf] %vm3824_vm4, %v3795_v27  ;;  %v3590_v45 = vadd.f32 %v7492_v6, %v3589_v49 }
 0x410   : > { %3844 = vst.msk [vmem:[%s7507_s27 + $0x4c] sm:$0xf] %vm3824_vm4, %v3811_v25 }
 0x411   : > { %v3673_v33 = vpop.f32.mrf.mxu3 }
 0x412   : > { %v3674_v16 = vadd.f32 %v3673_v33, %v3585_v37  ;;  %v3772_v57 = vpop.f32.mrf.mxu0 }
 0x414   : > { %v3763_v11 = vadd.f32 %v3762_v2, %v3674_v16 }
 0x416   : > { %v3812_v63 = vpack.c.bf16 %v3763_v11, %v3763_v11  ;;  %v3591_v40 = vpop.f32.mrf.mxu2 }
 0x417   : > { %v3592_v17 = vadd.f32 %v7492_v6, %v3591_v40 }
 0x418   : > { %3845 = vst.msk [vmem:[%s7507_s27 + $0x50] sm:$0xf] %vm3824_vm4, %v3812_v63 }
 0x419   : > { %v3675_v59 = vpop.f32.mrf.mxu3 }
 0x41a   : > { %v3676_v43 = vadd.f32 %v3675_v59, %v3587_v20  ;;  %v3774_v26 = vpop.f32.mrf.mxu0 }
 0x41c   : > { %v3765_v22 = vadd.f32 %v3764_v53, %v3676_v43 }
 0x41e   : > { %v3813_v36 = vpack.c.bf16 %v3765_v22, %v3765_v22 }
 0x420   : > { %3846 = vst.msk [vmem:[%s7507_s27 + $0x54] sm:$0xf] %vm3824_vm4, %v3813_v36 }
 0x421   : > { %v3678_v8 = vpop.f32.mrf.mxu3  ;;  %v3633_v56 = vpop.f32.mrf.mxu1 }
 0x422   : > { %v3679_v13 = vadd.f32 %v3678_v8, %v3590_v45  ;;  %v3634_v23 = vadd.f32 %v3633_v56, %v3545_v7 }
 0x424   : > { %v3768_v47 = vadd.f32 %v3767_v60, %v3679_v13  ;;  %v3723_v12 = vadd.f32 %v7404_v50, %v3634_v23 }
 0x426   : > { %v3814_v58 = vpack.c.bf16 %v3768_v47, %v3768_v47  ;;  %v3796_v32 = vpack.c.bf16 %v3723_v12, %v3723_v12 }
 0x428   : > { %3847 = vst.msk [vmem:[%s7507_s27 + $0x58] sm:$0xf] %vm3824_vm4, %v3814_v58 }
 0x429   : > { %3829 = vst.msk [vmem:[%s7507_s27 + $0x10] sm:$0xf] %vm3824_vm4, %v3796_v32  ;;  %v3680_v30 = vpop.f32.mrf.mxu3  ;;  %v3635_v52 = vpop.f32.mrf.mxu1 }
 0x42a   : > { %v3681_v0 = vadd.f32 %v3680_v30, %v3592_v17  ;;  %v3636_v31 = vadd.f32 %v3635_v52, %v3547_v55 }
 0x42c   : > { %v3770_v50 = vadd.f32 %v3769_v44, %v3681_v0  ;;  %v3725_v29 = vadd.f32 %v7420_v62, %v3636_v31 }
 0x42e   : > { %v3815_v10 = vpack.c.bf16 %v3770_v50, %v3770_v50  ;;  %v3797_v18 = vpack.c.bf16 %v3725_v29, %v3725_v29 }
 0x42f   : > { %v3594_v46 = vpop.f32.mrf.mxu2 }
 0x430   : > { %3848 = vst.msk [vmem:[%s7507_s27 + $0x5c] sm:$0xf] %vm3824_vm4, %v3815_v10  ;;  %v3595_v3 = vadd.f32 %v7492_v6, %v3594_v46 }
 0x431   : > { %3830 = vst.msk [vmem:[%s7507_s27 + $0x14] sm:$0xf] %vm3824_vm4, %v3797_v18 }
 0x437   : > { %v3596_v1 = vpop.f32.mrf.mxu2 }
 0x438   : > { %v3597_v51 = vadd.f32 %v7492_v6, %v3596_v1 }
 0x43e   : > { %v3683_v24 = vpop.f32.mrf.mxu3 }
 0x43f   : > { %v3684_v35 = vadd.f32 %v3683_v24, %v3595_v3 }
 0x441   : > { %v3773_v34 = vadd.f32 %v3772_v57, %v3684_v35 }
 0x443   : > { %v3816_v14 = vpack.c.bf16 %v3773_v34, %v3773_v34 }
 0x445   : > { %3849 = vst.msk [vmem:[%s7507_s27 + $0x60] sm:$0xf] %vm3824_vm4, %v3816_v14 }
 0x446   : > { %v3685_v62 = vpop.f32.mrf.mxu3 }
 0x447   : > { %v3686_v42 = vadd.f32 %v3685_v62, %v3597_v51 }
 0x449   : > { %v3638_v39 = vpop.f32.mrf.mxu1  ;;  %v3775_v48 = vadd.f32 %v3774_v26, %v3686_v42 }
 0x44a   : > { %v3639_v21 = vadd.f32 %v3638_v39, %v3550_v5 }
 0x44b   : > { %v3817_v61 = vpack.c.bf16 %v3775_v48, %v3775_v48 }
 0x44c   : > { %v3728_v38 = vadd.f32 %v7432_v4, %v3639_v21 }
 0x44d   : > { %3850 = vst.msk [vmem:[%s7507_s27 + $0x64] sm:$0xf] %vm3824_vm4, %v3817_v61 }
 0x44e   : > { %v3798_v9 = vpack.c.bf16 %v3728_v38, %v3728_v38 }
 0x450   : > { %3831 = vst.msk [vmem:[%s7507_s27 + $0x18] sm:$0xf] %vm3824_vm4, %v3798_v9 }
 0x451   : > { %v3640_v2 = vpop.f32.mrf.mxu1  ;;  %v3599_v37 = vpop.f32.mrf.mxu2 }
 0x452   : > { %v3641_v15 = vadd.f32 %v3640_v2, %v3552_v41  ;;  %v3600_v4 = vadd.f32 %v7492_v6, %v3599_v37 }
 0x454   : > { %v3730_v27 = vadd.f32 %v7443_v19, %v3641_v15 }
 0x456   : > { %v3799_v25 = vpack.c.bf16 %v3730_v27, %v3730_v27 }
 0x458   : > { %3832 = vst.msk [vmem:[%s7507_s27 + $0x1c] sm:$0xf] %vm3824_vm4, %v3799_v25 }
 0x459   : > { %v3777_v33 = vpop.f32.mrf.mxu1  ;;  %v3601_v63 = vpop.f32.mrf.mxu2 }
 0x45a   : > { %v3602_v53 = vadd.f32 %v7492_v6, %v3601_v63 }
 0x460   : > { %v3688_v16 = vpop.f32.mrf.mxu3 }
 0x461   : > { %v3689_v28 = vadd.f32 %v3688_v16, %v3600_v4  ;;  %v3779_v59 = vpop.f32.mrf.mxu1 }
 0x463   : > { %v3778_v11 = vadd.f32 %v3777_v33, %v3689_v28 }
 0x465   : > { %v3818_v54 = vpack.c.bf16 %v3778_v11, %v3778_v11 }
 0x467   : > { %3851 = vst.msk [vmem:[%s7507_s27 + $0x68] sm:$0xf] %vm3824_vm4, %v3818_v54 }
 0x468   : > { %v3690_v20 = vpop.f32.mrf.mxu3 }
 0x469   : > { %v3691_v19 = vadd.f32 %v3690_v20, %v3602_v53  ;;  %v3782_v36 = vpop.f32.mrf.mxu1 }
 0x46b   : > { %v3780_v43 = vadd.f32 %v3779_v59, %v3691_v19 }
 0x46d   : > { %v3819_v49 = vpack.c.bf16 %v3780_v43, %v3780_v43 }
 0x46e   : > { %v3604_v22 = vpop.f32.mrf.mxu2 }
 0x46f   : > { %3852 = vst.msk [vmem:[%s7507_s27 + $0x6c] sm:$0xf] %vm3824_vm4, %v3819_v49  ;;  %v3605_v45 = vadd.f32 %v7492_v6, %v3604_v22 }
 0x471   : > { %v3784_v47 = vpop.f32.mrf.mxu1 }
 0x476   : > { %v3606_v60 = vpop.f32.mrf.mxu2  ;;  %v3693_v7 = vpop.f32.mrf.mxu3 }
 0x477   : > { %v3694_v8 = vadd.f32 %v3693_v7, %v3605_v45  ;;  %v3607_v23 = vadd.f32 %v7492_v6, %v3606_v60 }
 0x479   : > { %v3783_v13 = vadd.f32 %v3782_v36, %v3694_v8  ;;  %v3787_v30 = vpop.f32.mrf.mxu1 }
 0x47b   : > { %v3820_v56 = vpack.c.bf16 %v3783_v13, %v3783_v13 }
 0x47d   : > { %3853 = vst.msk [vmem:[%s7507_s27 + $0x70] sm:$0xf] %vm3824_vm4, %v3820_v56 }
 0x47e   : > { %v3695_v40 = vpop.f32.mrf.mxu3 }
 0x47f   : > { %v3696_v12 = vadd.f32 %v3695_v40, %v3607_v23  ;;  %v3609_v58 = vpop.f32.mrf.mxu2 }
 0x480   : > { %v3610_v55 = vadd.f32 %v7492_v6, %v3609_v58 }
 0x481   : > { %v3785_v32 = vadd.f32 %v3784_v47, %v3696_v12  ;;  %v3789_v46 = vpop.f32.mrf.mxu1 }
 0x483   : > { %v3821_v17 = vpack.c.bf16 %v3785_v32, %v3785_v32 }
 0x485   : > { %3854 = vst.msk [vmem:[%s7507_s27 + $0x74] sm:$0xf] %vm3824_vm4, %v3821_v17 }
 0x486   : > { %v3698_v0 = vpop.f32.mrf.mxu3 }
 0x487   : > { %v3699_v52 = vadd.f32 %v3698_v0, %v3610_v55  ;;  %v3611_v31 = vpop.f32.mrf.mxu2 }
 0x488   : > { %v3612_v29 = vadd.f32 %v7492_v6, %v3611_v31 }
 0x489   : > { %v3788_v44 = vadd.f32 %v3787_v30, %v3699_v52 }
 0x48b   : > { %v3822_v50 = vpack.c.bf16 %v3788_v44, %v3788_v44 }
 0x48d   : > { %3855 = vst.msk [vmem:[%s7507_s27 + $0x78] sm:$0xf] %vm3824_vm4, %v3822_v50 }
 0x48e   : > { %v3700_v10 = vpop.f32.mrf.mxu3 }
 0x48f   : > { %v3701_v18 = vadd.f32 %v3700_v10, %v3612_v29 }
 0x491   : > { %v3790_v3 = vadd.f32 %v3789_v46, %v3701_v18 }
 0x493   : > { %v3823_v57 = vpack.c.bf16 %v3790_v3, %v3790_v3 }
 0x495   : > { %3856 = vst.msk [vmem:[%s7507_s27 + $0x7c] sm:$0xf] %vm3824_vm4, %v3823_v57 }
 0x496 PF: > { %s16_s21 = sadd.s32 1, %s4498_s21  }
 0x497   : > { %p13_p4 = scmp.ge.s32.totalorder %s16_s21, 4  }
 0x499   :  { %15 = sbr.rel (!%p13_p4) target bundleno = 1 (0x1), region = 79 }

// kernel: resnet_block_2d.3
= control target key start
LH: loop header
LB: loop body
LE: loop exit
PB: predicated region body
PF: predicated region fallthrough
CT: control target
= control target key end

     0   :  { %12 = vsyncpa [#allocation4], 0  ;;  %s8637_s0 = inlined_call_operand.vmem [shape: bf16[2,16,16,64], index: 0, kind: input, shape index: {}]   ;;  %s8638_s1 = inlined_call_operand.vmem [shape: bf16[2,16,16,32], index: 1, kind: input, shape index: {}]   ;;  %s8639_s2 = inlined_call_operand.vmem [shape: f32[1,64], index: 2, kind: input, shape index: {}]   ;;  %s8640_s3 = inlined_call_operand.vmem [shape: f32[1,64], index: 3, kind: input, shape index: {}]   ;;  %s8641_s4 = inlined_call_operand.vmem [shape: f32[64,64], index: 4, kind: input, shape index: {}]   ;;  %s8642_s5 = inlined_call_operand.vmem [shape: bf16[608,64], index: 5, kind: input, shape index: {}]   ;;  %s8643_s6 = inlined_call_operand.vmem [shape: f32[1,64], index: 6, kind: input, shape index: {}]   ;;  %s8644_s7 = inlined_call_operand.hbm [shape: f32[2,16,16,64], index: 7, kind: output, shape index: {}]  }
   0x1   :  { %14 = vsyncpa [#allocation4 + $0x1], 0  ;;  %s5582_s24 = smov 0   ;;  %s5584_s25 = smov 0  }
   0x2   :  { %s5586_s26 = smov 0   ;;  %s5588_s27 = smov 0  }
   0x3 LB: > { %s5603_s28 = sadd.s32 4294967295, %s5536_s27   ;;  %s4539_s29 = sadd.s32 4294967294, %s5536_s27   ;;  %s5536_s27 = sphi %s5588_s27, %s8927_s27   ;;  %s5532_s26 = sphi %s5586_s26, %s8926_s26   ;;  %s5528_s25 = sphi %s5584_s25, %s8925_s25   ;;  %s5524_s24 = sphi %s5582_s24, %s8924_s24  }
   0x4   : > { %s5607_s30 = sadd.s32 1, %s5536_s27   ;;  %s184_s8 = sadd.s32 1, %s5532_s26 }
   0x5   : > { %s181_s9 = ssub.s32 %s5536_s27, %s5607_s30  ;;  %p194_p0 = scmp.ne.s32.totalorder %s5532_s26, %s5528_s25 }
   0x6   : > { %p182_p1 = scmp.eq.s32.totalorder %s181_s9, 0  ;;  %p195_p2 = scmp.eq.s32.totalorder %s5603_s28, 1 }
   0x7   : > { %p200_p3 = scmp.ne.s32.totalorder %s5528_s25, %s5524_s24  ;;  %p201_p4 = scmp.eq.s32.totalorder %s4539_s29, 1 }
   0x8   : > { %s5618_s10 = scalar_select %p182_p1, %s5532_s26, %s184_s8  }
   0x9   : > { %p5620_p5 = por %p195_p2, %p194_p0  ;;  %p5624_p6 = por %p201_p4, %p200_p3 }
   0xa   : > { %p4542_p7 = scmp.ge.s32.totalorder %s5536_s27, 1  ;;  %p250_p8 = scmp.lt.s32.totalorder %s5536_s27, 3 }
   0xc   : > { %p251_p9 = pnand %p4542_p7, %p250_p8 }
   0xe   : > { %254 = sbr.rel (%p251_p9) target bundleno = 1097 (0x449), region = 48 }
  0x13   : > { %v369_v0 = vld [vmem:[%s8641_s4 + $0x38] sm:$0xff]  ;;  %v368_v1 = vld [vmem:[%s8641_s4 + $0x30] sm:$0xff]  ;;  %p287_p10 = scmp.lt.s32.totalorder %s5603_s28, 1  ;;  %v367_v2 = vld [vmem:[%s8641_s4 + $0x28] sm:$0xff]  ;;  %vm8660_vm0 = vcmask 523264   ;;  %s5538_s9 = smov 64  }
  0x14   : > { %554 = vmatpush.msra.mxu0 %v369_v0  ;;  %v366_v3 = vld [vmem:[%s8641_s4 + $0x20] sm:$0xff]  ;;  %v365_v4 = vld [vmem:[%s8641_s4 + $0x18] sm:$0xff]  ;;  %v364_v5 = vld [vmem:[%s8641_s4 + $0x10] sm:$0xff]  ;;  %s284_s18 = sand.u32 1, %s5528_s25   ;;  %s5195_s23 = sshll.u32 %s5603_s28, 8 }
  0x15   : > { %s5641_s19 = scalar_select %p287_p10, %s5603_s28, 1  ;;  %v363_v8 = vld [vmem:[%s8641_s4 + $0x8] sm:$0xff]  ;;  %v362_v12 = vld [vmem:[%s8641_s4] sm:$0xff] }
  0x16   : > { %555 = vmatpush.msra.mxu0 %v368_v1  ;;  %s4543_s20 = sshll.u32 %s284_s18, 8  ;;  %s4461_s15 = scalar_lea.hbm %s8644_s7, %s5195_s23 }
  0x17   : > { %s5075_s22 = sshll.u32 %s5641_s19, 7  ;;  %s8429_s21 = scalar_lea.vmem [#allocation3], %s4543_s20 }
  0x18   : > { %556 = vmatpush.msra.mxu0 %v367_v2  ;;  %s5652_s8 = scalar_lea.vmem %s8637_s0, %s5075_s22  ;;  %s6728_s17 = scalar_lea.vmem %s8638_s1, %s5075_s22 }
  0x19   : > { %v5197_v6 = vld [vmem:[%s5652_s8] sm:$0xff]   ;;  %v5260_v7 = vld [vmem:[%s5652_s8 + $0x8] sm:$0xff]   ;;  %v5261_v13 = vld [vmem:[%s5652_s8 + $0x10] sm:$0xff]   ;;  %s4462_s28 = sshll.u32 %s8429_s21, 4  ;;  %s4464_s16 = sshll.u32 %s4461_s15, 4  ;;  %s4463_s28 = int_to_ptr.vmem [resolvable:$true] %s4462_s28  ;;  %s4465_s16 = int_to_ptr.hbm [resolvable:$true] %s4464_s16 }
  0x1a   : > { %557 = vmatpush.msra.mxu0 %v366_v3  ;;  %v5665_v9 = vunpack.c.l.bf16 %v5197_v6  ;;  %v5667_v10 = vunpack.c.h.bf16 %v5197_v6  ;;  %v5669_v11 = vunpack.c.l.bf16 %v5260_v7  ;;  %v5675_v14 = vunpack.c.h.bf16 %v5260_v7  ;;  %v5262_v19 = vld [vmem:[%s5652_s8 + $0x18] sm:$0xff]   ;;  %v5263_v26 = vld [vmem:[%s5652_s8 + $0x20] sm:$0xff]   ;;  %v5264_v34 = vld [vmem:[%s5652_s8 + $0x28] sm:$0xff]   ;;  %s4450_s19 = scalar_lea.sflag [#allocation4], %s284_s18  ;;  %s5488_s22 = sshra.s32 %s4465_s16, 4  ;;  %s5489_s22 = int_to_ptr.hbm [resolvable:$true] %s5488_s22 }
  0x1b   : > { %v5677_v15 = vunpack.c.l.bf16 %v5261_v13  ;;  %v5686_v21 = vunpack.c.h.bf16 %v5261_v13  ;;  %v5690_v24 = vunpack.c.l.bf16 %v5262_v19  ;;  %v5695_v28 = vunpack.c.h.bf16 %v5262_v19  ;;  %v5265_v45 = vld [vmem:[%s5652_s8 + $0x30] sm:$0xff]   ;;  %v5266_v59 = vld [vmem:[%s5652_s8 + $0x38] sm:$0xff]   ;;  %s5494_s23 = scalar_lea.hbm %s8644_s7, 512  ;;  %p5495_p0 = scmp.lt.s32.totalorder %s5489_s22, %s8644_s7 }
  0x1c   : > { %558 = vmatpush.msra.mxu0 %v365_v4  ;;  %8711 = vst [vmem:[#allocation6_spill] sm:$0xff] %v5665_v9  ;;  %v373_v16 = vsel %vm8660_vm0, %v5665_v9, 0.0  ;;  %v374_v17 = vsel %vm8660_vm0, %v5667_v10, 0.0  ;;  %v376_v18 = vsel %vm8660_vm0, %v5669_v11, 0.0  ;;  %v378_v22 = vsel %vm8660_vm0, %v5675_v14, 0.0 }
  0x1d   : > { %8712 = vst [vmem:[#allocation7_spill] sm:$0xff] %v5667_v10  ;;  %v375_v20 = vadd.f32 %v374_v17, %v373_v16  ;;  %v380_v25 = vsel %vm8660_vm0, %v5677_v15, 0.0  ;;  %v382_v29 = vsel %vm8660_vm0, %v5686_v21, 0.0  ;;  %v5699_v31 = vunpack.c.l.bf16 %v5263_v26 }
  0x1e   : > { %559 = vmatpush.msra.mxu0 %v364_v5  ;;  %v384_v32 = vsel %vm8660_vm0, %v5690_v24, 0.0  ;;  %v442_v33 = vmul.f32 %v5665_v9, %v5665_v9  ;;  %v443_v36 = vmul.f32 %v5667_v10, %v5667_v10  ;;  %v444_v37 = vmul.f32 %v5669_v11, %v5669_v11 }
  0x1f   : > { %v377_v23 = vadd.f32 %v376_v18, %v375_v20  ;;  %8713 = vst [vmem:[#allocation8_spill] sm:$0xff] %v5699_v31  ;;  %v5710_v38 = vunpack.c.h.bf16 %v5263_v26  ;;  %v386_v39 = vsel %vm8660_vm0, %v5695_v28, 0.0  ;;  %v445_v41 = vmul.f32 %v5675_v14, %v5675_v14 }
  0x20   : > { %560 = vmatpush.msra.mxu0 %v363_v8  ;;  %v5716_v42 = vunpack.c.l.bf16 %v5264_v34  ;;  %v388_v43 = vsel %vm8660_vm0, %v5699_v31, 0.0  ;;  %v474_v44 = vsel %vm8660_vm0, %v442_v33, 0.0  ;;  %v446_v47 = vmul.f32 %v5677_v15, %v5677_v15 }
  0x21   : > { %v379_v27 = vadd.f32 %v378_v22, %v377_v23  ;;  %8714 = vst [vmem:[#allocation9_spill] sm:$0xff] %v5710_v38  ;;  %v475_v48 = vsel %vm8660_vm0, %v443_v36, 0.0  ;;  %v477_v49 = vsel %vm8660_vm0, %v444_v37, 0.0  ;;  %v5726_v50 = vunpack.c.h.bf16 %v5264_v34 }
  0x22   : > { %561 = vmatpush.msra.mxu0 %v362_v12  ;;  %v390_v51 = vsel %vm8660_vm0, %v5710_v38, 0.0  ;;  %v476_v52 = vadd.f32 %v475_v48, %v474_v44  ;;  %v447_v54 = vmul.f32 %v5686_v21, %v5686_v21  ;;  %v479_v55 = vsel %vm8660_vm0, %v445_v41, 0.0 }
  0x23   : > { %v381_v30 = vadd.f32 %v380_v25, %v379_v27  ;;  %v5733_v56 = vunpack.c.l.bf16 %v5265_v45  ;;  %v392_v57 = vsel %vm8660_vm0, %v5716_v42, 0.0  ;;  %v448_v61 = vmul.f32 %v5690_v24, %v5690_v24 }
  0x24   : > { %577 = vmatpush.msrb.mxu0 %v369_v0  ;;  %v478_v58 = vadd.f32 %v477_v49, %v476_v52  ;;  %v481_v62 = vsel %vm8660_vm0, %v446_v47, 0.0  ;;  %v5741_v63 = vunpack.c.h.bf16 %v5265_v45  ;;  %v394_v0 = vsel %vm8660_vm0, %v5726_v50, 0.0  ;;  %v5269_v45 = vld [vmem:[%s5652_s8 + $0x50] sm:$0xff]  }
  0x25   : > { %v383_v35 = vadd.f32 %v382_v29, %v381_v30  ;;  %v396_v6 = vsel %vm8660_vm0, %v5733_v56, 0.0  ;;  %v450_v13 = vmul.f32 %v5699_v31, %v5699_v31  ;;  %v485_v16 = vsel %vm8660_vm0, %v448_v61, 0.0  ;;  %v5268_v29 = vld [vmem:[%s5652_s8 + $0x48] sm:$0xff]  }
  0x26   : > { %578 = vmatpush.msrb.mxu0 %v368_v1  ;;  %v480_v1 = vadd.f32 %v479_v55, %v478_v58  ;;  %v5756_v17 = vunpack.c.h.bf16 %v5266_v59  ;;  %v398_v18 = vsel %vm8660_vm0, %v5741_v63, 0.0  ;;  %v451_v22 = vmul.f32 %v5710_v38, %v5710_v38 }
  0x27   : > { %v385_v40 = vadd.f32 %v384_v32, %v383_v35  ;;  %v452_v32 = vmul.f32 %v5716_v42, %v5716_v42  ;;  %v489_v33 = vsel %vm8660_vm0, %v450_v13, 0.0  ;;  %v5778_v41 = vunpack.c.l.bf16 %v5268_v29 }
  0x28   : > { %579 = vmatpush.msrb.mxu0 %v367_v2  ;;  %v482_v7 = vadd.f32 %v481_v62, %v480_v1  ;;  %v402_v35 = vsel %vm8660_vm0, %v5756_v17, 0.0  ;;  %v454_v47 = vmul.f32 %v5733_v56, %v5733_v56  ;;  %v5786_v49 = vunpack.c.h.bf16 %v5268_v29 }
  0x29   : > { %v387_v46 = vadd.f32 %v386_v39, %v385_v40  ;;  %v453_v39 = vmul.f32 %v5726_v50, %v5726_v50  ;;  %v491_v40 = vsel %vm8660_vm0, %v451_v22, 0.0  ;;  %8715 = vst [vmem:[#allocation10_spill] sm:$0xff] %v5778_v41  ;;  %v493_v48 = vsel %vm8660_vm0, %v452_v32, 0.0 }
  0x2a   : > { %580 = vmatpush.msrb.mxu0 %v366_v3  ;;  %v449_v3 = vmul.f32 %v5695_v28, %v5695_v28  ;;  %8716 = vst [vmem:[#allocation11_spill] sm:$0xff] %v5786_v49  ;;  %v408_v58 = vsel %vm8660_vm0, %v5778_v41, 0.0  ;;  %v5801_v1 = vunpack.c.h.bf16 %v5269_v45 }
  0x2b   : > { %v389_v53 = vadd.f32 %v388_v43, %v387_v46  ;;  %v495_v55 = vsel %vm8660_vm0, %v453_v39, 0.0  ;;  %v460_v39 = vmul.f32 %v5778_v41, %v5778_v41 }
  0x2c   : > { %581 = vmatpush.msrb.mxu0 %v365_v4  ;;  %v483_v4 = vsel %vm8660_vm0, %v447_v54, 0.0  ;;  %v487_v23 = vsel %vm8660_vm0, %v449_v3, 0.0  ;;  %v455_v54 = vmul.f32 %v5741_v63, %v5741_v63 }
  0x2d   : > { %v391_v60 = vadd.f32 %v390_v51, %v389_v53  ;;  %v484_v19 = vadd.f32 %v483_v4, %v482_v7 }
  0x2e   : > { %582 = vmatpush.msrb.mxu0 %v364_v5  ;;  %v5748_v5 = vunpack.c.l.bf16 %v5266_v59  ;;  %v499_v7 = vsel %vm8660_vm0, %v455_v54, 0.0  ;;  %v5273_v54 = vld [vmem:[%s5652_s8 + $0x70] sm:$0xff]  }
  0x2f   : > { %v393_v2 = vadd.f32 %v392_v57, %v391_v60  ;;  %v486_v27 = vadd.f32 %v485_v16, %v484_v19  ;;  %v5793_v57 = vunpack.c.l.bf16 %v5269_v45  ;;  %v5270_v60 = vld [vmem:[%s5652_s8 + $0x58] sm:$0xff]   ;;  %v5271_v16 = vld [vmem:[%s5652_s8 + $0x60] sm:$0xff]  }
  0x30   : > { %583 = vmatpush.msrb.mxu0 %v363_v8  ;;  %v5267_v8 = vld [vmem:[%s5652_s8 + $0x40] sm:$0xff]   ;;  %v400_v26 = vsel %vm8660_vm0, %v5748_v5, 0.0  ;;  %v456_v62 = vmul.f32 %v5748_v5, %v5748_v5  ;;  %v5816_v22 = vunpack.c.h.bf16 %v5270_v60  ;;  %v5823_v32 = vunpack.c.l.bf16 %v5271_v16 }
  0x31   : > { %v5763_v25 = vunpack.c.l.bf16 %v5267_v8  ;;  %v5771_v34 = vunpack.c.h.bf16 %v5267_v8  ;;  %v488_v36 = vadd.f32 %v487_v23, %v486_v27  ;;  %v5808_v8 = vunpack.c.l.bf16 %v5270_v60 }
  0x32   : > { %584 = vmatpush.msrb.mxu0 %v362_v12  ;;  %v395_v12 = vadd.f32 %v394_v0, %v393_v2  ;;  %v497_v0 = vsel %vm8660_vm0, %v454_v47, 0.0  ;;  %v410_v2 = vsel %vm8660_vm0, %v5786_v49, 0.0  ;;  %v414_v23 = vsel %vm8660_vm0, %v5801_v1, 0.0 }
  0x33   : > { %v404_v43 = vsel %vm8660_vm0, %v5763_v25, 0.0  ;;  %v490_v44 = vadd.f32 %v489_v33, %v488_v36  ;;  %v406_v51 = vsel %vm8660_vm0, %v5771_v34, 0.0  ;;  %v458_v19 = vmul.f32 %v5763_v25, %v5763_v25  ;;  %v5272_v36 = vld [vmem:[%s5652_s8 + $0x68] sm:$0xff]  }
  0x34   : > { %v397_v20 = vadd.f32 %v396_v6, %v395_v12  ;;  %v457_v6 = vmul.f32 %v5756_v17, %v5756_v17  ;;  %v412_v12 = vsel %vm8660_vm0, %v5793_v57, 0.0  ;;  %v459_v29 = vmul.f32 %v5771_v34, %v5771_v34 }
  0x35   : > { %v492_v52 = vadd.f32 %v491_v40, %v490_v44  ;;  %v416_v33 = vsel %vm8660_vm0, %v5808_v8, 0.0  ;;  %v505_v40 = vsel %vm8660_vm0, %v458_v19, 0.0  ;;  %v418_v44 = vsel %vm8660_vm0, %v5816_v22, 0.0 }
  0x36   : > { %v399_v30 = vadd.f32 %v398_v18, %v397_v20  ;;  %v501_v20 = vsel %vm8660_vm0, %v456_v62, 0.0  ;;  %v461_v47 = vmul.f32 %v5786_v49, %v5786_v49  ;;  %v5846_v60 = vunpack.c.h.bf16 %v5272_v36 }
  0x37   : > { %v494_v59 = vadd.f32 %v493_v48, %v492_v52  ;;  %v507_v48 = vsel %vm8660_vm0, %v459_v29, 0.0  ;;  %v420_v52 = vsel %vm8660_vm0, %v5823_v32, 0.0  ;;  %v5861_v19 = vunpack.c.h.bf16 %v5273_v54 }
  0x38   : > { %v401_v37 = vadd.f32 %v400_v26, %v399_v30  ;;  %v503_v30 = vsel %vm8660_vm0, %v457_v6, 0.0 }
  0x39   : > { %v496_v3 = vadd.f32 %v495_v55, %v494_v59  ;;  %v509_v59 = vsel %vm8660_vm0, %v460_v39, 0.0  ;;  %8717 = vst [vmem:[#allocation12_spill] sm:$0xff] %v5861_v19 }
  0x3a   : > { %v403_v46 = vadd.f32 %v402_v35, %v401_v37 }
  0x3b   : > { %v498_v13 = vadd.f32 %v497_v0, %v496_v3  ;;  %v511_v3 = vsel %vm8660_vm0, %v461_v47, 0.0 }
  0x3c   : > { %v405_v53 = vadd.f32 %v404_v43, %v403_v46  ;;  %v5831_v43 = vunpack.c.h.bf16 %v5271_v16  ;;  %v464_v16 = vmul.f32 %v5808_v8, %v5808_v8 }
  0x3d   : > { %v500_v26 = vadd.f32 %v499_v7, %v498_v13 }
  0x3e   : > { %v407_v61 = vadd.f32 %v406_v51, %v405_v53  ;;  %v5838_v51 = vunpack.c.l.bf16 %v5272_v36  ;;  %v517_v39 = vsel %vm8660_vm0, %v464_v16, 0.0  ;;  %v467_v47 = vmul.f32 %v5831_v43, %v5831_v43 }
  0x3f   : > { %v502_v35 = vadd.f32 %v501_v20, %v500_v26  ;;  %v426_v20 = vsel %vm8660_vm0, %v5846_v60, 0.0 }
  0x40   : > { %v409_v4 = vadd.f32 %v408_v58, %v407_v61  ;;  %v462_v58 = vmul.f32 %v5793_v57, %v5793_v57  ;;  %v422_v61 = vsel %vm8660_vm0, %v5831_v43, 0.0  ;;  %v424_v6 = vsel %vm8660_vm0, %v5838_v51, 0.0 }
  0x41   : > { %v504_v45 = vadd.f32 %v503_v30, %v502_v35 }
  0x42   : > { %v411_v18 = vadd.f32 %v410_v2, %v409_v4  ;;  %v463_v2 = vmul.f32 %v5801_v1, %v5801_v1  ;;  %v5853_v4 = vunpack.c.l.bf16 %v5273_v54 }
  0x43   : > { %v506_v53 = vadd.f32 %v505_v40, %v504_v45 }
  0x44   : > { %v413_v27 = vadd.f32 %v412_v12, %v411_v18  ;;  %v5274_v12 = vld [vmem:[%s5652_s8 + $0x78] sm:$0xff]   ;;  %v513_v18 = vsel %vm8660_vm0, %v462_v58, 0.0  ;;  %v515_v29 = vsel %vm8660_vm0, %v463_v2, 0.0  ;;  %v523_v2 = vsel %vm8660_vm0, %v467_v47, 0.0 }
  0x45   : > { %v508_v62 = vadd.f32 %v507_v48, %v506_v53  ;;  %v5868_v30 = vunpack.c.l.bf16 %v5274_v12  ;;  %v5875_v40 = vunpack.c.h.bf16 %v5274_v12 }
  0x46   : > { %v415_v37 = vadd.f32 %v414_v23, %v413_v27  ;;  %v465_v27 = vmul.f32 %v5816_v22, %v5816_v22 }
  0x47   : > { %v510_v7 = vadd.f32 %v509_v59, %v508_v62  ;;  %8718 = vst [vmem:[#allocation13_spill] sm:$0xff] %v5868_v30  ;;  %v434_v59 = vsel %vm8660_vm0, %v5875_v40, 0.0 }
  0x48   : > { %v417_v46 = vadd.f32 %v416_v33, %v415_v37  ;;  %v428_v33 = vsel %vm8660_vm0, %v5853_v4, 0.0  ;;  %v466_v37 = vmul.f32 %v5823_v32, %v5823_v32  ;;  %8719 = vst [vmem:[#allocation14_spill] sm:$0xff] %v5875_v40  ;;  %v519_v48 = vsel %vm8660_vm0, %v465_v27, 0.0 }
  0x49   : > { %v512_v23 = vadd.f32 %v511_v3, %v510_v7  ;;  %v470_v7 = vmul.f32 %v5853_v4, %v5853_v4  ;;  %v472_v27 = vmul.f32 %v5868_v30, %v5868_v30 }
  0x4a   : > { %v419_v55 = vadd.f32 %v418_v44, %v417_v46  ;;  %v430_v44 = vsel %vm8660_vm0, %v5861_v19, 0.0  ;;  %v521_v58 = vsel %vm8660_vm0, %v466_v37, 0.0 }
  0x4b   : > { %v514_v35 = vadd.f32 %v513_v18, %v512_v23  ;;  %v471_v18 = vmul.f32 %v5861_v19, %v5861_v19 }
  0x4c   : > { %v421_v0 = vadd.f32 %v420_v52, %v419_v55  ;;  %v432_v52 = vsel %vm8660_vm0, %v5868_v30, 0.0  ;;  %v468_v55 = vmul.f32 %v5838_v51, %v5838_v51 }
  0x4d   : > { %v516_v45 = vadd.f32 %v515_v29, %v514_v35  ;;  %v529_v29 = vsel %vm8660_vm0, %v470_v7, 0.0  ;;  %v531_v37 = vsel %vm8660_vm0, %v471_v18, 0.0 }
  0x4e   : > { %v423_v13 = vadd.f32 %v422_v61, %v421_v0  ;;  %v469_v0 = vmul.f32 %v5846_v60, %v5846_v60  ;;  %v525_v12 = vsel %vm8660_vm0, %v468_v55, 0.0 }
  0x4f   : > { %v518_v53 = vadd.f32 %v517_v39, %v516_v45  ;;  %v533_v45 = vsel %vm8660_vm0, %v472_v27, 0.0  ;;  %v370_v27 = vld [vmem:[%s8639_s2] sm:$0x1] }
  0x50   : > { %v425_v26 = vadd.f32 %v424_v6, %v423_v13 }
  0x51   : > { %v520_v61 = vadd.f32 %v519_v48, %v518_v53 }
  0x52   : > { %v427_v36 = vadd.f32 %v426_v20, %v425_v26  ;;  %v527_v20 = vsel %vm8660_vm0, %v469_v0, 0.0 }
  0x53   : > { %v522_v3 = vadd.f32 %v521_v58, %v520_v61 }
  0x54   : > { %v429_v46 = vadd.f32 %v428_v33, %v427_v36  ;;  %v473_v36 = vmul.f32 %v5875_v40, %v5875_v40 }
  0x55   : > { %v524_v13 = vadd.f32 %v523_v2, %v522_v3 }
  0x56   : > { %v431_v54 = vadd.f32 %v430_v44, %v429_v46  ;;  %v535_v48 = vsel %vm8660_vm0, %v473_v36, 0.0  ;;  %v371_v36 = vld [vmem:[%s8640_s3] sm:$0x1] }
  0x57   : > { %v526_v23 = vadd.f32 %v525_v12, %v524_v13 }
  0x58   : > { %v433_v62 = vadd.f32 %v432_v52, %v431_v54 }
  0x59   : > { %v528_v33 = vadd.f32 %v527_v20, %v526_v23 }
  0x5a   : > { %v435_v6 = vadd.f32 %v434_v59, %v433_v62 }
  0x5b   : > { %v530_v39 = vadd.f32 %v529_v29, %v528_v33 }
  0x5c   : > { %v436_v16 = vrot.slane %v435_v6, 4 }
  0x5d   : > { %v532_v46 = vadd.f32 %v531_v37, %v530_v39 }
  0x5e   : > { %v437_v26 = vadd.f32 %v436_v16, %v435_v6 }
  0x5f   : > { %v534_v52 = vadd.f32 %v533_v45, %v532_v46 }
  0x60   : > { %v438_v35 = vrot.slane %v437_v26, 2 }
  0x61   : > { %v536_v54 = vadd.f32 %v535_v48, %v534_v52 }
  0x62   : > { %v439_v44 = vadd.f32 %v438_v35, %v437_v26 }
  0x63   : > { %v537_v55 = vrot.slane %v536_v54, 4 }
  0x64   : > { %v440_v47 = vrot.slane %v439_v44, 1 }
  0x65   : > { %v538_v58 = vadd.f32 %v537_v55, %v536_v54 }
  0x66   : > { %v441_v53 = vadd.f32 %v440_v47, %v439_v44 }
  0x67   : > { %v539_v59 = vrot.slane %v538_v58, 2 }
  0x68   : > { %4548 = vmatmul.msk.f32.vlgmr.msra.gmra.mxu0 %vm8660_vm0, %v441_v53 }
  0x69   : > { %v540_v61 = vadd.f32 %v539_v59, %v538_v58 }
  0x6b   : > { %v541_v62 = vrot.slane %v540_v61, 1 }
  0x6d   : > { %v542_v0 = vadd.f32 %v541_v62, %v540_v61 }
  0x70   : > { %4549 = vmatmul.msk.f32.vlgmr.msrb.gmra.mxu0 %vm8660_vm0, %v542_v0 }
  0xe5   : > { %v563_v2 = vpop.f32.mrf.mxu0 }
  0xe6   : > { %v589_v3 = vmul.f32 %v563_v2, %v563_v2 }
  0xed   : > { %v586_v6 = vpop.f32.mrf.mxu0 }
  0xee   : > { %v590_v7 = vsub.f32 %v586_v6, %v589_v3 }
  0xf0   : > { %v591_v12 = vmax.f32 %v590_v7, 0.0 }
  0xf2   : > { %v592_v13 = vadd.f32 1e-06, %v591_v12 }
  0xf4   : > { %5343 = vrsqrt.f32 %v592_v13  ;;  %vm599_vm2 = vweird.f32 %v592_v13 }
  0xfa   : > { %v5344_v16 = vpop.eup %5343 }
  0xfb   : > { %v594_v18 = vmul.f32 %v5344_v16, %v592_v13  ;;  %vm600_vm1 = vweird.f32 %v5344_v16 }
  0xfc   : > { %vm601_vm3 = vmor %vm599_vm2, %vm600_vm1 }
  0xfd   : > { %v595_v20 = vmul.f32 %v5344_v16, %v594_v18 }
  0xff   : > { %v596_v23 = vmul.f32 0.5, %v595_v20 }
 0x101   : > { %v597_v26 = vsub.f32 1.5, %v596_v23 }
 0x103   : > { %v598_v29 = vmul.f32 %v5344_v16, %v597_v26 }
 0x105   : > { %v602_v33 = vsel %vm601_vm3, %v5344_v16, %v598_v29 }
 0x106   : > { %v603_v35 = vmul.f32 %v602_v33, %v370_v27 }
 0x108   : > { %v604_v37 = vmul.f32 %v603_v35, %v563_v2  ;;  %v5914_v39 = vperm.slane %v603_v35, 0 }
 0x10a   : > { %8720 = vst [vmem:[#allocation15_spill] sm:$0xff] %v5914_v39  ;;  %v605_v44 = vsub.f32 %v371_v36, %v604_v37  ;;  %v631_v45 = vmul.f32 %v5808_v8, %v5914_v39  ;;  %v629_v47 = vmul.f32 %v5793_v57, %v5914_v39  ;;  %v619_v48 = vmul.f32 %v5716_v42, %v5914_v39 }
 0x10b   : > { %v632_v52 = vmul.f32 %v5816_v22, %v5914_v39  ;;  %v630_v53 = vmul.f32 %v5801_v1, %v5914_v39  ;;  %v620_v54 = vmul.f32 %v5726_v50, %v5914_v39  ;;  %v621_v61 = vmul.f32 %v5733_v56, %v5914_v39 }
 0x10c   : > { %v5918_v46 = vperm.slane %v605_v44, 0  ;;  %v622_v6 = vmul.f32 %v5741_v63, %v5914_v39  ;;  %v611_v7 = vmul.f32 %v5669_v11, %v5914_v39 }
 0x10e   : > { %8721 = vst [vmem:[#allocation16_spill] sm:$0xff] %v5918_v46  ;;  %v5931_v55 = vadd.f32 %v5918_v46, %v631_v45  ;;  %v5934_v8 = vadd.f32 %v5918_v46, %v629_v47  ;;  %v5937_v57 = vadd.f32 %v5918_v46, %v619_v48  ;;  %v5940_v42 = vadd.f32 %v5918_v46, %v632_v52 }
 0x10f   : > { %v5943_v22 = vadd.f32 %v5918_v46, %v630_v53  ;;  %v5946_v1 = vadd.f32 %v5918_v46, %v620_v54  ;;  %v5956_v2 = vadd.f32 %v5918_v46, %v621_v61  ;;  %v5964_v56 = vadd.f32 %v5918_v46, %v622_v6 }
 0x110   : > { %v4572_v50 = vmul.f32 -1.442695, %v5931_v55  ;;  %v4570_v58 = vmul.f32 -1.442695, %v5934_v8  ;;  %v4560_v59 = vmul.f32 -1.442695, %v5937_v57  ;;  %v5968_v13 = vadd.f32 %v5918_v46, %v611_v7 }
 0x111   : > { %v4573_v62 = vmul.f32 -1.442695, %v5940_v42  ;;  %v4571_v0 = vmul.f32 -1.442695, %v5943_v22  ;;  %v4561_v3 = vmul.f32 -1.442695, %v5946_v1 }
 0x112   : > { %5345 = vpow2.f32 %v4572_v50  ;;  %v4562_v12 = vmul.f32 -1.442695, %v5956_v2  ;;  %v4563_v63 = vmul.f32 -1.442695, %v5964_v56  ;;  %v4552_v11 = vmul.f32 -1.442695, %v5968_v13 }
 0x113   : > { %5347 = vpow2.f32 %v4570_v58 }
 0x114   : > { %5349 = vpow2.f32 %v4560_v59 }
 0x115   : > { %5351 = vpow2.f32 %v4573_v62 }
 0x116   : > { %5353 = vpow2.f32 %v4571_v0 }
 0x117   : > { %5355 = vpow2.f32 %v4561_v3 }
 0x118   : > { %v5346_v16 = vpop.eup %5345  ;;  %5357 = vpow2.f32 %v4562_v12 }
 0x119   : > { %v5348_v18 = vpop.eup %5347  ;;  %v5970_v20 = vadd.f32 1.0, %v5346_v16 }
 0x11a   : > { %v5350_v23 = vpop.eup %5349  ;;  %v5973_v26 = vadd.f32 1.0, %v5348_v18 }
 0x11b   : > { %v5352_v27 = vpop.eup %5351  ;;  %5359 = vrcp.f32 %v5970_v20  ;;  %v5978_v35 = vadd.f32 1.0, %v5350_v23  ;;  %v1143_v37 = vand.u32 2147483647, %v5970_v20  ;;  %v1145_v45 = vand.u32 2147483648, %v5970_v20 }
 0x11c   : > { %v5354_v29 = vpop.eup %5353  ;;  %5361 = vrcp.f32 %v5973_v26  ;;  %v5980_v36 = vadd.f32 1.0, %v5352_v27  ;;  %v1113_v47 = vand.u32 2147483647, %v5973_v26  ;;  %v1115_v52 = vand.u32 2147483648, %v5973_v26 }
 0x11d   : > { %v5356_v33 = vpop.eup %5355  ;;  %5363 = vpow2.f32 %v4563_v63  ;;  %v5983_v44 = vadd.f32 1.0, %v5354_v29  ;;  %vm1139_vm4 = vweird.f32 %v5970_v20  ;;  %vm1109_vm5 = vweird.f32 %v5973_v26 }
 0x11e   : > { %5365 = vpow2.f32 %v4552_v11  ;;  %v5358_v48 = vpop.eup %5357  ;;  %v5990_v53 = vadd.f32 1.0, %v5356_v33  ;;  %v965_v50 = vand.u32 2147483648, %v5978_v35  ;;  %vm5997_vm6 = vcmp.eq.f32.partialorder %v1143_v37, 8.507059e+37 }
 0x11f   : > { %5367 = vrcp.f32 %v5978_v35  ;;  %v963_v62 = vand.u32 2147483647, %v5978_v35  ;;  %v1160_v0 = vand.u32 2147483648, %v5980_v36  ;;  %v1146_v6 = vor.u32 1.1754944e-38, %v1145_v45 }
 0x120   : > { %5369 = vrcp.f32 %v5980_v36  ;;  %vm6006_vm7 = vcmp.eq.f32.partialorder %v1113_v47, 8.507059e+37  ;;  %v1158_v16 = vand.u32 2147483647, %v5980_v36  ;;  %v1116_v23 = vor.u32 1.1754944e-38, %v1115_v52 }
 0x121   : > { %v5360_v54 = vpop.eup %5359  ;;  %5371 = vrcp.f32 %v5983_v44  ;;  %v1130_v11 = vand.u32 2147483648, %v5983_v44  ;;  %vm959_vm8 = vweird.f32 %v5978_v35  ;;  %v966_v33 = vor.u32 1.1754944e-38, %v965_v50 }
 0x122   : > { %v5362_v58 = vpop.eup %5361  ;;  %v1135_v59 = vmul.f32 %v5360_v54, %v5970_v20  ;;  %5373 = vrcp.f32 %v5990_v53  ;;  %vm1154_vm9 = vweird.f32 %v5980_v36  ;;  %vm1140_vm10 = vweird.f32 %v5360_v54 }
 0x123   : > { %v6003_v3 = vpop.eup %5363  ;;  %v1105_v7 = vmul.f32 %v5362_v58, %v5973_v26  ;;  %vm6018_vm11 = vcmp.eq.f32.partialorder %v963_v62, 8.507059e+37  ;;  %v1161_v52 = vor.u32 1.1754944e-38, %v1160_v0  ;;  %vm1110_vm12 = vweird.f32 %v5362_v58  ;;  %vm1141_vm15 = vmor %vm1139_vm4, %vm1140_vm10 }
 0x124   : > { %v6011_v18 = vpop.eup %5365  ;;  %v1136_v63 = vsub.f32 1.0, %v1135_v59  ;;  %vm6023_vm13 = vcmp.eq.f32.partialorder %v1158_v16, 8.507059e+37  ;;  %vm1124_vm14 = vweird.f32 %v5983_v44  ;;  %v1128_v50 = vand.u32 2147483647, %v5983_v44  ;;  %vm1111_vm3 = vmor %vm1109_vm5, %vm1110_vm12 }
 0x125   : > { %v5368_v27 = vpop.eup %5367  ;;  %v1106_v29 = vsub.f32 1.0, %v1105_v7  ;;  %v1131_v31 = vor.u32 1.1754944e-38, %v1130_v11  ;;  %vm974_vm10 = vweird.f32 %v5990_v53 }
 0x126   : > { %v5370_v37 = vpop.eup %5369  ;;  %v1137_v45 = vmul.f32 %v5360_v54, %v1136_v63  ;;  %v955_v47 = vmul.f32 %v5368_v27, %v5978_v35  ;;  %vm960_vm1 = vweird.f32 %v5368_v27 }
 0x127   : > { %v5372_v59 = vpop.eup %5371  ;;  %v1107_v30 = vmul.f32 %v5362_v58, %v1106_v29  ;;  %v1150_v7 = vmul.f32 %v5370_v37, %v5980_v36  ;;  %vm1155_vm2 = vweird.f32 %v5370_v37  ;;  %vm961_vm4 = vmor %vm959_vm8, %vm960_vm1 }
 0x128   : > { %v1138_v63 = vadd.f32 %v5360_v54, %v1137_v45  ;;  %v956_v10 = vsub.f32 1.0, %v955_v47  ;;  %v1120_v62 = vmul.f32 %v5372_v59, %v5983_v44  ;;  %v5374_v16 = vpop.eup %5373  ;;  %v6036_v47 = vadd.f32 1.0, %v5358_v48 }
 0x129   : > { %v1108_v0 = vadd.f32 %v5362_v58, %v1107_v30  ;;  %v1151_v29 = vsub.f32 1.0, %v1150_v7  ;;  %v970_v30 = vmul.f32 %v5374_v16, %v5990_v53  ;;  %vm1125_vm5 = vweird.f32 %v5372_v59 }
 0x12a   : > { %v1142_v9 = vsel %vm1141_vm15, %v5360_v54, %v1138_v63  ;;  %v957_v41 = vmul.f32 %v5368_v27, %v956_v10  ;;  %v1121_v45 = vsub.f32 1.0, %v1120_v62  ;;  %5375 = vrcp.f32 %v6036_v47 }
 0x12b   : > { %v1147_v11 = vsel %vm5997_vm6, %v1146_v6, %v1142_v9  ;;  %v1112_v49 = vsel %vm1111_vm3, %v5362_v58, %v1108_v0  ;;  %v1152_v20 = vmul.f32 %v5370_v37, %v1151_v29  ;;  %v971_v9 = vsub.f32 1.0, %v970_v30  ;;  %vm1156_vm6 = vmor %vm1154_vm9, %vm1155_vm2 }
 0x12c   : > { %v1306_v7 = vmul.f32 %v1147_v11, %v5931_v55  ;;  %v1117_v54 = vsel %vm6006_vm7, %v1116_v23, %v1112_v49  ;;  %v958_v63 = vadd.f32 %v5368_v27, %v957_v41  ;;  %v1122_v19 = vmul.f32 %v5372_v59, %v1121_v45  ;;  %vm1126_vm7 = vmor %vm1124_vm14, %vm1125_vm5 }
 0x12d   : > { %v1304_v26 = vmul.f32 %v1117_v54, %v5934_v8  ;;  %v1153_v10 = vadd.f32 %v5370_v37, %v1152_v20  ;;  %v972_v35 = vmul.f32 %v5374_v16, %v971_v9  ;;  %vm975_vm8 = vweird.f32 %v5374_v16 }
 0x12e   : > { %v6048_v48 = vpack.c.bf16 %v1306_v7, %v1306_v7  ;;  %v962_v58 = vsel %vm961_vm4, %v5368_v27, %v958_v63  ;;  %v1123_v55 = vadd.f32 %v5372_v59, %v1122_v19  ;;  %v980_v19 = vand.u32 2147483648, %v5990_v53 }
 0x12f   : > { %v6054_v41 = vpack.c.bf16 %v1304_v26, %v1304_v26  ;;  %v967_v49 = vsel %vm6018_vm11, %v966_v33, %v962_v58  ;;  %v1157_v8 = vsel %vm1156_vm6, %v5370_v37, %v1153_v10  ;;  %vm1129_vm9 = vcmp.eq.f32.partialorder %v1128_v50, 8.507059e+37  ;;  %vm976_vm11 = vmor %vm974_vm10, %vm975_vm8 }
 0x130   : > { %2078 = vrot.lane.b32.xlu2 %v6048_v48, %s5538_s9  ;;  %v1294_v61 = vmul.f32 %v967_v49, %v5937_v57  ;;  %v1162_v36 = vsel %vm6023_vm13, %v1161_v52, %v1157_v8  ;;  %v1127_v40 = vsel %vm1126_vm7, %v5372_v59, %v1123_v55  ;;  %v978_v6 = vand.u32 2147483647, %v5990_v53  ;;  %v5376_v33 = vpop.eup %5375 }
 0x131   : > { %2074 = vrot.lane.b32.xlu0 %v6054_v41, %s5538_s9  ;;  %v1307_v38 = vmul.f32 %v1162_v36, %v5940_v42  ;;  %v1132_v12 = vsel %vm1129_vm9, %v1131_v31, %v1127_v40  ;;  %v973_v23 = vadd.f32 %v5374_v16, %v972_v35  ;;  %v633_v27 = vmul.f32 %v5823_v32, %v5914_v39 }
 0x132   : > { %v6071_v57 = vpack.c.bf16 %v1294_v61, %v1294_v61  ;;  %v1305_v44 = vmul.f32 %v1132_v12, %v5943_v22  ;;  %v981_v52 = vor.u32 1.1754944e-38, %v980_v19  ;;  %vm979_vm12 = vcmp.eq.f32.partialorder %v978_v6, 8.507059e+37 }
 0x133   : > { %v977_v37 = vsel %vm976_vm11, %v5374_v16, %v973_v23  ;;  %v6080_v53 = vadd.f32 1.0, %v6003_v3  ;;  %v6083_v42 = vadd.f32 %v5918_v46, %v633_v27  ;;  %v6085_v31 = vpack.c.bf16 %v1307_v38, %v1307_v38 }
 0x134   : > { %2054 = vrot.lane.b32.xlu1 %v6071_v57, %s5538_s9  ;;  %v982_v22 = vsel %vm979_vm12, %v981_v52, %v977_v37  ;;  %v985_v59 = vmul.f32 %v5376_v33, %v6036_v47  ;;  %v6088_v50 = vpack.c.bf16 %v1305_v44, %v1305_v44  ;;  %v6092_v62 = vadd.f32 1.0, %v6011_v18 }
 0x135   : > { %8730 = vst [vmem:[#allocation17_spill] sm:$0xff] %v6085_v31  ;;  %v1295_v32 = vmul.f32 %v982_v22, %v5946_v1  ;;  %v995_v0 = vand.u32 2147483648, %v6036_v47  ;;  %5377 = vrcp.f32 %v6080_v53  ;;  %v4574_v29 = vmul.f32 -1.442695, %v6083_v42 }
 0x136   : > { %v986_v3 = vsub.f32 1.0, %v985_v59  ;;  %vm990_vm13 = vweird.f32 %v5376_v33  ;;  %v993_v1 = vand.u32 2147483647, %v6036_v47  ;;  %5379 = vrcp.f32 %v6092_v62 }
 0x137   : > { %v6101_v16 = vpack.c.bf16 %v1295_v32, %v1295_v32  ;;  %vm989_vm14 = vweird.f32 %v6036_v47  ;;  %v612_v11 = vmul.f32 %v5675_v14, %v5914_v39  ;;  %v996_v20 = vor.u32 1.1754944e-38, %v995_v0 }
 0x138   : > { %2080 = vrot.lane.b32.xlu2 %v6085_v31, %s5538_s9  ;;  %v987_v45 = vmul.f32 %v5376_v33, %v986_v3  ;;  %vm991_vm15 = vmor %vm989_vm14, %vm990_vm13  ;;  %5381 = vpow2.f32 %v4574_v29  ;;  %vm994_vm1 = vcmp.eq.f32.partialorder %v993_v1, 8.507059e+37  ;;  %vm1004_vm2 = vweird.f32 %v6080_v53 }
 0x139   : > { %2076 = vrot.lane.b32.xlu0 %v6088_v50, %s5538_s9  ;;  %v6112_v7 = vadd.f32 %v5918_v46, %v612_v11  ;;  %v634_v26 = vmul.f32 %v5831_v43, %v5914_v39  ;;  %v624_v47 = vmul.f32 %v5756_v17, %v5914_v39  ;;  %v623_v14 = vmul.f32 %v5748_v5, %v5914_v39 }
 0x13a   : > { %v988_v18 = vadd.f32 %v5376_v33, %v987_v45  ;;  %v1008_v58 = vand.u32 2147483647, %v6080_v53  ;;  %v1010_v8 = vand.u32 2147483648, %v6080_v53  ;;  %v843_v36 = vand.u32 2147483647, %v6092_v62 }
 0x13b   : > { %v5378_v54 = vpop.eup %5377  ;;  %v4553_v55 = vmul.f32 -1.442695, %v6112_v7  ;;  %v6126_v35 = vadd.f32 %v5918_v46, %v634_v26  ;;  %v6129_v43 = vadd.f32 %v5918_v46, %v624_v47  ;;  %v6132_v17 = vadd.f32 %v5918_v46, %v623_v14 }
 0x13c   : > { %2056 = vrot.lane.b32.xlu1 %v6101_v16, %s5538_s9  ;;  %v992_v30 = vsel %vm991_vm15, %v5376_v33, %v988_v18  ;;  %v1000_v9 = vmul.f32 %v5378_v54, %v6080_v53  ;;  %v5380_v49 = vpop.eup %5379  ;;  %v613_v38 = vmul.f32 %v5677_v15, %v5914_v39  ;;  %vm1005_vm3 = vweird.f32 %v5378_v54 }
 0x13d   : > { %v997_v63 = vsel %vm994_vm1, %v996_v20, %v992_v30  ;;  %v835_v61 = vmul.f32 %v5380_v49, %v6092_v62  ;;  %5383 = vpow2.f32 %v4553_v55  ;;  %v4575_v40 = vmul.f32 -1.442695, %v6126_v35  ;;  %vm1006_vm5 = vmor %vm1004_vm2, %vm1005_vm3 }
 0x13e   : > { %v1296_v10 = vmul.f32 %v997_v63, %v5956_v2  ;;  %v1001_v2 = vsub.f32 1.0, %v1000_v9  ;;  %v5382_v19 = vpop.eup %5381  ;;  %v4565_v6 = vmul.f32 -1.442695, %v6129_v43  ;;  %v845_v44 = vand.u32 2147483648, %v6092_v62 }
 0x13f   : > { %v836_v23 = vsub.f32 1.0, %v835_v61  ;;  %v6145_v27 = vadd.f32 1.0, %v5382_v19  ;;  %5385 = vpow2.f32 %v4575_v40  ;;  %v4564_v33 = vmul.f32 -1.442695, %v6132_v17 }
 0x140   : > { %v6134_v5 = vpack.c.bf16 %v1296_v10, %v1296_v10  ;;  %v1002_v12 = vmul.f32 %v5378_v54, %v1001_v2  ;;  %v6149_v37 = vadd.f32 %v5918_v46, %v613_v38  ;;  %vm840_vm4 = vweird.f32 %v5380_v49 }
 0x141   : > { %v837_v22 = vmul.f32 %v5380_v49, %v836_v23  ;;  %5387 = vpow2.f32 %v4565_v6  ;;  %v1011_v15 = vor.u32 1.1754944e-38, %v1010_v8  ;;  %vm1009_vm6 = vcmp.eq.f32.partialorder %v1008_v58, 8.507059e+37 }
 0x142   : > { %2058 = vrot.lane.b32.xlu0 %v6134_v5, %s5538_s9  ;;  %v1003_v52 = vadd.f32 %v5378_v54, %v1002_v12  ;;  %5389 = vrcp.f32 %v6145_v27  ;;  %vm839_vm7 = vweird.f32 %v6092_v62  ;;  %v846_v29 = vor.u32 1.1754944e-38, %v845_v44 }
 0x143   : > { %v838_v32 = vadd.f32 %v5380_v49, %v837_v22  ;;  %v5384_v3 = vpop.eup %5383  ;;  %vm841_vm8 = vmor %vm839_vm7, %vm840_vm4  ;;  %5391 = vpow2.f32 %v4564_v33  ;;  %v4554_v45 = vmul.f32 -1.442695, %v6149_v37  ;;  %vm844_vm9 = vcmp.eq.f32.partialorder %v843_v36, 8.507059e+37 }
 0x144   : > { %v1007_v59 = vsel %vm1006_vm5, %v5378_v54, %v1003_v52  ;;  %v6157_v53 = vadd.f32 1.0, %v5384_v3  ;;  %v1173_v63 = vand.u32 2147483647, %v6145_v27  ;;  %v1175_v47 = vand.u32 2147483648, %v6145_v27 }
 0x145   : > { %v1012_v0 = vsel %vm1009_vm6, %v1011_v15, %v1007_v59  ;;  %v842_v18 = vsel %vm841_vm8, %v5380_v49, %v838_v32  ;;  %v5386_v11 = vpop.eup %5385  ;;  %5393 = vpow2.f32 %v4554_v45  ;;  %vm1169_vm10 = vweird.f32 %v6145_v27 }
 0x146   : > { %v1297_v1 = vmul.f32 %v1012_v0, %v5964_v56  ;;  %v847_v20 = vsel %vm844_vm9, %v846_v29, %v842_v18  ;;  %5395 = vrcp.f32 %v6157_v53  ;;  %v6165_v56 = vadd.f32 1.0, %v5386_v11 }
 0x147   : > { %v5388_v30 = vpop.eup %5387  ;;  %v1286_v62 = vmul.f32 %v847_v20, %v5968_v13  ;;  %v635_v13 = vmul.f32 %v5838_v51, %v5914_v39  ;;  %vm6180_vm11 = vcmp.eq.f32.partialorder %v1173_v63, 8.507059e+37  ;;  %v858_v8 = vand.u32 2147483647, %v6157_v53 }
 0x148   : > { %v6159_v54 = vpack.c.bf16 %v1297_v1, %v1297_v1  ;;  %v5390_v26 = vpop.eup %5389  ;;  %v6167_v14 = vadd.f32 1.0, %v5388_v30  ;;  %5397 = vrcp.f32 %v6165_v56  ;;  %v860_v2 = vand.u32 2147483648, %v6157_v53 }
 0x149   : > { %v6171_v10 = vpack.c.bf16 %v1286_v62, %v1286_v62  ;;  %v1165_v9 = vmul.f32 %v5390_v26, %v6145_v27  ;;  %v5392_v58 = vpop.eup %5391  ;;  %v1176_v36 = vor.u32 1.1754944e-38, %v1175_v47  ;;  %v6188_v19 = vadd.f32 %v5918_v46, %v635_v13 }
 0x14a   : > { %2060 = vrot.lane.b32.xlu1 %v6159_v54, %s5538_s9  ;;  %5399 = vrcp.f32 %v6167_v14  ;;  %v614_v51 = vmul.f32 %v5686_v21, %v5914_v39  ;;  %vm1170_vm12 = vweird.f32 %v5390_v26  ;;  %v1188_v38 = vand.u32 2147483647, %v6165_v56 }
 0x14b   : > { %2038 = vrot.lane.b32.xlu2 %v6171_v10, %s5538_s9  ;;  %v1166_v55 = vsub.f32 1.0, %v1165_v9  ;;  %v5394_v61 = vpop.eup %5393  ;;  %v6193_v12 = vadd.f32 1.0, %v5392_v58  ;;  %vm854_vm13 = vweird.f32 %v6157_v53  ;;  %v1190_v44 = vand.u32 2147483648, %v6165_v56  ;;  %vm1171_vm15 = vmor %vm1169_vm10, %vm1170_vm12 }
 0x14c   : > { %v5396_v40 = vpop.eup %5395  ;;  %v6200_v33 = vmul.f32 %v5846_v60, %v5914_v39  ;;  %vm6202_vm14 = vcmp.eq.f32.partialorder %v858_v8, 8.507059e+37  ;;  %v861_v22 = vor.u32 1.1754944e-38, %v860_v2  ;;  %vm1184_vm1 = vweird.f32 %v6165_v56 }
 0x14d   : > { %v1167_v6 = vmul.f32 %v5390_v26, %v1166_v55  ;;  %v850_v23 = vmul.f32 %v5396_v40, %v6157_v53  ;;  %5401 = vrcp.f32 %v6193_v12  ;;  %v1038_v32 = vand.u32 2147483647, %v6167_v14 }
 0x14e   : > { %v5398_v15 = vpop.eup %5397  ;;  %v6211_v3 = vadd.f32 1.0, %v5394_v61  ;;  %vm6214_vm2 = vcmp.eq.f32.partialorder %v1188_v38, 8.507059e+37  ;;  %v1040_v45 = vand.u32 2147483648, %v6167_v14  ;;  %vm855_vm3 = vweird.f32 %v5396_v40 }
 0x14f   : > { %v1168_v52 = vadd.f32 %v5390_v26, %v1167_v6  ;;  %v851_v59 = vsub.f32 1.0, %v850_v23  ;;  %v1180_v0 = vmul.f32 %v5398_v15, %v6165_v56  ;;  %v1191_v11 = vor.u32 1.1754944e-38, %v1190_v44  ;;  %vm856_vm7 = vmor %vm854_vm13, %vm855_vm3 }
 0x150   : > { %v5400_v1 = vpop.eup %5399  ;;  %vm1034_vm4 = vweird.f32 %v6167_v14  ;;  %v1023_v63 = vand.u32 2147483647, %v6193_v12  ;;  %vm1185_vm5 = vweird.f32 %v5398_v15  ;;  %vm6225_vm6 = vcmp.eq.f32.partialorder %v1038_v32, 8.507059e+37 }
 0x151   : > { %v1172_v60 = vsel %vm1171_vm15, %v5390_v26, %v1168_v52  ;;  %v852_v18 = vmul.f32 %v5396_v40, %v851_v59  ;;  %v1181_v30 = vsub.f32 1.0, %v1180_v0  ;;  %v1030_v62 = vmul.f32 %v5400_v1, %v6167_v14  ;;  %vm1186_vm10 = vmor %vm1184_vm1, %vm1185_vm5 }
 0x152   : > { %v1177_v27 = vsel %vm6180_vm11, %v1176_v36, %v1172_v60  ;;  %5403 = vrcp.f32 %v6211_v3  ;;  %v4576_v55 = vmul.f32 -1.442695, %v6188_v19  ;;  %v1041_v8 = vor.u32 1.1754944e-38, %v1040_v45 }
 0x153   : > { %v1308_v20 = vmul.f32 %v1177_v27, %v6083_v42  ;;  %v853_v26 = vadd.f32 %v5396_v40, %v852_v18  ;;  %v5402_v9 = vpop.eup %5401  ;;  %v1182_v42 = vmul.f32 %v5398_v15, %v1181_v30  ;;  %v1031_v13 = vsub.f32 1.0, %v1030_v62 }
 0x154   : > { %v1015_v2 = vmul.f32 %v5402_v9, %v6193_v12  ;;  %vm1019_vm8 = vweird.f32 %v6193_v12  ;;  %vm6241_vm9 = vcmp.eq.f32.partialorder %v1023_v63, 8.507059e+37  ;;  %v1025_v6 = vand.u32 2147483648, %v6193_v12 }
 0x155   : > { %v6230_v58 = vpack.c.bf16 %v1308_v20, %v1308_v20  ;;  %v857_v49 = vsel %vm856_vm7, %v5396_v40, %v853_v26  ;;  %v1183_v36 = vadd.f32 %v5398_v15, %v1182_v42  ;;  %v1032_v38 = vmul.f32 %v5400_v1, %v1031_v13 }
 0x156   : > { %v862_v61 = vsel %vm6202_vm14, %v861_v22, %v857_v49  ;;  %vm1035_vm11 = vweird.f32 %v5400_v1  ;;  %v1016_v23 = vsub.f32 1.0, %v1015_v2  ;;  %vm1020_vm12 = vweird.f32 %v5402_v9 }
 0x157   : > { %2082 = vrot.lane.b32.xlu1 %v6230_v58, %s5538_s9  ;;  %v1287_v40 = vmul.f32 %v862_v61, %v6112_v7  ;;  %v1187_v44 = vsel %vm1186_vm10, %v5398_v15, %v1183_v36  ;;  %5405 = vpow2.f32 %v4576_v55  ;;  %v6251_v52 = vadd.f32 %v5918_v46, %v614_v51  ;;  %vm1036_vm13 = vmor %vm1034_vm4, %vm1035_vm11 }
 0x158   : > { %v5404_v21 = vpop.eup %5403  ;;  %v1192_v59 = vsel %vm6214_vm2, %v1191_v11, %v1187_v44  ;;  %v1033_v7 = vadd.f32 %v5400_v1, %v1032_v38  ;;  %v1017_v32 = vmul.f32 %v5402_v9, %v1016_v23  ;;  %v1026_v60 = vor.u32 1.1754944e-38, %v1025_v6  ;;  %vm1021_vm14 = vmor %vm1019_vm8, %vm1020_vm12 }
 0x159   : > { %v6253_v22 = vpack.c.bf16 %v1287_v40, %v1287_v40  ;;  %v1309_v56 = vmul.f32 %v1192_v59, %v6126_v35  ;;  %v865_v15 = vmul.f32 %v5404_v21, %v6211_v3  ;;  %v873_v0 = vand.u32 2147483647, %v6211_v3 }
 0x15a   : > { %v1037_v51 = vsel %vm1036_vm13, %v5400_v1, %v1033_v7  ;;  %v1018_v45 = vadd.f32 %v5402_v9, %v1017_v32  ;;  %v4555_v29 = vmul.f32 -1.442695, %v6251_v52  ;;  %v6267_v27 = vadd.f32 %v5918_v46, %v6200_v33 }
 0x15b   : > { %2040 = vrot.lane.b32.xlu0 %v6253_v22, %s5538_s9  ;;  %v6269_v35 = vpack.c.bf16 %v1309_v56, %v1309_v56  ;;  %v1042_v14 = vsel %vm6225_vm6, %v1041_v8, %v1037_v51  ;;  %v866_v18 = vsub.f32 1.0, %v865_v15  ;;  %v875_v11 = vand.u32 2147483648, %v6211_v3 }
 0x15c   : > { %v1299_v1 = vmul.f32 %v1042_v14, %v6129_v43  ;;  %v1022_v20 = vsel %vm1021_vm14, %v5402_v9, %v1018_v45  ;;  %5407 = vpow2.f32 %v4555_v29  ;;  %v4577_v30 = vmul.f32 -1.442695, %v6267_v27 }
 0x15d   : > { %v5406_v33 = vpop.eup %5405  ;;  %2084 = vrot.lane.b32.xlu2 %v6269_v35, %s5538_s9  ;;  %v1027_v62 = vsel %vm6241_vm9, %v1026_v60, %v1022_v20  ;;  %v867_v63 = vmul.f32 %v5404_v21, %v866_v18  ;;  %vm870_vm15 = vweird.f32 %v5404_v21  ;;  %v626_v12 = vmul.f32 %v5771_v34, %v5914_v39 }
 0x15e   : > { %v6285_v26 = vpack.c.bf16 %v1299_v1, %v1299_v1  ;;  %v1298_v43 = vmul.f32 %v1027_v62, %v6132_v17  ;;  %v798_v47 = vadd.f32 1.0, %v5406_v33  ;;  %5409 = vpow2.f32 %v4577_v30 }
 0x15f   : > { %v868_v9 = vadd.f32 %v5404_v21, %v867_v63  ;;  %vm869_vm1 = vweird.f32 %v6211_v3  ;;  %v876_v13 = vor.u32 1.1754944e-38, %v875_v11  ;;  %v6294_v55 = vadd.f32 %v5918_v46, %v626_v12 }
 0x160   : > { %2064 = vrot.lane.b32.xlu1 %v6285_v26, %s5538_s9  ;;  %v6291_v42 = vpack.c.bf16 %v1298_v43, %v1298_v43  ;;  %vm871_vm2 = vmor %vm869_vm1, %vm870_vm15  ;;  %5411 = vrcp.f32 %v798_v47  ;;  %vm874_vm3 = vcmp.eq.f32.partialorder %v873_v0, 8.507059e+37  ;;  %v625_v3 = vmul.f32 %v5763_v25, %v5914_v39 }
 0x161   : > { %v872_v34 = vsel %vm871_vm2, %v5404_v21, %v868_v9  ;;  %v4567_v36 = vmul.f32 -1.442695, %v6294_v55  ;;  %v615_v44 = vmul.f32 %v5690_v24, %v5914_v39  ;;  %v1205_v21 = vand.u32 2147483648, %v798_v47  ;;  %v8743_v9 = vld [vmem:[#allocation12_spill] sm:$0xff] }
 0x162   : > { %v5408_v49 = vpop.eup %5407  ;;  %v877_v17 = vsel %vm874_vm3, %v876_v13, %v872_v34  ;;  %v6305_v53 = vadd.f32 %v5918_v46, %v625_v3  ;;  %vm1199_vm4 = vweird.f32 %v798_v47  ;;  %v637_v56 = vmul.f32 %v5853_v4, %v5914_v39 }
 0x163   : > { %2062 = vrot.lane.b32.xlu0 %v6291_v42, %s5538_s9  ;;  %v1288_v8 = vmul.f32 %v877_v17, %v6149_v37  ;;  %v6301_v2 = vadd.f32 1.0, %v5408_v49  ;;  %v1203_v37 = vand.u32 2147483647, %v798_v47  ;;  %v6320_v32 = vadd.f32 %v5918_v46, %v615_v44 }
 0x164   : > { %v5410_v61 = vpop.eup %5409  ;;  %v4566_v23 = vmul.f32 -1.442695, %v6305_v53  ;;  %v1206_v45 = vor.u32 1.1754944e-38, %v1205_v21  ;;  %v6332_v14 = vadd.f32 %v5918_v46, %v637_v56  ;;  %v616_v62 = vmul.f32 %v5695_v28, %v5914_v39 }
 0x165   : > { %v6307_v6 = vpack.c.bf16 %v1288_v8, %v1288_v8  ;;  %5413 = vrcp.f32 %v6301_v2  ;;  %v6310_v38 = vadd.f32 1.0, %v5410_v61  ;;  %v890_v7 = vand.u32 2147483648, %v6301_v2 }
 0x166   : > { %v5412_v40 = vpop.eup %5411  ;;  %5415 = vpow2.f32 %v4567_v36  ;;  %vm6324_vm6 = vcmp.eq.f32.partialorder %v1203_v37, 8.507059e+37  ;;  %v4556_v24 = vmul.f32 -1.442695, %v6320_v32  ;;  %vm884_vm7 = vweird.f32 %v6301_v2 }
 0x167   : > { %2042 = vrot.lane.b32.xlu2 %v6307_v6, %s5538_s9  ;;  %v1195_v25 = vmul.f32 %v5412_v40, %v798_v47  ;;  %5417 = vrcp.f32 %v6310_v38  ;;  %vm1200_vm5 = vweird.f32 %v5412_v40  ;;  %v888_v4 = vand.u32 2147483647, %v6301_v2 }
 0x168   : > { %5419 = vpow2.f32 %v4566_v23  ;;  %v891_v11 = vor.u32 1.1754944e-38, %v890_v7  ;;  %vm1201_vm8 = vmor %vm1199_vm4, %vm1200_vm5  ;;  %v4578_v33 = vmul.f32 -1.442695, %v6332_v14  ;;  %v638_v13 = vmul.f32 %v8743_v9, %v5914_v39 }
 0x169   : > { %v1196_v59 = vsub.f32 1.0, %v1195_v25  ;;  %5421 = vpow2.f32 %v4556_v24  ;;  %v6348_v49 = vadd.f32 %v5918_v46, %v616_v62  ;;  %v1218_v3 = vand.u32 2147483647, %v6310_v38 }
 0x16a   : > { %v1220_v36 = vand.u32 2147483648, %v6310_v38  ;;  %vm889_vm12 = vcmp.eq.f32.partialorder %v888_v4, 8.507059e+37  ;;  %vm1214_vm13 = vweird.f32 %v6310_v38 }
 0x16b   : > { %v5414_v60 = vpop.eup %5413  ;;  %v1197_v15 = vmul.f32 %v5412_v40, %v1196_v59  ;;  %v4557_v44 = vmul.f32 -1.442695, %v6348_v49  ;;  %vm1219_vm15 = vcmp.eq.f32.partialorder %v1218_v3, 8.507059e+37 }
 0x16c   : > { %v5416_v51 = vpop.eup %5415  ;;  %v880_v29 = vmul.f32 %v5414_v60, %v6301_v2  ;;  %vm885_vm9 = vweird.f32 %v5414_v60  ;;  %v1221_v56 = vor.u32 1.1754944e-38, %v1220_v36 }
 0x16d   : > { %v1198_v18 = vadd.f32 %v5412_v40, %v1197_v15  ;;  %v6335_v1 = vadd.f32 1.0, %v5416_v51  ;;  %v5418_v20 = vpop.eup %5417  ;;  %vm886_vm10 = vmor %vm884_vm7, %vm885_vm9  ;;  %v8744_v51 = vld [vmem:[#allocation11_spill] sm:$0xff] }
 0x16e   : > { %v881_v30 = vsub.f32 1.0, %v880_v29  ;;  %v5420_v63 = vpop.eup %5419  ;;  %v1210_v43 = vmul.f32 %v5418_v20, %v6310_v38  ;;  %vm1215_vm11 = vweird.f32 %v5418_v20 }
 0x16f   : > { %v1202_v12 = vsel %vm1201_vm8, %v5412_v40, %v1198_v18  ;;  %5423 = vrcp.f32 %v6335_v1  ;;  %v6352_v8 = vadd.f32 1.0, %v5420_v63  ;;  %v6356_v40 = vadd.f32 %v5918_v46, %v638_v13  ;;  %vm1216_vm14 = vmor %vm1214_vm13, %vm1215_vm11 }
 0x170   : > { %v1207_v47 = vsel %vm6324_vm6, %v1206_v45, %v1202_v12  ;;  %v882_v34 = vmul.f32 %v5414_v60, %v881_v30  ;;  %v1211_v28 = vsub.f32 1.0, %v1210_v43  ;;  %5425 = vpow2.f32 %v4578_v33 }
 0x171   : > { %v1310_v17 = vmul.f32 %v1207_v47, %v6188_v19  ;;  %5427 = vrcp.f32 %v6352_v8  ;;  %v5422_v19 = vpop.eup %5421  ;;  %v4579_v24 = vmul.f32 -1.442695, %v6356_v40  ;;  %v628_v45 = vmul.f32 %v8744_v51, %v5914_v39 }
 0x172   : > { %v883_v61 = vadd.f32 %v5414_v60, %v882_v34  ;;  %v1212_v37 = vmul.f32 %v5418_v20, %v1211_v28  ;;  %5429 = vpow2.f32 %v4557_v44  ;;  %v1068_v30 = vand.u32 2147483647, %v6335_v1 }
 0x173   : > { %v6358_v25 = vpack.c.bf16 %v1310_v17, %v1310_v17  ;;  %vm1064_vm2 = vweird.f32 %v6335_v1  ;;  %v1055_v47 = vand.u32 2147483648, %v6352_v8  ;;  %v1053_v3 = vand.u32 2147483647, %v6352_v8 }
 0x174   : > { %v887_v23 = vsel %vm886_vm10, %v5414_v60, %v883_v61  ;;  %v1213_v7 = vadd.f32 %v5418_v20, %v1212_v37  ;;  %v6369_v60 = vadd.f32 1.0, %v5422_v19  ;;  %vm1069_vm4 = vcmp.eq.f32.partialorder %v1068_v30, 8.507059e+37 }
 0x175   : > { %v5424_v21 = vpop.eup %5423  ;;  %2086 = vrot.lane.b32.xlu1 %v6358_v25, %s5538_s9  ;;  %v892_v59 = vsel %vm889_vm12, %v891_v11, %v887_v23  ;;  %vm1049_vm6 = vweird.f32 %v6352_v8  ;;  %vm1054_vm8 = vcmp.eq.f32.partialorder %v1053_v3, 8.507059e+37 }
 0x176   : > { %v1289_v2 = vmul.f32 %v892_v59, %v6251_v52  ;;  %v1060_v15 = vmul.f32 %v5424_v21, %v6335_v1  ;;  %v1217_v0 = vsel %vm1216_vm14, %v5418_v20, %v1213_v7  ;;  %v5426_v29 = vpop.eup %5425  ;;  %v1070_v20 = vand.u32 2147483648, %v6335_v1 }
 0x177   : > { %v1222_v4 = vsel %vm1219_vm15, %v1221_v56, %v1217_v0  ;;  %v5428_v52 = vpop.eup %5427  ;;  %5431 = vrcp.f32 %v6369_v60  ;;  %vm1065_vm1 = vweird.f32 %v5424_v21  ;;  %v6385_v12 = vadd.f32 1.0, %v5426_v29 }
 0x178   : > { %v6374_v18 = vpack.c.bf16 %v1289_v2, %v1289_v2  ;;  %v1061_v38 = vsub.f32 1.0, %v1060_v15  ;;  %v1311_v11 = vmul.f32 %v1222_v4, %v6267_v27  ;;  %v1045_v62 = vmul.f32 %v5428_v52, %v6352_v8  ;;  %vm1066_vm3 = vmor %vm1064_vm2, %vm1065_vm1  ;;  %v5430_v34 = vpop.eup %5429 }
 0x179   : > { %5433 = vpow2.f32 %v4579_v24  ;;  %v6388_v27 = vadd.f32 %v5918_v46, %v628_v45  ;;  %v1071_v13 = vor.u32 1.1754944e-38, %v1070_v20  ;;  %vm1050_vm5 = vweird.f32 %v5428_v52 }
 0x17a   : > { %2044 = vrot.lane.b32.xlu0 %v6374_v18, %s5538_s9  ;;  %v1062_v33 = vmul.f32 %v5424_v21, %v1061_v38  ;;  %v6383_v63 = vpack.c.bf16 %v1311_v11, %v1311_v11  ;;  %v1046_v9 = vsub.f32 1.0, %v1045_v62  ;;  %5435 = vrcp.f32 %v6385_v12  ;;  %vm1051_vm7 = vmor %vm1049_vm6, %vm1050_vm5 }
 0x17b   : > { %v6396_v1 = vadd.f32 1.0, %v5430_v34  ;;  %v4569_v37 = vmul.f32 -1.442695, %v6388_v27  ;;  %v905_v24 = vand.u32 2147483648, %v6369_v60  ;;  %v903_v45 = vand.u32 2147483647, %v6369_v60 }
 0x17c   : > { %v1063_v43 = vadd.f32 %v5424_v21, %v1062_v33  ;;  %2088 = vrot.lane.b32.xlu2 %v6383_v63, %s5538_s9  ;;  %v1047_v28 = vmul.f32 %v5428_v52, %v1046_v9  ;;  %vm899_vm10 = vweird.f32 %v6369_v60  ;;  %v1233_v4 = vand.u32 2147483647, %v6385_v12 }
 0x17d   : > { %v5432_v61 = vpop.eup %5431  ;;  %5437 = vrcp.f32 %v6396_v1  ;;  %v1235_v11 = vand.u32 2147483648, %v6385_v12  ;;  %v918_v33 = vand.u32 2147483647, %v6396_v1  ;;  %v920_v62 = vand.u32 2147483648, %v6396_v1 }
 0x17e   : > { %v1067_v17 = vsel %vm1066_vm3, %v5424_v21, %v1063_v43  ;;  %v1048_v23 = vadd.f32 %v5428_v52, %v1047_v28  ;;  %v895_v44 = vmul.f32 %v5432_v61, %v6369_v60  ;;  %v1056_v21 = vor.u32 1.1754944e-38, %v1055_v47 }
 0x17f   : > { %v1072_v36 = vsel %vm1069_vm4, %v1071_v13, %v1067_v17  ;;  %v5434_v59 = vpop.eup %5433  ;;  %5439 = vpow2.f32 %v4569_v37  ;;  %vm900_vm9 = vweird.f32 %v5432_v61  ;;  %vm904_vm12 = vcmp.eq.f32.partialorder %v903_v45, 8.507059e+37  ;;  %v8752_v45 = vld [vmem:[#allocation8_spill] sm:$0xff] }
 0x180   : > { %v1301_v19 = vmul.f32 %v1072_v36, %v6294_v55  ;;  %v1052_v2 = vsel %vm1051_vm7, %v5428_v52, %v1048_v23  ;;  %v896_v56 = vsub.f32 1.0, %v895_v44  ;;  %v5436_v15 = vpop.eup %5435  ;;  %v6406_v55 = vadd.f32 1.0, %v5434_v59  ;;  %vm901_vm11 = vmor %vm899_vm10, %vm900_vm9 }
 0x181   : > { %v1057_v0 = vsel %vm1054_vm8, %v1056_v21, %v1052_v2  ;;  %v1225_v29 = vmul.f32 %v5436_v15, %v6385_v12  ;;  %vm1229_vm13 = vweird.f32 %v6385_v12  ;;  %vm1230_vm14 = vweird.f32 %v5436_v15 }
 0x182   : > { %v6403_v7 = vpack.c.bf16 %v1301_v19, %v1301_v19  ;;  %v1300_v8 = vmul.f32 %v1057_v0, %v6305_v53  ;;  %v897_v51 = vmul.f32 %v5432_v61, %v896_v56  ;;  %5441 = vrcp.f32 %v6406_v55  ;;  %vm1231_vm3 = vmor %vm1229_vm13, %vm1230_vm14  ;;  %v8750_v56 = vld [vmem:[#allocation10_spill] sm:$0xff] }
 0x183   : > { %v5438_v30 = vpop.eup %5437  ;;  %v906_v53 = vor.u32 1.1754944e-38, %v905_v24  ;;  %v1226_v20 = vsub.f32 1.0, %v1225_v29  ;;  %vm6425_vm15 = vcmp.eq.f32.partialorder %v1233_v4, 8.507059e+37  ;;  %v1236_v28 = vor.u32 1.1754944e-38, %v1235_v11 }
 0x184   : > { %2068 = vrot.lane.b32.xlu1 %v6403_v7, %s5538_s9  ;;  %v6415_v38 = vpack.c.bf16 %v1300_v8, %v1300_v8  ;;  %v898_v52 = vadd.f32 %v5432_v61, %v897_v51  ;;  %v910_v43 = vmul.f32 %v5438_v30, %v6396_v1  ;;  %vm914_vm1 = vweird.f32 %v6396_v1  ;;  %v8751_v8 = vld [vmem:[#allocation6_spill] sm:$0xff] }
 0x185   : > { %v5440_v9 = vpop.eup %5439  ;;  %v1227_v47 = vmul.f32 %v5436_v15, %v1226_v20  ;;  %vm6431_vm2 = vcmp.eq.f32.partialorder %v918_v33, 8.507059e+37  ;;  %v921_v37 = vor.u32 1.1754944e-38, %v920_v62  ;;  %vm915_vm4 = vweird.f32 %v5438_v30 }
 0x186   : > { %8745 = vst [vmem:[#allocation12_spill] sm:$0xff] %v6415_v38  ;;  %2066 = vrot.lane.b32.xlu0 %v6415_v38, %s5538_s9  ;;  %v902_v60 = vsel %vm901_vm11, %v5432_v61, %v898_v52  ;;  %v911_v3 = vsub.f32 1.0, %v910_v43  ;;  %v6435_v19 = vadd.f32 1.0, %v5440_v9  ;;  %v627_v0 = vmul.f32 %v8750_v56, %v5914_v39  ;;  %vm916_vm5 = vmor %vm914_vm1, %vm915_vm4 }
 0x187   : > { %v907_v13 = vsel %vm904_vm12, %v906_v53, %v902_v60  ;;  %v1228_v61 = vadd.f32 %v5436_v15, %v1227_v47  ;;  %v609_v51 = vmul.f32 %v8751_v8, %v5914_v39  ;;  %v1250_v52 = vand.u32 2147483648, %v6406_v55 }
 0x188   : > { %v1290_v17 = vmul.f32 %v907_v13, %v6320_v32  ;;  %v5442_v23 = vpop.eup %5441  ;;  %v912_v59 = vmul.f32 %v5438_v30, %v911_v3  ;;  %v1248_v32 = vand.u32 2147483647, %v6406_v55  ;;  %5443 = vrcp.f32 %v6435_v19 }
 0x189   : > { %v1232_v21 = vsel %vm1231_vm3, %v5436_v15, %v1228_v61  ;;  %v1240_v2 = vmul.f32 %v5442_v23, %v6406_v55  ;;  %v617_v15 = vmul.f32 %v8752_v45, %v5914_v39  ;;  %v6459_v11 = vadd.f32 %v5918_v46, %v627_v0 }
 0x18a   : > { %v6437_v44 = vpack.c.bf16 %v1290_v17, %v1290_v17  ;;  %v1237_v24 = vsel %vm6425_vm15, %v1236_v28, %v1232_v21  ;;  %v913_v12 = vadd.f32 %v5438_v30, %v912_v59  ;;  %vm1244_vm6 = vweird.f32 %v6406_v55  ;;  %v8753_v17 = vld [vmem:[#allocation7_spill] sm:$0xff]  ;;  %v8754_v55 = vld [vmem:[#allocation9_spill] sm:$0xff] }
 0x18b   : > { %v1312_v29 = vmul.f32 %v1237_v24, %v6332_v14  ;;  %v1241_v4 = vsub.f32 1.0, %v1240_v2  ;;  %v6463_v20 = vadd.f32 %v5918_v46, %v609_v51  ;;  %v6466_v33 = vadd.f32 %v5918_v46, %v617_v15 }
 0x18c   : > { %2046 = vrot.lane.b32.xlu2 %v6437_v44, %s5538_s9  ;;  %v917_v53 = vsel %vm916_vm5, %v5438_v30, %v913_v12  ;;  %vm1245_vm7 = vweird.f32 %v5442_v23  ;;  %v4568_v43 = vmul.f32 -1.442695, %v6459_v11  ;;  %vm1249_vm8 = vcmp.eq.f32.partialorder %v1248_v32, 8.507059e+37 }
 0x18d   : > { %v6468_v62 = vpack.c.bf16 %v1312_v29, %v1312_v29  ;;  %v922_v14 = vsel %vm6431_vm2, %v921_v37, %v917_v53  ;;  %v1242_v1 = vmul.f32 %v5442_v23, %v1241_v4  ;;  %v4550_v30 = vmul.f32 -1.442695, %v6463_v20  ;;  %vm1246_vm9 = vmor %vm1244_vm6, %vm1245_vm7 }
 0x18e   : > { %v1291_v60 = vmul.f32 %v922_v14, %v6348_v49  ;;  %v4558_v9 = vmul.f32 -1.442695, %v6466_v33  ;;  %v5444_v13 = vpop.eup %5443  ;;  %v1251_v34 = vor.u32 1.1754944e-38, %v1250_v52  ;;  %v610_v28 = vmul.f32 %v8753_v17, %v5914_v39 }
 0x18f   : > { %2090 = vrot.lane.b32.xlu1 %v6468_v62, %s5538_s9  ;;  %v1243_v47 = vadd.f32 %v5442_v23, %v1242_v1  ;;  %v1090_v49 = vmul.f32 %v5444_v13, %v6435_v19  ;;  %v1098_v61 = vand.u32 2147483647, %v6435_v19  ;;  %5445 = vpow2.f32 %v4568_v43 }
 0x190   : > { %v6480_v3 = vpack.c.bf16 %v1291_v60, %v1291_v60  ;;  %v1100_v37 = vand.u32 2147483648, %v6435_v19  ;;  %5447 = vpow2.f32 %v4550_v30  ;;  %v6488_v59 = vadd.f32 %v5918_v46, %v610_v28 }
 0x191   : > { %v1247_v36 = vsel %vm1246_vm9, %v5442_v23, %v1243_v47  ;;  %v1091_v21 = vsub.f32 1.0, %v1090_v49  ;;  %5449 = vpow2.f32 %v4558_v9  ;;  %v618_v2 = vmul.f32 %v8754_v55, %v5914_v39  ;;  %v1464_v39 = vld [vmem:[#allocation2 + $0x198] sm:$0x11] }
 0x192   : > { %2048 = vrot.lane.b32.xlu0 %v6480_v3, %s5538_s9  ;;  %v1252_v32 = vsel %vm1249_vm8, %v1251_v34, %v1247_v36  ;;  %v4551_v0 = vmul.f32 -1.442695, %v6488_v59  ;;  %vm1095_vm10 = vweird.f32 %v5444_v13  ;;  %v8655_v12 = vshrl.u32 %v6048_v48, 16 }
 0x193   : > { %v1313_v56 = vmul.f32 %v1252_v32, %v6356_v40  ;;  %v1092_v23 = vmul.f32 %v5444_v13, %v1091_v21  ;;  %v6497_v24 = vadd.f32 %v5918_v46, %v618_v2  ;;  %vm1094_vm11 = vweird.f32 %v6435_v19 }
 0x194   : > { %5451 = vpow2.f32 %v4551_v0  ;;  %vm1099_vm12 = vcmp.eq.f32.partialorder %v1098_v61, 8.507059e+37  ;;  %v1101_v15 = vor.u32 1.1754944e-38, %v1100_v37  ;;  %vm1096_vm13 = vmor %vm1094_vm11, %vm1095_vm10  ;;  %vm1362_vm14 = vcmask 1040384  }
 0x195   : > { %v6500_v8 = vpack.c.bf16 %v1313_v56, %v1313_v56  ;;  %v5446_v51 = vpop.eup %5445  ;;  %v1093_v45 = vadd.f32 %v5444_v13, %v1092_v23  ;;  %v4559_v40 = vmul.f32 -1.442695, %v6497_v24  ;;  %vm8662_vm15 = vsmask.f32 256 }
 0x196   : > { %v5448_v29 = vpop.eup %5447  ;;  %v6506_v4 = vadd.f32 1.0, %v5446_v51  ;;  %vm1365_vm1 = vcmask 1044484   ;;  %vm1366_vm2 = vsmask.f32 4352  ;;  %vm1515_vm3 = vcmask 1043459   ;;  %vm6514_vm5 = vmand %vm1362_vm14, %vm8662_vm15 }
 0x197   : > { %2092 = vrot.lane.b32.xlu2 %v6500_v8, %s5538_s9  ;;  %v5450_v52 = vpop.eup %5449  ;;  %v1097_v53 = vsel %vm1096_vm13, %v5444_v13, %v1093_v45  ;;  %v6508_v19 = vadd.f32 1.0, %v5448_v29  ;;  %5453 = vpow2.f32 %v4559_v40  ;;  %vm8661_vm4 = vsmask.f32 7950  ;;  %vm6525_vm8 = vmand %vm1365_vm1, %vm1366_vm2  ;;  %v1533_v45 = vld [vmem:[#allocation2 + $0x3c] sm:$0x88] }
 0x198   : > { %v1102_v14 = vsel %vm1099_vm12, %v1101_v15, %v1097_v53  ;;  %5455 = vrcp.f32 %v6506_v4  ;;  %vm1518_vm6 = vcmask 1047559   ;;  %vm1519_vm7 = vsmask.f32 7966  ;;  %vm6537_vm9 = vmand %vm1515_vm3, %vm8661_vm4  ;;  %v1380_v15 = vld [vmem:[#allocation2 + $0x28] sm:$0x11] }
 0x199   : > { %v1303_v1 = vmul.f32 %v1102_v14, %v6388_v27  ;;  %5457 = vrcp.f32 %v6508_v19  ;;  %v6520_v30 = vrot.slane %v8655_v12, 7  ;;  %v6522_v9 = vadd.f32 1.0, %v5450_v52  ;;  %vm1520_vm10 = vmand %vm1518_vm6, %vm1519_vm7 }
 0x19a   : > { %v5452_v43 = vpop.eup %5451  ;;  %v1083_v47 = vand.u32 2147483647, %v6506_v4  ;;  %v1085_v34 = vand.u32 2147483648, %v6506_v4  ;;  %v8654_v49 = vshll.u32 %v6048_v48, 16  ;;  %v813_v61 = vand.u32 2147483647, %v6508_v19  ;;  %vm6559_vm12 = vmor %vm6525_vm8, %vm6514_vm5 }
 0x19b   : > { %v6529_v27 = vpack.c.bf16 %v1303_v1, %v1303_v1  ;;  %v6533_v17 = vadd.f32 1.0, %v5452_v43  ;;  %v815_v36 = vand.u32 2147483648, %v6508_v19  ;;  %5459 = vrcp.f32 %v6522_v9  ;;  %vm6571_vm1 = vmor %vm1520_vm10, %vm6537_vm9 }
 0x19c   : > { %v6551_v21 = vor.u32 %v8654_v49, %v6520_v30  ;;  %vm1079_vm11 = vweird.f32 %v6506_v4  ;;  %vm6564_vm13 = vcmp.eq.f32.partialorder %v1083_v47, 8.507059e+37  ;;  %v1086_v23 = vor.u32 1.1754944e-38, %v1085_v34 }
 0x19d   : > { %v5454_v37 = vpop.eup %5453  ;;  %2072 = vrot.lane.b32.xlu1 %v6529_v27, %s5538_s9  ;;  %5461 = vrcp.f32 %v6533_v17  ;;  %vm809_vm14 = vweird.f32 %v6508_v19  ;;  %vm6576_vm2 = vcmp.eq.f32.partialorder %v813_v61, 8.507059e+37  ;;  %v816_v52 = vor.u32 1.1754944e-38, %v815_v36 }
 0x19e   : > { %v5456_v32 = vpop.eup %5455  ;;  %8761 = vst [vmem:[#allocation11_spill] sm:$0xff] %v6551_v21  ;;  %v933_v53 = vand.u32 2147483647, %v6522_v9  ;;  %v935_v14 = vand.u32 2147483648, %v6522_v9  ;;  %vm929_vm3 = vweird.f32 %v6522_v9  ;;  %v828_v60 = vand.u32 2147483647, %v6533_v17 }
 0x19f   : > { %v5458_v2 = vpop.eup %5457  ;;  %v1075_v56 = vmul.f32 %v5456_v32, %v6506_v4  ;;  %v6584_v43 = vadd.f32 1.0, %v5454_v37  ;;  %vm1350_vm5 = vcmask 519168   ;;  %v830_v34 = vand.u32 2147483648, %v6533_v17 }
 0x1a0   : > { %v805_v40 = vmul.f32 %v5458_v2, %v6508_v19  ;;  %v1534_v28 = vsel %vm6571_vm1, 0, %v1533_v45  ;;  %v1381_v61 = vsel %vm6559_vm12, 0, %v1380_v15  ;;  %vm1080_vm6 = vweird.f32 %v5456_v32 }
 0x1a1   : > { %v1076_v1 = vsub.f32 1.0, %v1075_v56  ;;  %v5460_v13 = vpop.eup %5459  ;;  %vm824_vm7 = vweird.f32 %v6533_v17  ;;  %5463 = vrcp.f32 %v6584_v43  ;;  %1535 = vst [vmem:[#allocation2 + $0x3c] sm:$0x88] %v1534_v28  ;;  %vm810_vm8 = vweird.f32 %v5458_v2  ;;  %vm1081_vm0 = vmor %vm1079_vm11, %vm1080_vm6 }
 0x1a2   : > { %v806_v47 = vsub.f32 1.0, %v805_v40  ;;  %v925_v56 = vmul.f32 %v5460_v13, %v6522_v9  ;;  %vm6594_vm9 = vcmp.eq.f32.partialorder %v933_v53, 8.507059e+37  ;;  %v936_v45 = vor.u32 1.1754944e-38, %v935_v14  ;;  %1382 = vst [vmem:[#allocation2 + $0x28] sm:$0x11] %v1381_v61  ;;  %vm811_vm4 = vmor %vm809_vm14, %vm810_vm8 }
 0x1a3   : > { %v1077_v36 = vmul.f32 %v5456_v32, %v1076_v1  ;;  %v5462_v37 = vpop.eup %5461  ;;  %vm6599_vm10 = vcmp.eq.f32.partialorder %v828_v60, 8.507059e+37  ;;  %v831_v53 = vor.u32 1.1754944e-38, %v830_v34  ;;  %v948_v28 = vand.u32 2147483647, %v6584_v43 }
 0x1a4   : > { %v807_v49 = vmul.f32 %v5458_v2, %v806_v47  ;;  %v926_v15 = vsub.f32 1.0, %v925_v56  ;;  %v820_v1 = vmul.f32 %v5462_v37, %v6533_v17  ;;  %v950_v14 = vand.u32 2147483648, %v6584_v43  ;;  %v1479_v56 = vld [vmem:[#allocation2 + $0x1e0] sm:$0x11] }
 0x1a5   : > { %v1078_v12 = vadd.f32 %v5456_v32, %v1077_v36  ;;  %vm930_vm15 = vweird.f32 %v5460_v13  ;;  %vm825_vm11 = vweird.f32 %v5462_v37  ;;  %vm944_vm6 = vweird.f32 %v6584_v43 }
 0x1a6   : > { %v808_v47 = vadd.f32 %v5458_v2, %v807_v49  ;;  %v927_v60 = vmul.f32 %v5460_v13, %v926_v15  ;;  %v821_v36 = vsub.f32 1.0, %v820_v1  ;;  %v1465_v49 = vsel %vm6559_vm12, 0, %v1464_v39  ;;  %v1542_v1 = vld [vmem:[#allocation2 + $0x64] sm:$0x88]  ;;  %vm826_vm14 = vmor %vm824_vm7, %vm825_vm11 }
 0x1a7   : > { %v1082_v61 = vsel %vm1081_vm0, %v5456_v32, %v1078_v12  ;;  %v6616_v34 = vpop.eup %5463  ;;  %1466 = vst [vmem:[#allocation2 + $0x198] sm:$0x11] %v1465_v49  ;;  %vm931_vm0 = vmor %vm929_vm3, %vm930_vm15  ;;  %vm1942_vm15 = vsmask.f32 7938  ;;  %vm2155_vm3 = vsmask.f32 3328 }
 0x1a8   : > { %v1087_v38 = vsel %vm6564_vm13, %v1086_v23, %v1082_v61  ;;  %v812_v4 = vsel %vm811_vm4, %v5458_v2, %v808_v47  ;;  %v928_v32 = vadd.f32 %v5460_v13, %v927_v60  ;;  %v822_v15 = vmul.f32 %v5462_v37, %v821_v36  ;;  %2582 = vst.msk [vmem:[#allocation2 + $0x198] sm:$0xf] %vm1350_vm5, %v6054_v41  ;;  %vm6659_vm7 = vmand %vm1350_vm5, %vm1942_vm15 }
 0x1a9   : > { %v1302_v12 = vmul.f32 %v1087_v38, %v6459_v11  ;;  %v817_v19 = vsel %vm6576_vm2, %v816_v52, %v812_v4  ;;  %v940_v39 = vmul.f32 %v6616_v34, %v6584_v43  ;;  %vm6627_vm4 = vcmp.eq.f32.partialorder %v948_v28, 8.507059e+37  ;;  %v5164_v43 = vld [vmem:[%s8642_s5 + $0x38] sm:$0xff] }
 0x1aa   : > { %v1284_v0 = vmul.f32 %v817_v19, %v6463_v20  ;;  %v951_v38 = vor.u32 1.1754944e-38, %v950_v14  ;;  %v1480_v11 = vsel %vm6559_vm12, 0, %v1479_v56  ;;  %v932_v20 = vsel %vm931_vm0, %v5460_v13, %v928_v32  ;;  %5276 = vmatpush.bf16.msra.mxu2 %v5164_v43  ;;  %5277 = vmatpush.bf16.msra.mxu3 %v5164_v43 }
 0x1ab   : > { %v6635_v23 = vpack.c.bf16 %v1302_v12, %v1302_v12  ;;  %v823_v29 = vadd.f32 %v5462_v37, %v822_v15  ;;  %vm1668_vm13 = vsmask.f32 4368  ;;  %1481 = vst [vmem:[#allocation2 + $0x1e0] sm:$0x11] %v1480_v11  ;;  %v937_v52 = vsel %vm6594_vm9, %v936_v45, %v932_v20  ;;  %v2079_v12 = vpop.permute.xlu2 %2078  ;;  %5275 = vmatpush.bf16.msra.mxu1 %v5164_v43 }
 0x1ac   : > { %v6637_v9 = vpack.c.bf16 %v1284_v0, %v1284_v0  ;;  %v941_v47 = vsub.f32 1.0, %v940_v39  ;;  %v1543_v28 = vsel %vm6571_vm1, 0, %v1542_v1  ;;  %v1292_v13 = vmul.f32 %v937_v52, %v6466_v33  ;;  %3972 = vmatpush.bf16.msra.mxu0 %v5164_v43 }
 0x1ad   : > { %2070 = vrot.lane.b32.xlu0 %v6635_v23, %s5538_s9  ;;  %v827_v14 = vsel %vm826_vm14, %v5462_v37, %v823_v29  ;;  %vm945_vm2 = vweird.f32 %v6616_v34  ;;  %1544 = vst [vmem:[#allocation2 + $0x64] sm:$0x88] %v1543_v28  ;;  %vm8707_vm8 = vcmask 1043968   ;;  %v1687_v46 = vshrl.u32 %v6171_v10, 16  ;;  %v1389_v28 = vld [vmem:[#allocation2 + $0x50] sm:$0x11] }
 0x1ae   : > { %2034 = vrot.lane.b32.xlu2 %v6637_v9, %s5538_s9  ;;  %v832_v17 = vsel %vm6599_vm10, %v831_v53, %v827_v14  ;;  %v942_v40 = vmul.f32 %v6616_v34, %v941_v47  ;;  %v1671_v45 = vshrl.u32 %v6637_v9, 16  ;;  %v1674_v61 = vshll.u32 %v6637_v9, 16  ;;  %v2806_v49 = vld [vmem:[#allocation2 + $0x19c] sm:$0xf]  ;;  %vm946_vm9 = vmor %vm944_vm6, %vm945_vm2 }
 0x1af   : > { %v6663_v37 = vpack.c.bf16 %v1292_v13, %v1292_v13  ;;  %v1285_v60 = vmul.f32 %v832_v17, %v6488_v59  ;;  %vm2156_vm10 = vsmask.f32 7440  ;;  %v1944_v59 = vld [vmem:[#allocation2 + $0x28] sm:$0xf]  ;;  %v2807_v32 = vsel %vm6659_vm7, %v6551_v21, %v2806_v49 }
 0x1b0   : > { %v943_v53 = vadd.f32 %v6616_v34, %v942_v40  ;;  %v1673_v36 = vrot.slane %v1671_v45, 7  ;;  %v2158_v56 = vrot.slane %v1671_v45, 4  ;;  %v2159_v4 = vrot.slane %v1674_v61, 5  ;;  %2808 = vst [vmem:[#allocation2 + $0x19c] sm:$0xf] %v2807_v32  ;;  %vm6700_vm11 = vmor %vm2155_vm3, %vm2156_vm10 }
 0x1b1   : > { %2050 = vrot.lane.b32.xlu1 %v6663_v37, %s5538_s9  ;;  %v6670_v19 = vpack.c.bf16 %v1285_v60, %v1285_v60  ;;  %v6681_v15 = vrot.slane %v1687_v46, 7  ;;  %2854 = vst.msk [vmem:[#allocation2 + $0x19c] sm:$0xf] %vm8707_vm8, %v2079_v12  ;;  %vm8780_vm6 = vsmask.f32 256  ;;  %v5539_v32 = vmov 0  }
 0x1b2   : > { %v947_v1 = vsel %vm946_vm9, %v6616_v34, %v943_v53  ;;  %v1677_v0 = vrot.slane %v1673_v36, 4  ;;  %v2160_v39 = vor.u32 %v2159_v4, %v2158_v56  ;;  %v6684_v11 = vor.u32 %v1674_v61, %v1673_v36  ;;  %v1988_v20 = vld [vmem:[#allocation2 + $0x1e0] sm:$0xf]  ;;  %vm6715_vm0 = vmor %vm8780_vm6, %vm1668_vm13  ;;  %1349 = vst [vmem:[#allocation2 + $0x8] sm:$0xff] %v5539_v32 }
 0x1b3   : > { %v952_v29 = vsel %vm6627_vm4, %v951_v38, %v947_v1  ;;  %v1679_v52 = vshrl.u32 %v6670_v19, 16  ;;  %v1682_v47 = vshll.u32 %v6670_v19, 16  ;;  %v1989_v34 = vsel %vm6659_vm7, %v6551_v21, %v1988_v20  ;;  %vm6741_vm4 = vmand %vm1350_vm5, %vm2155_vm3  ;;  %1348 = vst [vmem:[#allocation2] sm:$0xff] %v5539_v32  ;;  %v1434_v21 = vld [vmem:[#allocation2 + $0x118] sm:$0x11] }
 0x1b4   : > { %v1293_v13 = vmul.f32 %v952_v29, %v6497_v24  ;;  %v2161_v2 = vrot.slane %v2160_v39, 4  ;;  %v1945_v38 = vsel %vm6659_vm7, %v6684_v11, %v1944_v59  ;;  %1990 = vst [vmem:[#allocation2 + $0x1e0] sm:$0xf] %v1989_v34  ;;  %v1693_v17 = vrot.slane %v6681_v15, 4  ;;  %v2325_v39 = vld [vmem:[#allocation2 + $0x40] sm:$0xf]  ;;  %vm8790_vm10 = vmmov %vm8780_vm6 }
 0x1b5   : > { %2036 = vrot.lane.b32.xlu0 %v6670_v19, %s5538_s9  ;;  %v1681_v24 = vrot.slane %v1679_v52, 7  ;;  %v2162_v40 = vrot.slane %v1682_v47, 5  ;;  %v2164_v45 = vrot.slane %v1679_v52, 4  ;;  %1946 = vst [vmem:[#allocation2 + $0x28] sm:$0xf] %v1945_v38  ;;  %v1695_v61 = vshrl.u32 %v6253_v22, 16 }
 0x1b6   : > { %v6711_v60 = vpack.c.bf16 %v1293_v13, %v1293_v13  ;;  %2147 = vst.msk [vmem:[#allocation2 + $0x1e0] sm:$0xf] %vm8707_vm8, %v2079_v12  ;;  %v1698_v36 = vshll.u32 %v6253_v22, 16  ;;  %v1390_v56 = vsel %vm6559_vm12, 0, %v1389_v28  ;;  %v2927_v52 = vld [vmem:[%s6728_s17 + $0x4] sm:$0xf] }
 0x1b7   : > { %v1684_v4 = vor.u32 %v1682_v47, %v1681_v24  ;;  %v6732_v49 = vsel %vm6700_vm11, %v2161_v2, %v2162_v40  ;;  %v2165_v59 = vor.u32 %v2164_v45, %v2162_v40  ;;  %v1697_v12 = vrot.slane %v1695_v61, 7  ;;  %1391 = vst [vmem:[#allocation2 + $0x50] sm:$0x11] %v1390_v56  ;;  %v5163_v28 = vld [vmem:[%s8642_s5 + $0x30] sm:$0xff] }
 0x1b8   : > { %2052 = vrot.lane.b32.xlu2 %v6711_v60, %s5538_s9  ;;  %2323 = vst.msk [vmem:[#allocation2 + $0x2c] sm:$0xf] %vm1350_vm5, %v6732_v49  ;;  %v8668_v2 = vshrl.u32 %v6085_v31, 16  ;;  %5279 = vmatpush.bf16.msra.mxu2 %v5163_v28  ;;  %v1690_v24 = vshll.u32 %v6171_v10, 16  ;;  %vm1528_vm13 = vcmask 519171   ;;  %vm1375_vm9 = vcmask 516096  }
 0x1b9   : > { %v1685_v20 = vsel %vm6715_vm0, %v1677_v0, %v1684_v4  ;;  %v2166_v43 = vrot.slane %v2165_v59, 4  ;;  %v1700_v29 = vor.u32 %v1698_v36, %v1697_v12  ;;  %v2926_v0 = vld [vmem:[%s6728_s17] sm:$0xf]  ;;  %v1372_v13 = vld [vmem:[#allocation2 + $0x8] sm:$0x11]  ;;  %1352 = vst [vmem:[#allocation2 + $0x14] sm:$0xff] %v5539_v32  ;;  %5280 = vmatpush.bf16.msra.mxu3 %v5163_v28  ;;  %5278 = vmatpush.bf16.msra.mxu1 %v5163_v28  ;;  %vm6993_vm6 = vmand %vm1375_vm9, %vm8790_vm10 }
 0x1ba   : > { %2402 = vrot.lane.b32.xlu1 %v1685_v20, %s5538_s9  ;;  %1947 = vst.msk [vmem:[#allocation2 + $0x3c] sm:$0xf] %vm1350_vm5, %v1685_v20  ;;  %v1373_v38 = vsel %vm6559_vm12, 0, %v1372_v13  ;;  %3973 = vmatpush.bf16.msra.mxu0 %v5163_v28  ;;  %v1692_v40 = vor.u32 %v1690_v24, %v6681_v15  ;;  %v1857_v45 = vrot.slane %v8668_v2, 7  ;;  %v2168_v4 = vrot.slane %v1690_v24, 5  ;;  %v2081_v28 = vpop.permute.xlu2 %2080  ;;  %vm7855_vm9 = vmand %vm8707_vm8, %vm1942_vm15 }
 0x1bb   : > { %v2326_v47 = vsel %vm6741_vm4, %v2166_v43, %v2325_v39  ;;  %v6756_v34 = vsel %vm6715_vm0, %v1693_v17, %v1700_v29  ;;  %1351 = vst.msk [vmem:[#allocation2 + $0x10] sm:$0xf] %vm1350_vm5, %v5539_v32  ;;  %v5162_v17 = vld [vmem:[%s8642_s5 + $0x28] sm:$0xff]  ;;  %v2167_v59 = vrot.slane %v1687_v46, 4  ;;  %v8669_v15 = vshll.u32 %v6085_v31, 16 }
 0x1bc   : > { %2327 = vst [vmem:[#allocation2 + $0x40] sm:$0xf] %v2326_v47  ;;  %5282 = vmatpush.bf16.msra.mxu2 %v5162_v17  ;;  %v1617_v39 = vld [vmem:[#allocation2 + $0x1ac] sm:$0x88]  ;;  %v2171_v20 = vrot.slane %v1698_v36, 5  ;;  %v2173_v46 = vrot.slane %v1695_v61, 4 }
 0x1bd   : > { %2992 = vrot.lane.b32.xlu0 %v2927_v52, %s5538_s9  ;;  %1951 = vst.msk [vmem:[#allocation2 + $0x64] sm:$0xf] %vm1350_vm5, %v6756_v34  ;;  %5283 = vmatpush.bf16.msra.mxu3 %v5162_v17  ;;  %v1632_v29 = vld [vmem:[#allocation2 + $0x1f4] sm:$0x88]  ;;  %v1853_v52 = vrot.slane %v6520_v30, 4  ;;  %v2169_v36 = vor.u32 %v2168_v4, %v2167_v59  ;;  %v5161_v61 = vld [vmem:[%s8642_s5 + $0x20] sm:$0xff] }
 0x1be   : > { %1374 = vst [vmem:[#allocation2 + $0x8] sm:$0x11] %v1373_v38  ;;  %v1948_v56 = vld [vmem:[#allocation2 + $0x50] sm:$0xf]  ;;  %5281 = vmatpush.bf16.msra.mxu1 %v5162_v17  ;;  %3974 = vmatpush.bf16.msra.mxu0 %v5162_v17  ;;  %v1633_v30 = vsel %vm6571_vm1, 0, %v1632_v29  ;;  %v1703_v13 = vshrl.u32 %v6307_v6, 16 }
 0x1bf   : > { %1353 = vst [vmem:[#allocation2 + $0x1c] sm:$0xff] %v5539_v32  ;;  %v1949_v12 = vsel %vm6659_vm7, %v1692_v40, %v1948_v56  ;;  %v1711_v38 = vshrl.u32 %v6374_v18, 16  ;;  %v2170_v17 = vrot.slane %v2169_v36, 4  ;;  %vm8786_vm14 = vsmask.f32 7950 }
 0x1c0   : > { %2990 = vrot.lane.b32.xlu2 %v2926_v0, %s5538_s9  ;;  %1354 = vst.msk [vmem:[#allocation2 + $0x24] sm:$0xf] %vm1350_vm5, %v5539_v32  ;;  %v1618_v0 = vsel %vm6571_vm1, 0, %v1617_v39  ;;  %5285 = vmatpush.bf16.msra.mxu2 %v5161_v61  ;;  %vm6830_vm2 = vmand %vm1528_vm13, %vm8786_vm14  ;;  %v2329_v4 = vld [vmem:[#allocation2 + $0x68] sm:$0xf]  ;;  %v1705_v59 = vrot.slane %v1703_v13, 7 }
 0x1c1   : > { %1356 = vst [vmem:[#allocation2 + $0x258] sm:$0xff] %v5539_v32  ;;  %5286 = vmatpush.bf16.msra.mxu3 %v5161_v61  ;;  %v2929_v29 = vld [vmem:[%s6728_s17 + $0xc] sm:$0xf]  ;;  %vm8708_vm13 = vcmask 781824   ;;  %vm7841_vm14 = vmand %vm8707_vm8, %vm2155_vm3  ;;  %vm8706_vm15 = vcmask 785408  }
 0x1c2   : > { %2605 = vrot.lane.b32.xlu1 %v2166_v43, %s5538_s9  ;;  %1357 = vst [vmem:[#allocation2 + $0x260] sm:$0xff] %v5539_v32  ;;  %5284 = vmatpush.bf16.msra.mxu1 %v5161_v61 }
 0x1c3   : > { %1358 = vst.msk [vmem:[#allocation2 + $0x268] sm:$0xf] %vm1350_vm5, %v5539_v32  ;;  %3975 = vmatpush.bf16.msra.mxu0 %v5161_v61 }
 0x1c4   : > { %1359 = vst [vmem:[#allocation2 + $0x26c] sm:$0xff] %v5539_v32 }
 0x1c5   : > { %2400 = vrot.lane.b32.xlu0 %v6684_v11, %s5538_s9  ;;  %v2766_v43 = vld [vmem:[#allocation2 + $0xc] sm:$0xf]  ;;  %1360 = vst [vmem:[#allocation2 + $0x274] sm:$0xff] %v5539_v32  ;;  %v1860_v11 = vor.u32 %v8669_v15, %v1857_v45 }
 0x1c6   : > { %v2767_v47 = vsel %vm6659_vm7, %v1692_v40, %v2766_v43  ;;  %1361 = vst.msk [vmem:[#allocation2 + $0x27c] sm:$0xf] %vm1350_vm5, %v5539_v32  ;;  %v1539_v15 = vld [vmem:[#allocation2 + $0x4c] sm:$0x8] }
 0x1c7   : > { %1950 = vst [vmem:[#allocation2 + $0x50] sm:$0xf] %v1949_v12  ;;  %v6821_v32 = vsel %vm6715_vm0, %v1853_v52, %v1860_v11  ;;  %v1530_v45 = vld [vmem:[#allocation2 + $0x24] sm:$0x8]  ;;  %v1713_v12 = vrot.slane %v1711_v38, 7 }
 0x1c8   : > { %2603 = vrot.lane.b32.xlu2 %v6732_v49, %s5538_s9  ;;  %2562 = vst.msk [vmem:[#allocation2 + $0x8] sm:$0xf] %vm1350_vm5, %v6637_v9  ;;  %v2174_v49 = vor.u32 %v2173_v46, %v2171_v20  ;;  %v2928_v9 = vld [vmem:[%s6728_s17 + $0x8] sm:$0xf]  ;;  %v1531_v39 = vsel %vm6830_vm2, 0, %v1530_v45  ;;  %v1714_v46 = vshll.u32 %v6374_v18, 16 }
 0x1c9   : > { %2768 = vst [vmem:[#allocation2 + $0xc] sm:$0xf] %v2767_v47  ;;  %v1536_v11 = vld [vmem:[#allocation2 + $0x44] sm:$0x88]  ;;  %v1551_v52 = vld [vmem:[#allocation2 + $0x8c] sm:$0x88] }
 0x1ca   : > { %2406 = vrot.lane.b32.xlu1 %v6756_v34, %s5538_s9  ;;  %8785 = vst [vmem:[#allocation10_spill] sm:$0xff] %v6821_v32  ;;  %v2175_v56 = vrot.slane %v2174_v49, 4  ;;  %v1709_v47 = vrot.slane %v1705_v59, 4  ;;  %v1716_v36 = vor.u32 %v1714_v46, %v1713_v12  ;;  %v1537_v61 = vsel %vm6571_vm1, 0, %v1536_v11  ;;  %v1383_v49 = vld [vmem:[#allocation2 + $0x30] sm:$0x11] }
 0x1cb   : > { %1619 = vst [vmem:[#allocation2 + $0x1ac] sm:$0x88] %v1618_v0  ;;  %v1552_v0 = vsel %vm6571_vm1, 0, %v1551_v52  ;;  %v6869_v45 = vrot.slane %v1714_v46, 5  ;;  %v2176_v11 = vrot.slane %v1703_v13, 4 }
 0x1cc   : > { %1634 = vst [vmem:[#allocation2 + $0x1f4] sm:$0x88] %v1633_v30  ;;  %v2330_v43 = vsel %vm6741_vm4, %v2175_v56, %v2329_v4  ;;  %v1717_v30 = vsel %vm6715_vm0, %v1709_v47, %v1716_v36  ;;  %v1384_v4 = vsel %vm6559_vm12, 0, %v1383_v49  ;;  %v1470_v47 = vld [vmem:[#allocation2 + $0x1b8] sm:$0x11]  ;;  %v8672_v36 = vshrl.u32 %v6054_v41, 16 }
 0x1cd   : > { %2404 = vrot.lane.b32.xlu0 %v1692_v40, %s5538_s9  ;;  %1991 = vst.msk [vmem:[#allocation2 + $0x1f4] sm:$0xf] %vm1350_vm5, %v6821_v32  ;;  %v6840_v40 = vsel %vm6700_vm11, %v2170_v17, %v2171_v20  ;;  %v2039_v20 = vpop.permute.xlu2 %2038  ;;  %v5160_v17 = vld [vmem:[%s8642_s5 + $0x18] sm:$0xff]  ;;  %v8674_v49 = vshrl.u32 %v6071_v57, 16 }
 0x1ce   : > { %2148 = vst.msk [vmem:[#allocation2 + $0x1f4] sm:$0xf] %vm8707_vm8, %v2081_v28  ;;  %5288 = vmatpush.bf16.msra.mxu2 %v5160_v17  ;;  %5289 = vmatpush.bf16.msra.mxu3 %v5160_v17  ;;  %v1662_v14 = vld [vmem:[#allocation2 + $0x274] sm:$0x88] }
 0x1cf   : > { %2809 = vst.msk [vmem:[#allocation2 + $0x1b0] sm:$0xf] %vm1350_vm5, %v6821_v32  ;;  %5287 = vmatpush.bf16.msra.mxu1 %v5160_v17  ;;  %3976 = vmatpush.bf16.msra.mxu0 %v5160_v17 }
 0x1d0   : > { %2994 = vrot.lane.b32.xlu2 %v2928_v9, %s5538_s9  ;;  %2855 = vst.msk [vmem:[#allocation2 + $0x1b0] sm:$0xf] %vm8707_vm8, %v2081_v28  ;;  %v1706_v28 = vshll.u32 %v6307_v6, 16  ;;  %v1398_v9 = vld [vmem:[#allocation2 + $0x78] sm:$0x11] }
 0x1d1   : > { %2583 = vst.msk [vmem:[#allocation2 + $0x1ac] sm:$0xf] %vm1350_vm5, %v6088_v50  ;;  %v1399_v52 = vsel %vm6559_vm12, 0, %v1398_v9  ;;  %v8670_v9 = vshll.u32 %v6054_v41, 16 }
 0x1d2   : > { %2609 = vrot.lane.b32.xlu1 %v2175_v56, %s5538_s9  ;;  %2328 = vst.msk [vmem:[#allocation2 + $0x54] sm:$0xf] %vm1350_vm5, %v6840_v40  ;;  %v2177_v12 = vrot.slane %v1706_v28, 5 }
 0x1d3   : > { %1532 = vst [vmem:[#allocation2 + $0x24] sm:$0x8] %v1531_v39  ;;  %v1455_v39 = vld [vmem:[#allocation2 + $0x170] sm:$0x11] }
 0x1d4   : > { %2331 = vst [vmem:[#allocation2 + $0x68] sm:$0xf] %v2330_v43 }
 0x1d5   : > { %2996 = vrot.lane.b32.xlu0 %v2929_v29, %s5538_s9  ;;  %2127 = vst.msk [vmem:[#allocation2 + $0x50] sm:$0xf] %vm8707_vm8, %v2039_v20  ;;  %v1708_v29 = vor.u32 %v1706_v28, %v1705_v59  ;;  %v1425_v59 = vld [vmem:[#allocation2 + $0xf0] sm:$0x11] }
 0x1d6   : > { %2834 = vst.msk [vmem:[#allocation2 + $0xc] sm:$0xf] %vm8707_vm8, %v2039_v20  ;;  %v2182_v20 = vrot.slane %v1711_v38, 4  ;;  %v1456_v38 = vsel %vm6559_vm12, 0, %v1455_v39 }
 0x1d7   : > { %1538 = vst [vmem:[#allocation2 + $0x44] sm:$0x88] %v1537_v61  ;;  %v2930_v61 = vld [vmem:[%s6728_s17 + $0x10] sm:$0xf] }
 0x1d8   : > { %2607 = vrot.lane.b32.xlu2 %v6840_v40, %s5538_s9  ;;  %1553 = vst [vmem:[#allocation2 + $0x8c] sm:$0x88] %v1552_v0  ;;  %v2183_v13 = vor.u32 %v2182_v20, %v6869_v45  ;;  %v2178_v0 = vor.u32 %v2177_v12, %v2176_v11  ;;  %v1626_v12 = vld [vmem:[#allocation2 + $0x1d4] sm:$0x88] }
 0x1d9   : > { %1955 = vst.msk [vmem:[#allocation2 + $0x8c] sm:$0xf] %vm1350_vm5, %v1717_v30  ;;  %v2931_v11 = vld [vmem:[%s6728_s17 + $0x14] sm:$0xf] }
 0x1da   : > { %2410 = vrot.lane.b32.xlu1 %v1717_v30, %s5538_s9  ;;  %v2867_v43 = vld [vmem:[#allocation2 + $0x24] sm:$0xf]  ;;  %2773 = vst.msk [vmem:[#allocation2 + $0x48] sm:$0xf] %vm1350_vm5, %v1717_v30  ;;  %v6893_v28 = vrot.slane %v2183_v13, 4  ;;  %v6897_v30 = vrot.slane %v8672_v36, 7 }
 0x1db   : > { %v2868_v46 = vsel %vm6741_vm4, %v2175_v56, %v2867_v43  ;;  %2565 = vst.msk [vmem:[#allocation2 + $0x44] sm:$0xf] %vm1350_vm5, %v6253_v22  ;;  %v1410_v56 = vld [vmem:[#allocation2 + $0xa8] sm:$0x11]  ;;  %v1471_v22 = vsel %vm6559_vm12, 0, %v1470_v47  ;;  %v2179_v39 = vrot.slane %v2178_v0, 4 }
 0x1dc   : > { %2869 = vst [vmem:[#allocation2 + $0x24] sm:$0xf] %v2868_v46  ;;  %v1411_v17 = vsel %vm6559_vm12, 0, %v1410_v56  ;;  %v8665_v43 = vshrl.u32 %v6269_v35, 16  ;;  %v5159_v20 = vld [vmem:[%s8642_s5 + $0x10] sm:$0xff]  ;;  %v6918_v46 = vor.u32 %v8670_v9, %v6897_v30  ;;  %v8673_v56 = vshll.u32 %v6071_v57, 16 }
 0x1dd   : > { %2408 = vrot.lane.b32.xlu0 %v1708_v29, %s5538_s9  ;;  %1385 = vst [vmem:[#allocation2 + $0x30] sm:$0x11] %v1384_v4  ;;  %v1426_v4 = vsel %vm6559_vm12, 0, %v1425_v59  ;;  %5291 = vmatpush.bf16.msra.mxu2 %v5159_v20  ;;  %v6937_v59 = vsel %vm6700_vm11, %v2179_v39, %v6869_v45 }
 0x1de   : > { %1400 = vst [vmem:[#allocation2 + $0x78] sm:$0x11] %v1399_v52  ;;  %v6922_v52 = vrot.slane %v8674_v49, 7  ;;  %5292 = vmatpush.bf16.msra.mxu3 %v5159_v20  ;;  %5290 = vmatpush.bf16.msra.mxu1 %v5159_v20  ;;  %v1837_v49 = vrot.slane %v6897_v30, 4 }
 0x1df   : > { %2564 = vst.msk [vmem:[#allocation2 + $0x30] sm:$0xf] %vm1350_vm5, %v6171_v10  ;;  %v8667_v10 = vshrl.u32 %v6230_v58, 16  ;;  %3977 = vmatpush.bf16.msra.mxu0 %v5159_v20 }
 0x1e0   : > { %2998 = vrot.lane.b32.xlu2 %v2930_v61, %s5538_s9  ;;  %1457 = vst [vmem:[#allocation2 + $0x170] sm:$0x11] %v1456_v38  ;;  %v1627_v38 = vsel %vm6571_vm1, 0, %v1626_v12  ;;  %v2075_v12 = vpop.permute.xlu0 %2074 }
 0x1e1   : > { %1472 = vst [vmem:[#allocation2 + $0x1b8] sm:$0x11] %v1471_v22  ;;  %v6941_v0 = vrot.slane %v8667_v10, 7  ;;  %v1730_v10 = vshll.u32 %v6480_v3, 16 }
 0x1e2   : > { %2613 = vrot.lane.b32.xlu1 %v6893_v28, %s5538_s9  ;;  %2580 = vst.msk [vmem:[#allocation2 + $0x170] sm:$0xf] %vm1350_vm5, %v6635_v23 }
 0x1e3   : > { %1412 = vst [vmem:[#allocation2 + $0xa8] sm:$0x11] %v1411_v17  ;;  %v1873_v17 = vrot.slane %v8665_v43, 7  ;;  %v1869_v43 = vrot.slane %v6941_v0, 4 }
 0x1e4   : > { %v2770_v47 = vld [vmem:[#allocation2 + $0x34] sm:$0xf]  ;;  %1427 = vst [vmem:[#allocation2 + $0xf0] sm:$0x11] %v1426_v4 }
 0x1e5   : > { %3000 = vrot.lane.b32.xlu0 %v2931_v11, %s5538_s9  ;;  %v1952_v61 = vld [vmem:[#allocation2 + $0x78] sm:$0xf]  ;;  %v2771_v13 = vsel %vm6659_vm7, %v1708_v29, %v2770_v47  ;;  %2570 = vst.msk [vmem:[#allocation2 + $0xa8] sm:$0xf] %vm1350_vm5, %v6663_v37  ;;  %v8666_v11 = vshll.u32 %v6269_v35, 16 }
 0x1e6   : > { %v1953_v22 = vsel %vm6659_vm7, %v1708_v29, %v1952_v61  ;;  %2772 = vst [vmem:[#allocation2 + $0x34] sm:$0xf] %v2771_v13  ;;  %v6950_v29 = vor.u32 %v8673_v56, %v6922_v52  ;;  %v1641_v61 = vld [vmem:[#allocation2 + $0x21c] sm:$0x88]  ;;  %v8677_v56 = vshrl.u32 %v6101_v16, 16 }
 0x1e7   : > { %1954 = vst [vmem:[#allocation2 + $0x78] sm:$0xf] %v1953_v22  ;;  %v2802_v4 = vld [vmem:[#allocation2 + $0x174] sm:$0xf]  ;;  %v2055_v22 = vpop.permute.xlu1 %2054 }
 0x1e8   : > { %2611 = vrot.lane.b32.xlu2 %v6937_v59, %s5538_s9  ;;  %v1984_v45 = vld [vmem:[#allocation2 + $0x1b8] sm:$0xf]  ;;  %v2803_v39 = vsel %vm6659_vm7, %v6918_v46, %v2802_v4  ;;  %1628 = vst [vmem:[#allocation2 + $0x1d4] sm:$0x88] %v1627_v38  ;;  %v1876_v38 = vor.u32 %v8666_v11, %v1873_v17  ;;  %v1642_v17 = vsel %vm6571_vm1, 0, %v1641_v61  ;;  %v1761_v30 = vrot.slane %v8677_v56, 7 }
 0x1e9   : > { %v1985_v20 = vsel %vm6659_vm7, %v6918_v46, %v1984_v45  ;;  %2804 = vst [vmem:[#allocation2 + $0x174] sm:$0xf] %v2803_v39  ;;  %v5158_v39 = vld [vmem:[%s8642_s5 + $0x8] sm:$0xff] }
 0x1ea   : > { %1986 = vst [vmem:[#allocation2 + $0x1b8] sm:$0xf] %v1985_v20  ;;  %v2782_v47 = vld [vmem:[#allocation2 + $0xac] sm:$0xf]  ;;  %v2932_v20 = vld [vmem:[%s6728_s17 + $0x18] sm:$0xf]  ;;  %5294 = vmatpush.bf16.msra.mxu2 %v5158_v39  ;;  %5295 = vmatpush.bf16.msra.mxu3 %v5158_v39  ;;  %v6982_v11 = vsel %vm6715_vm0, %v1869_v43, %v1876_v38  ;;  %v2085_v43 = vpop.permute.xlu2 %2084 }
 0x1eb   : > { %2145 = vst.msk [vmem:[#allocation2 + $0x1b8] sm:$0xf] %vm8707_vm8, %v2075_v12  ;;  %v1964_v13 = vld [vmem:[#allocation2 + $0xf0] sm:$0xf]  ;;  %v2783_v45 = vsel %vm6659_vm7, %v6950_v29, %v2782_v47  ;;  %v8671_v47 = vshrl.u32 %v6088_v50, 16  ;;  %5293 = vmatpush.bf16.msra.mxu1 %v5158_v39  ;;  %3978 = vmatpush.bf16.msra.mxu0 %v5158_v39  ;;  %v1722_v39 = vshll.u32 %v6437_v44, 16 }
 0x1ec   : > { %2852 = vst.msk [vmem:[#allocation2 + $0x174] sm:$0xf] %vm8707_vm8, %v2075_v12  ;;  %v1965_v4 = vsel %vm6659_vm7, %v6950_v29, %v1964_v13  ;;  %v1719_v12 = vshrl.u32 %v6437_v44, 16  ;;  %v8679_v13 = vshrl.u32 %v6480_v3, 16  ;;  %v1386_v38 = vld [vmem:[#allocation2 + $0x38] sm:$0x1] }
 0x1ed   : > { %1966 = vst [vmem:[#allocation2 + $0xf0] sm:$0xf] %v1965_v4  ;;  %v1841_v2 = vrot.slane %v8671_v47, 7  ;;  %v2333_v47 = vld [vmem:[#allocation2 + $0x90] sm:$0xf] }
 0x1ee   : > { %2135 = vst.msk [vmem:[#allocation2 + $0xf0] sm:$0xf] %vm8707_vm8, %v2055_v22  ;;  %v1721_v61 = vrot.slane %v1719_v12, 7  ;;  %v1729_v4 = vrot.slane %v8679_v13, 7  ;;  %v2185_v56 = vrot.slane %v1719_v12, 4  ;;  %v2189_v13 = vrot.slane %v1730_v10, 5 }
 0x1ef   : > { %2784 = vst [vmem:[#allocation2 + $0xac] sm:$0xf] %v2783_v45 }
 0x1f0   : > { %8789 = vst [vmem:[#allocation6_spill] sm:$0xff] %v6982_v11  ;;  %3002 = vrot.lane.b32.xlu2 %v2932_v20, %s5538_s9  ;;  %v1732_v20 = vor.u32 %v1730_v10, %v1729_v4  ;;  %v8675_v4 = vshll.u32 %v6088_v50, 16  ;;  %v7019_v36 = vor.u32 %v1722_v39, %v1721_v61 }
 0x1f1   : > { %2842 = vst.msk [vmem:[#allocation2 + $0xac] sm:$0xf] %vm8707_vm8, %v2055_v22  ;;  %v1725_v22 = vrot.slane %v1721_v61, 4  ;;  %v2334_v61 = vsel %vm6741_vm4, %v6893_v28, %v2333_v47  ;;  %v2077_v47 = vpop.permute.xlu0 %2076 }
 0x1f2   : > { %1643 = vst [vmem:[#allocation2 + $0x21c] sm:$0x88] %v1642_v17  ;;  %v1387_v17 = vsel %vm6993_vm6, 0, %v1386_v38  ;;  %v1608_v38 = vld [vmem:[#allocation2 + $0x184] sm:$0x88]  ;;  %2412 = vrot.lane.b32.xlu0 %v7019_v36, %s5538_s9 }
 0x1f3   : > { %1995 = vst.msk [vmem:[#allocation2 + $0x21c] sm:$0xf] %vm1350_vm5, %v6982_v11  ;;  %v7011_v9 = vsel %vm6715_vm0, %v1725_v22, %v1732_v20  ;;  %v1540_v22 = vsel %vm6830_vm2, 0, %v1539_v15  ;;  %v1623_v20 = vld [vmem:[#allocation2 + $0x1cc] sm:$0x88]  ;;  %v1609_v15 = vsel %vm6571_vm1, 0, %v1608_v38 }
 0x1f4   : > { %2813 = vst.msk [vmem:[#allocation2 + $0x1d8] sm:$0xf] %vm1350_vm5, %v6982_v11  ;;  %2414 = vrot.lane.b32.xlu1 %v7011_v9, %s5538_s9  ;;  %v8678_v38 = vshll.u32 %v6101_v16, 16 }
 0x1f5   : > { %2150 = vst.msk [vmem:[#allocation2 + $0x21c] sm:$0xf] %vm8707_vm8, %v2085_v43  ;;  %v4704_v11 = vld [vmem:[#allocation2 + $0xf0] sm:$0xf] }
 0x1f6   : > { %2857 = vst.msk [vmem:[#allocation2 + $0x1d8] sm:$0xf] %vm8707_vm8, %v2085_v43  ;;  %v1844_v43 = vor.u32 %v8675_v4, %v1841_v2  ;;  %v1624_v2 = vsel %vm6571_vm1, 0, %v1623_v20  ;;  %v1578_v20 = vld [vmem:[#allocation2 + $0x104] sm:$0x88] }
 0x1f7   : > { %2585 = vst.msk [vmem:[#allocation2 + $0x1d4] sm:$0xf] %vm1350_vm5, %v6085_v31  ;;  %v1407_v4 = vld [vmem:[#allocation2 + $0xa0] sm:$0x11] }
 0x1f8   : > { %1388 = vst [vmem:[#allocation2 + $0x38] sm:$0x1] %v1387_v17  ;;  %v7046_v17 = vsel %vm6715_vm0, %v1837_v49, %v1844_v43  ;;  %v1764_v49 = vor.u32 %v8678_v38, %v1761_v30  ;;  %v1757_v43 = vrot.slane %v6922_v52, 4  ;;  %v1579_v52 = vsel %vm6571_vm1, 0, %v1578_v20  ;;  %v2043_v20 = vpop.permute.xlu2 %2042  ;;  %v1419_v38 = vld [vmem:[#allocation2 + $0xd0] sm:$0x11] }
 0x1f9   : > { %2332 = vst.msk [vmem:[#allocation2 + $0x7c] sm:$0xf] %vm1350_vm5, %v6937_v59  ;;  %v1408_v10 = vsel %vm6559_vm12, 0, %v1407_v4 }
 0x1fa   : > { %2870 = vst.msk [vmem:[#allocation2 + $0x38] sm:$0xf] %vm1350_vm5, %v6937_v59  ;;  %v5157_v59 = vld [vmem:[%s8642_s5] sm:$0xff]  ;;  %v7072_v30 = vsel %vm6715_vm0, %v1757_v43, %v1764_v49  ;;  %v8691_v43 = vshrl.u32 %v6159_v54, 16 }
 0x1fb   : > { %1541 = vst [vmem:[#allocation2 + $0x4c] sm:$0x8] %v1540_v22  ;;  %v1563_v22 = vld [vmem:[#allocation2 + $0xbc] sm:$0x88]  ;;  %5297 = vmatpush.bf16.msra.mxu2 %v5157_v59  ;;  %5298 = vmatpush.bf16.msra.mxu3 %v5157_v59 }
 0x1fc   : > { %2335 = vst [vmem:[#allocation2 + $0x90] sm:$0xf] %v2334_v61  ;;  %5296 = vmatpush.bf16.msra.mxu1 %v5157_v59  ;;  %3979 = vmatpush.bf16.msra.mxu0 %v5157_v59  ;;  %v8676_v59 = vshrl.u32 %v6134_v5, 16 }
 0x1fd   : > { %1610 = vst [vmem:[#allocation2 + $0x184] sm:$0x88] %v1609_v15  ;;  %v1564_v15 = vsel %vm6571_vm1, 0, %v1563_v22  ;;  %v1560_v22 = vld [vmem:[#allocation2 + $0xb4] sm:$0x88] }
 0x1fe   : > { %1625 = vst [vmem:[#allocation2 + $0x1cc] sm:$0x88] %v1624_v2  ;;  %v1769_v49 = vrot.slane %v8676_v59, 7  ;;  %v4804_v59 = vld [vmem:[#allocation2 + $0x1b8] sm:$0xf] }
 0x1ff   : > { %1987 = vst.msk [vmem:[#allocation2 + $0x1cc] sm:$0xf] %vm1350_vm5, %v7046_v17 }
 0x200   : > { %2146 = vst.msk [vmem:[#allocation2 + $0x1cc] sm:$0xf] %vm8707_vm8, %v2077_v47  ;;  %v1773_v4 = vrot.slane %v1769_v49, 4 }
 0x201   : > { %2805 = vst.msk [vmem:[#allocation2 + $0x188] sm:$0xf] %vm1350_vm5, %v7046_v17 }
 0x202   : > { %v2871_v61 = vld [vmem:[#allocation2 + $0x4c] sm:$0xf]  ;;  %2853 = vst.msk [vmem:[#allocation2 + $0x188] sm:$0xf] %vm8707_vm8, %v2077_v47  ;;  %v2057_v47 = vpop.permute.xlu1 %2056 }
 0x203   : > { %v2872_v2 = vsel %vm6741_vm4, %v6893_v28, %v2871_v61  ;;  %2581 = vst.msk [vmem:[#allocation2 + $0x184] sm:$0xf] %vm1350_vm5, %v6529_v27  ;;  %v1545_v28 = vld [vmem:[#allocation2 + $0x6c] sm:$0x88] }
 0x204   : > { %2873 = vst [vmem:[#allocation2 + $0x4c] sm:$0xf] %v2872_v2  ;;  %v1546_v61 = vsel %vm6571_vm1, 0, %v1545_v28  ;;  %v1392_v2 = vld [vmem:[#allocation2 + $0x58] sm:$0x11] }
 0x205   : > { %1565 = vst [vmem:[#allocation2 + $0xbc] sm:$0x88] %v1564_v15  ;;  %v1561_v15 = vsel %vm6571_vm1, 0, %v1560_v22  ;;  %v5172_v28 = vld [vmem:[%s8642_s5 + $0x78] sm:$0xff]  ;;  %v1777_v22 = vrot.slane %v8691_v43, 7  ;;  %v1393_v12 = vsel %vm6559_vm12, 0, %v1392_v2 }
 0x206   : > { %1580 = vst [vmem:[#allocation2 + $0x104] sm:$0x88] %v1579_v52  ;;  %v2186_v52 = vrot.slane %v1722_v39, 5  ;;  %4061 = vmatpush.bf16.msrb.mxu3 %v5172_v28 }
 0x207   : > { %1967 = vst.msk [vmem:[#allocation2 + $0x104] sm:$0xf] %vm1350_vm5, %v7072_v30 }
 0x208   : > { %2136 = vst.msk [vmem:[#allocation2 + $0x104] sm:$0xf] %vm8707_vm8, %v2057_v47  ;;  %v2187_v32 = vor.u32 %v2186_v52, %v2185_v56  ;;  %v8692_v56 = vshll.u32 %v6159_v54, 16  ;;  %v1435_v52 = vsel %vm6559_vm12, 0, %v1434_v21 }
 0x209   : > { %2785 = vst.msk [vmem:[#allocation2 + $0xc0] sm:$0xf] %vm1350_vm5, %v7072_v30 }
 0x20a   : > { %2843 = vst.msk [vmem:[#allocation2 + $0xc0] sm:$0xf] %vm8707_vm8, %v2057_v47  ;;  %v5134_v47 = vld [vmem:[#allocation2 + $0x1c8] sm:$0xf0] }
 0x20b   : > { %2571 = vst.msk [vmem:[#allocation2 + $0xbc] sm:$0xf] %vm1350_vm5, %v6711_v60  ;;  %v4805_v39 = vor.u32 %v5134_v47, %v4804_v59  ;;  %v1572_v47 = vld [vmem:[#allocation2 + $0xe4] sm:$0x88] }
 0x20c   : > { %2129 = vst.msk [vmem:[#allocation2 + $0x78] sm:$0xf] %vm8707_vm8, %v2043_v20  ;;  %v1573_v21 = vsel %vm6571_vm1, 0, %v1572_v47 }
 0x20d   : > { %2836 = vst.msk [vmem:[#allocation2 + $0x34] sm:$0xf] %vm8707_vm8, %v2043_v20  ;;  %4035 = vmatmul.bf16.vlgmr.msra.gmra.mxu3 %v4805_v39  ;;  %v2933_v39 = vld [vmem:[%s6728_s17 + $0x1c] sm:$0xf] }
 0x20e   : > { %1547 = vst [vmem:[#allocation2 + $0x6c] sm:$0x88] %v1546_v61  ;;  %v8793_v61 = vshrl.u32 %v6480_v3, 16  ;;  %3004 = vrot.lane.b32.xlu0 %v2933_v39, %s5538_s9  ;;  %v2934_v39 = vld [vmem:[%s6728_s17 + $0x20] sm:$0xf] }
 0x20f   : > { %1562 = vst [vmem:[#allocation2 + $0xb4] sm:$0x88] %v1561_v15  ;;  %v5109_v20 = vld [vmem:[#allocation2 + $0x100] sm:$0xf0]  ;;  %v2188_v15 = vrot.slane %v2187_v32, 4 }
 0x210   : > { %1959 = vst.msk [vmem:[#allocation2 + $0xb4] sm:$0xf] %vm1350_vm5, %v7011_v9  ;;  %v4705_v31 = vor.u32 %v5109_v20, %v4704_v11  ;;  %v2191_v59 = vrot.slane %v8793_v61, 4  ;;  %v1420_v11 = vsel %vm6559_vm12, 0, %v1419_v38  ;;  %v1587_v32 = vld [vmem:[#allocation2 + $0x12c] sm:$0x88] }
 0x211   : > { %2777 = vst.msk [vmem:[#allocation2 + $0x70] sm:$0xf] %vm1350_vm5, %v7011_v9  ;;  %v7122_v9 = vsel %vm6700_vm11, %v2188_v15, %v2189_v13  ;;  %v8693_v38 = vshll.u32 %v6134_v5, 16 }
 0x212   : > { %2567 = vst.msk [vmem:[#allocation2 + $0x6c] sm:$0xf] %vm1350_vm5, %v6374_v18  ;;  %4010 = vmatmul.bf16.vlgmr.msra.gmra.mxu2 %v4705_v31  ;;  %v2192_v2 = vor.u32 %v2191_v59, %v2189_v13  ;;  %v1780_v31 = vor.u32 %v8692_v56, %v1777_v22  ;;  %2615 = vrot.lane.b32.xlu2 %v7122_v9, %s5538_s9  ;;  %v1588_v13 = vsel %vm6571_vm1, 0, %v1587_v32  ;;  %v8685_v22 = vshrl.u32 %v6383_v63, 16 }
 0x213   : > { %1394 = vst [vmem:[#allocation2 + $0x58] sm:$0x11] %v1393_v12  ;;  %v7150_v20 = vor.u32 %v8693_v38, %v1769_v49  ;;  %v5139_v38 = vld [vmem:[#allocation2 + $0x1f0] sm:$0xf0] }
 0x214   : > { %1409 = vst [vmem:[#allocation2 + $0xa0] sm:$0x11] %v1408_v10  ;;  %v7128_v18 = vrot.slane %v2192_v2, 4  ;;  %v7143_v28 = vsel %vm6715_vm0, %v1773_v4, %v1780_v31  ;;  %v1889_v15 = vrot.slane %v8685_v22, 7  ;;  %v1635_v4 = vld [vmem:[#allocation2 + $0x1fc] sm:$0x88]  ;;  %v2061_v31 = vpop.permute.xlu1 %2060 }
 0x215   : > { %2566 = vst.msk [vmem:[#allocation2 + $0x58] sm:$0xf] %vm1350_vm5, %v6307_v6  ;;  %v8687_v6 = vshrl.u32 %v6358_v25, 16 }
 0x216   : > { %1421 = vst [vmem:[#allocation2 + $0xd0] sm:$0x11] %v1420_v11  ;;  %2617 = vrot.lane.b32.xlu1 %v7128_v18, %s5538_s9 }
 0x217   : > { %1436 = vst [vmem:[#allocation2 + $0x118] sm:$0x11] %v1435_v52  ;;  %v7163_v49 = vrot.slane %v8687_v6, 7  ;;  %v2059_v52 = vpop.permute.xlu0 %2058  ;;  %v4624_v6 = vld [vmem:[#allocation2 + $0x50] sm:$0xf] }
 0x218   : > { %2572 = vst.msk [vmem:[#allocation2 + $0xd0] sm:$0xf] %vm1350_vm5, %v6071_v57 }
 0x219   : > { %1574 = vst [vmem:[#allocation2 + $0xe4] sm:$0x88] %v1573_v21  ;;  %v5194_v21 = vld [vmem:[%s8642_s5 + $0x128] sm:$0xff] }
 0x21a   : > { %v2774_v12 = vld [vmem:[#allocation2 + $0x5c] sm:$0xf]  ;;  %1589 = vst [vmem:[#allocation2 + $0x12c] sm:$0x88] %v1588_v13  ;;  %v5171_v13 = vld [vmem:[%s8642_s5 + $0x70] sm:$0xff]  ;;  %3006 = vrot.lane.b32.xlu2 %v2934_v39, %s5538_s9  ;;  %4330 = vmatpush.bf16.msrb.mxu2 %v5194_v21 }
 0x21b   : > { %v1956_v61 = vld [vmem:[#allocation2 + $0xa0] sm:$0xf]  ;;  %v2775_v59 = vsel %vm6659_vm7, %v7019_v36, %v2774_v12  ;;  %1971 = vst.msk [vmem:[#allocation2 + $0x12c] sm:$0xf] %vm1350_vm5, %v7143_v28  ;;  %v1650_v12 = vld [vmem:[#allocation2 + $0x244] sm:$0x88]  ;;  %4062 = vmatpush.bf16.msrb.mxu3 %v5171_v13  ;;  %v2089_v13 = vpop.permute.xlu2 %2088 }
 0x21c   : > { %v1957_v10 = vsel %vm6659_vm7, %v7019_v36, %v1956_v61  ;;  %2776 = vst [vmem:[#allocation2 + $0x5c] sm:$0xf] %v2775_v59  ;;  %v8686_v36 = vshll.u32 %v6383_v63, 16  ;;  %v1885_v61 = vrot.slane %v7163_v49, 4  ;;  %v1395_v39 = vld [vmem:[#allocation2 + $0x60] sm:$0x1] }
 0x21d   : > { %1958 = vst [vmem:[#allocation2 + $0xa0] sm:$0xf] %v1957_v10  ;;  %v2786_v2 = vld [vmem:[#allocation2 + $0xd4] sm:$0xf]  ;;  %v1735_v10 = vshrl.u32 %v6663_v37, 16 }
 0x21e   : > { %v1968_v11 = vld [vmem:[#allocation2 + $0x118] sm:$0xf]  ;;  %v2787_v47 = vsel %vm6659_vm7, %v7150_v20, %v2786_v2  ;;  %2789 = vst.msk [vmem:[#allocation2 + $0xe8] sm:$0xf] %vm1350_vm5, %v7143_v28  ;;  %v1892_v59 = vor.u32 %v8686_v36, %v1889_v15  ;;  %v8694_v2 = vshrl.u32 %v6711_v60, 16  ;;  %v1651_v15 = vsel %vm6571_vm1, 0, %v1650_v12 }
 0x21f   : > { %v1969_v32 = vsel %vm6659_vm7, %v7150_v20, %v1968_v11  ;;  %2788 = vst [vmem:[#allocation2 + $0xd4] sm:$0xf] %v2787_v47  ;;  %v1636_v11 = vsel %vm6571_vm1, 0, %v1635_v4  ;;  %v1737_v47 = vrot.slane %v1735_v10, 7  ;;  %v1738_v12 = vshll.u32 %v6663_v37, 16  ;;  %v2041_v36 = vpop.permute.xlu0 %2040 }
 0x220   : > { %1970 = vst [vmem:[#allocation2 + $0x118] sm:$0xf] %v1969_v32  ;;  %v1746_v32 = vshll.u32 %v6711_v60, 16  ;;  %v7206_v21 = vsel %vm6715_vm0, %v1885_v61, %v1892_v59  ;;  %v1396_v59 = vsel %vm6993_vm6, 0, %v1395_v39  ;;  %v1525_v39 = vld [vmem:[#allocation2 + $0x1c] sm:$0x88] }
 0x221   : > { %2137 = vst.msk [vmem:[#allocation2 + $0x118] sm:$0xf] %vm8707_vm8, %v2059_v52  ;;  %v1741_v4 = vrot.slane %v1737_v47, 4  ;;  %v7221_v61 = vor.u32 %v1738_v12, %v1737_v47 }
 0x222   : > { %2844 = vst.msk [vmem:[#allocation2 + $0xd4] sm:$0xf] %vm8707_vm8, %v2059_v52  ;;  %v1745_v52 = vrot.slane %v8694_v2, 7  ;;  %v2198_v2 = vrot.slane %v1746_v32, 5 }
 0x223   : > { %2138 = vst.msk [vmem:[#allocation2 + $0x12c] sm:$0xf] %vm8707_vm8, %v2061_v31  ;;  %2416 = vrot.lane.b32.xlu0 %v7221_v61, %s5538_s9 }
 0x224   : > { %2845 = vst.msk [vmem:[#allocation2 + $0xe8] sm:$0xf] %vm8707_vm8, %v2061_v31  ;;  %v1748_v31 = vor.u32 %v1746_v32, %v1745_v52  ;;  %v1473_v52 = vld [vmem:[#allocation2 + $0x1c0] sm:$0x11] }
 0x225   : > { %2573 = vst.msk [vmem:[#allocation2 + $0xe4] sm:$0xf] %vm1350_vm5, %v6101_v16 }
 0x226   : > { %1637 = vst [vmem:[#allocation2 + $0x1fc] sm:$0x88] %v1636_v11  ;;  %v7215_v22 = vsel %vm6715_vm0, %v1741_v4, %v1748_v31  ;;  %v1548_v11 = vld [vmem:[#allocation2 + $0x74] sm:$0x8]  ;;  %v1488_v4 = vld [vmem:[#allocation2 + $0x208] sm:$0x11] }
 0x227   : > { %1652 = vst [vmem:[#allocation2 + $0x244] sm:$0x88] %v1651_v15  ;;  %2418 = vrot.lane.b32.xlu1 %v7215_v22, %s5538_s9  ;;  %v2337_v15 = vld [vmem:[#allocation2 + $0xb8] sm:$0xf]  ;;  %v1549_v47 = vsel %vm6830_vm2, 0, %v1548_v11  ;;  %v1526_v11 = vsel %vm6571_vm1, 0, %v1525_v39 }
 0x228   : > { %1999 = vst.msk [vmem:[#allocation2 + $0x244] sm:$0xf] %vm1350_vm5, %v7206_v21  ;;  %v2338_v31 = vsel %vm6741_vm4, %v7128_v18, %v2337_v15  ;;  %v8688_v15 = vshll.u32 %v6230_v58, 16 }
 0x229   : > { %2817 = vst.msk [vmem:[#allocation2 + $0x200] sm:$0xf] %vm1350_vm5, %v7206_v21 }
 0x22a   : > { %2152 = vst.msk [vmem:[#allocation2 + $0x244] sm:$0xf] %vm8707_vm8, %v2089_v13  ;;  %v5114_v43 = vld [vmem:[#allocation2 + $0x128] sm:$0xf0] }
 0x22b   : > { %2859 = vst.msk [vmem:[#allocation2 + $0x200] sm:$0xf] %vm8707_vm8, %v2089_v13  ;;  %v1474_v13 = vsel %vm6559_vm12, 0, %v1473_v52 }
 0x22c   : > { %2587 = vst.msk [vmem:[#allocation2 + $0x1fc] sm:$0xf] %vm1350_vm5, %v6269_v35 }
 0x22d   : > { %1397 = vst [vmem:[#allocation2 + $0x60] sm:$0x1] %v1396_v59  ;;  %v1489_v59 = vsel %vm6559_vm12, 0, %v1488_v4  ;;  %v8689_v4 = vshrl.u32 %v6285_v26, 16 }
 0x22e   : > { %2336 = vst.msk [vmem:[#allocation2 + $0xa4] sm:$0xf] %vm1350_vm5, %v7122_v9 }
 0x22f   : > { %2874 = vst.msk [vmem:[#allocation2 + $0x60] sm:$0xf] %vm1350_vm5, %v7122_v9  ;;  %v7252_v9 = vor.u32 %v8688_v15, %v6941_v0 }
 0x230   : > { %1550 = vst [vmem:[#allocation2 + $0x74] sm:$0x8] %v1549_v47 }
 0x231   : > { %2339 = vst [vmem:[#allocation2 + $0xb8] sm:$0xf] %v2338_v31  ;;  %v8690_v31 = vshrl.u32 %v6291_v42, 16 }
 0x232   : > { %1475 = vst [vmem:[#allocation2 + $0x1c0] sm:$0x11] %v1474_v13 }
 0x233   : > { %1490 = vst [vmem:[#allocation2 + $0x208] sm:$0x11] %v1489_v59  ;;  %v2083_v59 = vpop.permute.xlu1 %2082 }
 0x234   : > { %2584 = vst.msk [vmem:[#allocation2 + $0x1c0] sm:$0xf] %vm1350_vm5, %v6048_v48 }
 0x235   : > { %1527 = vst [vmem:[#allocation2 + $0x1c] sm:$0x88] %v1526_v11  ;;  %v2047_v11 = vpop.permute.xlu2 %2046 }
 0x236   : > { %2128 = vst.msk [vmem:[#allocation2 + $0x64] sm:$0xf] %vm8707_vm8, %v2041_v36 }
 0x237   : > { %v2875_v52 = vld [vmem:[#allocation2 + $0x74] sm:$0xf]  ;;  %2769 = vst.msk [vmem:[#allocation2 + $0x20] sm:$0xf] %vm1350_vm5, %v6756_v34 }
 0x238   : > { %v2876_v47 = vsel %vm6741_vm4, %v7128_v18, %v2875_v52  ;;  %2835 = vst.msk [vmem:[#allocation2 + $0x20] sm:$0xf] %vm8707_vm8, %v2041_v36  ;;  %v1554_v34 = vld [vmem:[#allocation2 + $0x94] sm:$0x88]  ;;  %v1569_v36 = vld [vmem:[#allocation2 + $0xdc] sm:$0x88] }
 0x239   : > { %2877 = vst [vmem:[#allocation2 + $0x74] sm:$0xf] %v2876_v47  ;;  %v2810_v13 = vld [vmem:[#allocation2 + $0x1c4] sm:$0xf]  ;;  %v1793_v52 = vrot.slane %v8689_v4, 7  ;;  %v7275_v47 = vrot.slane %v8690_v31, 7 }
 0x23a   : > { %v1992_v0 = vld [vmem:[#allocation2 + $0x208] sm:$0xf]  ;;  %v2811_v39 = vsel %vm6659_vm7, %v7252_v9, %v2810_v13  ;;  %2563 = vst.msk [vmem:[#allocation2 + $0x1c] sm:$0xf] %vm1350_vm5, %v6670_v19  ;;  %v1555_v19 = vsel %vm6571_vm1, 0, %v1554_v34  ;;  %v1570_v13 = vsel %vm6571_vm1, 0, %v1569_v36 }
 0x23b   : > { %v1993_v18 = vsel %vm6659_vm7, %v7252_v9, %v1992_v0  ;;  %2812 = vst [vmem:[#allocation2 + $0x1c4] sm:$0xf] %v2811_v39  ;;  %v1401_v0 = vld [vmem:[#allocation2 + $0x80] sm:$0x11]  ;;  %v2195_v39 = vrot.slane %v1738_v12, 5  ;;  %v2194_v12 = vrot.slane %v1735_v10, 4 }
 0x23c   : > { %1994 = vst [vmem:[#allocation2 + $0x208] sm:$0xf] %v1993_v18  ;;  %v1416_v18 = vld [vmem:[#allocation2 + $0xc8] sm:$0x11]  ;;  %v4724_v31 = vld [vmem:[#allocation2 + $0x118] sm:$0xf] }
 0x23d   : > { %2149 = vst.msk [vmem:[#allocation2 + $0x208] sm:$0xf] %vm8707_vm8, %v2083_v59  ;;  %v5089_v15 = vld [vmem:[#allocation2 + $0x60] sm:$0xf0]  ;;  %v4725_v56 = vor.u32 %v5114_v43, %v4724_v31  ;;  %v4824_v34 = vld [vmem:[#allocation2 + $0x1e0] sm:$0xf] }
 0x23e   : > { %2856 = vst.msk [vmem:[#allocation2 + $0x1c4] sm:$0xf] %vm8707_vm8, %v2083_v59  ;;  %v4625_v4 = vor.u32 %v5089_v15, %v4624_v6  ;;  %v1794_v59 = vshll.u32 %v6285_v26, 16  ;;  %v4825_v36 = vor.u32 %v5139_v38, %v4824_v34  ;;  %v1402_v6 = vsel %vm6559_vm12, 0, %v1401_v0  ;;  %v1581_v43 = vld [vmem:[#allocation2 + $0x10c] sm:$0x88] }
 0x23f   : > { %2131 = vst.msk [vmem:[#allocation2 + $0xa0] sm:$0xf] %vm8707_vm8, %v2047_v11  ;;  %4015 = vmatmul.bf16.gmra.mxu2 %v4725_v56  ;;  %v8794_v15 = vshrl.u32 %v6711_v60, 16  ;;  %v1417_v37 = vsel %vm6559_vm12, 0, %v1416_v18  ;;  %v1596_v38 = vld [vmem:[#allocation2 + $0x154] sm:$0x88] }
 0x240   : > { %2838 = vst.msk [vmem:[#allocation2 + $0x5c] sm:$0xf] %vm8707_vm8, %v2047_v11  ;;  %3990 = vmatmul.bf16.vlgmr.msra.gmra.mxu1 %v4625_v4  ;;  %v1789_v10 = vrot.slane %v7275_v47, 4  ;;  %v1796_v32 = vor.u32 %v1794_v59, %v1793_v52  ;;  %4040 = vmatmul.bf16.gmra.mxu3 %v4825_v36  ;;  %v2196_v4 = vor.u32 %v2195_v39, %v2194_v12  ;;  %v1582_v60 = vsel %vm6571_vm1, 0, %v1581_v43  ;;  %v2065_v39 = vpop.permute.xlu1 %2064  ;;  %v2935_v34 = vld [vmem:[%s6728_s17 + $0x24] sm:$0xf] }
 0x241   : > { %1556 = vst [vmem:[#allocation2 + $0x94] sm:$0x88] %v1555_v19  ;;  %v2200_v31 = vrot.slane %v8794_v15, 4  ;;  %v8697_v11 = vshrl.u32 %v6468_v62, 16  ;;  %v8695_v19 = vshrl.u32 %v6500_v8, 16  ;;  %v1597_v52 = vsel %vm6571_vm1, 0, %v1596_v38  ;;  %3008 = vrot.lane.b32.xlu0 %v2935_v34, %s5538_s9 }
 0x242   : > { %1571 = vst [vmem:[#allocation2 + $0xdc] sm:$0x88] %v1570_v13  ;;  %v5170_v36 = vld [vmem:[%s8642_s5 + $0x68] sm:$0xff]  ;;  %v5193_v12 = vld [vmem:[%s8642_s5 + $0x120] sm:$0xff]  ;;  %v8696_v15 = vshll.u32 %v6500_v8, 16 }
 0x243   : > { %1963 = vst.msk [vmem:[#allocation2 + $0xdc] sm:$0xf] %vm1350_vm5, %v7215_v22  ;;  %v2201_v56 = vor.u32 %v2200_v31, %v2198_v2  ;;  %v1905_v18 = vrot.slane %v8695_v19, 7  ;;  %v1443_v43 = vld [vmem:[#allocation2 + $0x140] sm:$0x11]  ;;  %4063 = vmatpush.bf16.msrb.mxu3 %v5170_v36  ;;  %4331 = vmatpush.bf16.msrb.mxu2 %v5193_v12  ;;  %v2093_v36 = vpop.permute.xlu2 %2092 }
 0x244   : > { %2781 = vst.msk [vmem:[#allocation2 + $0x98] sm:$0xf] %vm1350_vm5, %v7215_v22  ;;  %v2197_v22 = vrot.slane %v2196_v4, 4  ;;  %v1444_v4 = vsel %vm6559_vm12, 0, %v1443_v43  ;;  %v2063_v43 = vpop.permute.xlu0 %2062  ;;  %v1506_v19 = vld [vmem:[#allocation2 + $0x258] sm:$0x11] }
 0x245   : > { %2569 = vst.msk [vmem:[#allocation2 + $0x94] sm:$0xf] %vm1350_vm5, %v6480_v3  ;;  %v7311_v13 = vrot.slane %v2201_v56, 4  ;;  %v7317_v3 = vsel %vm6715_vm0, %v1789_v10, %v1796_v32  ;;  %v1644_v32 = vld [vmem:[#allocation2 + $0x224] sm:$0x88] }
 0x246   : > { %1403 = vst [vmem:[#allocation2 + $0x80] sm:$0x11] %v1402_v6  ;;  %v7321_v0 = vsel %vm6700_vm11, %v2197_v22, %v2198_v2  ;;  %v1428_v2 = vld [vmem:[#allocation2 + $0xf8] sm:$0x11]  ;;  %v1659_v56 = vld [vmem:[#allocation2 + $0x26c] sm:$0x88]  ;;  %v1908_v22 = vor.u32 %v8696_v15, %v1905_v18 }
 0x247   : > { %1418 = vst [vmem:[#allocation2 + $0xc8] sm:$0x11] %v1417_v37  ;;  %2619 = vrot.lane.b32.xlu2 %v7321_v0, %s5538_s9  ;;  %2621 = vrot.lane.b32.xlu1 %v7311_v13, %s5538_s9  ;;  %v1429_v10 = vsel %vm6559_vm12, 0, %v1428_v2  ;;  %v1660_v18 = vsel %vm6571_vm1, 0, %v1659_v56  ;;  %v1786_v2 = vshll.u32 %v6291_v42, 16 }
 0x248   : > { %2568 = vst.msk [vmem:[#allocation2 + $0x80] sm:$0xf] %vm1350_vm5, %v6437_v44  ;;  %v7329_v44 = vrot.slane %v8697_v11, 7  ;;  %v1557_v56 = vld [vmem:[#allocation2 + $0x9c] sm:$0x8] }
 0x249   : > { %1583 = vst [vmem:[#allocation2 + $0x10c] sm:$0x88] %v1582_v60  ;;  %2420 = vrot.lane.b32.xlu0 %v6950_v29, %s5538_s9  ;;  %v1599_v15 = vld [vmem:[#allocation2 + $0x15c] sm:$0x88] }
 0x24a   : > { %1598 = vst [vmem:[#allocation2 + $0x154] sm:$0x88] %v1597_v52  ;;  %v1901_v60 = vrot.slane %v7329_v44, 4  ;;  %v2936_v52 = vld [vmem:[%s6728_s17 + $0x28] sm:$0xf] }
 0x24b   : > { %1975 = vst.msk [vmem:[#allocation2 + $0x154] sm:$0xf] %vm1350_vm5, %v7317_v3 }
 0x24c   : > { %2793 = vst.msk [vmem:[#allocation2 + $0x110] sm:$0xf] %vm1350_vm5, %v7317_v3  ;;  %v7379_v34 = vsel %vm6715_vm0, %v1901_v60, %v1908_v22  ;;  %v2341_v60 = vld [vmem:[#allocation2 + $0xe0] sm:$0xf]  ;;  %v1482_v22 = vld [vmem:[#allocation2 + $0x1e8] sm:$0x11] }
 0x24d   : > { %v2778_v6 = vld [vmem:[#allocation2 + $0x84] sm:$0xf]  ;;  %2140 = vst.msk [vmem:[#allocation2 + $0x154] sm:$0xf] %vm8707_vm8, %v2065_v39 }
 0x24e   : > { %v1960_v31 = vld [vmem:[#allocation2 + $0xc8] sm:$0xf]  ;;  %v2779_v37 = vsel %vm6659_vm7, %v7221_v61, %v2778_v6  ;;  %2847 = vst.msk [vmem:[#allocation2 + $0x110] sm:$0xf] %vm8707_vm8, %v2065_v39  ;;  %v1645_v39 = vsel %vm6571_vm1, 0, %v1644_v32 }
 0x24f   : > { %v1961_v38 = vsel %vm6659_vm7, %v7221_v61, %v1960_v31  ;;  %2780 = vst [vmem:[#allocation2 + $0x84] sm:$0xf] %v2779_v37  ;;  %v5188_v61 = vld [vmem:[%s8642_s5 + $0xf8] sm:$0xff]  ;;  %2422 = vrot.lane.b32.xlu1 %v7072_v30, %s5538_s9  ;;  %3010 = vrot.lane.b32.xlu2 %v2936_v52, %s5538_s9  ;;  %v7386_v30 = vor.u32 %v1786_v2, %v7275_v47  ;;  %v1404_v47 = vld [vmem:[#allocation2 + $0x88] sm:$0x1]  ;;  %v8795_v37 = vshrl.u32 %v6071_v57, 16 }
 0x250   : > { %1962 = vst [vmem:[#allocation2 + $0xc8] sm:$0xf] %v1961_v38  ;;  %4239 = vmatpush.bf16.msrb.mxu1 %v5188_v61  ;;  %v1497_v52 = vld [vmem:[#allocation2 + $0x230] sm:$0x11] }
 0x251   : > { %2575 = vst.msk [vmem:[#allocation2 + $0x10c] sm:$0xf] %vm1350_vm5, %v6159_v54  ;;  %v2203_v38 = vrot.slane %v8795_v37, 4  ;;  %v1483_v37 = vsel %vm6559_vm12, 0, %v1482_v22  ;;  %v2045_v22 = vpop.permute.xlu0 %2044 }
 0x252   : > { %1430 = vst [vmem:[#allocation2 + $0xf8] sm:$0x11] %v1429_v10  ;;  %v8796_v10 = vshll.u32 %v6071_v57, 16  ;;  %v1558_v57 = vsel %vm6830_vm2, 0, %v1557_v56 }
 0x253   : > { %1445 = vst [vmem:[#allocation2 + $0x140] sm:$0x11] %v1444_v4  ;;  %v1405_v4 = vsel %vm6993_vm6, 0, %v1404_v47  ;;  %v8799_v47 = vld [vmem:[#allocation12_spill] sm:$0xff] }
 0x254   : > { %2574 = vst.msk [vmem:[#allocation2 + $0xf8] sm:$0xf] %vm1350_vm5, %v6134_v5  ;;  %v2204_v32 = vrot.slane %v8796_v10, 5 }
 0x255   : > { %1646 = vst [vmem:[#allocation2 + $0x224] sm:$0x88] %v1645_v39  ;;  %v8797_v39 = vshll.u32 %v6101_v16, 16 }
 0x256   : > { %1661 = vst [vmem:[#allocation2 + $0x26c] sm:$0x88] %v1660_v18  ;;  %v2205_v61 = vor.u32 %v2204_v32, %v2203_v38  ;;  %v1498_v38 = vsel %vm6559_vm12, 0, %v1497_v52  ;;  %v1590_v32 = vld [vmem:[#allocation2 + $0x134] sm:$0x88] }
 0x257   : > { %2003 = vst.msk [vmem:[#allocation2 + $0x26c] sm:$0xf] %vm1350_vm5, %v7379_v34  ;;  %v2207_v18 = vrot.slane %v8797_v39, 5  ;;  %v4844_v52 = vld [vmem:[#allocation2 + $0x208] sm:$0xf] }
 0x258   : > { %2821 = vst.msk [vmem:[#allocation2 + $0x228] sm:$0xf] %vm1350_vm5, %v7379_v34  ;;  %v5144_v39 = vld [vmem:[#allocation2 + $0x218] sm:$0xf0] }
 0x259   : > { %v2790_v12 = vld [vmem:[#allocation2 + $0xfc] sm:$0xf]  ;;  %2154 = vst.msk [vmem:[#allocation2 + $0x26c] sm:$0xf] %vm8707_vm8, %v2093_v36 }
 0x25a   : > { %v1972_v6 = vld [vmem:[#allocation2 + $0x140] sm:$0xf]  ;;  %v2791_v29 = vsel %vm6659_vm7, %v7386_v30, %v2790_v12  ;;  %2861 = vst.msk [vmem:[#allocation2 + $0x228] sm:$0xf] %vm8707_vm8, %v2093_v36  ;;  %v2206_v36 = vrot.slane %v2205_v61, 4  ;;  %v8701_v12 = vshrl.u32 %v6403_v7, 16 }
 0x25b   : > { %v1973_v31 = vsel %vm6659_vm7, %v7386_v30, %v1972_v6  ;;  %2792 = vst [vmem:[#allocation2 + $0xfc] sm:$0xf] %v2791_v29  ;;  %v2342_v6 = vsel %vm6741_vm4, %v7311_v13, %v2341_v60  ;;  %v8798_v29 = vshrl.u32 %v6101_v16, 16  ;;  %v5169_v16 = vld [vmem:[%s8642_s5 + $0x60] sm:$0xff]  ;;  %v5119_v60 = vld [vmem:[#allocation2 + $0x150] sm:$0xf0] }
 0x25c   : > { %1974 = vst [vmem:[#allocation2 + $0x140] sm:$0xf] %v1973_v31  ;;  %v8705_v31 = vshrl.u32 %v8799_v47, 16  ;;  %v7431_v10 = vsel %vm6700_vm11, %v2206_v36, %v2207_v18  ;;  %4064 = vmatpush.bf16.msrb.mxu3 %v5169_v16  ;;  %v1809_v36 = vrot.slane %v8701_v12, 7  ;;  %v1605_v16 = vld [vmem:[#allocation2 + $0x17c] sm:$0x88] }
 0x25d   : > { %2139 = vst.msk [vmem:[#allocation2 + $0x140] sm:$0xf] %vm8707_vm8, %v2063_v43  ;;  %2623 = vrot.lane.b32.xlu2 %v7431_v10, %s5538_s9 }
 0x25e   : > { %2846 = vst.msk [vmem:[#allocation2 + $0xfc] sm:$0xf] %vm8707_vm8, %v2063_v43  ;;  %v2209_v43 = vrot.slane %v8798_v29, 4  ;;  %v4845_v29 = vor.u32 %v5144_v39, %v4844_v52  ;;  %v8702_v52 = vshll.u32 %v6403_v7, 16 }
 0x25f   : > { %2589 = vst.msk [vmem:[#allocation2 + $0x224] sm:$0xf] %vm1350_vm5, %v6383_v63 }
 0x260   : > { %1406 = vst [vmem:[#allocation2 + $0x88] sm:$0x1] %v1405_v4  ;;  %v2210_v4 = vor.u32 %v2209_v43, %v2207_v18  ;;  %v5187_v18 = vld [vmem:[%s8642_s5 + $0xf0] sm:$0xff]  ;;  %v2087_v43 = vpop.permute.xlu1 %2086  ;;  %4045 = vmatmul.bf16.gmra.mxu3 %v4845_v29 }
 0x261   : > { %2340 = vst.msk [vmem:[#allocation2 + $0xcc] sm:$0xf] %vm1350_vm5, %v7321_v0  ;;  %4240 = vmatpush.bf16.msrb.mxu1 %v5187_v18 }
 0x262   : > { %2878 = vst.msk [vmem:[#allocation2 + $0x88] sm:$0xf] %vm1350_vm5, %v7321_v0  ;;  %v5192_v0 = vld [vmem:[%s8642_s5 + $0x118] sm:$0xff] }
 0x263   : > { %1559 = vst [vmem:[#allocation2 + $0x9c] sm:$0x8] %v1558_v57  ;;  %4332 = vmatpush.bf16.msrb.mxu2 %v5192_v0  ;;  %v8698_v57 = vshll.u32 %v6358_v25, 16  ;;  %v7453_v0 = vrot.slane %v2210_v4, 4 }
 0x264   : > { %2343 = vst [vmem:[#allocation2 + $0xe0] sm:$0xf] %v2342_v6  ;;  %v4744_v56 = vld [vmem:[#allocation2 + $0x140] sm:$0xf]  ;;  %v7449_v6 = vrot.slane %v8705_v31, 7 }
 0x265   : > { %1484 = vst [vmem:[#allocation2 + $0x1e8] sm:$0x11] %v1483_v37  ;;  %v4745_v61 = vor.u32 %v5119_v60, %v4744_v56  ;;  %v2035_v37 = vpop.permute.xlu2 %2034  ;;  %v2937_v56 = vld [vmem:[%s6728_s17 + $0x2c] sm:$0xf]  ;;  %v7462_v60 = vor.u32 %v8698_v57, %v7163_v49  ;;  %2625 = vrot.lane.b32.xlu1 %v7453_v0, %s5538_s9  ;;  %v5180_v57 = vld [vmem:[%s8642_s5 + $0xb8] sm:$0xff] }
 0x266   : > { %1499 = vst [vmem:[#allocation2 + $0x230] sm:$0x11] %v1498_v38  ;;  %v1591_v38 = vsel %vm6571_vm1, 0, %v1590_v32  ;;  %3012 = vrot.lane.b32.xlu0 %v2937_v56, %s5538_s9  ;;  %v1606_v32 = vsel %vm6571_vm1, 0, %v1605_v16  ;;  %v4644_v16 = vld [vmem:[#allocation2 + $0x78] sm:$0xf]  ;;  %4150 = vmatpush.bf16.msrb.mxu0 %v5180_v57 }
 0x267   : > { %2586 = vst.msk [vmem:[#allocation2 + $0x1e8] sm:$0xf] %vm1350_vm5, %v6230_v58  ;;  %4020 = vmatmul.bf16.gmra.mxu2 %v4745_v61  ;;  %v1805_v61 = vrot.slane %v7449_v6, 4  ;;  %v1600_v57 = vsel %vm6571_vm1, 0, %v1599_v15  ;;  %v8804_v15 = vshrl.u32 %v6291_v42, 16 }
 0x268   : > { %2130 = vst.msk [vmem:[#allocation2 + $0x8c] sm:$0xf] %vm8707_vm8, %v2045_v22  ;;  %v2069_v56 = vpop.permute.xlu1 %2068 }
 0x269   : > { %2837 = vst.msk [vmem:[#allocation2 + $0x48] sm:$0xf] %vm8707_vm8, %v2045_v22  ;;  %v1812_v22 = vor.u32 %v8702_v52, %v1809_v36  ;;  %v5167_v52 = vld [vmem:[%s8642_s5 + $0x50] sm:$0xff] }
 0x26a   : > { %v2879_v4 = vld [vmem:[#allocation2 + $0x9c] sm:$0xf]  ;;  %2125 = vst.msk [vmem:[#allocation2 + $0x28] sm:$0xf] %vm8707_vm8, %v2035_v37 }
 0x26b   : > { %v2880_v49 = vsel %vm6741_vm4, %v7311_v13, %v2879_v4  ;;  %1592 = vst [vmem:[#allocation2 + $0x134] sm:$0x88] %v1591_v38  ;;  %v7486_v13 = vsel %vm6715_vm0, %v1805_v61, %v1812_v22  ;;  %v1437_v4 = vld [vmem:[#allocation2 + $0x120] sm:$0x11]  ;;  %v5186_v61 = vld [vmem:[%s8642_s5 + $0xe8] sm:$0xff] }
 0x26c   : > { %2881 = vst [vmem:[#allocation2 + $0x9c] sm:$0xf] %v2880_v49  ;;  %v2814_v39 = vld [vmem:[#allocation2 + $0x1ec] sm:$0xf]  ;;  %v5168_v49 = vld [vmem:[%s8642_s5 + $0x58] sm:$0xff]  ;;  %4241 = vmatpush.bf16.msrb.mxu1 %v5186_v61 }
 0x26d   : > { %v1996_v29 = vld [vmem:[#allocation2 + $0x230] sm:$0xf]  ;;  %v2815_v18 = vsel %vm6659_vm7, %v7462_v60, %v2814_v39  ;;  %1607 = vst [vmem:[#allocation2 + $0x17c] sm:$0x88] %v1606_v32  ;;  %v2067_v32 = vpop.permute.xlu0 %2066  ;;  %2426 = vrot.lane.b32.xlu1 %v7143_v28, %s5538_s9  ;;  %v2053_v22 = vpop.permute.xlu2 %2052  ;;  %4065 = vmatpush.bf16.msrb.mxu3 %v5168_v49  ;;  %v1438_v28 = vsel %vm6559_vm12, 0, %v1437_v4 }
 0x26e   : > { %v1997_v37 = vsel %vm6659_vm7, %v7462_v60, %v1996_v29  ;;  %2816 = vst [vmem:[#allocation2 + $0x1ec] sm:$0xf] %v2815_v18  ;;  %2424 = vrot.lane.b32.xlu0 %v7150_v20, %s5538_s9  ;;  %v2938_v39 = vld [vmem:[%s6728_s17 + $0x30] sm:$0xf]  ;;  %v8704_v18 = vshll.u32 %v8799_v47, 16 }
 0x26f   : > { %1998 = vst [vmem:[#allocation2 + $0x230] sm:$0xf] %v1997_v37  ;;  %v5094_v36 = vld [vmem:[#allocation2 + $0x88] sm:$0xf0]  ;;  %3014 = vrot.lane.b32.xlu2 %v2938_v39, %s5538_s9  ;;  %v1413_v29 = vld [vmem:[#allocation2 + $0xb0] sm:$0x1] }
 0x270   : > { %2151 = vst.msk [vmem:[#allocation2 + $0x230] sm:$0xf] %vm8707_vm8, %v2087_v43  ;;  %v4645_v38 = vor.u32 %v5094_v36, %v4644_v16  ;;  %v1414_v37 = vsel %vm6993_vm6, 0, %v1413_v29  ;;  %v1566_v16 = vld [vmem:[#allocation2 + $0xc4] sm:$0x8]  ;;  %v7523_v36 = vor.u32 %v8704_v18, %v7449_v6  ;;  %v8800_v6 = vshrl.u32 %v6134_v5, 16 }
 0x271   : > { %2858 = vst.msk [vmem:[#allocation2 + $0x1ec] sm:$0xf] %vm8707_vm8, %v2087_v43  ;;  %v1452_v43 = vld [vmem:[#allocation2 + $0x168] sm:$0x11]  ;;  %v1567_v4 = vsel %vm6830_vm2, 0, %v1566_v16  ;;  %v8801_v39 = vshll.u32 %v6134_v5, 16  ;;  %4066 = vmatpush.bf16.msrb.mxu3 %v5167_v52 }
 0x272   : > { %1979 = vst.msk [vmem:[#allocation2 + $0x17c] sm:$0xf] %vm1350_vm5, %v7486_v13  ;;  %3995 = vmatmul.bf16.gmra.mxu1 %v4645_v38  ;;  %v1453_v20 = vsel %vm6559_vm12, 0, %v1452_v43  ;;  %v7526_v38 = vpop.permute.xlu1 %2090  ;;  %v2345_v61 = vld [vmem:[#allocation2 + $0x108] sm:$0xf] }
 0x273   : > { %2797 = vst.msk [vmem:[#allocation2 + $0x138] sm:$0xf] %vm1350_vm5, %v7486_v13  ;;  %v2346_v5 = vsel %vm6741_vm4, %v7453_v0, %v2345_v61 }
 0x274   : > { %2142 = vst.msk [vmem:[#allocation2 + $0x17c] sm:$0xf] %vm8707_vm8, %v2069_v56 }
 0x275   : > { %2849 = vst.msk [vmem:[#allocation2 + $0x138] sm:$0xf] %vm8707_vm8, %v2069_v56  ;;  %v2049_v56 = vpop.permute.xlu0 %2048  ;;  %v7530_v49 = vpop.permute.xlu2 %2990 }
 0x276   : > { %2577 = vst.msk [vmem:[#allocation2 + $0x134] sm:$0xf] %vm1350_vm5, %v6285_v26 }
 0x277   : > { %1439 = vst [vmem:[#allocation2 + $0x120] sm:$0x11] %v1438_v28  ;;  %v2213_v28 = vrot.slane %v8801_v39, 5 }
 0x278   : > { %1454 = vst [vmem:[#allocation2 + $0x168] sm:$0x11] %v1453_v20 }
 0x279   : > { %2576 = vst.msk [vmem:[#allocation2 + $0x120] sm:$0xf] %vm1350_vm5, %v6291_v42 }
 0x27a   : > { %2134 = vst.msk [vmem:[#allocation2 + $0xdc] sm:$0xf] %vm8707_vm8, %v2053_v22 }
 0x27b   : > { %2841 = vst.msk [vmem:[#allocation2 + $0x98] sm:$0xf] %vm8707_vm8, %v2053_v22  ;;  %v2212_v22 = vrot.slane %v8800_v6, 4 }
 0x27c   : > { %1415 = vst [vmem:[#allocation2 + $0xb0] sm:$0x1] %v1414_v37  ;;  %v1491_v37 = vld [vmem:[#allocation2 + $0x210] sm:$0x11] }
 0x27d   : > { %2344 = vst.msk [vmem:[#allocation2 + $0xf4] sm:$0xf] %vm1350_vm5, %v7431_v10  ;;  %v1492_v6 = vsel %vm6559_vm12, 0, %v1491_v37  ;;  %v7566_v37 = vpop.permute.xlu1 %2072  ;;  %v2729_v33 = vld [vmem:[#allocation2 + $0x134] sm:$0xf] }
 0x27e   : > { %v2794_v43 = vld [vmem:[#allocation2 + $0x124] sm:$0xf]  ;;  %2882 = vst.msk [vmem:[#allocation2 + $0xb0] sm:$0xf] %vm1350_vm5, %v7431_v10  ;;  %v2214_v10 = vor.u32 %v2213_v28, %v2212_v22  ;;  %v1507_v22 = vsel %vm6559_vm12, 0, %v1506_v19  ;;  %v8700_v28 = vshrl.u32 %v6635_v23, 16 }
 0x27f   : > { %v1976_v20 = vld [vmem:[#allocation2 + $0x168] sm:$0xf]  ;;  %v2795_v29 = vsel %vm6659_vm7, %v7523_v36, %v2794_v43  ;;  %1568 = vst [vmem:[#allocation2 + $0xc4] sm:$0x8] %v1567_v4  ;;  %v8802_v4 = vshll.u32 %v6159_v54, 16  ;;  %v8703_v19 = vshll.u32 %v6468_v62, 16 }
 0x280   : > { %v1977_v16 = vsel %vm6659_vm7, %v7523_v36, %v1976_v20  ;;  %2796 = vst [vmem:[#allocation2 + $0x124] sm:$0xf] %v2795_v29  ;;  %v2215_v43 = vrot.slane %v2214_v10, 4  ;;  %v8699_v20 = vshrl.u32 %v6529_v27, 16  ;;  %v1377_v29 = vld [vmem:[#allocation2 + $0x10] sm:$0x1] }
 0x281   : > { %1978 = vst [vmem:[#allocation2 + $0x168] sm:$0xf] %v1977_v16  ;;  %v7554_v39 = vrot.slane %v8802_v4, 5  ;;  %v7568_v16 = vpop.permute.xlu0 %2070  ;;  %v7588_v11 = vrot.slane %v8700_v28, 7  ;;  %v4864_v28 = vld [vmem:[#allocation2 + $0x230] sm:$0xf] }
 0x282   : > { %2141 = vst.msk [vmem:[#allocation2 + $0x168] sm:$0xf] %vm8707_vm8, %v2067_v32 }
 0x283   : > { %2848 = vst.msk [vmem:[#allocation2 + $0x124] sm:$0xf] %vm8707_vm8, %v2067_v32  ;;  %v7564_v61 = vsel %vm6700_vm11, %v2215_v43, %v7554_v39  ;;  %v5191_v32 = vld [vmem:[%s8642_s5 + $0x110] sm:$0xff]  ;;  %v1826_v43 = vshll.u32 %v6529_v27, 16 }
 0x284   : > { %2347 = vst [vmem:[#allocation2 + $0x108] sm:$0xf] %v2346_v5  ;;  %2627 = vrot.lane.b32.xlu2 %v7564_v61, %s5538_s9  ;;  %v7576_v5 = vpop.permute.xlu2 %2603  ;;  %4333 = vmatpush.bf16.msrb.mxu2 %v5191_v32  ;;  %v1614_v32 = vld [vmem:[#allocation2 + $0x1a4] sm:$0x88] }
 0x285   : > { %1493 = vst [vmem:[#allocation2 + $0x210] sm:$0x11] %v1492_v6  ;;  %v1825_v6 = vrot.slane %v8699_v20, 7  ;;  %v5124_v20 = vld [vmem:[#allocation2 + $0x178] sm:$0xf0] }
 0x286   : > { %v2883_v10 = vld [vmem:[#allocation2 + $0xc4] sm:$0xf]  ;;  %1508 = vst [vmem:[#allocation2 + $0x258] sm:$0x11] %v1507_v22  ;;  %v1378_v22 = vsel %vm6993_vm6, 0, %v1377_v29 }
 0x287   : > { %v2884_v4 = vsel %vm6741_vm4, %v7453_v0, %v2883_v10  ;;  %2588 = vst.msk [vmem:[#allocation2 + $0x210] sm:$0xf] %vm1350_vm5, %v6358_v25  ;;  %v7598_v0 = vor.u32 %v8703_v19, %v7329_v44  ;;  %v5149_v29 = vld [vmem:[#allocation2 + $0x240] sm:$0xf0]  ;;  %v8803_v19 = vshrl.u32 %v6159_v54, 16  ;;  %v1821_v54 = vrot.slane %v7588_v11, 4 }
 0x288   : > { %2885 = vst [vmem:[#allocation2 + $0xc4] sm:$0xf] %v2884_v4  ;;  %v4865_v12 = vor.u32 %v5149_v29, %v4864_v28  ;;  %v5185_v44 = vld [vmem:[%s8642_s5 + $0xe0] sm:$0xff] }
 0x289   : > { %2132 = vst.msk [vmem:[#allocation2 + $0xb4] sm:$0xf] %vm8707_vm8, %v2049_v56  ;;  %v4764_v10 = vld [vmem:[#allocation2 + $0x168] sm:$0xf]  ;;  %v2218_v18 = vrot.slane %v8803_v19, 4  ;;  %4242 = vmatpush.bf16.msrb.mxu1 %v5185_v44  ;;  %v2221_v19 = vrot.slane %v8804_v15, 4 }
 0x28a   : > { %2839 = vst.msk [vmem:[#allocation2 + $0x70] sm:$0xf] %vm8707_vm8, %v2049_v56  ;;  %v4765_v4 = vor.u32 %v5124_v20, %v4764_v10  ;;  %v1828_v56 = vor.u32 %v1826_v43, %v1825_v6  ;;  %4050 = vmatmul.bf16.gmra.mxu3 %v4865_v12  ;;  %v7637_v10 = vpop.permute.xlu0 %2036 }
 0x28b   : > { %1379 = vst [vmem:[#allocation2 + $0x10] sm:$0x1] %v1378_v22  ;;  %v4664_v22 = vld [vmem:[#allocation2 + $0xa0] sm:$0xf] }
 0x28c   : > { %v2818_v31 = vld [vmem:[#allocation2 + $0x214] sm:$0xf]  ;;  %2866 = vst.msk [vmem:[#allocation2 + $0x10] sm:$0xf] %vm1350_vm5, %v6840_v40  ;;  %4025 = vmatmul.bf16.gmra.mxu2 %v4765_v4  ;;  %v2219_v40 = vor.u32 %v2218_v18, %v7554_v39  ;;  %v7635_v39 = vpop.permute.xlu1 %2050  ;;  %v7645_v42 = vpop.permute.xlu2 %2994  ;;  %v7657_v29 = vsel %vm6715_vm0, %v1821_v54, %v1828_v56 }
 0x28d   : > { %v2000_v20 = vld [vmem:[#allocation2 + $0x258] sm:$0xf]  ;;  %v2819_v28 = vsel %vm6659_vm7, %v7598_v0, %v2818_v31  ;;  %3087 = vst.msk [vmem:[#allocation2 + $0x10] sm:$0xf] %vm8708_vm13, %v7530_v49  ;;  %v1615_v31 = vsel %vm6571_vm1, 0, %v1614_v32  ;;  %v2222_v49 = vrot.slane %v1786_v2, 5 }
 0x28e   : > { %v2001_v6 = vsel %vm6659_vm7, %v7598_v0, %v2000_v20  ;;  %2820 = vst [vmem:[#allocation2 + $0x214] sm:$0xf] %v2819_v28  ;;  %v7632_v12 = vrot.slane %v2219_v40, 4  ;;  %v2939_v18 = vld [vmem:[%s6728_s17 + $0x34] sm:$0xf]  ;;  %v5178_v2 = vld [vmem:[%s8642_s5 + $0xa8] sm:$0xff] }
 0x28f   : > { %2002 = vst [vmem:[#allocation2 + $0x258] sm:$0xf] %v2001_v6  ;;  %v5179_v4 = vld [vmem:[%s8642_s5 + $0xb0] sm:$0xff]  ;;  %3016 = vrot.lane.b32.xlu0 %v2939_v18, %s5538_s9  ;;  %v5184_v32 = vld [vmem:[%s8642_s5 + $0xd8] sm:$0xff]  ;;  %v5166_v28 = vld [vmem:[%s8642_s5 + $0x48] sm:$0xff]  ;;  %v2223_v15 = vor.u32 %v2222_v49, %v2221_v19  ;;  %v2225_v18 = vrot.slane %v1794_v59, 5 }
 0x290   : > { %2153 = vst.msk [vmem:[#allocation2 + $0x258] sm:$0xf] %vm8707_vm8, %v7526_v38  ;;  %v5099_v52 = vld [vmem:[#allocation2 + $0xb0] sm:$0xf0]  ;;  %2629 = vrot.lane.b32.xlu1 %v7632_v12, %s5538_s9  ;;  %4151 = vmatpush.bf16.msrb.mxu0 %v5179_v4  ;;  %v2940_v20 = vld [vmem:[%s6728_s17 + $0x38] sm:$0xf] }
 0x291   : > { %2860 = vst.msk [vmem:[#allocation2 + $0x214] sm:$0xf] %vm8707_vm8, %v7526_v38  ;;  %v4665_v44 = vor.u32 %v5099_v52, %v4664_v22  ;;  %v5190_v40 = vld [vmem:[%s8642_s5 + $0x108] sm:$0xff]  ;;  %4243 = vmatpush.bf16.msrb.mxu1 %v5184_v32  ;;  %3018 = vrot.lane.b32.xlu2 %v2940_v20, %s5538_s9  ;;  %v1461_v56 = vld [vmem:[#allocation2 + $0x190] sm:$0x11]  ;;  %v2224_v54 = vrot.slane %v2223_v15, 4 }
 0x292   : > { %1601 = vst [vmem:[#allocation2 + $0x15c] sm:$0x88] %v1600_v57  ;;  %v1446_v38 = vld [vmem:[#allocation2 + $0x148] sm:$0x11]  ;;  %4067 = vmatpush.bf16.msrb.mxu3 %v5166_v28  ;;  %4334 = vmatpush.bf16.msrb.mxu2 %v5190_v40  ;;  %v5177_v57 = vld [vmem:[%s8642_s5 + $0xa0] sm:$0xff]  ;;  %v1462_v6 = vsel %vm6559_vm12, 0, %v1461_v56  ;;  %v7684_v22 = vpop.permute.xlu0 %2992 }
 0x293   : > { %1616 = vst [vmem:[#allocation2 + $0x1a4] sm:$0x88] %v1615_v31  ;;  %4000 = vmatmul.bf16.gmra.mxu1 %v4665_v44  ;;  %v1447_v19 = vsel %vm6559_vm12, 0, %v1446_v38  ;;  %v1369_v31 = vld [vmem:[#allocation2] sm:$0x11]  ;;  %v8805_v4 = vshrl.u32 %v6285_v26, 16 }
 0x294   : > { %1983 = vst.msk [vmem:[#allocation2 + $0x1a4] sm:$0xf] %vm1350_vm5, %v7657_v29  ;;  %4152 = vmatpush.bf16.msrb.mxu0 %v5178_v2  ;;  %v7686_v49 = vpop.permute.xlu1 %2402  ;;  %v1522_v2 = vld [vmem:[#allocation2 + $0x14] sm:$0x88]  ;;  %v7696_v32 = vpop.permute.xlu2 %2607  ;;  %v1422_v44 = vld [vmem:[#allocation2 + $0xd8] sm:$0x1] }
 0x295   : > { %2801 = vst.msk [vmem:[#allocation2 + $0x160] sm:$0xf] %vm1350_vm5, %v7657_v29  ;;  %v2227_v52 = vrot.slane %v8805_v4, 4  ;;  %v5176_v26 = vld [vmem:[%s8642_s5 + $0x98] sm:$0xff]  ;;  %v5183_v59 = vld [vmem:[%s8642_s5 + $0xd0] sm:$0xff]  ;;  %v1370_v20 = vsel %vm6559_vm12, 0, %v1369_v31 }
 0x296   : > { %2144 = vst.msk [vmem:[#allocation2 + $0x1a4] sm:$0xf] %vm8707_vm8, %v7566_v37  ;;  %v5154_v28 = vld [vmem:[#allocation2 + $0x268] sm:$0xf0]  ;;  %v1523_v40 = vsel %vm6571_vm1, 0, %v1522_v2  ;;  %4244 = vmatpush.bf16.msrb.mxu1 %v5183_v59  ;;  %v1423_v56 = vsel %vm6993_vm6, 0, %v1422_v44 }
 0x297   : > { %2851 = vst.msk [vmem:[#allocation2 + $0x160] sm:$0xf] %vm8707_vm8, %v7566_v37  ;;  %2428 = vrot.lane.b32.xlu0 %v7386_v30, %s5538_s9  ;;  %v4884_v37 = vld [vmem:[#allocation2 + $0x258] sm:$0xf]  ;;  %v7708_v30 = vsel %vm6700_vm11, %v2224_v54, %v2225_v18  ;;  %v2228_v38 = vor.u32 %v2227_v52, %v2225_v18  ;;  %v2941_v18 = vld [vmem:[%s6728_s17 + $0x3c] sm:$0xf] }
 0x298   : > { %2579 = vst.msk [vmem:[#allocation2 + $0x15c] sm:$0xf] %vm1350_vm5, %v6403_v7  ;;  %2430 = vrot.lane.b32.xlu1 %v7317_v3, %s5538_s9  ;;  %4153 = vmatpush.bf16.msrb.mxu0 %v5177_v57  ;;  %v1818_v3 = vshll.u32 %v6635_v23, 16  ;;  %v4885_v15 = vor.u32 %v5154_v28, %v4884_v37  ;;  %v8806_v57 = vshrl.u32 %v8799_v47, 16  ;;  %v5165_v4 = vld [vmem:[%s8642_s5 + $0x40] sm:$0xff] }
 0x299   : > { %1448 = vst [vmem:[#allocation2 + $0x148] sm:$0x11] %v1447_v19  ;;  %2631 = vrot.lane.b32.xlu2 %v7708_v30, %s5538_s9  ;;  %v8807_v19 = vshll.u32 %v8799_v47, 16  ;;  %v5189_v52 = vld [vmem:[%s8642_s5 + $0x100] sm:$0xff]  ;;  %v2349_v2 = vld [vmem:[#allocation2 + $0x130] sm:$0xf]  ;;  %4068 = vmatpush.bf16.msrb.mxu3 %v5165_v4 }
 0x29a   : > { %1463 = vst [vmem:[#allocation2 + $0x190] sm:$0x11] %v1462_v6  ;;  %v2230_v54 = vrot.slane %v8806_v57, 4  ;;  %v7730_v31 = vor.u32 %v1818_v3, %v7588_v11  ;;  %4055 = vmatmul.bf16.gmra.mxu3 %v4885_v15  ;;  %v5182_v11 = vld [vmem:[%s8642_s5 + $0xc8] sm:$0xff]  ;;  %v7745_v37 = vrot.slane %v2228_v38, 4  ;;  %4335 = vmatpush.bf16.msrb.mxu2 %v5189_v52 }
 0x29b   : > { %2578 = vst.msk [vmem:[#allocation2 + $0x148] sm:$0xf] %vm1350_vm5, %v8799_v47  ;;  %v2231_v6 = vrot.slane %v8807_v19, 5  ;;  %v1575_v47 = vld [vmem:[#allocation2 + $0xec] sm:$0x8]  ;;  %4245 = vmatpush.bf16.msrb.mxu1 %v5182_v11  ;;  %v8808_v11 = vshll.u32 %v6403_v7, 16 }
 0x29c   : > { %2699 = vst.msk [vmem:[#allocation2 + $0x8] sm:$0xf] %vm8707_vm8, %v7576_v5  ;;  %4154 = vmatpush.bf16.msrb.mxu0 %v5176_v26  ;;  %v5175_v5 = vld [vmem:[%s8642_s5 + $0x90] sm:$0xff]  ;;  %v7747_v44 = vpop.permute.xlu1 %2605  ;;  %v7749_v26 = vpop.permute.xlu0 %2400  ;;  %v2942_v59 = vld [vmem:[%s6728_s17 + $0x40] sm:$0xf] }
 0x29d   : > { %1371 = vst [vmem:[#allocation2] sm:$0x11] %v1370_v20  ;;  %v7755_v28 = vpop.permute.xlu2 %2998  ;;  %v2232_v57 = vor.u32 %v2231_v6, %v2230_v54  ;;  %v2350_v54 = vsel %vm6741_vm4, %v7632_v12, %v2349_v2  ;;  %v2234_v52 = vrot.slane %v8808_v11, 5 }
 0x29e   : > { %1524 = vst [vmem:[#allocation2 + $0x14] sm:$0x88] %v1523_v40  ;;  %v5181_v40 = vld [vmem:[%s8642_s5 + $0xc0] sm:$0xff] }
 0x29f   : > { %1424 = vst [vmem:[#allocation2 + $0xd8] sm:$0x1] %v1423_v56  ;;  %3020 = vrot.lane.b32.xlu0 %v2941_v18, %s5538_s9  ;;  %v5174_v56 = vld [vmem:[%s8642_s5 + $0x88] sm:$0xff]  ;;  %4246 = vmatpush.bf16.msrb.mxu1 %v5181_v40  ;;  %v2233_v4 = vrot.slane %v2232_v57, 4 }
 0x2a0   : > { %v2798_v20 = vld [vmem:[#allocation2 + $0x14c] sm:$0xf]  ;;  %2348 = vst.msk [vmem:[#allocation2 + $0x11c] sm:$0xf] %vm1350_vm5, %v7564_v61  ;;  %2633 = vrot.lane.b32.xlu1 %v7745_v37, %s5538_s9  ;;  %4155 = vmatpush.bf16.msrb.mxu0 %v5175_v5  ;;  %v5173_v5 = vld [vmem:[%s8642_s5 + $0x80] sm:$0xff] }
 0x2a1   : > { %v1980_v15 = vld [vmem:[#allocation2 + $0x190] sm:$0xf]  ;;  %v2799_v38 = vsel %vm6659_vm7, %v7730_v31, %v2798_v20  ;;  %2886 = vst.msk [vmem:[#allocation2 + $0xd8] sm:$0xf] %vm1350_vm5, %v7564_v61  ;;  %3022 = vrot.lane.b32.xlu2 %v2942_v59, %s5538_s9  ;;  %v1576_v61 = vsel %vm6830_vm2, 0, %v1575_v47  ;;  %v8809_v59 = vshrl.u32 %v6403_v7, 16 }
 0x2a2   : > { %v1981_v19 = vsel %vm6659_vm7, %v7730_v31, %v1980_v15  ;;  %2800 = vst [vmem:[#allocation2 + $0x14c] sm:$0xf] %v2799_v38  ;;  %v5129_v15 = vld [vmem:[#allocation2 + $0x1a0] sm:$0xf0]  ;;  %v1431_v7 = vld [vmem:[#allocation2 + $0x100] sm:$0x1]  ;;  %v7806_v38 = vsel %vm6700_vm11, %v2233_v4, %v2234_v52 }
 0x2a3   : > { %1982 = vst [vmem:[#allocation2 + $0x190] sm:$0xf] %v1981_v19  ;;  %v2236_v20 = vrot.slane %v8809_v59, 4  ;;  %v1432_v57 = vsel %vm6993_vm6, 0, %v1431_v7  ;;  %v8810_v19 = vshrl.u32 %v6635_v23, 16 }
 0x2a4   : > { %2143 = vst.msk [vmem:[#allocation2 + $0x190] sm:$0xf] %vm8707_vm8, %v7568_v16  ;;  %v4584_v18 = vld [vmem:[#allocation2] sm:$0xf]  ;;  %4156 = vmatpush.bf16.msrb.mxu0 %v5174_v56  ;;  %v7790_v2 = vpop.permute.xlu1 %2406  ;;  %v7792_v40 = vpop.permute.xlu0 %2404  ;;  %v1584_v56 = vld [vmem:[#allocation2 + $0x114] sm:$0x8] }
 0x2a5   : > { %2850 = vst.msk [vmem:[#allocation2 + $0x14c] sm:$0xf] %vm8707_vm8, %v7568_v16  ;;  %v5079_v6 = vld [vmem:[#allocation2 + $0x10] sm:$0xf0]  ;;  %v7798_v16 = vpop.permute.xlu2 %2611  ;;  %v1585_v11 = vsel %vm6830_vm2, 0, %v1584_v56 }
 0x2a6   : > { %v4585_v47 = vor.u32 %v5079_v6, %v4584_v18  ;;  %1577 = vst [vmem:[#allocation2 + $0xec] sm:$0x8] %v1576_v61  ;;  %v2240_v61 = vrot.slane %v1818_v3, 5  ;;  %v2353_v6 = vld [vmem:[#allocation2 + $0x158] sm:$0xf] }
 0x2a7   : > { %2351 = vst [vmem:[#allocation2 + $0x130] sm:$0xf] %v2350_v54  ;;  %2432 = vrot.lane.b32.xlu0 %v7523_v36, %s5538_s9  ;;  %v2237_v36 = vor.u32 %v2236_v20, %v2234_v52  ;;  %v2943_v54 = vld [vmem:[%s6728_s17 + $0x44] sm:$0xf]  ;;  %v2354_v59 = vsel %vm6741_vm4, %v7745_v37, %v2353_v6  ;;  %v4600_v6 = vld [vmem:[#allocation2 + $0x10] sm:$0xf] }
 0x2a8   : > { %3980 = vmatmul.bf16.vlgmr.msra.gmra.mxu0 %v4585_v47  ;;  %2133 = vst.msk [vmem:[#allocation2 + $0xc8] sm:$0xf] %vm8707_vm8, %v7635_v39  ;;  %2434 = vrot.lane.b32.xlu1 %v7486_v13, %s5538_s9 }
 0x2a9   : > { %2840 = vst.msk [vmem:[#allocation2 + $0x84] sm:$0xf] %vm8707_vm8, %v7635_v39  ;;  %4157 = vmatpush.bf16.msrb.mxu0 %v5173_v5  ;;  %2635 = vrot.lane.b32.xlu2 %v7806_v38, %s5538_s9  ;;  %v7830_v5 = vrot.slane %v2237_v36, 4  ;;  %v2701_v36 = vld [vmem:[#allocation2 + $0x1c] sm:$0xf] }
 0x2aa   : > { %2126 = vst.msk [vmem:[#allocation2 + $0x3c] sm:$0xf] %vm8707_vm8, %v7637_v10  ;;  %v2239_v10 = vrot.slane %v8810_v19, 4  ;;  %v2702_v56 = vsel %vm7841_vm14, %v7747_v44, %v2701_v36  ;;  %v1440_v19 = vld [vmem:[#allocation2 + $0x128] sm:$0x1]  ;;  %v8817_v36 = vshll.u32 %v6054_v41, 16 }
 0x2ab   : > { %3089 = vst.msk [vmem:[#allocation2 + $0x38] sm:$0xf] %vm8708_vm13, %v7645_v42  ;;  %v4784_v39 = vld [vmem:[#allocation2 + $0x190] sm:$0xf]  ;;  %v5104_v42 = vld [vmem:[#allocation2 + $0xd8] sm:$0xf0] }
 0x2ac   : > { %3088 = vst.msk [vmem:[#allocation2 + $0x24] sm:$0xf] %vm8708_vm13, %v7684_v22  ;;  %v4785_v13 = vor.u32 %v5129_v15, %v4784_v39  ;;  %v7832_v3 = vpop.permute.xlu1 %2609  ;;  %v7834_v4 = vpop.permute.xlu0 %2996  ;;  %v2498_v15 = vld [vmem:[#allocation2 + $0x4] sm:$0xf]  ;;  %v2241_v7 = vor.u32 %v2240_v61, %v2239_v10  ;;  %v4604_v39 = vld [vmem:[#allocation2 + $0x28] sm:$0xf] }
 0x2ad   : > { %v2887_v18 = vld [vmem:[#allocation2 + $0xec] sm:$0xf]  ;;  %2704 = vst.msk [vmem:[#allocation2 + $0x30] sm:$0xf] %vm8707_vm8, %v7696_v32  ;;  %v2944_v32 = vld [vmem:[%s6728_s17 + $0x48] sm:$0xf] }
 0x2ae   : > { %v2888_v22 = vsel %vm6741_vm4, %v7632_v12, %v2887_v18  ;;  %2501 = vst.msk [vmem:[#allocation2 + $0x18] sm:$0xf] %vm8707_vm8, %v7686_v49  ;;  %4030 = vmatmul.bf16.gmra.mxu2 %v4785_v13  ;;  %v7846_v49 = vpop.permute.xlu2 %3002  ;;  %v2502_v10 = vld [vmem:[#allocation2 + $0x2c] sm:$0xf] }
 0x2af   : > { %2889 = vst [vmem:[#allocation2 + $0xec] sm:$0xf] %v2888_v22  ;;  %v4684_v23 = vld [vmem:[#allocation2 + $0xc8] sm:$0xf]  ;;  %3024 = vrot.lane.b32.xlu0 %v2943_v54, %s5538_s9  ;;  %v2503_v61 = vsel %vm7855_vm9, %v7792_v40, %v2502_v10  ;;  %v1593_v22 = vld [vmem:[#allocation2 + $0x13c] sm:$0x8] }
 0x2b0   : > { %v4685_v47 = vor.u32 %v5104_v42, %v4684_v23  ;;  %1433 = vst [vmem:[#allocation2 + $0x100] sm:$0x1] %v1432_v57  ;;  %2637 = vrot.lane.b32.xlu1 %v7830_v5, %s5538_s9  ;;  %v2499_v57 = vsel %vm7855_vm9, %v7749_v26, %v2498_v15  ;;  %v2243_v42 = vrot.slane %v1826_v43, 5  ;;  %v8815_v26 = vshrl.u32 %v6529_v27, 16  ;;  %v2357_v23 = vld [vmem:[#allocation2 + $0x180] sm:$0xf] }
 0x2b1   : > { %v5084_v52 = vld [vmem:[#allocation2 + $0x38] sm:$0xf0]  ;;  %2352 = vst.msk [vmem:[#allocation2 + $0x144] sm:$0xf] %vm1350_vm5, %v7708_v30  ;;  %3026 = vrot.lane.b32.xlu2 %v2944_v32, %s5538_s9  ;;  %v4594_v32 = vld [vmem:[#allocation2 + $0x1c] sm:$0xf0] }
 0x2b2   : > { %4005 = vmatmul.bf16.gmra.mxu1 %v4685_v47  ;;  %2890 = vst.msk [vmem:[#allocation2 + $0x100] sm:$0xf] %vm1350_vm5, %v7708_v30  ;;  %v4605_v13 = vor.u32 %v5084_v52, %v4604_v39  ;;  %v2242_v30 = vrot.slane %v2241_v7, 4  ;;  %v2245_v54 = vrot.slane %v8815_v26, 4  ;;  %v5078_v52 = vld [vmem:[#allocation2 + $0xc] sm:$0xf] }
 0x2b3   : > { %1586 = vst [vmem:[#allocation2 + $0x114] sm:$0x8] %v1585_v11  ;;  %v5081_v43 = vld [vmem:[#allocation2 + $0x20] sm:$0xf0]  ;;  %v8816_v15 = vshrl.u32 %v6054_v41, 16  ;;  %v2249_v39 = vrot.slane %v8817_v36, 5 }
 0x2b4   : > { %2355 = vst [vmem:[#allocation2 + $0x158] sm:$0xf] %v2354_v59  ;;  %v7875_v18 = vpop.permute.xlu1 %2410  ;;  %v7877_v44 = vpop.permute.xlu0 %2408  ;;  %v7895_v27 = vsel %vm6700_vm11, %v2242_v30, %v2243_v42  ;;  %v4601_v47 = vor.u32 %v5081_v43, %v4600_v6  ;;  %v2705_v11 = vld [vmem:[#allocation2 + $0x44] sm:$0xf]  ;;  %v2358_v59 = vsel %vm6741_vm4, %v7830_v5, %v2357_v23  ;;  %v2946_v41 = vld [vmem:[%s6728_s17 + $0x50] sm:$0xf] }
 0x2b5   : > { %3091 = vst.msk [vmem:[#allocation2 + $0x60] sm:$0xf] %vm8708_vm13, %v7755_v28  ;;  %v1441_v28 = vsel %vm6993_vm6, 0, %v1440_v19  ;;  %v2248_v7 = vrot.slane %v8816_v15, 4  ;;  %v2706_v19 = vsel %vm7841_vm14, %v7832_v3, %v2705_v11  ;;  %v8819_v6 = vld [vmem:[#allocation13_spill] sm:$0xff] }
 0x2b6   : > { %2703 = vst [vmem:[#allocation2 + $0x1c] sm:$0xf] %v2702_v56  ;;  %v2616_v40 = vpop.permute.xlu2 %2615  ;;  %v4620_v36 = vld [vmem:[#allocation2 + $0x38] sm:$0xf] }
 0x2b7   : > { %2500 = vst [vmem:[#allocation2 + $0x4] sm:$0xf] %v2499_v57  ;;  %2436 = vrot.lane.b32.xlu0 %v7730_v31, %s5538_s9  ;;  %v2250_v3 = vor.u32 %v2249_v39, %v2248_v7  ;;  %v8822_v7 = vshrl.u32 %v6088_v50, 16 }
 0x2b8   : > { %3985 = vmatmul.bf16.gmra.mxu0 %v4605_v13  ;;  %2708 = vst.msk [vmem:[#allocation2 + $0x58] sm:$0xf] %vm8707_vm8, %v7798_v16  ;;  %2438 = vrot.lane.b32.xlu1 %v7657_v29, %s5538_s9  ;;  %v1594_v29 = vsel %vm6830_vm2, 0, %v1593_v22  ;;  %v4586_v13 = vld [vmem:[#allocation2 + $0x14] sm:$0xf0]  ;;  %v8818_v22 = vld [vmem:[#allocation15_spill] sm:$0xff] }
 0x2b9   : > { %2505 = vst.msk [vmem:[#allocation2 + $0x40] sm:$0xf] %vm8707_vm8, %v7790_v2  ;;  %2639 = vrot.lane.b32.xlu2 %v7895_v27, %s5538_s9  ;;  %v2246_v2 = vor.u32 %v2245_v54, %v2243_v42  ;;  %v4597_v42 = vor.u32 %v5078_v52, %v4594_v32  ;;  %v1449_v54 = vld [vmem:[#allocation2 + $0x150] sm:$0x1]  ;;  %v639_v43 = vmul.f32 %v8819_v6, %v8818_v22  ;;  %v8824_v6 = vshll.u32 %v6048_v48, 16 }
 0x2ba   : > { %v2891_v16 = vld [vmem:[#allocation2 + $0x114] sm:$0xf]  ;;  %2504 = vst [vmem:[#allocation2 + $0x2c] sm:$0xf] %v2503_v61 }
 0x2bb   : > { %v2892_v31 = vsel %vm6741_vm4, %v7745_v37, %v2891_v16  ;;  %1442 = vst [vmem:[#allocation2 + $0x128] sm:$0x1] %v1441_v28  ;;  %v2945_v37 = vld [vmem:[%s6728_s17 + $0x4c] sm:$0xf]  ;;  %v7920_v30 = vrot.slane %v2246_v2, 4  ;;  %v8820_v2 = vld [vmem:[#allocation16_spill] sm:$0xff] }
 0x2bc   : > { %2893 = vst [vmem:[#allocation2 + $0x114] sm:$0xf] %v2892_v31  ;;  %v7922_v10 = vpop.permute.xlu1 %2613  ;;  %v7924_v61 = vpop.permute.xlu0 %3000  ;;  %v2506_v28 = vld [vmem:[#allocation2 + $0x54] sm:$0xf]  ;;  %v4592_v16 = vld [vmem:[#allocation2 + $0x8] sm:$0xf]  ;;  %v7944_v32 = vadd.f32 %v8820_v2, %v639_v43 }
 0x2bd   : > { %2356 = vst.msk [vmem:[#allocation2 + $0x16c] sm:$0xf] %vm1350_vm5, %v7806_v38  ;;  %v1450_v31 = vsel %vm6993_vm6, 0, %v1449_v54  ;;  %v2258_v43 = vrot.slane %v8824_v6, 5 }
 0x2be   : > { %5054 = vmatmul.msk.bf16.vlgmr.msrb.gmra.mxu2 %vm8706_vm15, %v4601_v47  ;;  %v5077_v56 = vld [vmem:[#allocation2 + $0x4] sm:$0xf]  ;;  %2894 = vst.msk [vmem:[#allocation2 + $0x128] sm:$0xf] %vm1350_vm5, %v7806_v38  ;;  %v3007_v26 = vpop.permute.xlu2 %3006  ;;  %v5080_v38 = vld [vmem:[#allocation2 + $0x18] sm:$0xf0] }
 0x2bf   : > { %v4589_v57 = vor.u32 %v5077_v56, %v4586_v13  ;;  %1595 = vst [vmem:[#allocation2 + $0x13c] sm:$0x8] %v1594_v29  ;;  %3028 = vrot.lane.b32.xlu0 %v2945_v37, %s5538_s9  ;;  %v4593_v23 = vor.u32 %v5080_v38, %v4592_v16  ;;  %v1602_v29 = vld [vmem:[#allocation2 + $0x164] sm:$0x8]  ;;  %v2251_v47 = vrot.slane %v2250_v3, 4  ;;  %v8821_v37 = vshll.u32 %v6088_v50, 16 }
 0x2c0   : > { %2359 = vst [vmem:[#allocation2 + $0x180] sm:$0xf] %v2358_v59  ;;  %2641 = vrot.lane.b32.xlu1 %v7920_v30, %s5538_s9  ;;  %v4606_v54 = vld [vmem:[#allocation2 + $0x3c] sm:$0xf0]  ;;  %v8823_v3 = vshrl.u32 %v6048_v48, 16 }
 0x2c1   : > { %4069 = vmatmul.bf16.vlgmr.msrb.gmra.mxu3 %v4589_v57  ;;  %3093 = vst.msk [vmem:[#allocation2 + $0x88] sm:$0xf] %vm8708_vm13, %v7846_v49  ;;  %3030 = vrot.lane.b32.xlu2 %v2946_v41, %s5538_s9  ;;  %v2507_v49 = vsel %vm7855_vm9, %v7877_v44, %v2506_v28  ;;  %v2252_v15 = vrot.slane %v8821_v37, 5  ;;  %v4614_v57 = vld [vmem:[#allocation2 + $0x44] sm:$0xf0] }
 0x2c2   : > { %4247 = vmatmul.bf16.vlgmr.msrb.gmra.mxu1 %v4597_v42  ;;  %2707 = vst [vmem:[#allocation2 + $0x44] sm:$0xf] %v2706_v19  ;;  %v1458_v42 = vld [vmem:[#allocation2 + $0x178] sm:$0x1]  ;;  %v5082_v38 = vld [vmem:[#allocation2 + $0x2c] sm:$0xf] }
 0x2c3   : > { %3090 = vst.msk [vmem:[#allocation2 + $0x4c] sm:$0xf] %vm8708_vm13, %v7834_v4  ;;  %v2361_v4 = vld [vmem:[#allocation2 + $0x1a8] sm:$0xf]  ;;  %v2253_v50 = vsel %vm6700_vm11, %v2251_v47, %v2252_v15  ;;  %v2257_v28 = vrot.slane %v8823_v3, 4  ;;  %v1459_v48 = vsel %vm6993_vm6, 0, %v1458_v42 }
 0x2c4   : > { %2712 = vst.msk [vmem:[#allocation2 + $0x80] sm:$0xf] %vm8707_vm8, %v2616_v40  ;;  %v1603_v40 = vsel %vm6830_vm2, 0, %v1602_v29  ;;  %v2415_v52 = vpop.permute.xlu1 %2414  ;;  %v2413_v59 = vpop.permute.xlu0 %2412  ;;  %v2362_v56 = vsel %vm6741_vm4, %v7920_v30, %v2361_v4  ;;  %v5083_v16 = vld [vmem:[#allocation2 + $0x34] sm:$0xf] }
 0x2c5   : > { %2509 = vst.msk [vmem:[#allocation2 + $0x68] sm:$0xf] %vm8707_vm8, %v7875_v18  ;;  %v2254_v18 = vrot.slane %v8822_v7, 4  ;;  %v2948_v47 = vld [vmem:[%s6728_s17 + $0x58] sm:$0xf]  ;;  %v8825_v7 = vld [vmem:[#allocation14_spill] sm:$0xff] }
 0x2c6   : > { %v2895_v11 = vld [vmem:[#allocation2 + $0x13c] sm:$0xf]  ;;  %2508 = vst [vmem:[#allocation2 + $0x54] sm:$0xf] %v2507_v49  ;;  %v2620_v39 = vpop.permute.xlu2 %2619  ;;  %v4609_v49 = vor.u32 %v5082_v38, %v4606_v54  ;;  %v4640_v38 = vld [vmem:[#allocation2 + $0x60] sm:$0xf] }
 0x2c7   : > { %v2896_v44 = vsel %vm6741_vm4, %v7830_v5, %v2895_v11  ;;  %1451 = vst [vmem:[#allocation2 + $0x150] sm:$0x1] %v1450_v31  ;;  %2440 = vrot.lane.b32.xlu0 %v6918_v46, %s5538_s9  ;;  %v4580_v5 = vmul.f32 -1.442695, %v7944_v32  ;;  %v2709_v46 = vld [vmem:[#allocation2 + $0x6c] sm:$0xf]  ;;  %v4617_v11 = vor.u32 %v5083_v16, %v4614_v57 }
 0x2c8   : > { %4158 = vmatmul.bf16.vlgmr.msrb.gmra.mxu0 %v4593_v23  ;;  %2897 = vst [vmem:[#allocation2 + $0x13c] sm:$0xf] %v2896_v44  ;;  %2442 = vrot.lane.b32.xlu1 %v7046_v17, %s5538_s9  ;;  %v2710_v41 = vsel %vm7841_vm14, %v7922_v10, %v2709_v46  ;;  %v2255_v17 = vor.u32 %v2254_v18, %v2252_v15  ;;  %v2510_v10 = vld [vmem:[#allocation2 + $0x7c] sm:$0xf]  ;;  %v2365_v15 = vld [vmem:[#allocation2 + $0x1d0] sm:$0xf] }
 0x2c9   : > { %2360 = vst.msk [vmem:[#allocation2 + $0x194] sm:$0xf] %vm1350_vm5, %v7895_v27  ;;  %2643 = vrot.lane.b32.xlu2 %v2253_v50, %s5538_s9  ;;  %5465 = vpow2.f32 %v4580_v5  ;;  %v2511_v23 = vsel %vm7855_vm9, %v2413_v59, %v2510_v10  ;;  %v5085_v44 = vld [vmem:[#allocation2 + $0x40] sm:$0xf0]  ;;  %v640_v18 = vmul.f32 %v8825_v7, %v8818_v22 }
 0x2ca   : > { %v5086_v13 = vld [vmem:[#allocation2 + $0x48] sm:$0xf0]  ;;  %2898 = vst.msk [vmem:[#allocation2 + $0x150] sm:$0xf] %vm1350_vm5, %v7895_v27  ;;  %v2947_v27 = vld [vmem:[%s6728_s17 + $0x54] sm:$0xf] }
 0x2cb   : > { %v4621_v19 = vor.u32 %v5086_v13, %v4620_v36  ;;  %1604 = vst [vmem:[#allocation2 + $0x164] sm:$0x8] %v1603_v40  ;;  %v2259_v40 = vor.u32 %v2258_v43, %v2257_v28  ;;  %v4612_v36 = vld [vmem:[#allocation2 + $0x30] sm:$0xf]  ;;  %v8007_v57 = vadd.f32 %v8820_v2, %v640_v18  ;;  %v8829_v28 = vld [vmem:[#allocation11_spill] sm:$0xff] }
 0x2cc   : > { %2363 = vst [vmem:[#allocation2 + $0x1a8] sm:$0xf] %v2362_v56  ;;  %v2618_v31 = vpop.permute.xlu1 %2617  ;;  %v3005_v29 = vpop.permute.xlu0 %3004  ;;  %v8826_v56 = vld [vmem:[#allocation17_spill] sm:$0xff]  ;;  %v1467_v43 = vld [vmem:[#allocation2 + $0x1a0] sm:$0x1] }
 0x2cd   : > { %3095 = vst.msk [vmem:[#allocation2 + $0xb0] sm:$0xf] %vm8708_vm13, %v3007_v26  ;;  %v7986_v26 = vrot.slane %v2255_v17, 4  ;;  %v8827_v13 = vshll.u32 %v8826_v56, 16  ;;  %v2713_v17 = vld [vmem:[#allocation2 + $0x94] sm:$0xf] }
 0x2ce   : > { %5055 = vmatmul.msk.bf16.gmra.mxu2 %vm8706_vm15, %v4621_v19  ;;  %2711 = vst [vmem:[#allocation2 + $0x6c] sm:$0xf] %v2710_v41  ;;  %v3011_v4 = vpop.permute.xlu2 %3010  ;;  %v2260_v19 = vrot.slane %v2259_v40, 4  ;;  %v2714_v2 = vsel %vm7841_vm14, %v2618_v31, %v2713_v17  ;;  %v4581_v16 = vmul.f32 -1.442695, %v8007_v57 }
 0x2cf   : > { %3092 = vst.msk [vmem:[#allocation2 + $0x74] sm:$0xf] %vm8708_vm13, %v7924_v61  ;;  %3032 = vrot.lane.b32.xlu0 %v2947_v27, %s5538_s9  ;;  %v1611_v61 = vld [vmem:[#allocation2 + $0x18c] sm:$0x8]  ;;  %v5466_v59 = vpop.eup %5465  ;;  %v2261_v46 = vrot.slane %v8827_v13, 5  ;;  %v2366_v22 = vsel %vm6741_vm4, %v7986_v26, %v2365_v15  ;;  %v8832_v15 = vshll.u32 %v6230_v58, 16 }
 0x2d0   : > { %2716 = vst.msk [vmem:[#allocation2 + $0xa8] sm:$0xf] %vm8707_vm8, %v2620_v39  ;;  %2645 = vrot.lane.b32.xlu1 %v7986_v26, %s5538_s9  ;;  %v4613_v39 = vor.u32 %v5085_v44, %v4612_v36  ;;  %v1612_v5 = vsel %vm6830_vm2, 0, %v1611_v61  ;;  %v8015_v42 = vadd.f32 1.0, %v5466_v59  ;;  %v2514_v31 = vld [vmem:[#allocation2 + $0xa4] sm:$0xf] }
 0x2d1   : > { %4074 = vmatmul.bf16.gmra.mxu3 %v4609_v49  ;;  %2513 = vst.msk [vmem:[#allocation2 + $0x90] sm:$0xf] %vm8707_vm8, %v2415_v52  ;;  %3034 = vrot.lane.b32.xlu2 %v2948_v47, %s5538_s9  ;;  %v2262_v10 = vsel %vm6700_vm11, %v2260_v19, %v2261_v46  ;;  %v4634_v47 = vld [vmem:[#allocation2 + $0x6c] sm:$0xf0]  ;;  %v8831_v44 = vshrl.u32 %v6230_v58, 16  ;;  %v2267_v7 = vrot.slane %v8832_v15, 5  ;;  %v8051_v58 = vpop.f32.mrf.mxu3 }
 0x2d2   : > { %4252 = vmatmul.bf16.gmra.mxu1 %v4617_v11  ;;  %v2899_v37 = vld [vmem:[#allocation2 + $0x164] sm:$0xf]  ;;  %2512 = vst [vmem:[#allocation2 + $0x7c] sm:$0xf] %v2511_v23  ;;  %5467 = vrcp.f32 %v8015_v42  ;;  %v5087_v40 = vld [vmem:[#allocation2 + $0x54] sm:$0xf]  ;;  %vm1259_vm10 = vweird.f32 %v8015_v42 }
 0x2d3   : > { %v2900_v52 = vsel %vm6741_vm4, %v7920_v30, %v2899_v37  ;;  %1460 = vst [vmem:[#allocation2 + $0x178] sm:$0x1] %v1459_v48  ;;  %v8828_v30 = vshrl.u32 %v8826_v56, 16  ;;  %v1468_v48 = vsel %vm6993_vm6, 0, %v1467_v43  ;;  %v2266_v61 = vrot.slane %v8831_v44, 4 }
 0x2d4   : > { %2901 = vst [vmem:[#allocation2 + $0x164] sm:$0xf] %v2900_v52  ;;  %v2419_v27 = vpop.permute.xlu1 %2418  ;;  %v2417_v3 = vpop.permute.xlu0 %2416  ;;  %v4626_v59 = vld [vmem:[#allocation2 + $0x64] sm:$0xf0]  ;;  %5469 = vpow2.f32 %v4581_v16  ;;  %v2369_v36 = vld [vmem:[#allocation2 + $0x1f8] sm:$0xf] }
 0x2d5   : > { %2364 = vst.msk [vmem:[#allocation2 + $0x1bc] sm:$0xf] %vm1350_vm5, %v2253_v50  ;;  %v2263_v41 = vrot.slane %v8828_v30, 4  ;;  %v2515_v11 = vsel %vm7855_vm9, %v2417_v3, %v2514_v31  ;;  %v5090_v17 = vld [vmem:[#allocation2 + $0x68] sm:$0xf0]  ;;  %v8834_v3 = vshrl.u32 %v6269_v35, 16 }
 0x2d6   : > { %2902 = vst.msk [vmem:[#allocation2 + $0x178] sm:$0xf] %vm1350_vm5, %v2253_v50  ;;  %v5091_v54 = vld [vmem:[#allocation2 + $0x70] sm:$0xf0]  ;;  %v2624_v6 = vpop.permute.xlu2 %2623  ;;  %v8830_v50 = vld [vmem:[#allocation10_spill] sm:$0xff] }
 0x2d7   : > { %1613 = vst [vmem:[#allocation2 + $0x18c] sm:$0x8] %v1612_v5  ;;  %2444 = vrot.lane.b32.xlu0 %v8829_v28, %s5538_s9  ;;  %v2264_v49 = vor.u32 %v2263_v41, %v2261_v46  ;;  %v4641_v23 = vor.u32 %v5091_v54, %v4640_v38  ;;  %v4629_v5 = vor.u32 %v5087_v40, %v4626_v59  ;;  %v8056_v38 = vpop.f32.mrf.mxu2  ;;  %v2272_v28 = vrot.slane %v8834_v3, 4  ;;  %v2717_v43 = vld [vmem:[#allocation2 + $0xbc] sm:$0xf] }
 0x2d8   : > { %4163 = vmatmul.bf16.gmra.mxu0 %v4613_v39  ;;  %2367 = vst [vmem:[#allocation2 + $0x1d0] sm:$0xf] %v2366_v22  ;;  %2446 = vrot.lane.b32.xlu1 %v8830_v50, %s5538_s9  ;;  %v8045_v52 = vpop.eup %5467  ;;  %v5088_v39 = vld [vmem:[#allocation2 + $0x5c] sm:$0xf]  ;;  %v2950_v22 = vld [vmem:[%s6728_s17 + $0x60] sm:$0xf]  ;;  %v2268_v54 = vor.u32 %v2267_v7, %v2266_v61 }
 0x2d9   : > { %3097 = vst.msk [vmem:[#allocation2 + $0xd8] sm:$0xf] %vm8708_vm13, %v3011_v4  ;;  %2647 = vrot.lane.b32.xlu2 %v2262_v10, %s5538_s9  ;;  %v1620_v4 = vld [vmem:[#allocation2 + $0x1b4] sm:$0x8]  ;;  %v8039_v37 = vrot.slane %v2264_v49, 4  ;;  %v4637_v19 = vor.u32 %v5088_v39, %v4634_v47  ;;  %v1255_v16 = vmul.f32 %v8045_v52, %v8015_v42  ;;  %vm1260_vm3 = vweird.f32 %v8045_v52 }
 0x2da   : > { %2715 = vst [vmem:[#allocation2 + $0x94] sm:$0xf] %v2714_v2  ;;  %v1621_v30 = vsel %vm6830_vm2, 0, %v1620_v4  ;;  %v8833_v2 = vshll.u32 %v6269_v35, 16  ;;  %v4632_v50 = vld [vmem:[#allocation2 + $0x58] sm:$0xf] }
 0x2db   : > { %3094 = vst.msk [vmem:[#allocation2 + $0x9c] sm:$0xf] %vm8708_vm13, %v3005_v29  ;;  %v2949_v29 = vld [vmem:[%s6728_s17 + $0x5c] sm:$0xf]  ;;  %v8835_v35 = vshrl.u32 %v6358_v25, 16  ;;  %v2269_v4 = vrot.slane %v2268_v54, 4 }
 0x2dc   : > { %2720 = vst.msk [vmem:[#allocation2 + $0xd0] sm:$0xf] %vm8707_vm8, %v2624_v6  ;;  %v2622_v13 = vpop.permute.xlu1 %2621  ;;  %v3009_v46 = vpop.permute.xlu0 %3008  ;;  %v8074_v31 = vld [vmem:[#allocation2 + $0x1dc] sm:$0x8]  ;;  %v4660_v40 = vld [vmem:[#allocation2 + $0x88] sm:$0xf] }
 0x2dd   : > { %2517 = vst.msk [vmem:[#allocation2 + $0xb8] sm:$0xf] %vm8707_vm8, %v2419_v27  ;;  %v2270_v27 = vrot.slane %v8833_v2, 5  ;;  %v5470_v6 = vpop.eup %5469  ;;  %v2718_v49 = vsel %vm7841_vm14, %v2622_v13, %v2717_v43  ;;  %v2275_v47 = vrot.slane %v8835_v35, 4  ;;  %v1256_v59 = vsub.f32 1.0, %v1255_v16  ;;  %v8837_v13 = vld [vmem:[#allocation6_spill] sm:$0xff] }
 0x2de   : > { %5056 = vmatmul.msk.bf16.gmra.mxu2 %vm8706_vm15, %v4641_v23  ;;  %v2903_v18 = vld [vmem:[#allocation2 + $0x18c] sm:$0xf]  ;;  %2516 = vst [vmem:[#allocation2 + $0xa4] sm:$0xf] %v2515_v11  ;;  %v3015_v41 = vpop.permute.xlu2 %3014  ;;  %v4633_v23 = vor.u32 %v5090_v17, %v4632_v50  ;;  %v8081_v61 = vadd.f32 1.0, %v5470_v6  ;;  %v8838_v6 = vshll.u32 %v6383_v63, 16 }
 0x2df   : > { %v2904_v56 = vsel %vm6741_vm4, %v7986_v26, %v2903_v18  ;;  %1469 = vst [vmem:[#allocation2 + $0x1a0] sm:$0x1] %v1468_v48  ;;  %3036 = vrot.lane.b32.xlu0 %v2949_v29, %s5538_s9  ;;  %v2370_v26 = vsel %vm6741_vm4, %v8039_v37, %v2369_v36  ;;  %v1476_v48 = vld [vmem:[#allocation2 + $0x1c8] sm:$0x1]  ;;  %v2273_v44 = vor.u32 %v2272_v28, %v2270_v27  ;;  %v2518_v7 = vld [vmem:[#allocation2 + $0xcc] sm:$0xf]  ;;  %v8112_v28 = vpop.f32.mrf.mxu2 }
 0x2e0   : > { %2905 = vst [vmem:[#allocation2 + $0x18c] sm:$0xf] %v2904_v56  ;;  %2649 = vrot.lane.b32.xlu1 %v8039_v37, %s5538_s9  ;;  %5471 = vrcp.f32 %v8081_v61  ;;  %v1477_v39 = vsel %vm6993_vm6, 0, %v1476_v48  ;;  %v8092_v56 = vld [vmem:[#allocation2 + $0x204] sm:$0x8]  ;;  %v1257_v2 = vmul.f32 %v8045_v52, %v1256_v59  ;;  %v8116_v43 = vrot.slane %v8838_v6, 5 }
 0x2e1   : > { %4079 = vmatmul.bf16.gmra.mxu3 %v4629_v5  ;;  %2368 = vst.msk [vmem:[#allocation2 + $0x1e4] sm:$0xf] %vm1350_vm5, %v2262_v10  ;;  %3038 = vrot.lane.b32.xlu2 %v2950_v22, %s5538_s9  ;;  %v8102_v22 = vrot.slane %v2273_v44, 4  ;;  %v2373_v54 = vld [vmem:[#allocation2 + $0x220] sm:$0xf]  ;;  %v1639_v16 = vsel %vm6830_vm2, 0, %v8092_v56 }
 0x2e2   : > { %4257 = vmatmul.bf16.gmra.mxu1 %v4637_v19  ;;  %2906 = vst.msk [vmem:[#allocation2 + $0x1a0] sm:$0xf] %vm1350_vm5, %v2262_v10  ;;  %v8836_v10 = vshll.u32 %v6358_v25, 16  ;;  %v5096_v29 = vld [vmem:[#allocation2 + $0x98] sm:$0xf0]  ;;  %v1265_v59 = vand.u32 2147483648, %v8015_v42 }
 0x2e3   : > { %1622 = vst [vmem:[#allocation2 + $0x1b4] sm:$0x8] %v1621_v30  ;;  %v1263_v19 = vand.u32 2147483647, %v8015_v42  ;;  %v5093_v30 = vld [vmem:[#allocation2 + $0x84] sm:$0xf] }
 0x2e4   : > { %2371 = vst [vmem:[#allocation2 + $0x1f8] sm:$0xf] %v2370_v26  ;;  %v2276_v11 = vrot.slane %v8836_v10, 5  ;;  %v2423_v15 = vpop.permute.xlu1 %2422  ;;  %v2421_v18 = vpop.permute.xlu0 %2420  ;;  %v4654_v50 = vld [vmem:[#allocation2 + $0x94] sm:$0xf0] }
 0x2e5   : > { %3099 = vst.msk [vmem:[#allocation2 + $0x100] sm:$0xf] %vm8708_vm13, %v3015_v41  ;;  %v2519_v36 = vsel %vm7855_vm9, %v2421_v18, %v2518_v7  ;;  %v4661_v41 = vor.u32 %v5096_v29, %v4660_v40  ;;  %v8105_v26 = vpop.f32.mrf.mxu3  ;;  %v2951_v10 = vld [vmem:[%s6728_s17 + $0x64] sm:$0xf]  ;;  %v1258_v40 = vadd.f32 %v8045_v52, %v1257_v2 }
 0x2e6   : > { %2719 = vst [vmem:[#allocation2 + $0xbc] sm:$0xf] %v2718_v49  ;;  %v2628_v25 = vpop.permute.xlu2 %2627  ;;  %v2277_v5 = vor.u32 %v2276_v11, %v2275_v47  ;;  %v5092_v49 = vld [vmem:[#allocation2 + $0x7c] sm:$0xf]  ;;  %v8123_v47 = vpop.eup %5471  ;;  %v8840_v11 = vshrl.u32 %v6468_v62, 16 }
 0x2e7   : > { %3096 = vst.msk [vmem:[#allocation2 + $0xc4] sm:$0xf] %vm8708_vm13, %v3009_v46  ;;  %2448 = vrot.lane.b32.xlu0 %v7252_v9, %s5538_s9  ;;  %v2271_v9 = vsel %vm6700_vm11, %v2269_v4, %v2270_v27  ;;  %v1630_v46 = vsel %vm6830_vm2, 0, %v8074_v31  ;;  %v4646_v27 = vld [vmem:[#allocation2 + $0x8c] sm:$0xf0]  ;;  %v8839_v31 = vshrl.u32 %v6383_v63, 16  ;;  %v1270_v29 = vmul.f32 %v8123_v47, %v8081_v61 }
 0x2e8   : > { %4168 = vmatmul.bf16.gmra.mxu0 %v4633_v23  ;;  %2521 = vst.msk [vmem:[#allocation2 + $0xe0] sm:$0xf] %vm8707_vm8, %v2423_v15  ;;  %2450 = vrot.lane.b32.xlu1 %v8837_v13, %s5538_s9  ;;  %v2278_v23 = vrot.slane %v2277_v5, 4  ;;  %v2284_v48 = vrot.slane %v8840_v11, 4  ;;  %v8841_v4 = vshll.u32 %v6468_v62, 16  ;;  %v4657_v15 = vor.u32 %v5093_v30, %v4654_v50 }
 0x2e9   : > { %2724 = vst.msk [vmem:[#allocation2 + $0xf8] sm:$0xf] %vm8707_vm8, %v2628_v25  ;;  %2651 = vrot.lane.b32.xlu2 %v2271_v9, %s5538_s9  ;;  %v2281_v35 = vrot.slane %v8839_v31, 4  ;;  %v1485_v63 = vld [vmem:[#allocation2 + $0x1f0] sm:$0x1]  ;;  %v4649_v7 = vor.u32 %v5092_v49, %v4646_v27  ;;  %v1271_v30 = vsub.f32 1.0, %v1270_v29  ;;  %vm1275_vm8 = vweird.f32 %v8123_v47  ;;  %v8171_v49 = vpop.f32.mrf.mxu1 }
 0x2ea   : > { %v2907_v17 = vld [vmem:[#allocation2 + $0x1b4] sm:$0xf]  ;;  %2520 = vst [vmem:[#allocation2 + $0xcc] sm:$0xf] %v2519_v36  ;;  %v2285_v44 = vrot.slane %v8841_v4, 5  ;;  %v1280_v27 = vand.u32 2147483648, %v8081_v61 }
 0x2eb   : > { %v2908_v3 = vsel %vm6741_vm4, %v8039_v37, %v2907_v17  ;;  %1478 = vst [vmem:[#allocation2 + $0x1c8] sm:$0x1] %v1477_v39  ;;  %v2374_v37 = vsel %vm6741_vm4, %v8102_v22, %v2373_v54  ;;  %v2721_v18 = vld [vmem:[#allocation2 + $0xe4] sm:$0xf]  ;;  %v2952_v39 = vld [vmem:[%s6728_s17 + $0x68] sm:$0xf]  ;;  %v2282_v17 = vor.u32 %v2281_v35, %v8116_v43  ;;  %v1272_v6 = vmul.f32 %v8123_v47, %v1271_v30 }
 0x2ec   : > { %2909 = vst [vmem:[#allocation2 + $0x1b4] sm:$0xf] %v2908_v3  ;;  %v2626_v25 = vpop.permute.xlu1 %2625  ;;  %v3013_v36 = vpop.permute.xlu0 %3012  ;;  %v2286_v54 = vor.u32 %v2285_v44, %v2284_v48  ;;  %v4652_v50 = vld [vmem:[#allocation2 + $0x80] sm:$0xf]  ;;  %v2522_v4 = vld [vmem:[#allocation2 + $0xf4] sm:$0xf] }
 0x2ed   : > { %2372 = vst.msk [vmem:[#allocation2 + $0x20c] sm:$0xf] %vm1350_vm5, %v2271_v9  ;;  %v2722_v13 = vsel %vm7841_vm14, %v2626_v25, %v2721_v18  ;;  %v8176_v35 = vpop.f32.mrf.mxu3  ;;  %v1273_v11 = vadd.f32 %v8123_v47, %v1272_v6  ;;  %v8182_v48 = vpop.f32.mrf.mxu2  ;;  %v8186_v42 = vrot.slane %v2282_v17, 4  ;;  %v8845_v44 = vshrl.u32 %v6500_v8, 16  ;;  %v4666_v17 = vld [vmem:[#allocation2 + $0xb4] sm:$0xf0] }
 0x2ee   : > { %5057 = vmatmul.msk.bf16.gmra.mxu2 %vm8706_vm15, %v4661_v41  ;;  %2910 = vst.msk [vmem:[#allocation2 + $0x1c8] sm:$0xf] %vm1350_vm5, %v2271_v9  ;;  %v3019_v5 = vpop.permute.xlu2 %3018  ;;  %v8148_v9 = vsel %vm6700_vm11, %v2278_v23, %v8116_v43  ;;  %v1486_v41 = vsel %vm6993_vm6, 0, %v1485_v63  ;;  %vm8159_vm15 = vmor %vm1259_vm10, %vm1260_vm3  ;;  %v1278_v43 = vand.u32 2147483647, %v8081_v61  ;;  %vm1264_vm3 = vcmp.eq.f32.partialorder %v1263_v19, 8.507059e+37 }
 0x2ef   : > { %1631 = vst [vmem:[#allocation2 + $0x1dc] sm:$0x8] %v1630_v46  ;;  %3040 = vrot.lane.b32.xlu0 %v2951_v10, %s5538_s9  ;;  %v5095_v46 = vld [vmem:[#allocation2 + $0x90] sm:$0xf0]  ;;  %v1262_v3 = vsel %vm8159_vm15, %v8045_v52, %v1258_v40  ;;  %v1266_v23 = vor.u32 1.1754944e-38, %v1265_v59  ;;  %vm1274_vm15 = vweird.f32 %v8081_v61  ;;  %v2290_v63 = vrot.slane %v8845_v44, 4 }
 0x2f0   : > { %2375 = vst [vmem:[#allocation2 + $0x220] sm:$0xf] %v2374_v37  ;;  %2653 = vrot.lane.b32.xlu1 %v8102_v22, %s5538_s9  ;;  %v4653_v31 = vor.u32 %v5095_v46, %v4652_v50  ;;  %v2377_v52 = vld [vmem:[#allocation2 + $0x248] sm:$0xf]  ;;  %v8844_v37 = vshll.u32 %v6500_v8, 16  ;;  %vm1276_vm10 = vmor %vm1274_vm15, %vm1275_vm8  ;;  %v1281_v59 = vor.u32 1.1754944e-38, %v1280_v27 }
 0x2f1   : > { %4084 = vmatmul.bf16.gmra.mxu3 %v4649_v7  ;;  %3101 = vst.msk [vmem:[#allocation2 + $0x128] sm:$0xf] %vm8708_vm13, %v3019_v5  ;;  %3042 = vrot.lane.b32.xlu2 %v2952_v39, %s5538_s9  ;;  %v1494_v19 = vld [vmem:[#allocation2 + $0x218] sm:$0x1]  ;;  %v1267_v40 = vsel %vm1264_vm3, %v1266_v23, %v1262_v3  ;;  %v2287_v61 = vrot.slane %v2286_v54, 4  ;;  %vm8846_vm8 = vcmask 1043968   ;;  %v2378_v56 = vsel %vm6741_vm4, %v8186_v42, %v2377_v52 }
 0x2f2   : > { %4262 = vmatmul.bf16.gmra.mxu1 %v4657_v15  ;;  %2723 = vst [vmem:[#allocation2 + $0xe4] sm:$0xf] %v2722_v13  ;;  %v2288_v10 = vrot.slane %v8844_v37, 5  ;;  %v1277_v15 = vsel %vm1276_vm10, %v8123_v47, %v1273_v11  ;;  %v4680_v7 = vld [vmem:[#allocation2 + $0xb0] sm:$0xf]  ;;  %v1314_v30 = vmul.f32 %v1267_v40, %v7944_v32  ;;  %v1495_v32 = vsel %vm6993_vm6, 0, %v1494_v19 }
 0x2f3   : > { %3098 = vst.msk [vmem:[#allocation2 + $0xec] sm:$0xf] %vm8708_vm13, %v3013_v36  ;;  %vm1279_vm13 = vcmp.eq.f32.partialorder %v1278_v43, 8.507059e+37  ;;  %v5101_v18 = vld [vmem:[#allocation2 + $0xc0] sm:$0xf0]  ;;  %vm8848_vm3 = vcmask 785408  }
 0x2f4   : > { %1487 = vst [vmem:[#allocation2 + $0x1f0] sm:$0x1] %v1486_v41  ;;  %v2427_v36 = vpop.permute.xlu1 %2426  ;;  %v2425_v39 = vpop.permute.xlu0 %2424  ;;  %v1282_v5 = vsel %vm1279_vm13, %v1281_v59, %v1277_v15  ;;  %vm8847_vm13 = vmmov %vm8846_vm8  ;;  %v1647_v46 = vld [vmem:[#allocation2 + $0x22c] sm:$0x8]  ;;  %v5097_v41 = vld [vmem:[#allocation2 + $0xa4] sm:$0xf]  ;;  %v8223_v54 = vpack.c.bf16 %v1314_v30, %v1314_v30 }
 0x2f5   : > { %2376 = vst.msk [vmem:[#allocation2 + $0x234] sm:$0xf] %vm1350_vm5, %v8148_v9  ;;  %v2523_v13 = vsel %vm7855_vm9, %v2425_v39, %v2522_v4  ;;  %v5098_v27 = vld [vmem:[#allocation2 + $0xac] sm:$0xf]  ;;  %v8233_v43 = vpop.f32.mrf.mxu3  ;;  %v2381_v23 = vld [vmem:[#allocation2 + $0x270] sm:$0xf]  ;;  %v8237_v52 = vpop.f32.mrf.mxu2 }
 0x2f6   : > { %v2911_v29 = vld [vmem:[#allocation2 + $0x1dc] sm:$0xf]  ;;  %2914 = vst.msk [vmem:[#allocation2 + $0x1f0] sm:$0xf] %vm1350_vm5, %v8148_v9  ;;  %v2632_v47 = vpop.permute.xlu2 %2631  ;;  %v2953_v3 = vld [vmem:[%s6728_s17 + $0x6c] sm:$0xf] }
 0x2f7   : > { %v2912_v25 = vsel %vm6741_vm4, %v8102_v22, %v2911_v29  ;;  %1640 = vst [vmem:[#allocation2 + $0x204] sm:$0x8] %v1639_v16  ;;  %2452 = vrot.lane.b32.xlu0 %v7462_v60, %s5538_s9  ;;  %v1315_v22 = vmul.f32 %v1282_v5, %v8007_v57  ;;  %v2291_v16 = vor.u32 %v2290_v63, %v2288_v10  ;;  %v4674_v57 = vld [vmem:[#allocation2 + $0xbc] sm:$0xf0]  ;;  %v1648_v11 = vsel %vm6830_vm2, 0, %v1647_v46 }
 0x2f8   : > { %4173 = vmatmul.bf16.gmra.mxu0 %v4653_v31  ;;  %2913 = vst [vmem:[#allocation2 + $0x1dc] sm:$0xf] %v2912_v25  ;;  %2454 = vrot.lane.b32.xlu1 %v7206_v21, %s5538_s9  ;;  %v4681_v60 = vor.u32 %v5101_v18, %v4680_v7  ;;  %v8221_v21 = vsel %vm6700_vm11, %v2287_v61, %v2288_v10  ;;  %v2954_v10 = vld [vmem:[%s6728_s17 + $0x70] sm:$0xf]  ;;  %v2385_v44 = vshrl.u32 %v8223_v54, 16  ;;  %vm8849_vm15 = vcmask 781824  }
 0x2f9   : > { %2728 = vst.msk [vmem:[#allocation2 + $0x120] sm:$0xf] %vm8846_vm8, %v2632_v47  ;;  %2655 = vrot.lane.b32.xlu2 %v8148_v9, %s5538_s9  ;;  %v8225_v2 = vpack.c.bf16 %v1315_v22, %v1315_v22  ;;  %v8227_v9 = vpop.f32.mrf.mxu1  ;;  %v8230_v6 = vrot.slane %v2291_v16, 4  ;;  %v4669_v31 = vor.u32 %v5097_v41, %v4666_v17  ;;  %v4677_v4 = vor.u32 %v5098_v27, %v4674_v57  ;;  %v5100_v40 = vld [vmem:[#allocation2 + $0xb8] sm:$0xf0]  ;;  %vm8850_vm10 = vmmov %vm8849_vm15 }
 0x2fa   : > { %2525 = vst.msk [vmem:[#allocation2 + $0x108] sm:$0xf] %vm8847_vm13, %v2427_v36  ;;  %v1500_v61 = vld [vmem:[#allocation2 + $0x238] sm:$0x11]  ;;  %v4672_v15 = vld [vmem:[#allocation2 + $0xa8] sm:$0xf]  ;;  %vm8851_vm13 = vmmov %vm8846_vm8 }
 0x2fb   : > { %2524 = vst [vmem:[#allocation2 + $0xf4] sm:$0xf] %v2523_v13  ;;  %v2393_v63 = vshrl.u32 %v8225_v2, 16  ;;  %v2382_v59 = vsel %vm6741_vm4, %v8230_v6, %v2381_v23  ;;  %v2725_v7 = vld [vmem:[#allocation2 + $0x10c] sm:$0xf]  ;;  %v4673_v25 = vor.u32 %v5100_v40, %v4672_v15  ;;  %v2387_v36 = vrot.slane %v2385_v44, 7 }
 0x2fc   : > { %2379 = vst [vmem:[#allocation2 + $0x248] sm:$0xf] %v2378_v56  ;;  %v1501_v5 = vsel %vm6559_vm12, 0, %v1500_v61  ;;  %v2388_v47 = vshll.u32 %v8223_v54, 16  ;;  %v2396_v13 = vshll.u32 %v8225_v2, 16 }
 0x2fd   : > { %1496 = vst [vmem:[#allocation2 + $0x218] sm:$0x1] %v1495_v32  ;;  %v2395_v39 = vrot.slane %v2393_v63, 7  ;;  %v4700_v22 = vld [vmem:[#allocation2 + $0xd8] sm:$0xf]  ;;  %v8268_v16 = vpop.f32.mrf.mxu3  ;;  %v2391_v57 = vrot.slane %v2387_v36, 4  ;;  %v8274_v41 = vpop.f32.mrf.mxu2 }
 0x2fe   : > { %5058 = vmatmul.msk.bf16.gmra.mxu2 %vm8848_vm3, %v4681_v60  ;;  %v2915_v50 = vld [vmem:[#allocation2 + $0x204] sm:$0xf]  ;;  %2380 = vst.msk [vmem:[#allocation2 + $0x25c] sm:$0xf] %vm1350_vm5, %v8221_v21  ;;  %v3023_v19 = vpop.permute.xlu2 %3022  ;;  %v5106_v56 = vld [vmem:[#allocation2 + $0xe8] sm:$0xf0] }
 0x2ff   : > { %v2916_v37 = vsel %vm6741_vm4, %v8186_v42, %v2915_v50  ;;  %2918 = vst.msk [vmem:[#allocation2 + $0x218] sm:$0xf] %vm1350_vm5, %v8221_v21  ;;  %3044 = vrot.lane.b32.xlu0 %v2953_v3, %s5538_s9  ;;  %v1653_v32 = vld [vmem:[#allocation2 + $0x24c] sm:$0x88]  ;;  %v2398_v46 = vor.u32 %v2396_v13, %v2395_v39  ;;  %v2595_v27 = vrot.slane %v2388_v47, 5  ;;  %v2594_v3 = vrot.slane %v2385_v44, 4 }
 0x300   : > { %2917 = vst [vmem:[#allocation2 + $0x204] sm:$0xf] %v2916_v37  ;;  %2657 = vrot.lane.b32.xlu1 %v8186_v42, %s5538_s9  ;;  %v4701_v50 = vor.u32 %v5106_v56, %v4700_v22  ;;  %v2526_v23 = vld [vmem:[#allocation2 + $0x11c] sm:$0xf]  ;;  %v4694_v40 = vld [vmem:[#allocation2 + $0xe4] sm:$0xf0] }
 0x301   : > { %4089 = vmatmul.bf16.gmra.mxu3 %v4669_v31  ;;  %3103 = vst.msk [vmem:[#allocation2 + $0x150] sm:$0xf] %vm8849_vm15, %v3023_v19  ;;  %v3017_v29 = vpop.permute.xlu0 %3016  ;;  %3046 = vrot.lane.b32.xlu2 %v2954_v10, %s5538_s9  ;;  %v8266_v30 = vpop.f32.mrf.mxu1  ;;  %v4686_v19 = vld [vmem:[#allocation2 + $0xdc] sm:$0xf0]  ;;  %v8293_v44 = vsel %vm6715_vm0, %v2391_v57, %v2398_v46  ;;  %v4692_v22 = vld [vmem:[#allocation2 + $0xd0] sm:$0xf]  ;;  %vm8856_vm15 = vmmov %vm8848_vm3 }
 0x302   : > { %4267 = vmatmul.bf16.gmra.mxu1 %v4677_v4  ;;  %1649 = vst [vmem:[#allocation2 + $0x22c] sm:$0x8] %v1648_v11  ;;  %v2630_v18 = vpop.permute.xlu1 %2629  ;;  %v1654_v11 = vsel %vm6571_vm1, 0, %v1653_v32  ;;  %v5102_v4 = vld [vmem:[#allocation2 + $0xcc] sm:$0xf]  ;;  %v2600_v32 = vrot.slane %v2393_v63, 4 }
 0x303   : > { %3100 = vst.msk [vmem:[#allocation2 + $0x114] sm:$0xf] %vm8850_vm10, %v3017_v29  ;;  %v2726_v42 = vsel %vm7841_vm14, %v2630_v18, %v2725_v7  ;;  %v1503_v29 = vld [vmem:[#allocation2 + $0x240] sm:$0x1]  ;;  %v4689_v61 = vor.u32 %v5102_v4, %v4686_v19  ;;  %v5105_v18 = vld [vmem:[#allocation2 + $0xe0] sm:$0xf0] }
 0x304   : > { %2383 = vst [vmem:[#allocation2 + $0x270] sm:$0xf] %v2382_v59  ;;  %v2596_v59 = vor.u32 %v2595_v27, %v2594_v3  ;;  %v4693_v57 = vor.u32 %v5105_v18, %v4692_v22  ;;  %v1509_v27 = vld [vmem:[#allocation2 + $0x260] sm:$0x11]  ;;  %v1663_v19 = vsel %vm6571_vm1, 0, %v1662_v14 }
 0x305   : > { %2727 = vst [vmem:[#allocation2 + $0x10c] sm:$0xf] %v2726_v42  ;;  %v8314_v56 = vpop.f32.mrf.mxu2  ;;  %v1510_v63 = vsel %vm6559_vm12, 0, %v1509_v27  ;;  %vm8855_vm12 = vmmov %vm8846_vm8  ;;  %v2534_v27 = vld [vmem:[#allocation2 + $0x16c] sm:$0xf] }
 0x306   : > { %v2636_v60 = vpop.permute.xlu2 %2635  ;;  %1502 = vst [vmem:[#allocation2 + $0x238] sm:$0x11] %v1501_v5  ;;  %v2597_v39 = vrot.slane %v2596_v59, 4  ;;  %v8310_v5 = vpop.f32.mrf.mxu3  ;;  %v5108_v59 = vld [vmem:[#allocation2 + $0xfc] sm:$0xf] }
 0x307   : > { %2456 = vrot.lane.b32.xlu0 %v7598_v0, %s5538_s9  ;;  %2732 = vst.msk [vmem:[#allocation2 + $0x148] sm:$0xf] %vm8846_vm8, %v2636_v60  ;;  %v2598_v60 = vrot.slane %v2396_v13, 5 }
 0x308   : > { %4178 = vmatmul.bf16.gmra.mxu0 %v4673_v25  ;;  %2458 = vrot.lane.b32.xlu1 %v7379_v34, %s5538_s9  ;;  %2590 = vst.msk [vmem:[#allocation2 + $0x238] sm:$0xf] %vm1350_vm5, %v6468_v62  ;;  %v5103_v34 = vld [vmem:[#allocation2 + $0xd4] sm:$0xf] }
 0x309   : > { %v2919_v17 = vld [vmem:[#allocation2 + $0x22c] sm:$0xf]  ;;  %v2429_v0 = vpop.permute.xlu0 %2428  ;;  %2659 = vrot.lane.b32.xlu2 %v8221_v21, %s5538_s9  ;;  %v2390_v21 = vor.u32 %v2388_v47, %v2387_v36  ;;  %v2955_v62 = vld [vmem:[%s6728_s17 + $0x74] sm:$0xf]  ;;  %1655 = vst [vmem:[#allocation2 + $0x24c] sm:$0x88] %v1654_v11  ;;  %v4697_v7 = vor.u32 %v5103_v34, %v4694_v40  ;;  %v8304_v25 = vpop.f32.mrf.mxu1  ;;  %v2601_v13 = vor.u32 %v2600_v32, %v2598_v60 }
 0x30a   : > { %v2920_v31 = vsel %vm6741_vm4, %v8230_v6, %v2919_v17  ;;  %v2431_v37 = vpop.permute.xlu1 %2430  ;;  %v2527_v10 = vsel %vm7855_vm9, %v2429_v0, %v2526_v23  ;;  %2825 = vst.msk [vmem:[#allocation2 + $0x250] sm:$0xf] %vm1350_vm5, %v8293_v44  ;;  %v1504_v36 = vsel %vm6993_vm6, 0, %v1503_v29  ;;  %v1656_v47 = vld [vmem:[#allocation2 + $0x254] sm:$0x8]  ;;  %v8325_v17 = vsel %vm6700_vm11, %v2597_v39, %v2598_v60  ;;  %vm8854_vm11 = vmmov %vm8846_vm8 }
 0x30b   : > { %2921 = vst [vmem:[#allocation2 + $0x22c] sm:$0xf] %v2920_v31  ;;  %v1657_v3 = vsel %vm6830_vm2, 0, %v1656_v47  ;;  %v5111_v23 = vld [vmem:[#allocation2 + $0x110] sm:$0xf0]  ;;  %v2602_v55 = vrot.slane %v2601_v13, 4 }
 0x30c   : > { %2529 = vst.msk [vmem:[#allocation2 + $0x130] sm:$0xf] %vm8851_vm13, %v2431_v37  ;;  %v2530_v34 = vld [vmem:[#allocation2 + $0x144] sm:$0xf]  ;;  %v4706_v40 = vld [vmem:[#allocation2 + $0x104] sm:$0xf0] }
 0x30d   : > { %2528 = vst [vmem:[#allocation2 + $0x11c] sm:$0xf] %v2527_v10  ;;  %v2822_v15 = vld [vmem:[#allocation2 + $0x23c] sm:$0xf]  ;;  %v4714_v29 = vld [vmem:[#allocation2 + $0x10c] sm:$0xf0] }
 0x30e   : > { %5059 = vmatmul.msk.bf16.gmra.mxu2 %vm8848_vm3, %v4701_v50  ;;  %v2823_v53 = vsel %vm6659_vm7, %v2390_v21, %v2822_v15  ;;  %2591 = vst.msk [vmem:[#allocation2 + $0x24c] sm:$0xf] %vm1350_vm5, %v6500_v8  ;;  %v3027_v42 = vpop.permute.xlu2 %3026  ;;  %vm8852_vm7 = vmmov %vm8850_vm10  ;;  %v4720_v50 = vld [vmem:[#allocation2 + $0x100] sm:$0xf]  ;;  %v2956_v15 = vld [vmem:[%s6728_s17 + $0x78] sm:$0xf]  ;;  %v4717_v51 = vor.u32 %v5108_v59, %v4714_v29 }
 0x30f   : > { %3048 = vrot.lane.b32.xlu0 %v2955_v62, %s5538_s9  ;;  %2824 = vst [vmem:[#allocation2 + $0x23c] sm:$0xf] %v2823_v53  ;;  %vm8853_vm0 = vmmov %vm8852_vm7  ;;  %v4721_v31 = vor.u32 %v5111_v23, %v4720_v50  ;;  %v8344_v62 = vpop.f32.mrf.mxu3  ;;  %v5110_v18 = vld [vmem:[#allocation2 + $0x108] sm:$0xf0]  ;;  %v4712_v39 = vld [vmem:[#allocation2 + $0xf8] sm:$0xf] }
 0x310   : > { %2661 = vrot.lane.b32.xlu1 %v8230_v6, %s5538_s9  ;;  %3105 = vst.msk [vmem:[#allocation2 + $0x178] sm:$0xf] %vm8852_vm7, %v3027_v42  ;;  %vm8857_vm1 = vmmov %vm8853_vm0  ;;  %v4740_v60 = vld [vmem:[#allocation2 + $0x128] sm:$0xf]  ;;  %v5113_v50 = vld [vmem:[#allocation2 + $0x124] sm:$0xf] }
 0x311   : > { %4094 = vmatmul.bf16.gmra.mxu3 %v4689_v61  ;;  %v3021_v8 = vpop.permute.xlu0 %3020  ;;  %2460 = vrot.lane.b32.xlu2 %v2390_v21, %s5538_s9  ;;  %1505 = vst [vmem:[#allocation2 + $0x240] sm:$0x1] %v1504_v36  ;;  %v8338_v10 = vpop.f32.mrf.mxu1  ;;  %v5107_v21 = vld [vmem:[#allocation2 + $0xf4] sm:$0xf]  ;;  %vm8858_vm10 = vmmov %vm8853_vm0  ;;  %v4732_v59 = vld [vmem:[#allocation2 + $0x120] sm:$0xf] }
 0x312   : > { %4272 = vmatmul.bf16.gmra.mxu1 %v4697_v7  ;;  %v2634_v6 = vpop.permute.xlu1 %2633  ;;  %3102 = vst.msk [vmem:[#allocation2 + $0x13c] sm:$0xf] %vm8853_vm0, %v3021_v8  ;;  %v8347_v61 = vpop.f32.mrf.mxu2  ;;  %v4709_v7 = vor.u32 %v5107_v21, %v4706_v40  ;;  %vm8862_vm13 = vmmov %vm8853_vm0  ;;  %v2737_v29 = vld [vmem:[#allocation2 + $0x184] sm:$0xf] }
 0x313   : > { %v2730_v46 = vsel %vm7841_vm14, %v2634_v6, %v2729_v33  ;;  %2922 = vst.msk [vmem:[#allocation2 + $0x240] sm:$0xf] %vm1350_vm5, %v8325_v17  ;;  %v2733_v33 = vld [vmem:[#allocation2 + $0x15c] sm:$0xf]  ;;  %v4726_v14 = vld [vmem:[#allocation2 + $0x12c] sm:$0xf0] }
 0x314   : > { %2731 = vst [vmem:[#allocation2 + $0x134] sm:$0xf] %v2730_v46 }
 0x315   : > { %1658 = vst [vmem:[#allocation2 + $0x254] sm:$0x8] %v1657_v3 }
 0x316   : > { %v2640_v0 = vpop.permute.xlu2 %2639  ;;  %1511 = vst [vmem:[#allocation2 + $0x260] sm:$0x11] %v1510_v63  ;;  %v5112_v63 = vld [vmem:[#allocation2 + $0x11c] sm:$0xf] }
 0x317   : > { %2828 = vrot.lane.b32.xlu0 %v8223_v54, %s5538_s9  ;;  %2736 = vst.msk [vmem:[#allocation2 + $0x170] sm:$0xf] %vm8854_vm11, %v2640_v0  ;;  %v8368_v1 = vpop.f32.mrf.mxu3 }
 0x318   : > { %4183 = vmatmul.bf16.gmra.mxu0 %v4693_v57  ;;  %2830 = vrot.lane.b32.xlu1 %v8225_v2, %s5538_s9  ;;  %2592 = vst.msk [vmem:[#allocation2 + $0x260] sm:$0xf] %vm1350_vm5, %v8223_v54 }
 0x319   : > { %v2433_v37 = vpop.permute.xlu0 %2432  ;;  %1664 = vst [vmem:[#allocation2 + $0x274] sm:$0x88] %v1663_v19  ;;  %v8366_v22 = vpop.f32.mrf.mxu1  ;;  %v5116_v32 = vld [vmem:[#allocation2 + $0x138] sm:$0xf0] }
 0x31a   : > { %v2435_v11 = vpop.permute.xlu1 %2434  ;;  %v2531_v4 = vsel %vm7855_vm9, %v2433_v37, %v2530_v34  ;;  %2593 = vst.msk [vmem:[#allocation2 + $0x274] sm:$0xf] %vm1350_vm5, %v8225_v2  ;;  %v8370_v6 = vpop.f32.mrf.mxu2  ;;  %v4741_v46 = vor.u32 %v5116_v32, %v4740_v60  ;;  %vm8859_vm5 = vmmov %vm8846_vm8  ;;  %v4729_v37 = vor.u32 %v5112_v63, %v4726_v14  ;;  %v8412_v14 = vld [vmem:[%s8643_s6] ss:$0 sm:$0xff] }
 0x31b   : > { %2533 = vst.msk [vmem:[#allocation2 + $0x158] sm:$0xf] %vm8855_vm12, %v2435_v11  ;;  %vm8861_vm8 = vmmov %vm8848_vm3 }
 0x31c   : > { %2532 = vst [vmem:[#allocation2 + $0x144] sm:$0xf] %v2531_v4  ;;  %v2923_v53 = vld [vmem:[#allocation2 + $0x254] sm:$0xf]  ;;  %vm8863_vm3 = vmmov %vm8853_vm0 }
 0x31d   : > { %v2924_v36 = vsel %vm6741_vm4, %v2602_v55, %v2923_v53  ;;  %vm8860_vm4 = vmmov %vm8859_vm5 }
 0x31e   : > { %5060 = vmatmul.msk.bf16.gmra.mxu2 %vm8856_vm15, %v4721_v31  ;;  %v3031_v42 = vpop.permute.xlu2 %3030  ;;  %2925 = vst [vmem:[#allocation2 + $0x254] sm:$0xf] %v2924_v36  ;;  %v4734_v31 = vld [vmem:[#allocation2 + $0x134] sm:$0xf0]  ;;  %vm8864_vm7 = vmmov %vm8860_vm4 }
 0x31f   : > { %2462 = vrot.lane.b32.xlu0 %v8293_v44, %s5538_s9  ;;  %3107 = vst.msk [vmem:[#allocation2 + $0x1a0] sm:$0xf] %vm8857_vm1, %v3031_v42  ;;  %v4713_v44 = vor.u32 %v5110_v18, %v4712_v39  ;;  %v4737_v11 = vor.u32 %v5113_v50, %v4734_v31  ;;  %v8386_v4 = vpop.f32.mrf.mxu3  ;;  %v4760_v42 = vld [vmem:[#allocation2 + $0x150] sm:$0xf]  ;;  %vm8865_vm0 = vmmov %vm8860_vm4  ;;  %v4754_v50 = vld [vmem:[#allocation2 + $0x15c] sm:$0xf0] }
 0x320   : > { %3050 = vrot.lane.b32.xlu1 %v2956_v15, %s5538_s9  ;;  %vm8866_vm11 = vmmov %vm8861_vm8 }
 0x321   : > { %4099 = vmatmul.bf16.gmra.mxu3 %v4709_v7  ;;  %v3025_v54 = vpop.permute.xlu0 %3024  ;;  %vm8867_vm12 = vmmov %vm8857_vm1 }
 0x322   : > { %4277 = vmatmul.bf16.gmra.mxu1 %v4717_v51  ;;  %v2638_v8 = vpop.permute.xlu1 %2637  ;;  %3104 = vst.msk [vmem:[#allocation2 + $0x164] sm:$0xf] %vm8858_vm10, %v3025_v54  ;;  %vm8868_vm15 = vmmov %vm8857_vm1 }
 0x323   : > { %v2734_v2 = vsel %vm7841_vm14, %v2638_v8, %v2733_v33  ;;  %vm8869_vm1 = vmmov %vm8865_vm0 }
 0x324   : > { %2735 = vst [vmem:[#allocation2 + $0x15c] sm:$0xf] %v2734_v2  ;;  %vm8870_vm10 = vmmov %vm8865_vm0 }
 0x325   : > { %v8364_v47 = vpop.f32.mrf.mxu0 }
 0x326   : > { %v2644_v57 = vpop.permute.xlu2 %2643 }
 0x327   : > { %2665 = vrot.lane.b32.xlu0 %v2602_v55, %s5538_s9  ;;  %2740 = vst.msk [vmem:[#allocation2 + $0x198] sm:$0xf] %vm8859_vm5, %v2644_v57  ;;  %v5115_v55 = vld [vmem:[#allocation2 + $0x130] sm:$0xf0]  ;;  %v8400_v33 = vpop.f32.mrf.mxu3  ;;  %v5117_v57 = vld [vmem:[#allocation2 + $0x144] sm:$0xf] }
 0x328   : > { %4188 = vmatmul.bf16.gmra.mxu0 %v4713_v44  ;;  %2663 = vrot.lane.b32.xlu1 %v8325_v17, %s5538_s9  ;;  %v2957_v17 = vld [vmem:[%s6728_s17 + $0x7c] sm:$0xf]  ;;  %v4733_v7 = vor.u32 %v5115_v55, %v4732_v59  ;;  %v2538_v44 = vld [vmem:[#allocation2 + $0x194] sm:$0xf]  ;;  %v3982_v55 = vadd.f32 %v8412_v14, %v8364_v47  ;;  %vm8871_vm5 = vcmask 523264  }
 0x329   : > { %v2437_v3 = vpop.permute.xlu0 %2436  ;;  %3052 = vrot.lane.b32.xlu2 %v2957_v17, %s5538_s9  ;;  %v5121_v36 = vld [vmem:[#allocation2 + $0x160] sm:$0xf0]  ;;  %s5490_s9 = scalar_lea.hbm %s5489_s22, 256 }
 0x32a   : > { %v2439_v23 = vpop.permute.xlu1 %2438  ;;  %v2535_v13 = vsel %vm7855_vm9, %v2437_v3, %v2534_v27  ;;  %v4761_v8 = vor.u32 %v5121_v36, %v4760_v42  ;;  %v5118_v3 = vld [vmem:[#allocation2 + $0x14c] sm:$0xf]  ;;  %p5491_p11 = scmp.ne.s32.totalorder %s5489_s22, %s5490_s9  ;;  %p5496_p1 = scmp.lt.s32.totalorder %s5494_s23, %s5490_s9 }
 0x32b   : > { %2537 = vst.msk [vmem:[#allocation2 + $0x180] sm:$0xf] %vm8860_vm4, %v2439_v23  ;;  %v4757_v63 = vor.u32 %v5118_v3, %v4754_v50  ;;  %v5120_v31 = vld [vmem:[#allocation2 + $0x158] sm:$0xf0]  ;;  %vm8872_vm4 = vmmov %vm8861_vm8 }
 0x32c   : > { %2536 = vst [vmem:[#allocation2 + $0x16c] sm:$0xf] %v2535_v13  ;;  %p5492_p12 = pnand %p5491_p11, %p5620_p5  ;;  %p5497_p2 = por %p5496_p1, %p5495_p0 }
 0x32d   : > { %v8379_v0 = vpop.f32.mrf.mxu0 }
 0x32e   : > { %5061 = vmatmul.msk.bf16.gmra.mxu2 %vm8861_vm8, %v4741_v46  ;;  %v3035_v21 = vpop.permute.xlu2 %3034  ;;  %v4746_v46 = vld [vmem:[#allocation2 + $0x154] sm:$0xf0]  ;;  %v3984_v3 = vadd.f32 %v8412_v14, %v8379_v0  ;;  %vm8873_vm8 = vmmov %vm8863_vm3  ;;  %p5493_p13 = pneg %p5492_p12 }
 0x32f   : > { %v8384_v34 = vpop.f32.mrf.mxu1  ;;  %3109 = vst.msk [vmem:[#allocation2 + $0x1c8] sm:$0xf] %vm8862_vm13, %v3035_v21  ;;  %v4749_v13 = vor.u32 %v5117_v57, %v4746_v46  ;;  %v4752_v21 = vld [vmem:[#allocation2 + $0x148] sm:$0xf]  ;;  %v2542_v57 = vld [vmem:[#allocation2 + $0x1bc] sm:$0xf]  ;;  %vm8874_vm13 = vmmov %vm8863_vm3 }
 0x330   : > { %p5498_p3 = pnand %p5497_p2, %p5493_p13 }
 0x331   : > { %4104 = vmatmul.bf16.gmra.mxu3 %v4729_v37  ;;  %v8388_v19 = vpop.f32.mrf.mxu2  ;;  %v3029_v40 = vpop.permute.xlu0 %3028 }
 0x332   : > { %4282 = vmatmul.bf16.gmra.mxu1 %v4737_v11  ;;  %v2642_v15 = vpop.permute.xlu1 %2641  ;;  %3106 = vst.msk [vmem:[#allocation2 + $0x18c] sm:$0xf] %vm8863_vm3, %v3029_v40  ;;  %v2741_v40 = vld [vmem:[#allocation2 + $0x1ac] sm:$0xf]  ;;  %vm8875_vm3 = vmmov %vm8871_vm5 }
 0x333   : > { %v2738_v51 = vsel %vm7841_vm14, %v2642_v15, %v2737_v29  ;;  %v4753_v29 = vor.u32 %v5120_v31, %v4752_v21  ;;  %v4774_v21 = vld [vmem:[#allocation2 + $0x184] sm:$0xf0] }
 0x334   : > { %2739 = vst [vmem:[#allocation2 + $0x184] sm:$0xf] %v2738_v51 }
 0x335   : > { %v8394_v53 = vpop.f32.mrf.mxu0 }
 0x336   : > { %v2648_v39 = vpop.permute.xlu2 %2647 }
 0x337   : > { %v8396_v18 = vpop.f32.mrf.mxu1  ;;  %2744 = vst.msk [vmem:[#allocation2 + $0x1c0] sm:$0xf] %vm8864_vm7, %v2648_v39  ;;  %vm8876_vm7 = vmmov %vm8865_vm0 }
 0x338   : > { %4193 = vmatmul.bf16.gmra.mxu0 %v4733_v7 }
 0x339   : > { %v8398_v54 = vpop.f32.mrf.mxu2  ;;  %v2441_v2 = vpop.permute.xlu0 %2440  ;;  %v5126_v47 = vld [vmem:[#allocation2 + $0x188] sm:$0xf0] }
 0x33a   : > { %v2443_v60 = vpop.permute.xlu1 %2442  ;;  %v2539_v32 = vsel %vm7855_vm9, %v2441_v2, %v2538_v44 }
 0x33b   : > { %2541 = vst.msk [vmem:[#allocation2 + $0x1a8] sm:$0xf] %vm8865_vm0, %v2443_v60 }
 0x33c   : > { %2540 = vst [vmem:[#allocation2 + $0x194] sm:$0xf] %v2539_v32 }
 0x33d   : > { %v8406_v27 = vpop.f32.mrf.mxu0 }
 0x33e   : > { %5062 = vmatmul.msk.bf16.gmra.mxu2 %vm8866_vm11, %v4761_v8  ;;  %v3039_v37 = vpop.permute.xlu2 %3038  ;;  %v4780_v8 = vld [vmem:[#allocation2 + $0x178] sm:$0xf]  ;;  %vm8877_vm11 = vmmov %vm8875_vm3 }
 0x33f   : > { %v4248_v23 = vpop.f32.mrf.mxu1  ;;  %3111 = vst.msk [vmem:[#allocation2 + $0x1f0] sm:$0xf] %vm8867_vm12, %v3039_v37  ;;  %v4781_v32 = vor.u32 %v5126_v47, %v4780_v8  ;;  %v5122_v37 = vld [vmem:[#allocation2 + $0x16c] sm:$0xf]  ;;  %v3987_v8 = vadd.f32 %v8412_v14, %v8394_v53  ;;  %vm8878_vm12 = vmmov %vm8872_vm4 }
 0x341   : > { %4109 = vmatmul.bf16.gmra.mxu3 %v4749_v13  ;;  %v4337_v17 = vpop.f32.mrf.mxu2  ;;  %v3033_v11 = vpop.permute.xlu0 %3032 }
 0x342   : > { %4287 = vmatmul.bf16.gmra.mxu1 %v4757_v63  ;;  %v2646_v59 = vpop.permute.xlu1 %2645  ;;  %3108 = vst.msk [vmem:[#allocation2 + $0x1b4] sm:$0xf] %vm8868_vm15, %v3033_v11  ;;  %v4766_v11 = vld [vmem:[#allocation2 + $0x17c] sm:$0xf0]  ;;  %vm8879_vm15 = vmmov %vm8873_vm8 }
 0x343   : > { %v2742_v7 = vsel %vm7841_vm14, %v2646_v59, %v2741_v40  ;;  %v5123_v40 = vld [vmem:[#allocation2 + $0x174] sm:$0xf]  ;;  %v4769_v59 = vor.u32 %v5122_v37, %v4766_v11 }
 0x344   : > { %v4070_v15 = vpop.f32.mrf.mxu3  ;;  %2743 = vst [vmem:[#allocation2 + $0x1ac] sm:$0xf] %v2742_v7  ;;  %v5125_v7 = vld [vmem:[#allocation2 + $0x180] sm:$0xf0] }
 0x345   : > { %v4159_v51 = vpop.f32.mrf.mxu0  ;;  %v4071_v42 = vadd.f32 %v4070_v15, %v3982_v55 }
 0x346   : > { %v2652_v60 = vpop.permute.xlu2 %2651 }
 0x347   : > { %v4160_v36 = vadd.f32 %v4159_v51, %v4071_v42  ;;  %v4250_v39 = vpop.f32.mrf.mxu1  ;;  %2748 = vst.msk [vmem:[#allocation2 + $0x1e8] sm:$0xf] %vm8869_vm1, %v2652_v60  ;;  %v2745_v60 = vld [vmem:[#allocation2 + $0x1d4] sm:$0xf]  ;;  %vm8880_vm1 = vmmov %vm8873_vm8 }
 0x348   : > { %4198 = vmatmul.bf16.gmra.mxu0 %v4753_v29  ;;  %v4777_v29 = vor.u32 %v5123_v40, %v4774_v21 }
 0x349   : > { %v4249_v44 = vadd.f32 %v4248_v23, %v4160_v36  ;;  %v4339_v2 = vpop.f32.mrf.mxu2  ;;  %v2445_v46 = vpop.permute.xlu0 %2444  ;;  %v5131_v53 = vld [vmem:[#allocation2 + $0x1b0] sm:$0xf0] }
 0x34a   : > { %v2447_v13 = vpop.permute.xlu1 %2446  ;;  %v2543_v63 = vsel %vm7855_vm9, %v2445_v46, %v2542_v57 }
 0x34b   : > { %v4338_v50 = vadd.f32 %v4337_v17, %v4249_v44  ;;  %2545 = vst.msk [vmem:[#allocation2 + $0x1d0] sm:$0xf] %vm8870_vm10, %v2447_v13  ;;  %v4772_v44 = vld [vmem:[#allocation2 + $0x170] sm:$0xf]  ;;  %vm8881_vm10 = vmmov %vm8875_vm3 }
 0x34c   : > { %v4072_v31 = vpop.f32.mrf.mxu3  ;;  %2544 = vst [vmem:[#allocation2 + $0x1bc] sm:$0xf] %v2543_v63  ;;  %v4773_v57 = vor.u32 %v5125_v7, %v4772_v44  ;;  %v5127_v7 = vld [vmem:[#allocation2 + $0x194] sm:$0xf] }
 0x34d   : > { %4417 = vst.msk [vmem:[%s8429_s21] sm:$0xff] %vm8871_vm5, %v4338_v50  ;;  %v4161_v23 = vpop.f32.mrf.mxu0  ;;  %v4073_v55 = vadd.f32 %v4072_v31, %v3984_v3  ;;  %v4800_v31 = vld [vmem:[#allocation2 + $0x1a0] sm:$0xf]  ;;  %vm8882_vm5 = vmmov %vm8865_vm0 }
 0x34e   : > { %5063 = vmatmul.msk.bf16.gmra.mxu2 %vm8872_vm4, %v4781_v32  ;;  %v3043_v42 = vpop.permute.xlu2 %3042  ;;  %vm8883_vm4 = vmmov %vm8865_vm0 }
 0x34f   : > { %v4162_v0 = vadd.f32 %v4161_v23, %v4073_v55  ;;  %v4253_v17 = vpop.f32.mrf.mxu1  ;;  %3113 = vst.msk [vmem:[#allocation2 + $0x218] sm:$0xf] %vm8873_vm8, %v3043_v42  ;;  %v4801_v23 = vor.u32 %v5131_v53, %v4800_v31  ;;  %v2546_v55 = vld [vmem:[#allocation2 + $0x1e4] sm:$0xf]  ;;  %v4786_v42 = vld [vmem:[#allocation2 + $0x1a4] sm:$0xf0]  ;;  %vm8884_vm8 = vmmov %vm8875_vm3 }
 0x350   : > { %v4789_v44 = vor.u32 %v5127_v7, %v4786_v42  ;;  %v4792_v31 = vld [vmem:[#allocation2 + $0x198] sm:$0xf]  ;;  %v2749_v53 = vld [vmem:[#allocation2 + $0x1fc] sm:$0xf]  ;;  %v2550_v42 = vld [vmem:[#allocation2 + $0x20c] sm:$0xf] }
 0x351   : > { %v4251_v15 = vadd.f32 %v4250_v39, %v4162_v0  ;;  %4114 = vmatmul.bf16.gmra.mxu3 %v4769_v59  ;;  %v4342_v51 = vpop.f32.mrf.mxu2  ;;  %v3037_v36 = vpop.permute.xlu0 %3036  ;;  %v3989_v0 = vadd.f32 %v8412_v14, %v8406_v27 }
 0x352   : > { %4292 = vmatmul.bf16.gmra.mxu1 %v4777_v29  ;;  %v2650_v32 = vpop.permute.xlu1 %2649  ;;  %3110 = vst.msk [vmem:[#allocation2 + $0x1dc] sm:$0xf] %vm8874_vm13, %v3037_v36  ;;  %vm8885_vm13 = vmmov %vm8878_vm12 }
 0x353   : > { %v4340_v47 = vadd.f32 %v4339_v2, %v4251_v15  ;;  %v2746_v46 = vsel %vm7841_vm14, %v2650_v32, %v2745_v60 }
 0x354   : > { %v4075_v39 = vpop.f32.mrf.mxu3  ;;  %2747 = vst [vmem:[#allocation2 + $0x1d4] sm:$0xf] %v2746_v46 }
 0x355   : > { %4418 = vst.msk [vmem:[%s8429_s21 + $0x8] sm:$0xff] %vm8875_vm3, %v4340_v47  ;;  %v4164_v3 = vpop.f32.mrf.mxu0  ;;  %v4076_v50 = vadd.f32 %v4075_v39, %v3987_v8  ;;  %v4794_v8 = vld [vmem:[#allocation2 + $0x1ac] sm:$0xf0]  ;;  %vm8886_vm3 = vmmov %vm8880_vm1 }
 0x356   : > { %v2656_v11 = vpop.permute.xlu2 %2655 }
 0x357   : > { %v4165_v13 = vadd.f32 %v4164_v3, %v4076_v50  ;;  %v4255_v63 = vpop.f32.mrf.mxu1  ;;  %2752 = vst.msk [vmem:[#allocation2 + $0x210] sm:$0xf] %vm8876_vm7, %v2656_v11  ;;  %v3992_v50 = vadd.f32 %v8412_v14, %v8171_v49  ;;  %vm8887_vm7 = vmmov %vm8884_vm8 }
 0x358   : > { %4203 = vmatmul.bf16.gmra.mxu0 %v4773_v57  ;;  %v5130_v57 = vld [vmem:[#allocation2 + $0x1a8] sm:$0xf0] }
 0x359   : > { %v4254_v2 = vadd.f32 %v4253_v17, %v4165_v13  ;;  %v4344_v37 = vpop.f32.mrf.mxu2  ;;  %v2449_v21 = vpop.permute.xlu0 %2448  ;;  %v4793_v11 = vor.u32 %v5130_v57, %v4792_v31  ;;  %v5136_v49 = vld [vmem:[#allocation2 + $0x1d8] sm:$0xf0] }
 0x35a   : > { %v2451_v59 = vpop.permute.xlu1 %2450  ;;  %v2547_v29 = vsel %vm7855_vm9, %v2449_v21, %v2546_v55 }
 0x35b   : > { %v4343_v40 = vadd.f32 %v4342_v51, %v4254_v2  ;;  %2549 = vst.msk [vmem:[#allocation2 + $0x1f8] sm:$0xf] %vm8865_vm0, %v2451_v59  ;;  %v5128_v51 = vld [vmem:[#allocation2 + $0x19c] sm:$0xf]  ;;  %v4820_v59 = vld [vmem:[#allocation2 + $0x1c8] sm:$0xf] }
 0x35c   : > { %v4077_v15 = vpop.f32.mrf.mxu3  ;;  %2548 = vst [vmem:[#allocation2 + $0x1e4] sm:$0xf] %v2547_v29  ;;  %v4797_v60 = vor.u32 %v5128_v51, %v4794_v8  ;;  %v4821_v7 = vor.u32 %v5136_v49, %v4820_v59  ;;  %v4812_v59 = vld [vmem:[#allocation2 + $0x1c0] sm:$0xf]  ;;  %v2753_v49 = vld [vmem:[#allocation2 + $0x224] sm:$0xf] }
 0x35d   : > { %4419 = vst.msk [vmem:[%s8429_s21 + $0x10] sm:$0xff] %vm8877_vm11, %v4343_v40  ;;  %v4166_v17 = vpop.f32.mrf.mxu0  ;;  %v4078_v36 = vadd.f32 %v4077_v15, %v3989_v0  ;;  %vm8888_vm11 = vmmov %vm8887_vm7 }
 0x35e   : > { %5064 = vmatmul.msk.bf16.gmra.mxu2 %vm8878_vm12, %v4801_v23  ;;  %v3047_v46 = vpop.permute.xlu2 %3046 }
 0x35f   : > { %v4167_v47 = vadd.f32 %v4166_v17, %v4078_v36  ;;  %v4258_v27 = vpop.f32.mrf.mxu1  ;;  %3115 = vst.msk [vmem:[#allocation2 + $0x240] sm:$0xf] %vm8879_vm15, %v3047_v46  ;;  %v3994_v36 = vadd.f32 %v8412_v14, %v8227_v9  ;;  %v5133_v46 = vld [vmem:[#allocation2 + $0x1c4] sm:$0xf]  ;;  %vm8890_vm15 = vmmov %vm8887_vm7 }
 0x361   : > { %v4256_v32 = vadd.f32 %v4255_v63, %v4167_v47  ;;  %4119 = vmatmul.bf16.gmra.mxu3 %v4789_v44  ;;  %v4347_v39 = vpop.f32.mrf.mxu2  ;;  %v3041_v3 = vpop.permute.xlu0 %3040 }
 0x362   : > { %4297 = vmatmul.bf16.gmra.mxu1 %v4797_v60  ;;  %v2654_v2 = vpop.permute.xlu1 %2653  ;;  %3112 = vst.msk [vmem:[#allocation2 + $0x204] sm:$0xf] %vm8880_vm1, %v3041_v3  ;;  %v5132_v60 = vld [vmem:[#allocation2 + $0x1bc] sm:$0xf] }
 0x363   : > { %v4345_v13 = vadd.f32 %v4344_v37, %v4256_v32  ;;  %v2750_v23 = vsel %vm7841_vm14, %v2654_v2, %v2749_v53  ;;  %v4806_v32 = vld [vmem:[#allocation2 + $0x1cc] sm:$0xf0]  ;;  %v5135_v53 = vld [vmem:[#allocation2 + $0x1d0] sm:$0xf0] }
 0x364   : > { %v4080_v63 = vpop.f32.mrf.mxu3  ;;  %2751 = vst [vmem:[#allocation2 + $0x1fc] sm:$0xf] %v2750_v23 }
 0x365   : > { %4420 = vst.msk [vmem:[%s8429_s21 + $0x18] sm:$0xff] %vm8881_vm10, %v4345_v13  ;;  %v4169_v55 = vpop.f32.mrf.mxu0  ;;  %v4081_v21 = vadd.f32 %v4080_v63, %v3992_v50  ;;  %v4809_v50 = vor.u32 %v5132_v60, %v4806_v32  ;;  %v2554_v60 = vld [vmem:[#allocation2 + $0x234] sm:$0xf]  ;;  %vm8892_vm10 = vmmov %vm8865_vm0 }
 0x366   : > { %v2660_v15 = vpop.permute.xlu2 %2659 }
 0x367   : > { %v4170_v0 = vadd.f32 %v4169_v55, %v4081_v21  ;;  %v4260_v40 = vpop.f32.mrf.mxu1  ;;  %2756 = vst.msk [vmem:[#allocation2 + $0x238] sm:$0xf] %vm8882_vm5, %v2660_v15  ;;  %v3997_v21 = vadd.f32 %v8412_v14, %v8266_v30  ;;  %v4840_v30 = vld [vmem:[#allocation2 + $0x1f0] sm:$0xf]  ;;  %vm8893_vm5 = vmmov %vm8887_vm7 }
 0x368   : > { %4208 = vmatmul.bf16.gmra.mxu0 %v4793_v11  ;;  %v2558_v11 = vld [vmem:[#allocation2 + $0x25c] sm:$0xf] }
 0x369   : > { %v4259_v37 = vadd.f32 %v4258_v27, %v4170_v0  ;;  %v4349_v29 = vpop.f32.mrf.mxu2  ;;  %v2453_v17 = vpop.permute.xlu0 %2452 }
 0x36a   : > { %v2455_v47 = vpop.permute.xlu1 %2454  ;;  %v2551_v51 = vsel %vm7855_vm9, %v2453_v17, %v2550_v42 }
 0x36b   : > { %v4348_v8 = vadd.f32 %v4347_v39, %v4259_v37  ;;  %2553 = vst.msk [vmem:[#allocation2 + $0x220] sm:$0xf] %vm8883_vm4, %v2455_v47  ;;  %v4814_v39 = vld [vmem:[#allocation2 + $0x1d4] sm:$0xf0]  ;;  %vm8894_vm4 = vmmov %vm8878_vm12 }
 0x36c   : > { %v4082_v44 = vpop.f32.mrf.mxu3  ;;  %2552 = vst [vmem:[#allocation2 + $0x20c] sm:$0xf] %v2551_v51  ;;  %v4817_v13 = vor.u32 %v5133_v46, %v4814_v39 }
 0x36d   : > { %4421 = vst.msk [vmem:[%s8429_s21 + $0x20] sm:$0xff] %vm8884_vm8, %v4348_v8  ;;  %v4171_v27 = vpop.f32.mrf.mxu0  ;;  %v4083_v57 = vadd.f32 %v4082_v44, %v3994_v36  ;;  %vm8895_vm8 = vmmov %vm8886_vm3 }
 0x36e   : > { %5065 = vmatmul.msk.bf16.gmra.mxu2 %vm8885_vm13, %v4821_v7  ;;  %v2461_v63 = vpop.permute.xlu2 %2460  ;;  %vm8898_vm13 = vmmov %vm8893_vm5 }
 0x36f   : > { %v4172_v3 = vadd.f32 %v4171_v27, %v4083_v57  ;;  %v4263_v9 = vpop.f32.mrf.mxu1  ;;  %v2559_v23 = vsel %vm7855_vm9, %v2461_v63, %v2558_v11  ;;  %v3999_v27 = vadd.f32 %v8412_v14, %v8304_v25 }
 0x370   : > { %2560 = vst [vmem:[#allocation2 + $0x25c] sm:$0xf] %v2559_v23 }
 0x371   : > { %v4261_v31 = vadd.f32 %v4260_v40, %v4172_v3  ;;  %4124 = vmatmul.bf16.gmra.mxu3 %v4809_v50  ;;  %v4352_v2 = vpop.f32.mrf.mxu2  ;;  %v3045_v55 = vpop.permute.xlu0 %3044  ;;  %v4813_v40 = vor.u32 %v5135_v53, %v4812_v59  ;;  %v5137_v50 = vld [vmem:[#allocation2 + $0x1e4] sm:$0xf]  ;;  %v5138_v53 = vld [vmem:[#allocation2 + $0x1ec] sm:$0xf]  ;;  %v4002_v59 = vadd.f32 %v8412_v14, %v8338_v10  ;;  %v4860_v10 = vld [vmem:[#allocation2 + $0x218] sm:$0xf] }
 0x372   : > { %4302 = vmatmul.bf16.gmra.mxu1 %v4817_v13  ;;  %v2658_v37 = vpop.permute.xlu1 %2657  ;;  %3114 = vst.msk [vmem:[#allocation2 + $0x22c] sm:$0xf] %vm8886_vm3, %v3045_v55  ;;  %v4826_v13 = vld [vmem:[#allocation2 + $0x1f4] sm:$0xf0]  ;;  %v5140_v55 = vld [vmem:[#allocation2 + $0x1f8] sm:$0xf0] }
 0x373   : > { %v4350_v0 = vadd.f32 %v4349_v29, %v4261_v31  ;;  %v2754_v7 = vsel %vm7841_vm14, %v2658_v37, %v2753_v49  ;;  %v5141_v29 = vld [vmem:[#allocation2 + $0x200] sm:$0xf0]  ;;  %v4829_v63 = vor.u32 %v5137_v50, %v4826_v13  ;;  %v4832_v37 = vld [vmem:[#allocation2 + $0x1e8] sm:$0xf]  ;;  %v4846_v50 = vld [vmem:[#allocation2 + $0x21c] sm:$0xf0] }
 0x374   : > { %v4085_v15 = vpop.f32.mrf.mxu3  ;;  %2755 = vst [vmem:[#allocation2 + $0x224] sm:$0xf] %v2754_v7  ;;  %v4841_v44 = vor.u32 %v5141_v29, %v4840_v30  ;;  %v4833_v7 = vor.u32 %v5140_v55, %v4832_v37  ;;  %v4007_v37 = vadd.f32 %v8412_v14, %v8384_v34 }
 0x375   : > { %4422 = vst.msk [vmem:[%s8429_s21 + $0x28] sm:$0xff] %vm8887_vm7, %v4350_v0  ;;  %v4174_v42 = vpop.f32.mrf.mxu0  ;;  %v4086_v17 = vadd.f32 %v4085_v15, %v3997_v21  ;;  %vm8900_vm7 = vmmov %vm8893_vm5 }
 0x377   : > { %v4175_v36 = vadd.f32 %v4174_v42, %v4086_v17  ;;  %v4265_v8 = vpop.f32.mrf.mxu1 }
 0x378   : > { %4213 = vmatmul.bf16.gmra.mxu0 %v4813_v40  ;;  %v2757_v40 = vld [vmem:[#allocation2 + $0x24c] sm:$0xf] }
 0x379   : > { %v4264_v47 = vadd.f32 %v4263_v9, %v4175_v36  ;;  %v4354_v51 = vpop.f32.mrf.mxu2  ;;  %v2457_v32 = vpop.permute.xlu0 %2456 }
 0x37a   : > { %v2459_v46 = vpop.permute.xlu1 %2458  ;;  %v2555_v3 = vsel %vm7855_vm9, %v2457_v32, %v2554_v60  ;;  %vm8889_vm9 = vmmov %vm8880_vm1 }
 0x37b   : > { %v4353_v57 = vadd.f32 %v4352_v2, %v4264_v47  ;;  %2557 = vst.msk [vmem:[#allocation2 + $0x248] sm:$0xf] %vm8865_vm0, %v2459_v46  ;;  %v4834_v2 = vld [vmem:[#allocation2 + $0x1fc] sm:$0xf0]  ;;  %v5146_v47 = vld [vmem:[#allocation2 + $0x228] sm:$0xf0]  ;;  %vm8891_vm1 = vmmov %vm8865_vm0 }
 0x37c   : > { %v4087_v39 = vpop.f32.mrf.mxu3  ;;  %2556 = vst [vmem:[#allocation2 + $0x234] sm:$0xf] %v2555_v3  ;;  %v4837_v23 = vor.u32 %v5138_v53, %v4834_v2  ;;  %v4861_v60 = vor.u32 %v5146_v47, %v4860_v10  ;;  %v1665_v53 = vld [vmem:[#allocation2 + $0x27c] sm:$0x8] }
 0x37d   : > { %4423 = vst.msk [vmem:[%s8429_s21 + $0x30] sm:$0xff] %vm8888_vm11, %v4353_v57  ;;  %v4176_v9 = vpop.f32.mrf.mxu0  ;;  %v4088_v31 = vadd.f32 %v4087_v39, %v3999_v27  ;;  %v4004_v27 = vadd.f32 %v8412_v14, %v8366_v22  ;;  %v5142_v39 = vld [vmem:[#allocation2 + $0x20c] sm:$0xf]  ;;  %v1666_v22 = vsel %vm6830_vm2, 0, %v1665_v53  ;;  %vm8896_vm2 = vmmov %vm8865_vm0 }
 0x37e   : > { %5066 = vmatmul.msk.bf16.gmra.mxu2 %vm8878_vm12, %v4841_v44  ;;  %1667 = vst [vmem:[#allocation2 + $0x27c] sm:$0x8] %v1666_v22  ;;  %vm8903_vm11 = vmmov %vm8893_vm5 }
 0x37f   : > { %v4177_v11 = vadd.f32 %v4176_v9, %v4088_v31  ;;  %v4268_v25 = vpop.f32.mrf.mxu1  ;;  %v5143_v31 = vld [vmem:[#allocation2 + $0x214] sm:$0xf] }
 0x381   : > { %v4266_v20 = vadd.f32 %v4265_v8, %v4177_v11  ;;  %4129 = vmatmul.bf16.gmra.mxu3 %v4829_v63  ;;  %v4357_v21 = vpop.f32.mrf.mxu2  ;;  %v3049_v0 = vpop.permute.xlu0 %3048 }
 0x382   : > { %4307 = vmatmul.bf16.gmra.mxu1 %v4837_v23  ;;  %v2662_v15 = vpop.permute.xlu1 %2661  ;;  %3116 = vst.msk [vmem:[#allocation2 + $0x254] sm:$0xf] %vm8889_vm9, %v3049_v0  ;;  %v4854_v23 = vld [vmem:[#allocation2 + $0x224] sm:$0xf0]  ;;  %vm8905_vm9 = vmmov %vm8893_vm5 }
 0x383   : > { %v4355_v49 = vadd.f32 %v4354_v51, %v4266_v20  ;;  %v2758_v17 = vsel %vm7841_vm14, %v2662_v15, %v2757_v40  ;;  %v3053_v11 = vpop.permute.xlu2 %3052  ;;  %v4849_v20 = vor.u32 %v5142_v39, %v4846_v50  ;;  %v4852_v15 = vld [vmem:[#allocation2 + $0x210] sm:$0xf] }
 0x384   : > { %v4090_v42 = vpop.f32.mrf.mxu3  ;;  %2759 = vst [vmem:[#allocation2 + $0x24c] sm:$0xf] %v2758_v17 }
 0x385   : > { %4424 = vst.msk [vmem:[%s8429_s21 + $0x38] sm:$0xff] %vm8890_vm15, %v4355_v49  ;;  %v4179_v36 = vpop.f32.mrf.mxu0  ;;  %v4091_v8 = vadd.f32 %v4090_v42, %v4002_v59  ;;  %v5145_v59 = vld [vmem:[#allocation2 + $0x220] sm:$0xf0]  ;;  %vm8906_vm15 = vmmov %vm8893_vm5 }
 0x386   : > { %3118 = vst.msk [vmem:[#allocation2 + $0x27c] sm:$0xf] %vm8895_vm8, %v3053_v11  ;;  %v4853_v45 = vor.u32 %v5145_v59, %v4852_v15 }
 0x387   : > { %v4180_v30 = vadd.f32 %v4179_v36, %v4091_v8  ;;  %v4270_v29 = vpop.f32.mrf.mxu1 }
 0x388   : > { %4218 = vmatmul.bf16.gmra.mxu0 %v4833_v7 }
 0x389   : > { %v4269_v51 = vadd.f32 %v4268_v25, %v4180_v30  ;;  %v4359_v44 = vpop.f32.mrf.mxu2  ;;  %v2829_v32 = vpop.permute.xlu0 %2828  ;;  %v1512_v25 = vld [vmem:[#allocation2 + $0x268] sm:$0x1]  ;;  %v5151_v10 = vld [vmem:[#allocation2 + $0x250] sm:$0xf0] }
 0x38a   : > { %v2831_v46 = vpop.permute.xlu1 %2830  ;;  %2862 = vst.msk [vmem:[#allocation2 + $0x23c] sm:$0xf] %vm8891_vm1, %v2829_v32  ;;  %v1513_v55 = vsel %vm6993_vm6, 0, %v1512_v25  ;;  %vm8897_vm6 = vmmov %vm8886_vm3  ;;  %v4009_v32 = vadd.f32 %v8412_v14, %v8396_v18 }
 0x38b   : > { %v4358_v57 = vadd.f32 %v4357_v21, %v4269_v51  ;;  %2863 = vst.msk [vmem:[#allocation2 + $0x250] sm:$0xf] %vm8892_vm10, %v2831_v46  ;;  %v4857_v21 = vor.u32 %v5143_v31, %v4854_v23  ;;  %vm8899_vm3 = vmmov %vm8865_vm0  ;;  %v5150_v12 = vld [vmem:[#allocation2 + $0x248] sm:$0xf0]  ;;  %v4012_v23 = vadd.f32 %v8412_v14, %v8056_v38  ;;  %v4014_v38 = vadd.f32 %v8412_v14, %v8112_v28 }
 0x38c   : > { %v4092_v3 = vpop.f32.mrf.mxu3  ;;  %1514 = vst [vmem:[#allocation2 + $0x268] sm:$0x1] %v1513_v55  ;;  %vm8901_vm0 = vmmov %vm8894_vm4  ;;  %v4872_v55 = vld [vmem:[#allocation2 + $0x238] sm:$0xf] }
 0x38d   : > { %4425 = vst.msk [vmem:[%s8429_s21 + $0x40] sm:$0xff] %vm8893_vm5, %v4358_v57  ;;  %v4181_v13 = vpop.f32.mrf.mxu0  ;;  %v4093_v9 = vadd.f32 %v4092_v3, %v4004_v27  ;;  %v5156_v15 = vld [vmem:[#allocation2 + $0x278] sm:$0xf0]  ;;  %vm8904_vm12 = vmmov %vm8901_vm0 }
 0x38e   : > { %5067 = vmatmul.msk.bf16.gmra.mxu2 %vm8894_vm4, %v4861_v60  ;;  %vm8907_vm1 = vmmov %vm8893_vm5 }
 0x38f   : > { %v4182_v2 = vadd.f32 %v4181_v13, %v4093_v9  ;;  %v4273_v63 = vpop.f32.mrf.mxu1  ;;  %v5147_v13 = vld [vmem:[#allocation2 + $0x234] sm:$0xf]  ;;  %v4866_v9 = vld [vmem:[#allocation2 + $0x244] sm:$0xf0]  ;;  %vm8908_vm10 = vmmov %vm8907_vm1 }
 0x390   : > { %v4869_v25 = vor.u32 %v5147_v13, %v4866_v9  ;;  %vm8910_vm4 = vmmov %vm8907_vm1 }
 0x391   : > { %v4271_v0 = vadd.f32 %v4270_v29, %v4182_v2  ;;  %4134 = vmatmul.bf16.gmra.mxu3 %v4849_v20  ;;  %v4362_v49 = vpop.f32.mrf.mxu2  ;;  %v2463_v24 = vpop.permute.xlu0 %2462  ;;  %v4880_v29 = vld [vmem:[#allocation2 + $0x240] sm:$0xf]  ;;  %v5148_v57 = vld [vmem:[#allocation2 + $0x23c] sm:$0xf]  ;;  %vm8911_vm8 = vmmov %vm8907_vm1 }
 0x392   : > { %4312 = vmatmul.bf16.gmra.mxu1 %v4857_v21  ;;  %v3051_v7 = vpop.permute.xlu1 %3050  ;;  %2561 = vst.msk [vmem:[#allocation2 + $0x270] sm:$0xf] %vm8896_vm2, %v2463_v24  ;;  %v4881_v51 = vor.u32 %v5151_v10, %v4880_v29  ;;  %v4874_v46 = vld [vmem:[#allocation2 + $0x24c] sm:$0xf0]  ;;  %v4873_v21 = vor.u32 %v5150_v12, %v4872_v55  ;;  %v5152_v10 = vld [vmem:[#allocation2 + $0x25c] sm:$0xf]  ;;  %vm8912_vm2 = vmmov %vm8907_vm1 }
 0x393   : > { %v4360_v40 = vadd.f32 %v4359_v44, %v4271_v0  ;;  %3117 = vst.msk [vmem:[#allocation2 + $0x268] sm:$0xf] %vm8897_vm6, %v3051_v7  ;;  %v2761_v44 = vld [vmem:[#allocation2 + $0x274] sm:$0xf]  ;;  %v4877_v18 = vor.u32 %v5148_v57, %v4874_v46  ;;  %vm8913_vm6 = vmmov %vm8907_vm1 }
 0x394   : > { %v4095_v42 = vpop.f32.mrf.mxu3 }
 0x395   : > { %4426 = vst.msk [vmem:[%s8429_s21 + $0x48] sm:$0xff] %vm8898_vm13, %v4360_v40  ;;  %v4184_v17 = vpop.f32.mrf.mxu0  ;;  %v4096_v36 = vadd.f32 %v4095_v42, %v4007_v37  ;;  %vm8914_vm13 = vmmov %vm8907_vm1 }
 0x397   : > { %v4185_v8 = vadd.f32 %v4184_v17, %v4096_v36  ;;  %v4275_v30 = vpop.f32.mrf.mxu1 }
 0x398   : > { %4223 = vmatmul.bf16.gmra.mxu0 %v4853_v45 }
 0x399   : > { %v4274_v34 = vadd.f32 %v4273_v63, %v4185_v8  ;;  %v4364_v47 = vpop.f32.mrf.mxu2  ;;  %v2666_v60 = vpop.permute.xlu0 %2665  ;;  %v4886_v17 = vld [vmem:[#allocation2 + $0x26c] sm:$0xf0]  ;;  %v5153_v8 = vld [vmem:[#allocation2 + $0x264] sm:$0xf] }
 0x39a   : > { %v2664_v3 = vpop.permute.xlu1 %2663  ;;  %v2762_v39 = vsel %vm7841_vm14, %v2666_v60, %v2761_v44  ;;  %vm8902_vm14 = vmmov %vm8893_vm5  ;;  %v4900_v40 = vld [vmem:[#allocation2 + $0x268] sm:$0xf] }
 0x39b   : > { %v4363_v27 = vadd.f32 %v4362_v49, %v4274_v34  ;;  %2760 = vst.msk [vmem:[#allocation2 + $0x260] sm:$0xf] %vm8899_vm3, %v2664_v3  ;;  %v4901_v42 = vor.u32 %v5156_v15, %v4900_v40  ;;  %v4017_v3 = vadd.f32 %v8412_v14, %v8182_v48  ;;  %vm8909_vm5 = vmmov %vm8907_vm1 }
 0x39c   : > { %v4097_v50 = vpop.f32.mrf.mxu3  ;;  %2763 = vst [vmem:[#allocation2 + $0x274] sm:$0xf] %v2762_v39  ;;  %vm8915_vm3 = vmmov %vm8907_vm1 }
 0x39d   : > { %4427 = vst.msk [vmem:[%s8429_s21 + $0x50] sm:$0xff] %vm8900_vm7, %v4363_v27  ;;  %v4186_v31 = vpop.f32.mrf.mxu0  ;;  %v4098_v53 = vadd.f32 %v4097_v50, %v4009_v32  ;;  %vm8916_vm7 = vmmov %vm8907_vm1 }
 0x39e   : > { %5068 = vmatmul.msk.bf16.gmra.mxu2 %vm8901_vm0, %v4881_v51  ;;  %v4889_v51 = vor.u32 %v5152_v10, %v4886_v17  ;;  %v4027_v10 = vadd.f32 %v8412_v14, %v8347_v61  ;;  %vm8917_vm0 = vmmov %vm8907_vm1 }
 0x39f   : > { %v4187_v11 = vadd.f32 %v4186_v31, %v4098_v53  ;;  %v4278_v22 = vpop.f32.mrf.mxu1 }
 0x3a1   : > { %v4276_v2 = vadd.f32 %v4275_v30, %v4187_v11  ;;  %4139 = vmatmul.bf16.gmra.mxu3 %v4869_v25  ;;  %v4367_v63 = vpop.f32.mrf.mxu2  ;;  %v4894_v30 = vld [vmem:[#allocation2 + $0x274] sm:$0xf0]  ;;  %v4019_v25 = vadd.f32 %v8412_v14, %v8237_v52 }
 0x3a2   : > { %4317 = vmatmul.bf16.gmra.mxu1 %v4877_v18  ;;  %v4897_v44 = vor.u32 %v5153_v8, %v4894_v30  ;;  %v4892_v28 = vld [vmem:[#allocation2 + $0x260] sm:$0xf] }
 0x3a3   : > { %v4365_v20 = vadd.f32 %v4364_v47, %v4276_v2  ;;  %v5155_v46 = vld [vmem:[#allocation2 + $0x270] sm:$0xf0] }
 0x3a4   : > { %v4100_v0 = vpop.f32.mrf.mxu3  ;;  %v4893_v13 = vor.u32 %v5155_v46, %v4892_v28 }
 0x3a5   : > { %4428 = vst.msk [vmem:[%s8429_s21 + $0x58] sm:$0xff] %vm8902_vm14, %v4365_v20  ;;  %v4189_v59 = vpop.f32.mrf.mxu0  ;;  %v4101_v49 = vadd.f32 %v4100_v0, %v4012_v23  ;;  %v4022_v0 = vadd.f32 %v8412_v14, %v8274_v41  ;;  %vm8918_vm14 = vmmov %vm8917_vm0 }
 0x3a7   : > { %v4190_v24 = vadd.f32 %v4189_v59, %v4101_v49  ;;  %v4280_v37 = vpop.f32.mrf.mxu1 }
 0x3a8   : > { %4228 = vmatmul.bf16.gmra.mxu0 %v4873_v21 }
 0x3a9   : > { %v4279_v7 = vadd.f32 %v4278_v22, %v4190_v24  ;;  %v4369_v45 = vpop.f32.mrf.mxu2 }
 0x3ab   : > { %v4368_v36 = vadd.f32 %v4367_v63, %v4279_v7 }
 0x3ac   : > { %v4102_v29 = vpop.f32.mrf.mxu3 }
 0x3ad   : > { %4429 = vst.msk [vmem:[%s8429_s21 + $0x60] sm:$0xff] %vm8903_vm11, %v4368_v36  ;;  %v4191_v34 = vpop.f32.mrf.mxu0  ;;  %v4103_v47 = vadd.f32 %v4102_v29, %v4014_v38  ;;  %vm8919_vm11 = vmmov %vm8917_vm0 }
 0x3ae   : > { %5069 = vmatmul.msk.bf16.gmra.mxu2 %vm8904_vm12, %v4901_v42  ;;  %vm8920_vm12 = vmmov %vm8917_vm0 }
 0x3af   : > { %v4192_v60 = vadd.f32 %v4191_v34, %v4103_v47  ;;  %v4283_v32 = vpop.f32.mrf.mxu1 }
 0x3b1   : > { %v4281_v27 = vadd.f32 %v4280_v37, %v4192_v60  ;;  %4144 = vmatmul.bf16.gmra.mxu3 %v4889_v51  ;;  %v4372_v57 = vpop.f32.mrf.mxu2 }
 0x3b2   : > { %4322 = vmatmul.bf16.gmra.mxu1 %v4897_v44 }
 0x3b3   : > { %v4370_v39 = vadd.f32 %v4369_v45, %v4281_v27  ;;  %v4024_v45 = vadd.f32 %v8412_v14, %v8314_v56 }
 0x3b4   : > { %v4105_v50 = vpop.f32.mrf.mxu3 }
 0x3b5   : > { %4430 = vst.msk [vmem:[%s8429_s21 + $0x68] sm:$0xff] %vm8905_vm9, %v4370_v39  ;;  %v4194_v9 = vpop.f32.mrf.mxu0  ;;  %v4106_v31 = vadd.f32 %v4105_v50, %v4017_v3  ;;  %vm8921_vm9 = vmmov %vm8917_vm0 }
 0x3b7   : > { %v4195_v53 = vadd.f32 %v4194_v9, %v4106_v31  ;;  %v4285_v18 = vpop.f32.mrf.mxu1  ;;  %v4032_v31 = vadd.f32 %v8412_v14, %v8388_v19 }
 0x3b8   : > { %4233 = vmatmul.bf16.gmra.mxu0 %v4893_v13 }
 0x3b9   : > { %v4284_v11 = vadd.f32 %v4283_v32, %v4195_v53  ;;  %v4374_v22 = vpop.f32.mrf.mxu2 }
 0x3bb   : > { %v4373_v2 = vadd.f32 %v4372_v57, %v4284_v11  ;;  %v4029_v57 = vadd.f32 %v8412_v14, %v8370_v6 }
 0x3bc   : > { %v4107_v12 = vpop.f32.mrf.mxu3 }
 0x3bd   : > { %4431 = vst.msk [vmem:[%s8429_s21 + $0x70] sm:$0xff] %vm8906_vm15, %v4373_v2  ;;  %v4196_v48 = vpop.f32.mrf.mxu0  ;;  %v4108_v63 = vadd.f32 %v4107_v12, %v4019_v25  ;;  %vm8922_vm15 = vmmov %vm8917_vm0 }
 0x3bf   : > { %v4197_v23 = vadd.f32 %v4196_v48, %v4108_v63  ;;  %v4288_v20 = vpop.f32.mrf.mxu1  ;;  %v4034_v48 = vadd.f32 %v8412_v14, %v8398_v54 }
 0x3c1   : > { %v4286_v55 = vadd.f32 %v4285_v18, %v4197_v23  ;;  %v4377_v21 = vpop.f32.mrf.mxu2 }
 0x3c3   : > { %v4375_v59 = vadd.f32 %v4374_v22, %v4286_v55 }
 0x3c4   : > { %v4110_v49 = vpop.f32.mrf.mxu3 }
 0x3c5   : > { %4432 = vst.msk [vmem:[%s8429_s21 + $0x78] sm:$0xff] %vm8907_vm1, %v4375_v59  ;;  %v4199_v24 = vpop.f32.mrf.mxu0  ;;  %v4111_v52 = vadd.f32 %v4110_v49, %v4022_v0  ;;  %v4037_v49 = vadd.f32 %v8412_v14, %v8051_v58  ;;  %vm8923_vm1 = vmmov %vm8917_vm0 }
 0x3c7   : > { %v4200_v37 = vadd.f32 %v4199_v24, %v4111_v52  ;;  %v4290_v40 = vpop.f32.mrf.mxu1 }
 0x3c9   : > { %v4289_v15 = vadd.f32 %v4288_v20, %v4200_v37  ;;  %v4379_v7 = vpop.f32.mrf.mxu2 }
 0x3cb   : > { %v4378_v42 = vadd.f32 %v4377_v21, %v4289_v15 }
 0x3cc   : > { %v4112_v17 = vpop.f32.mrf.mxu3 }
 0x3cd   : > { %4433 = vst.msk [vmem:[%s8429_s21 + $0x80] sm:$0xff] %vm8908_vm10, %v4378_v42  ;;  %v4201_v38 = vpop.f32.mrf.mxu0  ;;  %v4113_v41 = vadd.f32 %v4112_v17, %v4024_v45  ;;  %v4039_v42 = vadd.f32 %v8412_v14, %v8105_v26 }
 0x3cf   : > { %v4202_v36 = vadd.f32 %v4201_v38, %v4113_v41  ;;  %v4293_v8 = vpop.f32.mrf.mxu1 }
 0x3d1   : > { %v4291_v30 = vadd.f32 %v4290_v40, %v4202_v36  ;;  %v4382_v29 = vpop.f32.mrf.mxu2 }
 0x3d3   : > { %v4380_v34 = vadd.f32 %v4379_v7, %v4291_v30 }
 0x3d4   : > { %v4115_v47 = vpop.f32.mrf.mxu3 }
 0x3d5   : > { %4434 = vst.msk [vmem:[%s8429_s21 + $0x88] sm:$0xff] %vm8909_vm5, %v4380_v34  ;;  %v4204_v51 = vpop.f32.mrf.mxu0  ;;  %v4116_v56 = vadd.f32 %v4115_v47, %v4027_v10  ;;  %v4042_v10 = vadd.f32 %v8412_v14, %v8176_v35 }
 0x3d7   : > { %v4205_v44 = vadd.f32 %v4204_v51, %v4116_v56  ;;  %v4295_v60 = vpop.f32.mrf.mxu1 }
 0x3d9   : > { %v4294_v32 = vadd.f32 %v4293_v8, %v4205_v44  ;;  %v4384_v27 = vpop.f32.mrf.mxu2 }
 0x3db   : > { %v4383_v28 = vadd.f32 %v4382_v29, %v4294_v32 }
 0x3dc   : > { %v4117_v46 = vpop.f32.mrf.mxu3 }
 0x3dd   : > { %4435 = vst.msk [vmem:[%s8429_s21 + $0x90] sm:$0xff] %vm8910_vm4, %v4383_v28  ;;  %v4206_v3 = vpop.f32.mrf.mxu0  ;;  %v4118_v61 = vadd.f32 %v4117_v46, %v4029_v57 }
 0x3df   : > { %v4207_v39 = vadd.f32 %v4206_v3, %v4118_v61  ;;  %v4298_v50 = vpop.f32.mrf.mxu1 }
 0x3e1   : > { %v4296_v13 = vadd.f32 %v4295_v60, %v4207_v39  ;;  %v4387_v9 = vpop.f32.mrf.mxu2 }
 0x3e3   : > { %v4385_v53 = vadd.f32 %v4384_v27, %v4296_v13  ;;  %v4044_v27 = vadd.f32 %v8412_v14, %v8233_v43  ;;  %v4047_v13 = vadd.f32 %v8412_v14, %v8268_v16 }
 0x3e4   : > { %v4120_v18 = vpop.f32.mrf.mxu3 }
 0x3e5   : > { %4436 = vst.msk [vmem:[%s8429_s21 + $0x98] sm:$0xff] %vm8911_vm8, %v4385_v53  ;;  %v4209_v11 = vpop.f32.mrf.mxu0  ;;  %v4121_v6 = vadd.f32 %v4120_v18, %v4032_v31 }
 0x3e7   : > { %v4210_v22 = vadd.f32 %v4209_v11, %v4121_v6  ;;  %v4300_v25 = vpop.f32.mrf.mxu1 }
 0x3e9   : > { %v4299_v2 = vadd.f32 %v4298_v50, %v4210_v22  ;;  %v4389_v12 = vpop.f32.mrf.mxu2 }
 0x3eb   : > { %v4388_v63 = vadd.f32 %v4387_v9, %v4299_v2 }
 0x3ec   : > { %v4122_v23 = vpop.f32.mrf.mxu3 }
 0x3ed   : > { %4437 = vst.msk [vmem:[%s8429_s21 + $0xa0] sm:$0xff] %vm8912_vm2, %v4388_v63  ;;  %v4211_v20 = vpop.f32.mrf.mxu0  ;;  %v4123_v19 = vadd.f32 %v4122_v23, %v4034_v48 }
 0x3ef   : > { %v4212_v55 = vadd.f32 %v4211_v20, %v4123_v19  ;;  %v4303_v21 = vpop.f32.mrf.mxu1  ;;  %v4052_v19 = vadd.f32 %v8412_v14, %v8344_v62 }
 0x3f1   : > { %v4301_v0 = vadd.f32 %v4300_v25, %v4212_v55  ;;  %v4392_v59 = vpop.f32.mrf.mxu2  ;;  %v4049_v25 = vadd.f32 %v8412_v14, %v8310_v5 }
 0x3f3   : > { %v4390_v24 = vadd.f32 %v4389_v12, %v4301_v0 }
 0x3f4   : > { %v4125_v52 = vpop.f32.mrf.mxu3 }
 0x3f5   : > { %4438 = vst.msk [vmem:[%s8429_s21 + $0xa8] sm:$0xff] %vm8913_vm6, %v4390_v24  ;;  %v4214_v37 = vpop.f32.mrf.mxu0  ;;  %v4126_v54 = vadd.f32 %v4125_v52, %v4037_v49  ;;  %v4054_v52 = vadd.f32 %v8412_v14, %v8368_v1 }
 0x3f7   : > { %v4215_v40 = vadd.f32 %v4214_v37, %v4126_v54  ;;  %v4305_v15 = vpop.f32.mrf.mxu1 }
 0x3f9   : > { %v4304_v7 = vadd.f32 %v4303_v21, %v4215_v40  ;;  %v4394_v45 = vpop.f32.mrf.mxu2 }
 0x3fb   : > { %v4393_v17 = vadd.f32 %v4392_v59, %v4304_v7 }
 0x3fc   : > { %v4127_v38 = vpop.f32.mrf.mxu3 }
 0x3fd   : > { %4439 = vst.msk [vmem:[%s8429_s21 + $0xb0] sm:$0xff] %vm8914_vm13, %v4393_v17  ;;  %v4216_v41 = vpop.f32.mrf.mxu0  ;;  %v4128_v58 = vadd.f32 %v4127_v38, %v4039_v42  ;;  %v4057_v17 = vadd.f32 %v8412_v14, %v8386_v4 }
 0x3ff   : > { %v4217_v36 = vadd.f32 %v4216_v41, %v4128_v58  ;;  %v4308_v8 = vpop.f32.mrf.mxu1 }
 0x401   : > { %v4306_v30 = vadd.f32 %v4305_v15, %v4217_v36  ;;  %v4397_v29 = vpop.f32.mrf.mxu2 }
 0x403   : > { %v4395_v34 = vadd.f32 %v4394_v45, %v4306_v30 }
 0x404   : > { %v4130_v47 = vpop.f32.mrf.mxu3 }
 0x405   : > { %4440 = vst.msk [vmem:[%s8429_s21 + $0xb8] sm:$0xff] %vm8915_vm3, %v4395_v34  ;;  %v4219_v51 = vpop.f32.mrf.mxu0  ;;  %v4131_v26 = vadd.f32 %v4130_v47, %v4042_v10  ;;  %v5473_v10 = vld [vmem:[%s8643_s6] ss:$0 sm:$0xff] }
 0x406   : > { %v4059_v34 = vadd.f32 %v5473_v10, %v8400_v33 }
 0x407   : > { %v4220_v56 = vadd.f32 %v4219_v51, %v4131_v26  ;;  %v4310_v44 = vpop.f32.mrf.mxu1 }
 0x409   : > { %v4309_v60 = vadd.f32 %v4308_v8, %v4220_v56  ;;  %v4399_v32 = vpop.f32.mrf.mxu2 }
 0x40b   : > { %v4398_v57 = vadd.f32 %v4397_v29, %v4309_v60 }
 0x40c   : > { %v4132_v28 = vpop.f32.mrf.mxu3 }
 0x40d   : > { %4441 = vst.msk [vmem:[%s8429_s21 + $0xc0] sm:$0xff] %vm8916_vm7, %v4398_v57  ;;  %v4221_v46 = vpop.f32.mrf.mxu0  ;;  %v4133_v35 = vadd.f32 %v4132_v28, %v4044_v27 }
 0x40f   : > { %v4222_v3 = vadd.f32 %v4221_v46, %v4133_v35  ;;  %v4313_v61 = vpop.f32.mrf.mxu1 }
 0x411   : > { %v4311_v39 = vadd.f32 %v4310_v44, %v4222_v3  ;;  %v4402_v50 = vpop.f32.mrf.mxu2 }
 0x413   : > { %v4400_v9 = vadd.f32 %v4399_v32, %v4311_v39 }
 0x414   : > { %v4135_v31 = vpop.f32.mrf.mxu3 }
 0x415   : > { %4442 = vst.msk [vmem:[%s8429_s21 + $0xc8] sm:$0xff] %vm8917_vm0, %v4400_v9  ;;  %v4224_v53 = vpop.f32.mrf.mxu0  ;;  %v4136_v43 = vadd.f32 %v4135_v31, %v4047_v13 }
 0x417   : > { %v4225_v18 = vadd.f32 %v4224_v53, %v4136_v43  ;;  %v4315_v6 = vpop.f32.mrf.mxu1 }
 0x419   : > { %v4314_v11 = vadd.f32 %v4313_v61, %v4225_v18  ;;  %v4404_v22 = vpop.f32.mrf.mxu2 }
 0x41b   : > { %v4403_v2 = vadd.f32 %v4402_v50, %v4314_v11 }
 0x41c   : > { %v4137_v12 = vpop.f32.mrf.mxu3 }
 0x41d   : > { %4443 = vst.msk [vmem:[%s8429_s21 + $0xd0] sm:$0xff] %vm8918_vm14, %v4403_v2  ;;  %v4226_v48 = vpop.f32.mrf.mxu0  ;;  %v4138_v16 = vadd.f32 %v4137_v12, %v4049_v25 }
 0x41f   : > { %v4227_v63 = vadd.f32 %v4226_v48, %v4138_v16  ;;  %v4318_v20 = vpop.f32.mrf.mxu1 }
 0x421   : > { %v4316_v23 = vadd.f32 %v4315_v6, %v4227_v63  ;;  %v4407_v21 = vpop.f32.mrf.mxu2 }
 0x423   : > { %v4405_v55 = vadd.f32 %v4404_v22, %v4316_v23 }
 0x424   : > { %v4140_v0 = vpop.f32.mrf.mxu3 }
 0x425   : > { %4444 = vst.msk [vmem:[%s8429_s21 + $0xd8] sm:$0xff] %vm8919_vm11, %v4405_v55  ;;  %v4229_v59 = vpop.f32.mrf.mxu0  ;;  %v4141_v5 = vadd.f32 %v4140_v0, %v4052_v19 }
 0x427   : > { %v4230_v49 = vadd.f32 %v4229_v59, %v4141_v5  ;;  %v4320_v40 = vpop.f32.mrf.mxu1 }
 0x429   : > { %v4319_v24 = vadd.f32 %v4318_v20, %v4230_v49  ;;  %v4409_v7 = vpop.f32.mrf.mxu2 }
 0x42b   : > { %v4408_v37 = vadd.f32 %v4407_v21, %v4319_v24 }
 0x42c   : > { %v4142_v54 = vpop.f32.mrf.mxu3 }
 0x42d   : > { %4445 = vst.msk [vmem:[%s8429_s21 + $0xe0] sm:$0xff] %vm8920_vm12, %v4408_v37  ;;  %v4231_v62 = vpop.f32.mrf.mxu0  ;;  %v4143_v15 = vadd.f32 %v4142_v54, %v4054_v52 }
 0x42f   : > { %v4232_v45 = vadd.f32 %v4231_v62, %v4143_v15  ;;  %v4323_v36 = vpop.f32.mrf.mxu1 }
 0x431   : > { %v4321_v42 = vadd.f32 %v4320_v40, %v4232_v45  ;;  %v4412_v30 = vpop.f32.mrf.mxu2 }
 0x433   : > { %v4410_v38 = vadd.f32 %v4409_v7, %v4321_v42 }
 0x434   : > { %v4145_v41 = vpop.f32.mrf.mxu3 }
 0x435   : > { %4446 = vst.msk [vmem:[%s8429_s21 + $0xe8] sm:$0xff] %vm8921_vm9, %v4410_v38  ;;  %v4146_v1 = vadd.f32 %v4145_v41, %v4057_v17  ;;  %v4234_v58 = vpop.f32.mrf.mxu0 }
 0x437   : > { %v4235_v8 = vadd.f32 %v4234_v58, %v4146_v1  ;;  %v4325_v56 = vpop.f32.mrf.mxu1 }
 0x439   : > { %v4324_v29 = vadd.f32 %v4323_v36, %v4235_v8  ;;  %v4414_v60 = vpop.f32.mrf.mxu2 }
 0x43b   : > { %v4413_v4 = vadd.f32 %v4412_v30, %v4324_v29 }
 0x43c   : > { %v4147_v14 = vpop.f32.mrf.mxu3 }
 0x43d   : > { %4447 = vst.msk [vmem:[%s8429_s21 + $0xf0] sm:$0xff] %vm8922_vm15, %v4413_v4  ;;  %v4148_v47 = vadd.f32 %v4147_v14, %v4059_v34  ;;  %v4236_v51 = vpop.f32.mrf.mxu0 }
 0x43f   : > { %v4237_v26 = vadd.f32 %v4236_v51, %v4148_v47 }
 0x441   : > { %v4326_v44 = vadd.f32 %v4325_v56, %v4237_v26 }
 0x443   : > { %v4415_v33 = vadd.f32 %v4414_v60, %v4326_v44 }
 0x445   : > { %4448 = vst.msk [vmem:[%s8429_s21 + $0xf8] sm:$0xff] %vm8923_vm1, %v4415_v33 }
 0x446   : > { %5501 = shalt.err (!%p5498_p3)
}
 0x447   : > { %s5540_s18 = smov 128   ;;  %s5541_s21 = smov 8  }
 0x448   : > { %5299 = dma.vmem_to_hbm [thread:$0]  (%p5620_p5), %s4463_s28, 4096, %s4465_s16, %s4450_s19, %s5540_s18, %s5540_s18, %s5541_s21  }
 0x449 PF: > { %p5305_p4 = scmp.ge.s32.totalorder %s5536_s27, 2  ;;  %s4479_s13 = sand.u32 1, %s5524_s24  }
 0x44a   : > { %s4480_s14 = scalar_lea.sflag [#allocation4], %s4479_s13 }
 0x44b   : > { %p5302_p7 = pnand %p5305_p4, %p5624_p6 }
 0x44d   : > { %p5303_p8 = pneg %p5302_p7 }
 0x44f   : > { %5519 = dma.done.wait (%p5303_p8), %s4480_s14, 4096  }
 0x450   : > { %5521 = vsyncadd (%p5303_p8), %s4480_s14, 4294963200  ;;  %p17_p9 = scmp.ge.s32.totalorder %s5607_s30, 4   ;;  %s8924_s24 = smov %s5528_s25 }
 0x451   : > { %s8925_s25 = smov %s5532_s26  ;;  %s8926_s26 = smov %s5618_s10 }
 0x452   : > { %s8927_s27 = smov %s5607_s30  ;;  %19 = sbr.rel (!%p17_p9) target bundleno = 3 (0x3), region = 88 }
 0x457   :  { %4486 = vsyncpa [#allocation4], 1 }
 0x458   :  { %4488 = vsyncpa [#allocation4 + $0x1], 1 }

</bundles_post_ra>
